<compile_context>
chip_gen: v7x
topology: tpu7x:2x2x1
jax: 0.10.0
libtpu: 0.0.40
codegen_flags: <defaults>
</compile_context>

<pallas_src>
import jax
import jax.numpy as jnp
from jax.experimental import pallas as pl
from jax.experimental.pallas import tpu as pltpu


_VMEM = pl.BlockSpec(memory_space=pltpu.MemorySpace.VMEM)


# ------------------------------ fused Pallas kernel ------------------------------

def _elu(x):
    # ELU(alpha=1). The min() keeps the discarded branch finite (no exp overflow).
    return jnp.where(x > 0, x, jnp.exp(jnp.minimum(x, 0.0)) - 1.0)


def _fused_forward_kernel(p1_ref, w1_ref, b1_ref,
                          a2_ref, w2_ref, b2_ref,
                          a3_ref, w3_ref, b3_ref,
                          a4_ref, w4_ref, b4_ref,
                          hx_ref,
                          wih_ref, whh_ref, bih_ref, bhh_ref,
                          wpi_ref, bpi_ref, wv_ref, bv_ref,
                          logp_ref, v_ref, hxn_ref):
    f32 = jnp.float32

    # ---- conv1 + ELU: im2col patches (P1, 9*C0) @ (9*C0, 32) + b  (patches from wrapper)
    x = jnp.dot(p1_ref[...], w1_ref[...], preferred_element_type=f32) + b1_ref[...]
    x = _elu(x)                                               # (441, 32), row = ho*W+wo

    # ---- conv2..conv4 + ELU, fully VMEM-resident.
    #      One streamed gather-matmul per layer collects all nine 3x3/stride-2 taps
    #      (activation x is the MXU-stationary operand, pushed once, not 9x), then nine
    #      tiny per-tap (blk,32)@(32,32) matmuls accumulate the conv in f32.
    for a_ref, w_ref, b_ref in ((a2_ref, w2_ref, b2_ref),
                                (a3_ref, w3_ref, b3_ref),
                                (a4_ref, w4_ref, b4_ref)):
        blk = a_ref.shape[0] // 9                             # 8-aligned rows per tap
        g = jnp.dot(a_ref[...].astype(f32), x,
                    preferred_element_type=f32)               # (9*blk, 32) gathered taps
        acc = b_ref[...]                                      # (1, 32) -> broadcasts
        for k in range(9):                                    # static, sublane-aligned
            acc = acc + jnp.dot(g[k * blk:(k + 1) * blk, :], w_ref[k],
                                preferred_element_type=f32)
        x = _elu(acc)                                         # (blk, 32); rows >= P_out junk

    # ---- GRUCell (PyTorch semantics). Valid conv4 rows are p = 0..8 (spatial-major);
    #      wih_ref was pre-permuted per spatial position so the channel-major .view(288)
    #      flatten order is honored without any in-kernel relayout.
    h_prev = hx_ref[...]                                      # (1, H)
    H = hxn_ref.shape[1]
    gi = bih_ref[...]                                         # (1, 3H)
    for p in range(wih_ref.shape[0]):                         # 9 spatial positions
        gi = gi + jnp.dot(x[p:p + 1, :], wih_ref[p], preferred_element_type=f32)
    gh = jnp.dot(h_prev, whh_ref[...], preferred_element_type=f32) + bhh_ref[...]
    r = jax.nn.sigmoid(gi[:, 0:H] + gh[:, 0:H])
    z = jax.nn.sigmoid(gi[:, H:2 * H] + gh[:, H:2 * H])
    n = jnp.tanh(gi[:, 2 * H:3 * H] + r * gh[:, 2 * H:3 * H])
    h_new = (1.0 - z) * n + z * h_prev
    hxn_ref[...] = h_new

    # ---- policy / value heads + log-softmax.
    logits = jnp.dot(h_new, wpi_ref[...], preferred_element_type=f32) + bpi_ref[...]
    m = jnp.max(logits, axis=-1, keepdims=True)
    e = jnp.exp(logits - m)
    s = jnp.sum(e, axis=-1, keepdims=True)
    logp_ref[...] = (logits - m) - jnp.log(s)
    v_ref[...] = jnp.dot(h_new, wv_ref[...], preferred_element_type=f32) + bv_ref[...]


# ------------------------------- one-time param prep -------------------------------

def _conv_out_hw(h, w):
    # 3x3, stride 2, padding 1
    return (h - 1) // 2 + 1, (w - 1) // 2 + 1


def _ceil_to(n, m):
    return -(-n // m) * m


def _select_stack(h_in, w_in, p_in_cols):
    """Stacked 0/1 gather matrix for one 3x3 / stride-2 / pad-1 conv layer.

    Returns (A, h_out, w_out, blk) where A has shape (9*blk, p_in_cols), blk is
    h_out*w_out rounded up to a multiple of 8, and rows [k*blk + p] (k = di*3+dj,
    p = ho*w_out+wo) select input pixel (2ho+di-1, 2wo+dj-1); zero row if that tap is
    padding, zero padding rows/columns otherwise (so junk rows never propagate)."""
    h_out, w_out = _conv_out_hw(h_in, w_in)
    p_out = h_out * w_out
    blk = _ceil_to(p_out, 8)
    ho = jnp.arange(h_out)
    wo = jnp.arange(w_out)
    hi = jnp.arange(h_in)
    wi = jnp.arange(w_in)
    blocks = []
    for di in range(3):
        for dj in range(3):
            rm = (2 * ho[:, None] + di - 1) == hi[None, :]      # (h_out, h_in)
            cm = (2 * wo[:, None] + dj - 1) == wi[None, :]      # (w_out, w_in)
            m = rm[:, None, :, None] & cm[None, :, None, :]     # (h_out,w_out,h_in,w_in)
            a = m.reshape(p_out, h_in * w_in).astype(jnp.float32)
            a = jnp.pad(a, ((0, blk - p_out), (0, p_in_cols - h_in * w_in)))
            blocks.append(a)
    return jnp.concatenate(blocks, axis=0), h_out, w_out, blk


def _uniform(key, shape, bound):
    return jax.random.uniform(key, shape, jnp.float32, -bound, bound)


def init_params(key, input_dims, n_actions, hidden=256):
    """Raw PyTorch-layout parameters (same init style as nn.Conv2d/GRUCell/Linear)."""
    C0, H0, W0 = input_dims
    params = {}
    keys = jax.random.split(key, 16)
    ki = iter(keys)

    conv_in = [C0, 32, 32, 32]
    for li in range(4):
        fan_in = conv_in[li] * 9
        bnd = 1.0 / float(fan_in) ** 0.5
        params[f"conv{li + 1}_w"] = _uniform(next(ki), (32, conv_in[li], 3, 3), bnd)
        params[f"conv{li + 1}_b"] = _uniform(next(ki), (32,), bnd)

    h, w = H0, W0
    for _ in range(4):
        h, w = _conv_out_hw(h, w)
    conv_feat = 32 * h * w                      # 288 for a 42x42 input

    bnd = 1.0 / float(hidden) ** 0.5
    params["gru_wih"] = _uniform(next(ki), (3 * hidden, conv_feat), bnd)
    params["gru_whh"] = _uniform(next(ki), (3 * hidden, hidden), bnd)
    params["gru_bih"] = _uniform(next(ki), (3 * hidden,), bnd)
    params["gru_bhh"] = _uniform(next(ki), (3 * hidden,), bnd)

    params["pi_w"] = _uniform(next(ki), (n_actions, hidden), bnd)
    params["pi_b"] = _uniform(next(ki), (n_actions,), bnd)
    params["v_w"] = _uniform(next(ki), (1, hidden), bnd)
    params["v_b"] = _uniform(next(ki), (1,), bnd)
    return params


def prepare_params(params, input_dims, hidden=256):
    """One-time re-layout of all weights into the forms the fused kernel consumes."""
    C0, H0, W0 = input_dims
    prep = {}

    # conv1: im2col matmul weight; flatten order (c, ki, kj) matches im2col().
    prep["w1"] = params["conv1_w"].reshape(32, C0 * 9).T             # (9*C0, 32)
    prep["b1"] = params["conv1_b"].reshape(1, 32)

    h, w = _conv_out_hw(H0, W0)                                      # conv1 output spatial
    cols = h * w                                                     # conv1 out has no junk rows
    for li in (2, 3, 4):
        a, ho, wo, blk = _select_stack(h, w, cols)
        prep[f"a{li}"] = a.astype(jnp.bfloat16)                      # exact 0/1 -> half the DMA
        cw = params[f"conv{li}_w"]                                   # (Cout, Cin, 3, 3)
        prep[f"w{li}"] = jnp.transpose(cw, (2, 3, 1, 0)).reshape(9, 32, 32)  # [k]=(Cin,Cout)
        prep[f"b{li}"] = params[f"conv{li}_b"].reshape(1, 32)
        h, w, cols = ho, wo, blk

    n_sp = h * w                                                     # 9 spatial positions
    # Fold PyTorch's channel-major .view(288) flatten order into Wih: block p holds the
    # columns of Wih for features (c*9 + p), so the kernel consumes (n_sp, 32) rows.
    wih_t = params["gru_wih"].T                                      # (288, 3H), rows = c*9+p
    prep["wih"] = wih_t.reshape(32, n_sp, 3 * hidden).transpose(1, 0, 2)  # (9, 32, 3H)
    prep["whh"] = params["gru_whh"].T                                # (H, 3H)
    prep["bih"] = params["gru_bih"].reshape(1, -1)
    prep["bhh"] = params["gru_bhh"].reshape(1, -1)

    prep["wpi"] = params["pi_w"].T                                   # (H, n_actions)
    prep["bpi"] = params["pi_b"].reshape(1, -1)
    prep["wv"] = params["v_w"].T                                     # (H, 1)
    prep["bv"] = params["v_b"].reshape(1, -1)
    return prep


# --------------------------------- jitted forward ---------------------------------

def _im2col_layer1(x, ksize=3, stride=2, pad=1):
    """x: (C, H, W) -> (Ho*Wo, C*9) patches, inner order (c, ki, kj) = PyTorch flatten."""
    C, H, W = x.shape
    xp = jnp.pad(x, ((0, 0), (pad, pad), (pad, pad)))
    Ho = (H + 2 * pad - ksize) // stride + 1
    Wo = (W + 2 * pad - ksize) // stride + 1
    cols = []
    for di in range(ksize):
        for dj in range(ksize):
            patch = jax.lax.slice(
                xp, (0, di, dj),
                (C, di + stride * (Ho - 1) + 1, dj + stride * (Wo - 1) + 1),
                (1, stride, stride))                                 # (C, Ho, Wo)
            cols.append(patch)
    patches = jnp.stack(cols, axis=1)                                # (C, 9, Ho, Wo)
    return patches.reshape(C * ksize * ksize, Ho * Wo).T             # (Ho*Wo, C*9)


@jax.jit
def actor_critic_forward(prep, state, hx, sample_key):
    """state: (C, H, W) float32, hx: (hidden,) float32.
    Returns (action_scalar, v(1,), log_prob(1,), hx_new(hidden,))."""
    hidden = hx.shape[0]
    n_actions = prep["bpi"].shape[1]

    patches1 = _im2col_layer1(state.astype(jnp.float32))             # (441, 9*C0)

    logp, v, hx_new = pl.pallas_call(
        _fused_forward_kernel,
        out_shape=(jax.ShapeDtypeStruct((1, n_actions), jnp.float32),
                   jax.ShapeDtypeStruct((1, 1), jnp.float32),
                   jax.ShapeDtypeStruct((1, hidden), jnp.float32)),
        in_specs=[_VMEM] * 21,
        out_specs=(_VMEM, _VMEM, _VMEM),
        compiler_params=pltpu.CompilerParams(vmem_limit_bytes=32 * 1024 * 1024),
    )(patches1, prep["w1"], prep["b1"],
      prep["a2"], prep["w2"], prep["b2"],
      prep["a3"], prep["w3"], prep["b3"],
      prep["a4"], prep["w4"], prep["b4"],
      hx.reshape(1, hidden),
      prep["wih"], prep["whh"], prep["bih"], prep["bhh"],
      prep["wpi"], prep["bpi"], prep["wv"], prep["bv"])

    # Categorical sample + log_prob (deterministic given sample_key).
    action = jax.random.categorical(sample_key, logp[0])
    log_prob = logp[0, action].reshape(1)
    return action, v.reshape(1), log_prob, hx_new.reshape(-1)


# --------------------------------------- main ---------------------------------------

if __name__ == "__main__":
    input_dims = (1, 42, 42)   # four stride-2 convs -> 32*3*3 = 288, matching .view(288)
    n_actions = 6
    hidden = 256

    root = jax.random.PRNGKey(0)
    k_params, k_state, k_sample = jax.random.split(root, 3)

    params = init_params(k_params, input_dims, n_actions, hidden)
    prep = prepare_params(params, input_dims, hidden)   # one-time weight re-layout
    state = jax.random.normal(k_state, input_dims, jnp.float32)
    hx = jnp.zeros((hidden,), jnp.float32)

    action, v, log_prob, hx_new = actor_critic_forward(prep, state, hx, k_sample)
    jax.block_until_ready((action, v, log_prob, hx_new))

    assert v.shape == (1,) and log_prob.shape == (1,) and hx_new.shape == (hidden,)
    assert 0 <= int(action) < n_actions
    assert bool(jnp.isfinite(v).all()) and bool(jnp.isfinite(log_prob).all())
    assert bool(jnp.all(jnp.abs(hx_new) < 1.0 + 1e-5))   # GRU output is tanh/convex bounded
    print("KERNEL_OK")
</pallas_src>

<mosaic_0001>
module attributes {stable_mosaic.version = 11 : i64} {
  func.func @_fused_forward_kernel(%arg0: memref<441x9xf32, #tpu.memory_space<vmem>>, %arg1: memref<9x32xf32, #tpu.memory_space<vmem>>, %arg2: memref<1x32xf32, #tpu.memory_space<vmem>>, %arg3: memref<1152x441xbf16, #tpu.memory_space<vmem>>, %arg4: memref<9x32x32xf32, #tpu.memory_space<vmem>>, %arg5: memref<1x32xf32, #tpu.memory_space<vmem>>, %arg6: memref<360x128xbf16, #tpu.memory_space<vmem>>, %arg7: memref<9x32x32xf32, #tpu.memory_space<vmem>>, %arg8: memref<1x32xf32, #tpu.memory_space<vmem>>, %arg9: memref<144x40xbf16, #tpu.memory_space<vmem>>, %arg10: memref<9x32x32xf32, #tpu.memory_space<vmem>>, %arg11: memref<1x32xf32, #tpu.memory_space<vmem>>, %arg12: memref<1x256xf32, #tpu.memory_space<vmem>>, %arg13: memref<9x32x768xf32, #tpu.memory_space<vmem>>, %arg14: memref<256x768xf32, #tpu.memory_space<vmem>>, %arg15: memref<1x768xf32, #tpu.memory_space<vmem>>, %arg16: memref<1x768xf32, #tpu.memory_space<vmem>>, %arg17: memref<256x6xf32, #tpu.memory_space<vmem>>, %arg18: memref<1x6xf32, #tpu.memory_space<vmem>>, %arg19: memref<256x1xf32, #tpu.memory_space<vmem>>, %arg20: memref<1x1xf32, #tpu.memory_space<vmem>>, %arg21: memref<1x6xf32, #tpu.memory_space<vmem>>, %arg22: memref<1x1xf32, #tpu.memory_space<vmem>>, %arg23: memref<1x256xf32, #tpu.memory_space<vmem>>) attributes {dimension_semantics = [], scalar_prefetch = 0 : i64, scratch_operands = 0 : i64, tpu.core_type = #tpu.core_type<tc>} {
    %c0 = arith.constant 0 : index
    %c0_0 = arith.constant 0 : index
    %0 = vector.load %arg0[%c0, %c0_0] : memref<441x9xf32, #tpu.memory_space<vmem>>, vector<441x9xf32>
    %c0_1 = arith.constant 0 : index
    %c0_2 = arith.constant 0 : index
    %1 = vector.load %arg1[%c0_1, %c0_2] : memref<9x32xf32, #tpu.memory_space<vmem>>, vector<9x32xf32>
    %cst = arith.constant dense<0.000000e+00> : vector<441x32xf32>
    %2 = tpu.matmul %0, %1, %cst {dimension_numbers = #tpu.dot_dimension_numbers<[1], [0], [0], [1], [0, 0, 1, 1], [], []>} : vector<441x9xf32>, vector<9x32xf32>, vector<441x32xf32> -> vector<441x32xf32>
    %c0_3 = arith.constant 0 : index
    %c0_4 = arith.constant 0 : index
    %3 = vector.load %arg2[%c0_3, %c0_4] : memref<1x32xf32, #tpu.memory_space<vmem>>, vector<1x32xf32>
    %4 = vector.broadcast %3 : vector<1x32xf32> to vector<441x32xf32>
    %5 = arith.addf %2, %4 : vector<441x32xf32>
    %cst_5 = arith.constant 0.000000e+00 : f32
    %6 = vector.broadcast %cst_5 : f32 to vector<441x32xf32>
    %7 = arith.cmpf ogt, %5, %6 : vector<441x32xf32>
    %cst_6 = arith.constant 0.000000e+00 : f32
    %8 = vector.broadcast %cst_6 : f32 to vector<441x32xf32>
    %9 = arith.minimumf %5, %8 : vector<441x32xf32>
    %10 = math.exp %9 : vector<441x32xf32>
    %cst_7 = arith.constant 1.000000e+00 : f32
    %11 = vector.broadcast %cst_7 : f32 to vector<441x32xf32>
    %12 = arith.subf %10, %11 : vector<441x32xf32>
    %13 = arith.select %7, %5, %12 : vector<441x32xi1>, vector<441x32xf32>
    %c0_8 = arith.constant 0 : index
    %c0_9 = arith.constant 0 : index
    %14 = vector.load %arg3[%c0_8, %c0_9] : memref<1152x441xbf16, #tpu.memory_space<vmem>>, vector<1152x441xbf16>
    %15 = arith.extf %14 : vector<1152x441xbf16> to vector<1152x441xf32>
    %cst_10 = arith.constant dense<0.000000e+00> : vector<1152x32xf32>
    %16 = tpu.matmul %15, %13, %cst_10 {dimension_numbers = #tpu.dot_dimension_numbers<[1], [0], [0], [1], [0, 0, 1, 1], [], []>} : vector<1152x441xf32>, vector<441x32xf32>, vector<1152x32xf32> -> vector<1152x32xf32>
    %c0_11 = arith.constant 0 : index
    %c0_12 = arith.constant 0 : index
    %17 = vector.load %arg5[%c0_11, %c0_12] : memref<1x32xf32, #tpu.memory_space<vmem>>, vector<1x32xf32>
    %18 = vector.extract_strided_slice %16 {offsets = [0, 0], sizes = [128, 32], strides = [1, 1]} : vector<1152x32xf32> to vector<128x32xf32>
    %c0_13 = arith.constant 0 : index
    %c0_14 = arith.constant 0 : index
    %c0_15 = arith.constant 0 : index
    %19 = vector.load %arg4[%c0_13, %c0_14, %c0_15] : memref<9x32x32xf32, #tpu.memory_space<vmem>>, vector<1x32x32xf32>
    %20 = vector.shape_cast %19 : vector<1x32x32xf32> to vector<32x32xf32>
    %cst_16 = arith.constant dense<0.000000e+00> : vector<128x32xf32>
    %21 = tpu.matmul %18, %20, %cst_16 {dimension_numbers = #tpu.dot_dimension_numbers<[1], [0], [0], [1], [0, 0, 1, 1], [], []>} : vector<128x32xf32>, vector<32x32xf32>, vector<128x32xf32> -> vector<128x32xf32>
    %22 = vector.broadcast %17 : vector<1x32xf32> to vector<128x32xf32>
    %23 = arith.addf %22, %21 : vector<128x32xf32>
    %24 = vector.extract_strided_slice %16 {offsets = [128, 0], sizes = [128, 32], strides = [1, 1]} : vector<1152x32xf32> to vector<128x32xf32>
    %c1 = arith.constant 1 : index
    %c0_17 = arith.constant 0 : index
    %c0_18 = arith.constant 0 : index
    %25 = vector.load %arg4[%c1, %c0_17, %c0_18] : memref<9x32x32xf32, #tpu.memory_space<vmem>>, vector<1x32x32xf32>
    %26 = vector.shape_cast %25 : vector<1x32x32xf32> to vector<32x32xf32>
    %cst_19 = arith.constant dense<0.000000e+00> : vector<128x32xf32>
    %27 = tpu.matmul %24, %26, %cst_19 {dimension_numbers = #tpu.dot_dimension_numbers<[1], [0], [0], [1], [0, 0, 1, 1], [], []>} : vector<128x32xf32>, vector<32x32xf32>, vector<128x32xf32> -> vector<128x32xf32>
    %28 = arith.addf %23, %27 : vector<128x32xf32>
    %29 = vector.extract_strided_slice %16 {offsets = [256, 0], sizes = [128, 32], strides = [1, 1]} : vector<1152x32xf32> to vector<128x32xf32>
    %c2 = arith.constant 2 : index
    %c0_20 = arith.constant 0 : index
    %c0_21 = arith.constant 0 : index
    %30 = vector.load %arg4[%c2, %c0_20, %c0_21] : memref<9x32x32xf32, #tpu.memory_space<vmem>>, vector<1x32x32xf32>
    %31 = vector.shape_cast %30 : vector<1x32x32xf32> to vector<32x32xf32>
    %cst_22 = arith.constant dense<0.000000e+00> : vector<128x32xf32>
    %32 = tpu.matmul %29, %31, %cst_22 {dimension_numbers = #tpu.dot_dimension_numbers<[1], [0], [0], [1], [0, 0, 1, 1], [], []>} : vector<128x32xf32>, vector<32x32xf32>, vector<128x32xf32> -> vector<128x32xf32>
    %33 = arith.addf %28, %32 : vector<128x32xf32>
    %34 = vector.extract_strided_slice %16 {offsets = [384, 0], sizes = [128, 32], strides = [1, 1]} : vector<1152x32xf32> to vector<128x32xf32>
    %c3 = arith.constant 3 : index
    %c0_23 = arith.constant 0 : index
    %c0_24 = arith.constant 0 : index
    %35 = vector.load %arg4[%c3, %c0_23, %c0_24] : memref<9x32x32xf32, #tpu.memory_space<vmem>>, vector<1x32x32xf32>
    %36 = vector.shape_cast %35 : vector<1x32x32xf32> to vector<32x32xf32>
    %cst_25 = arith.constant dense<0.000000e+00> : vector<128x32xf32>
    %37 = tpu.matmul %34, %36, %cst_25 {dimension_numbers = #tpu.dot_dimension_numbers<[1], [0], [0], [1], [0, 0, 1, 1], [], []>} : vector<128x32xf32>, vector<32x32xf32>, vector<128x32xf32> -> vector<128x32xf32>
    %38 = arith.addf %33, %37 : vector<128x32xf32>
    %39 = vector.extract_strided_slice %16 {offsets = [512, 0], sizes = [128, 32], strides = [1, 1]} : vector<1152x32xf32> to vector<128x32xf32>
    %c4 = arith.constant 4 : index
    %c0_26 = arith.constant 0 : index
    %c0_27 = arith.constant 0 : index
    %40 = vector.load %arg4[%c4, %c0_26, %c0_27] : memref<9x32x32xf32, #tpu.memory_space<vmem>>, vector<1x32x32xf32>
    %41 = vector.shape_cast %40 : vector<1x32x32xf32> to vector<32x32xf32>
    %cst_28 = arith.constant dense<0.000000e+00> : vector<128x32xf32>
    %42 = tpu.matmul %39, %41, %cst_28 {dimension_numbers = #tpu.dot_dimension_numbers<[1], [0], [0], [1], [0, 0, 1, 1], [], []>} : vector<128x32xf32>, vector<32x32xf32>, vector<128x32xf32> -> vector<128x32xf32>
    %43 = arith.addf %38, %42 : vector<128x32xf32>
    %44 = vector.extract_strided_slice %16 {offsets = [640, 0], sizes = [128, 32], strides = [1, 1]} : vector<1152x32xf32> to vector<128x32xf32>
    %c5 = arith.constant 5 : index
    %c0_29 = arith.constant 0 : index
    %c0_30 = arith.constant 0 : index
    %45 = vector.load %arg4[%c5, %c0_29, %c0_30] : memref<9x32x32xf32, #tpu.memory_space<vmem>>, vector<1x32x32xf32>
    %46 = vector.shape_cast %45 : vector<1x32x32xf32> to vector<32x32xf32>
    %cst_31 = arith.constant dense<0.000000e+00> : vector<128x32xf32>
    %47 = tpu.matmul %44, %46, %cst_31 {dimension_numbers = #tpu.dot_dimension_numbers<[1], [0], [0], [1], [0, 0, 1, 1], [], []>} : vector<128x32xf32>, vector<32x32xf32>, vector<128x32xf32> -> vector<128x32xf32>
    %48 = arith.addf %43, %47 : vector<128x32xf32>
    %49 = vector.extract_strided_slice %16 {offsets = [768, 0], sizes = [128, 32], strides = [1, 1]} : vector<1152x32xf32> to vector<128x32xf32>
    %c6 = arith.constant 6 : index
    %c0_32 = arith.constant 0 : index
    %c0_33 = arith.constant 0 : index
    %50 = vector.load %arg4[%c6, %c0_32, %c0_33] : memref<9x32x32xf32, #tpu.memory_space<vmem>>, vector<1x32x32xf32>
    %51 = vector.shape_cast %50 : vector<1x32x32xf32> to vector<32x32xf32>
    %cst_34 = arith.constant dense<0.000000e+00> : vector<128x32xf32>
    %52 = tpu.matmul %49, %51, %cst_34 {dimension_numbers = #tpu.dot_dimension_numbers<[1], [0], [0], [1], [0, 0, 1, 1], [], []>} : vector<128x32xf32>, vector<32x32xf32>, vector<128x32xf32> -> vector<128x32xf32>
    %53 = arith.addf %48, %52 : vector<128x32xf32>
    %54 = vector.extract_strided_slice %16 {offsets = [896, 0], sizes = [128, 32], strides = [1, 1]} : vector<1152x32xf32> to vector<128x32xf32>
    %c7 = arith.constant 7 : index
    %c0_35 = arith.constant 0 : index
    %c0_36 = arith.constant 0 : index
    %55 = vector.load %arg4[%c7, %c0_35, %c0_36] : memref<9x32x32xf32, #tpu.memory_space<vmem>>, vector<1x32x32xf32>
    %56 = vector.shape_cast %55 : vector<1x32x32xf32> to vector<32x32xf32>
    %cst_37 = arith.constant dense<0.000000e+00> : vector<128x32xf32>
    %57 = tpu.matmul %54, %56, %cst_37 {dimension_numbers = #tpu.dot_dimension_numbers<[1], [0], [0], [1], [0, 0, 1, 1], [], []>} : vector<128x32xf32>, vector<32x32xf32>, vector<128x32xf32> -> vector<128x32xf32>
    %58 = arith.addf %53, %57 : vector<128x32xf32>
    %59 = vector.extract_strided_slice %16 {offsets = [1024, 0], sizes = [128, 32], strides = [1, 1]} : vector<1152x32xf32> to vector<128x32xf32>
    %c8 = arith.constant 8 : index
    %c0_38 = arith.constant 0 : index
    %c0_39 = arith.constant 0 : index
    %60 = vector.load %arg4[%c8, %c0_38, %c0_39] : memref<9x32x32xf32, #tpu.memory_space<vmem>>, vector<1x32x32xf32>
    %61 = vector.shape_cast %60 : vector<1x32x32xf32> to vector<32x32xf32>
    %cst_40 = arith.constant dense<0.000000e+00> : vector<128x32xf32>
    %62 = tpu.matmul %59, %61, %cst_40 {dimension_numbers = #tpu.dot_dimension_numbers<[1], [0], [0], [1], [0, 0, 1, 1], [], []>} : vector<128x32xf32>, vector<32x32xf32>, vector<128x32xf32> -> vector<128x32xf32>
    %63 = arith.addf %58, %62 : vector<128x32xf32>
    %cst_41 = arith.constant 0.000000e+00 : f32
    %64 = vector.broadcast %cst_41 : f32 to vector<128x32xf32>
    %65 = arith.cmpf ogt, %63, %64 : vector<128x32xf32>
    %cst_42 = arith.constant 0.000000e+00 : f32
    %66 = vector.broadcast %cst_42 : f32 to vector<128x32xf32>
    %67 = arith.minimumf %63, %66 : vector<128x32xf32>
    %68 = math.exp %67 : vector<128x32xf32>
    %cst_43 = arith.constant 1.000000e+00 : f32
    %69 = vector.broadcast %cst_43 : f32 to vector<128x32xf32>
    %70 = arith.subf %68, %69 : vector<128x32xf32>
    %71 = arith.select %65, %63, %70 : vector<128x32xi1>, vector<128x32xf32>
    %c0_44 = arith.constant 0 : index
    %c0_45 = arith.constant 0 : index
    %72 = vector.load %arg6[%c0_44, %c0_45] : memref<360x128xbf16, #tpu.memory_space<vmem>>, vector<360x128xbf16>
    %73 = arith.extf %72 : vector<360x128xbf16> to vector<360x128xf32>
    %cst_46 = arith.constant dense<0.000000e+00> : vector<360x32xf32>
    %74 = tpu.matmul %73, %71, %cst_46 {dimension_numbers = #tpu.dot_dimension_numbers<[1], [0], [0], [1], [0, 0, 1, 1], [], []>} : vector<360x128xf32>, vector<128x32xf32>, vector<360x32xf32> -> vector<360x32xf32>
    %c0_47 = arith.constant 0 : index
    %c0_48 = arith.constant 0 : index
    %75 = vector.load %arg8[%c0_47, %c0_48] : memref<1x32xf32, #tpu.memory_space<vmem>>, vector<1x32xf32>
    %76 = vector.extract_strided_slice %74 {offsets = [0, 0], sizes = [40, 32], strides = [1, 1]} : vector<360x32xf32> to vector<40x32xf32>
    %c0_49 = arith.constant 0 : index
    %c0_50 = arith.constant 0 : index
    %c0_51 = arith.constant 0 : index
    %77 = vector.load %arg7[%c0_49, %c0_50, %c0_51] : memref<9x32x32xf32, #tpu.memory_space<vmem>>, vector<1x32x32xf32>
    %78 = vector.shape_cast %77 : vector<1x32x32xf32> to vector<32x32xf32>
    %cst_52 = arith.constant dense<0.000000e+00> : vector<40x32xf32>
    %79 = tpu.matmul %76, %78, %cst_52 {dimension_numbers = #tpu.dot_dimension_numbers<[1], [0], [0], [1], [0, 0, 1, 1], [], []>} : vector<40x32xf32>, vector<32x32xf32>, vector<40x32xf32> -> vector<40x32xf32>
    %80 = vector.broadcast %75 : vector<1x32xf32> to vector<40x32xf32>
    %81 = arith.addf %80, %79 : vector<40x32xf32>
    %82 = vector.extract_strided_slice %74 {offsets = [40, 0], sizes = [40, 32], strides = [1, 1]} : vector<360x32xf32> to vector<40x32xf32>
    %c1_53 = arith.constant 1 : index
    %c0_54 = arith.constant 0 : index
    %c0_55 = arith.constant 0 : index
    %83 = vector.load %arg7[%c1_53, %c0_54, %c0_55] : memref<9x32x32xf32, #tpu.memory_space<vmem>>, vector<1x32x32xf32>
    %84 = vector.shape_cast %83 : vector<1x32x32xf32> to vector<32x32xf32>
    %cst_56 = arith.constant dense<0.000000e+00> : vector<40x32xf32>
    %85 = tpu.matmul %82, %84, %cst_56 {dimension_numbers = #tpu.dot_dimension_numbers<[1], [0], [0], [1], [0, 0, 1, 1], [], []>} : vector<40x32xf32>, vector<32x32xf32>, vector<40x32xf32> -> vector<40x32xf32>
    %86 = arith.addf %81, %85 : vector<40x32xf32>
    %87 = vector.extract_strided_slice %74 {offsets = [80, 0], sizes = [40, 32], strides = [1, 1]} : vector<360x32xf32> to vector<40x32xf32>
    %c2_57 = arith.constant 2 : index
    %c0_58 = arith.constant 0 : index
    %c0_59 = arith.constant 0 : index
    %88 = vector.load %arg7[%c2_57, %c0_58, %c0_59] : memref<9x32x32xf32, #tpu.memory_space<vmem>>, vector<1x32x32xf32>
    %89 = vector.shape_cast %88 : vector<1x32x32xf32> to vector<32x32xf32>
    %cst_60 = arith.constant dense<0.000000e+00> : vector<40x32xf32>
    %90 = tpu.matmul %87, %89, %cst_60 {dimension_numbers = #tpu.dot_dimension_numbers<[1], [0], [0], [1], [0, 0, 1, 1], [], []>} : vector<40x32xf32>, vector<32x32xf32>, vector<40x32xf32> -> vector<40x32xf32>
    %91 = arith.addf %86, %90 : vector<40x32xf32>
    %92 = vector.extract_strided_slice %74 {offsets = [120, 0], sizes = [40, 32], strides = [1, 1]} : vector<360x32xf32> to vector<40x32xf32>
    %c3_61 = arith.constant 3 : index
    %c0_62 = arith.constant 0 : index
    %c0_63 = arith.constant 0 : index
    %93 = vector.load %arg7[%c3_61, %c0_62, %c0_63] : memref<9x32x32xf32, #tpu.memory_space<vmem>>, vector<1x32x32xf32>
    %94 = vector.shape_cast %93 : vector<1x32x32xf32> to vector<32x32xf32>
    %cst_64 = arith.constant dense<0.000000e+00> : vector<40x32xf32>
    %95 = tpu.matmul %92, %94, %cst_64 {dimension_numbers = #tpu.dot_dimension_numbers<[1], [0], [0], [1], [0, 0, 1, 1], [], []>} : vector<40x32xf32>, vector<32x32xf32>, vector<40x32xf32> -> vector<40x32xf32>
    %96 = arith.addf %91, %95 : vector<40x32xf32>
    %97 = vector.extract_strided_slice %74 {offsets = [160, 0], sizes = [40, 32], strides = [1, 1]} : vector<360x32xf32> to vector<40x32xf32>
    %c4_65 = arith.constant 4 : index
    %c0_66 = arith.constant 0 : index
    %c0_67 = arith.constant 0 : index
    %98 = vector.load %arg7[%c4_65, %c0_66, %c0_67] : memref<9x32x32xf32, #tpu.memory_space<vmem>>, vector<1x32x32xf32>
    %99 = vector.shape_cast %98 : vector<1x32x32xf32> to vector<32x32xf32>
    %cst_68 = arith.constant dense<0.000000e+00> : vector<40x32xf32>
    %100 = tpu.matmul %97, %99, %cst_68 {dimension_numbers = #tpu.dot_dimension_numbers<[1], [0], [0], [1], [0, 0, 1, 1], [], []>} : vector<40x32xf32>, vector<32x32xf32>, vector<40x32xf32> -> vector<40x32xf32>
    %101 = arith.addf %96, %100 : vector<40x32xf32>
    %102 = vector.extract_strided_slice %74 {offsets = [200, 0], sizes = [40, 32], strides = [1, 1]} : vector<360x32xf32> to vector<40x32xf32>
    %c5_69 = arith.constant 5 : index
    %c0_70 = arith.constant 0 : index
    %c0_71 = arith.constant 0 : index
    %103 = vector.load %arg7[%c5_69, %c0_70, %c0_71] : memref<9x32x32xf32, #tpu.memory_space<vmem>>, vector<1x32x32xf32>
    %104 = vector.shape_cast %103 : vector<1x32x32xf32> to vector<32x32xf32>
    %cst_72 = arith.constant dense<0.000000e+00> : vector<40x32xf32>
    %105 = tpu.matmul %102, %104, %cst_72 {dimension_numbers = #tpu.dot_dimension_numbers<[1], [0], [0], [1], [0, 0, 1, 1], [], []>} : vector<40x32xf32>, vector<32x32xf32>, vector<40x32xf32> -> vector<40x32xf32>
    %106 = arith.addf %101, %105 : vector<40x32xf32>
    %107 = vector.extract_strided_slice %74 {offsets = [240, 0], sizes = [40, 32], strides = [1, 1]} : vector<360x32xf32> to vector<40x32xf32>
    %c6_73 = arith.constant 6 : index
    %c0_74 = arith.constant 0 : index
    %c0_75 = arith.constant 0 : index
    %108 = vector.load %arg7[%c6_73, %c0_74, %c0_75] : memref<9x32x32xf32, #tpu.memory_space<vmem>>, vector<1x32x32xf32>
    %109 = vector.shape_cast %108 : vector<1x32x32xf32> to vector<32x32xf32>
    %cst_76 = arith.constant dense<0.000000e+00> : vector<40x32xf32>
    %110 = tpu.matmul %107, %109, %cst_76 {dimension_numbers = #tpu.dot_dimension_numbers<[1], [0], [0], [1], [0, 0, 1, 1], [], []>} : vector<40x32xf32>, vector<32x32xf32>, vector<40x32xf32> -> vector<40x32xf32>
    %111 = arith.addf %106, %110 : vector<40x32xf32>
    %112 = vector.extract_strided_slice %74 {offsets = [280, 0], sizes = [40, 32], strides = [1, 1]} : vector<360x32xf32> to vector<40x32xf32>
    %c7_77 = arith.constant 7 : index
    %c0_78 = arith.constant 0 : index
    %c0_79 = arith.constant 0 : index
    %113 = vector.load %arg7[%c7_77, %c0_78, %c0_79] : memref<9x32x32xf32, #tpu.memory_space<vmem>>, vector<1x32x32xf32>
    %114 = vector.shape_cast %113 : vector<1x32x32xf32> to vector<32x32xf32>
    %cst_80 = arith.constant dense<0.000000e+00> : vector<40x32xf32>
    %115 = tpu.matmul %112, %114, %cst_80 {dimension_numbers = #tpu.dot_dimension_numbers<[1], [0], [0], [1], [0, 0, 1, 1], [], []>} : vector<40x32xf32>, vector<32x32xf32>, vector<40x32xf32> -> vector<40x32xf32>
    %116 = arith.addf %111, %115 : vector<40x32xf32>
    %117 = vector.extract_strided_slice %74 {offsets = [320, 0], sizes = [40, 32], strides = [1, 1]} : vector<360x32xf32> to vector<40x32xf32>
    %c8_81 = arith.constant 8 : index
    %c0_82 = arith.constant 0 : index
    %c0_83 = arith.constant 0 : index
    %118 = vector.load %arg7[%c8_81, %c0_82, %c0_83] : memref<9x32x32xf32, #tpu.memory_space<vmem>>, vector<1x32x32xf32>
    %119 = vector.shape_cast %118 : vector<1x32x32xf32> to vector<32x32xf32>
    %cst_84 = arith.constant dense<0.000000e+00> : vector<40x32xf32>
    %120 = tpu.matmul %117, %119, %cst_84 {dimension_numbers = #tpu.dot_dimension_numbers<[1], [0], [0], [1], [0, 0, 1, 1], [], []>} : vector<40x32xf32>, vector<32x32xf32>, vector<40x32xf32> -> vector<40x32xf32>
    %121 = arith.addf %116, %120 : vector<40x32xf32>
    %cst_85 = arith.constant 0.000000e+00 : f32
    %122 = vector.broadcast %cst_85 : f32 to vector<40x32xf32>
    %123 = arith.cmpf ogt, %121, %122 : vector<40x32xf32>
    %cst_86 = arith.constant 0.000000e+00 : f32
    %124 = vector.broadcast %cst_86 : f32 to vector<40x32xf32>
    %125 = arith.minimumf %121, %124 : vector<40x32xf32>
    %126 = math.exp %125 : vector<40x32xf32>
    %cst_87 = arith.constant 1.000000e+00 : f32
    %127 = vector.broadcast %cst_87 : f32 to vector<40x32xf32>
    %128 = arith.subf %126, %127 : vector<40x32xf32>
    %129 = arith.select %123, %121, %128 : vector<40x32xi1>, vector<40x32xf32>
    %c0_88 = arith.constant 0 : index
    %c0_89 = arith.constant 0 : index
    %130 = vector.load %arg9[%c0_88, %c0_89] : memref<144x40xbf16, #tpu.memory_space<vmem>>, vector<144x40xbf16>
    %131 = arith.extf %130 : vector<144x40xbf16> to vector<144x40xf32>
    %cst_90 = arith.constant dense<0.000000e+00> : vector<144x32xf32>
    %132 = tpu.matmul %131, %129, %cst_90 {dimension_numbers = #tpu.dot_dimension_numbers<[1], [0], [0], [1], [0, 0, 1, 1], [], []>} : vector<144x40xf32>, vector<40x32xf32>, vector<144x32xf32> -> vector<144x32xf32>
    %c0_91 = arith.constant 0 : index
    %c0_92 = arith.constant 0 : index
    %133 = vector.load %arg11[%c0_91, %c0_92] : memref<1x32xf32, #tpu.memory_space<vmem>>, vector<1x32xf32>
    %134 = vector.extract_strided_slice %132 {offsets = [0, 0], sizes = [16, 32], strides = [1, 1]} : vector<144x32xf32> to vector<16x32xf32>
    %c0_93 = arith.constant 0 : index
    %c0_94 = arith.constant 0 : index
    %c0_95 = arith.constant 0 : index
    %135 = vector.load %arg10[%c0_93, %c0_94, %c0_95] : memref<9x32x32xf32, #tpu.memory_space<vmem>>, vector<1x32x32xf32>
    %136 = vector.shape_cast %135 : vector<1x32x32xf32> to vector<32x32xf32>
    %cst_96 = arith.constant dense<0.000000e+00> : vector<16x32xf32>
    %137 = tpu.matmul %134, %136, %cst_96 {dimension_numbers = #tpu.dot_dimension_numbers<[1], [0], [0], [1], [0, 0, 1, 1], [], []>} : vector<16x32xf32>, vector<32x32xf32>, vector<16x32xf32> -> vector<16x32xf32>
    %138 = vector.broadcast %133 : vector<1x32xf32> to vector<16x32xf32>
    %139 = arith.addf %138, %137 : vector<16x32xf32>
    %140 = vector.extract_strided_slice %132 {offsets = [16, 0], sizes = [16, 32], strides = [1, 1]} : vector<144x32xf32> to vector<16x32xf32>
    %c1_97 = arith.constant 1 : index
    %c0_98 = arith.constant 0 : index
    %c0_99 = arith.constant 0 : index
    %141 = vector.load %arg10[%c1_97, %c0_98, %c0_99] : memref<9x32x32xf32, #tpu.memory_space<vmem>>, vector<1x32x32xf32>
    %142 = vector.shape_cast %141 : vector<1x32x32xf32> to vector<32x32xf32>
    %cst_100 = arith.constant dense<0.000000e+00> : vector<16x32xf32>
    %143 = tpu.matmul %140, %142, %cst_100 {dimension_numbers = #tpu.dot_dimension_numbers<[1], [0], [0], [1], [0, 0, 1, 1], [], []>} : vector<16x32xf32>, vector<32x32xf32>, vector<16x32xf32> -> vector<16x32xf32>
    %144 = arith.addf %139, %143 : vector<16x32xf32>
    %145 = vector.extract_strided_slice %132 {offsets = [32, 0], sizes = [16, 32], strides = [1, 1]} : vector<144x32xf32> to vector<16x32xf32>
    %c2_101 = arith.constant 2 : index
    %c0_102 = arith.constant 0 : index
    %c0_103 = arith.constant 0 : index
    %146 = vector.load %arg10[%c2_101, %c0_102, %c0_103] : memref<9x32x32xf32, #tpu.memory_space<vmem>>, vector<1x32x32xf32>
    %147 = vector.shape_cast %146 : vector<1x32x32xf32> to vector<32x32xf32>
    %cst_104 = arith.constant dense<0.000000e+00> : vector<16x32xf32>
    %148 = tpu.matmul %145, %147, %cst_104 {dimension_numbers = #tpu.dot_dimension_numbers<[1], [0], [0], [1], [0, 0, 1, 1], [], []>} : vector<16x32xf32>, vector<32x32xf32>, vector<16x32xf32> -> vector<16x32xf32>
    %149 = arith.addf %144, %148 : vector<16x32xf32>
    %150 = vector.extract_strided_slice %132 {offsets = [48, 0], sizes = [16, 32], strides = [1, 1]} : vector<144x32xf32> to vector<16x32xf32>
    %c3_105 = arith.constant 3 : index
    %c0_106 = arith.constant 0 : index
    %c0_107 = arith.constant 0 : index
    %151 = vector.load %arg10[%c3_105, %c0_106, %c0_107] : memref<9x32x32xf32, #tpu.memory_space<vmem>>, vector<1x32x32xf32>
    %152 = vector.shape_cast %151 : vector<1x32x32xf32> to vector<32x32xf32>
    %cst_108 = arith.constant dense<0.000000e+00> : vector<16x32xf32>
    %153 = tpu.matmul %150, %152, %cst_108 {dimension_numbers = #tpu.dot_dimension_numbers<[1], [0], [0], [1], [0, 0, 1, 1], [], []>} : vector<16x32xf32>, vector<32x32xf32>, vector<16x32xf32> -> vector<16x32xf32>
    %154 = arith.addf %149, %153 : vector<16x32xf32>
    %155 = vector.extract_strided_slice %132 {offsets = [64, 0], sizes = [16, 32], strides = [1, 1]} : vector<144x32xf32> to vector<16x32xf32>
    %c4_109 = arith.constant 4 : index
    %c0_110 = arith.constant 0 : index
    %c0_111 = arith.constant 0 : index
    %156 = vector.load %arg10[%c4_109, %c0_110, %c0_111] : memref<9x32x32xf32, #tpu.memory_space<vmem>>, vector<1x32x32xf32>
    %157 = vector.shape_cast %156 : vector<1x32x32xf32> to vector<32x32xf32>
    %cst_112 = arith.constant dense<0.000000e+00> : vector<16x32xf32>
    %158 = tpu.matmul %155, %157, %cst_112 {dimension_numbers = #tpu.dot_dimension_numbers<[1], [0], [0], [1], [0, 0, 1, 1], [], []>} : vector<16x32xf32>, vector<32x32xf32>, vector<16x32xf32> -> vector<16x32xf32>
    %159 = arith.addf %154, %158 : vector<16x32xf32>
    %160 = vector.extract_strided_slice %132 {offsets = [80, 0], sizes = [16, 32], strides = [1, 1]} : vector<144x32xf32> to vector<16x32xf32>
    %c5_113 = arith.constant 5 : index
    %c0_114 = arith.constant 0 : index
    %c0_115 = arith.constant 0 : index
    %161 = vector.load %arg10[%c5_113, %c0_114, %c0_115] : memref<9x32x32xf32, #tpu.memory_space<vmem>>, vector<1x32x32xf32>
    %162 = vector.shape_cast %161 : vector<1x32x32xf32> to vector<32x32xf32>
    %cst_116 = arith.constant dense<0.000000e+00> : vector<16x32xf32>
    %163 = tpu.matmul %160, %162, %cst_116 {dimension_numbers = #tpu.dot_dimension_numbers<[1], [0], [0], [1], [0, 0, 1, 1], [], []>} : vector<16x32xf32>, vector<32x32xf32>, vector<16x32xf32> -> vector<16x32xf32>
    %164 = arith.addf %159, %163 : vector<16x32xf32>
    %165 = vector.extract_strided_slice %132 {offsets = [96, 0], sizes = [16, 32], strides = [1, 1]} : vector<144x32xf32> to vector<16x32xf32>
    %c6_117 = arith.constant 6 : index
    %c0_118 = arith.constant 0 : index
    %c0_119 = arith.constant 0 : index
    %166 = vector.load %arg10[%c6_117, %c0_118, %c0_119] : memref<9x32x32xf32, #tpu.memory_space<vmem>>, vector<1x32x32xf32>
    %167 = vector.shape_cast %166 : vector<1x32x32xf32> to vector<32x32xf32>
    %cst_120 = arith.constant dense<0.000000e+00> : vector<16x32xf32>
    %168 = tpu.matmul %165, %167, %cst_120 {dimension_numbers = #tpu.dot_dimension_numbers<[1], [0], [0], [1], [0, 0, 1, 1], [], []>} : vector<16x32xf32>, vector<32x32xf32>, vector<16x32xf32> -> vector<16x32xf32>
    %169 = arith.addf %164, %168 : vector<16x32xf32>
    %170 = vector.extract_strided_slice %132 {offsets = [112, 0], sizes = [16, 32], strides = [1, 1]} : vector<144x32xf32> to vector<16x32xf32>
    %c7_121 = arith.constant 7 : index
    %c0_122 = arith.constant 0 : index
    %c0_123 = arith.constant 0 : index
    %171 = vector.load %arg10[%c7_121, %c0_122, %c0_123] : memref<9x32x32xf32, #tpu.memory_space<vmem>>, vector<1x32x32xf32>
    %172 = vector.shape_cast %171 : vector<1x32x32xf32> to vector<32x32xf32>
    %cst_124 = arith.constant dense<0.000000e+00> : vector<16x32xf32>
    %173 = tpu.matmul %170, %172, %cst_124 {dimension_numbers = #tpu.dot_dimension_numbers<[1], [0], [0], [1], [0, 0, 1, 1], [], []>} : vector<16x32xf32>, vector<32x32xf32>, vector<16x32xf32> -> vector<16x32xf32>
    %174 = arith.addf %169, %173 : vector<16x32xf32>
    %175 = vector.extract_strided_slice %132 {offsets = [128, 0], sizes = [16, 32], strides = [1, 1]} : vector<144x32xf32> to vector<16x32xf32>
    %c8_125 = arith.constant 8 : index
    %c0_126 = arith.constant 0 : index
    %c0_127 = arith.constant 0 : index
    %176 = vector.load %arg10[%c8_125, %c0_126, %c0_127] : memref<9x32x32xf32, #tpu.memory_space<vmem>>, vector<1x32x32xf32>
    %177 = vector.shape_cast %176 : vector<1x32x32xf32> to vector<32x32xf32>
    %cst_128 = arith.constant dense<0.000000e+00> : vector<16x32xf32>
    %178 = tpu.matmul %175, %177, %cst_128 {dimension_numbers = #tpu.dot_dimension_numbers<[1], [0], [0], [1], [0, 0, 1, 1], [], []>} : vector<16x32xf32>, vector<32x32xf32>, vector<16x32xf32> -> vector<16x32xf32>
    %179 = arith.addf %174, %178 : vector<16x32xf32>
    %cst_129 = arith.constant 0.000000e+00 : f32
    %180 = vector.broadcast %cst_129 : f32 to vector<16x32xf32>
    %181 = arith.cmpf ogt, %179, %180 : vector<16x32xf32>
    %cst_130 = arith.constant 0.000000e+00 : f32
    %182 = vector.broadcast %cst_130 : f32 to vector<16x32xf32>
    %183 = arith.minimumf %179, %182 : vector<16x32xf32>
    %184 = math.exp %183 : vector<16x32xf32>
    %cst_131 = arith.constant 1.000000e+00 : f32
    %185 = vector.broadcast %cst_131 : f32 to vector<16x32xf32>
    %186 = arith.subf %184, %185 : vector<16x32xf32>
    %187 = arith.select %181, %179, %186 : vector<16x32xi1>, vector<16x32xf32>
    %c0_132 = arith.constant 0 : index
    %c0_133 = arith.constant 0 : index
    %188 = vector.load %arg12[%c0_132, %c0_133] : memref<1x256xf32, #tpu.memory_space<vmem>>, vector<1x256xf32>
    %c0_134 = arith.constant 0 : index
    %c0_135 = arith.constant 0 : index
    %189 = vector.load %arg15[%c0_134, %c0_135] : memref<1x768xf32, #tpu.memory_space<vmem>>, vector<1x768xf32>
    %190 = vector.extract_strided_slice %187 {offsets = [0, 0], sizes = [1, 32], strides = [1, 1]} : vector<16x32xf32> to vector<1x32xf32>
    %c0_136 = arith.constant 0 : index
    %c0_137 = arith.constant 0 : index
    %c0_138 = arith.constant 0 : index
    %191 = vector.load %arg13[%c0_136, %c0_137, %c0_138] : memref<9x32x768xf32, #tpu.memory_space<vmem>>, vector<1x32x768xf32>
    %192 = vector.shape_cast %191 : vector<1x32x768xf32> to vector<32x768xf32>
    %cst_139 = arith.constant dense<0.000000e+00> : vector<1x768xf32>
    %193 = tpu.matmul %190, %192, %cst_139 {dimension_numbers = #tpu.dot_dimension_numbers<[1], [0], [0], [1], [0, 0, 1, 1], [], []>} : vector<1x32xf32>, vector<32x768xf32>, vector<1x768xf32> -> vector<1x768xf32>
    %194 = arith.addf %189, %193 : vector<1x768xf32>
    %195 = vector.extract_strided_slice %187 {offsets = [1, 0], sizes = [1, 32], strides = [1, 1]} : vector<16x32xf32> to vector<1x32xf32>
    %c1_140 = arith.constant 1 : index
    %c0_141 = arith.constant 0 : index
    %c0_142 = arith.constant 0 : index
    %196 = vector.load %arg13[%c1_140, %c0_141, %c0_142] : memref<9x32x768xf32, #tpu.memory_space<vmem>>, vector<1x32x768xf32>
    %197 = vector.shape_cast %196 : vector<1x32x768xf32> to vector<32x768xf32>
    %cst_143 = arith.constant dense<0.000000e+00> : vector<1x768xf32>
    %198 = tpu.matmul %195, %197, %cst_143 {dimension_numbers = #tpu.dot_dimension_numbers<[1], [0], [0], [1], [0, 0, 1, 1], [], []>} : vector<1x32xf32>, vector<32x768xf32>, vector<1x768xf32> -> vector<1x768xf32>
    %199 = arith.addf %194, %198 : vector<1x768xf32>
    %200 = vector.extract_strided_slice %187 {offsets = [2, 0], sizes = [1, 32], strides = [1, 1]} : vector<16x32xf32> to vector<1x32xf32>
    %c2_144 = arith.constant 2 : index
    %c0_145 = arith.constant 0 : index
    %c0_146 = arith.constant 0 : index
    %201 = vector.load %arg13[%c2_144, %c0_145, %c0_146] : memref<9x32x768xf32, #tpu.memory_space<vmem>>, vector<1x32x768xf32>
    %202 = vector.shape_cast %201 : vector<1x32x768xf32> to vector<32x768xf32>
    %cst_147 = arith.constant dense<0.000000e+00> : vector<1x768xf32>
    %203 = tpu.matmul %200, %202, %cst_147 {dimension_numbers = #tpu.dot_dimension_numbers<[1], [0], [0], [1], [0, 0, 1, 1], [], []>} : vector<1x32xf32>, vector<32x768xf32>, vector<1x768xf32> -> vector<1x768xf32>
    %204 = arith.addf %199, %203 : vector<1x768xf32>
    %205 = vector.extract_strided_slice %187 {offsets = [3, 0], sizes = [1, 32], strides = [1, 1]} : vector<16x32xf32> to vector<1x32xf32>
    %c3_148 = arith.constant 3 : index
    %c0_149 = arith.constant 0 : index
    %c0_150 = arith.constant 0 : index
    %206 = vector.load %arg13[%c3_148, %c0_149, %c0_150] : memref<9x32x768xf32, #tpu.memory_space<vmem>>, vector<1x32x768xf32>
    %207 = vector.shape_cast %206 : vector<1x32x768xf32> to vector<32x768xf32>
    %cst_151 = arith.constant dense<0.000000e+00> : vector<1x768xf32>
    %208 = tpu.matmul %205, %207, %cst_151 {dimension_numbers = #tpu.dot_dimension_numbers<[1], [0], [0], [1], [0, 0, 1, 1], [], []>} : vector<1x32xf32>, vector<32x768xf32>, vector<1x768xf32> -> vector<1x768xf32>
    %209 = arith.addf %204, %208 : vector<1x768xf32>
    %210 = vector.extract_strided_slice %187 {offsets = [4, 0], sizes = [1, 32], strides = [1, 1]} : vector<16x32xf32> to vector<1x32xf32>
    %c4_152 = arith.constant 4 : index
    %c0_153 = arith.constant 0 : index
    %c0_154 = arith.constant 0 : index
    %211 = vector.load %arg13[%c4_152, %c0_153, %c0_154] : memref<9x32x768xf32, #tpu.memory_space<vmem>>, vector<1x32x768xf32>
    %212 = vector.shape_cast %211 : vector<1x32x768xf32> to vector<32x768xf32>
    %cst_155 = arith.constant dense<0.000000e+00> : vector<1x768xf32>
    %213 = tpu.matmul %210, %212, %cst_155 {dimension_numbers = #tpu.dot_dimension_numbers<[1], [0], [0], [1], [0, 0, 1, 1], [], []>} : vector<1x32xf32>, vector<32x768xf32>, vector<1x768xf32> -> vector<1x768xf32>
    %214 = arith.addf %209, %213 : vector<1x768xf32>
    %215 = vector.extract_strided_slice %187 {offsets = [5, 0], sizes = [1, 32], strides = [1, 1]} : vector<16x32xf32> to vector<1x32xf32>
    %c5_156 = arith.constant 5 : index
    %c0_157 = arith.constant 0 : index
    %c0_158 = arith.constant 0 : index
    %216 = vector.load %arg13[%c5_156, %c0_157, %c0_158] : memref<9x32x768xf32, #tpu.memory_space<vmem>>, vector<1x32x768xf32>
    %217 = vector.shape_cast %216 : vector<1x32x768xf32> to vector<32x768xf32>
    %cst_159 = arith.constant dense<0.000000e+00> : vector<1x768xf32>
    %218 = tpu.matmul %215, %217, %cst_159 {dimension_numbers = #tpu.dot_dimension_numbers<[1], [0], [0], [1], [0, 0, 1, 1], [], []>} : vector<1x32xf32>, vector<32x768xf32>, vector<1x768xf32> -> vector<1x768xf32>
    %219 = arith.addf %214, %218 : vector<1x768xf32>
    %220 = vector.extract_strided_slice %187 {offsets = [6, 0], sizes = [1, 32], strides = [1, 1]} : vector<16x32xf32> to vector<1x32xf32>
    %c6_160 = arith.constant 6 : index
    %c0_161 = arith.constant 0 : index
    %c0_162 = arith.constant 0 : index
    %221 = vector.load %arg13[%c6_160, %c0_161, %c0_162] : memref<9x32x768xf32, #tpu.memory_space<vmem>>, vector<1x32x768xf32>
    %222 = vector.shape_cast %221 : vector<1x32x768xf32> to vector<32x768xf32>
    %cst_163 = arith.constant dense<0.000000e+00> : vector<1x768xf32>
    %223 = tpu.matmul %220, %222, %cst_163 {dimension_numbers = #tpu.dot_dimension_numbers<[1], [0], [0], [1], [0, 0, 1, 1], [], []>} : vector<1x32xf32>, vector<32x768xf32>, vector<1x768xf32> -> vector<1x768xf32>
    %224 = arith.addf %219, %223 : vector<1x768xf32>
    %225 = vector.extract_strided_slice %187 {offsets = [7, 0], sizes = [1, 32], strides = [1, 1]} : vector<16x32xf32> to vector<1x32xf32>
    %c7_164 = arith.constant 7 : index
    %c0_165 = arith.constant 0 : index
    %c0_166 = arith.constant 0 : index
    %226 = vector.load %arg13[%c7_164, %c0_165, %c0_166] : memref<9x32x768xf32, #tpu.memory_space<vmem>>, vector<1x32x768xf32>
    %227 = vector.shape_cast %226 : vector<1x32x768xf32> to vector<32x768xf32>
    %cst_167 = arith.constant dense<0.000000e+00> : vector<1x768xf32>
    %228 = tpu.matmul %225, %227, %cst_167 {dimension_numbers = #tpu.dot_dimension_numbers<[1], [0], [0], [1], [0, 0, 1, 1], [], []>} : vector<1x32xf32>, vector<32x768xf32>, vector<1x768xf32> -> vector<1x768xf32>
    %229 = arith.addf %224, %228 : vector<1x768xf32>
    %230 = vector.extract_strided_slice %187 {offsets = [8, 0], sizes = [1, 32], strides = [1, 1]} : vector<16x32xf32> to vector<1x32xf32>
    %c8_168 = arith.constant 8 : index
    %c0_169 = arith.constant 0 : index
    %c0_170 = arith.constant 0 : index
    %231 = vector.load %arg13[%c8_168, %c0_169, %c0_170] : memref<9x32x768xf32, #tpu.memory_space<vmem>>, vector<1x32x768xf32>
    %232 = vector.shape_cast %231 : vector<1x32x768xf32> to vector<32x768xf32>
    %cst_171 = arith.constant dense<0.000000e+00> : vector<1x768xf32>
    %233 = tpu.matmul %230, %232, %cst_171 {dimension_numbers = #tpu.dot_dimension_numbers<[1], [0], [0], [1], [0, 0, 1, 1], [], []>} : vector<1x32xf32>, vector<32x768xf32>, vector<1x768xf32> -> vector<1x768xf32>
    %234 = arith.addf %229, %233 : vector<1x768xf32>
    %c0_172 = arith.constant 0 : index
    %c0_173 = arith.constant 0 : index
    %235 = vector.load %arg14[%c0_172, %c0_173] : memref<256x768xf32, #tpu.memory_space<vmem>>, vector<256x768xf32>
    %cst_174 = arith.constant dense<0.000000e+00> : vector<1x768xf32>
    %236 = tpu.matmul %188, %235, %cst_174 {dimension_numbers = #tpu.dot_dimension_numbers<[1], [0], [0], [1], [0, 0, 1, 1], [], []>} : vector<1x256xf32>, vector<256x768xf32>, vector<1x768xf32> -> vector<1x768xf32>
    %c0_175 = arith.constant 0 : index
    %c0_176 = arith.constant 0 : index
    %237 = vector.load %arg16[%c0_175, %c0_176] : memref<1x768xf32, #tpu.memory_space<vmem>>, vector<1x768xf32>
    %238 = arith.addf %236, %237 : vector<1x768xf32>
    %239 = vector.extract_strided_slice %234 {offsets = [0, 0], sizes = [1, 256], strides = [1, 1]} : vector<1x768xf32> to vector<1x256xf32>
    %240 = vector.extract_strided_slice %238 {offsets = [0, 0], sizes = [1, 256], strides = [1, 1]} : vector<1x768xf32> to vector<1x256xf32>
    %241 = arith.addf %239, %240 : vector<1x256xf32>
    %242 = arith.negf %241 : vector<1x256xf32>
    %243 = math.exp %242 : vector<1x256xf32>
    %cst_177 = arith.constant 1.000000e+00 : f32
    %244 = vector.broadcast %cst_177 : f32 to vector<1x256xf32>
    %245 = arith.addf %244, %243 : vector<1x256xf32>
    %246 = arith.divf %244, %245 : vector<1x256xf32>
    %247 = vector.extract_strided_slice %234 {offsets = [0, 256], sizes = [1, 256], strides = [1, 1]} : vector<1x768xf32> to vector<1x256xf32>
    %248 = vector.extract_strided_slice %238 {offsets = [0, 256], sizes = [1, 256], strides = [1, 1]} : vector<1x768xf32> to vector<1x256xf32>
    %249 = arith.addf %247, %248 : vector<1x256xf32>
    %250 = arith.negf %249 : vector<1x256xf32>
    %251 = math.exp %250 : vector<1x256xf32>
    %cst_178 = arith.constant 1.000000e+00 : f32
    %252 = vector.broadcast %cst_178 : f32 to vector<1x256xf32>
    %253 = arith.addf %252, %251 : vector<1x256xf32>
    %254 = arith.divf %252, %253 : vector<1x256xf32>
    %255 = vector.extract_strided_slice %234 {offsets = [0, 512], sizes = [1, 256], strides = [1, 1]} : vector<1x768xf32> to vector<1x256xf32>
    %256 = vector.extract_strided_slice %238 {offsets = [0, 512], sizes = [1, 256], strides = [1, 1]} : vector<1x768xf32> to vector<1x256xf32>
    %257 = arith.mulf %246, %256 : vector<1x256xf32>
    %258 = arith.addf %255, %257 : vector<1x256xf32>
    %259 = math.tanh %258 : vector<1x256xf32>
    %cst_179 = arith.constant 1.000000e+00 : f32
    %260 = vector.broadcast %cst_179 : f32 to vector<1x256xf32>
    %261 = arith.subf %260, %254 : vector<1x256xf32>
    %262 = arith.mulf %261, %259 : vector<1x256xf32>
    %263 = arith.mulf %254, %188 : vector<1x256xf32>
    %264 = arith.addf %262, %263 : vector<1x256xf32>
    %c0_180 = arith.constant 0 : index
    %c0_181 = arith.constant 0 : index
    %265 = vector.load %arg23[%c0_180, %c0_181] : memref<1x256xf32, #tpu.memory_space<vmem>>, vector<1x256xf32>
    tpu.vector_store %arg23[%c0_180, %c0_181], %264 {strides = array<i32>} : memref<1x256xf32, #tpu.memory_space<vmem>>, vector<1x256xf32>,
    %c0_182 = arith.constant 0 : index
    %c0_183 = arith.constant 0 : index
    %266 = vector.load %arg17[%c0_182, %c0_183] : memref<256x6xf32, #tpu.memory_space<vmem>>, vector<256x6xf32>
    %cst_184 = arith.constant dense<0.000000e+00> : vector<1x6xf32>
    %267 = tpu.matmul %264, %266, %cst_184 {dimension_numbers = #tpu.dot_dimension_numbers<[1], [0], [0], [1], [0, 0, 1, 1], [], []>} : vector<1x256xf32>, vector<256x6xf32>, vector<1x6xf32> -> vector<1x6xf32>
    %c0_185 = arith.constant 0 : index
    %c0_186 = arith.constant 0 : index
    %268 = vector.load %arg18[%c0_185, %c0_186] : memref<1x6xf32, #tpu.memory_space<vmem>>, vector<1x6xf32>
    %269 = arith.addf %267, %268 : vector<1x6xf32>
    %cst_187 = arith.constant dense<0xFF800000> : vector<1xf32>
    %270 = vector.multi_reduction <maximumf>, %269, %cst_187 [1] : vector<1x6xf32> to vector<1xf32>
    %271 = vector.shape_cast %270 : vector<1xf32> to vector<1x1xf32>
    %272 = vector.broadcast %271 : vector<1x1xf32> to vector<1x6xf32>
    %273 = arith.subf %269, %272 : vector<1x6xf32>
    %274 = math.exp %273 : vector<1x6xf32>
    %cst_188 = arith.constant dense<0.000000e+00> : vector<1xf32>
    %275 = vector.multi_reduction <add>, %274, %cst_188 [1] : vector<1x6xf32> to vector<1xf32>
    %276 = vector.shape_cast %275 : vector<1xf32> to vector<1x1xf32>
    %277 = vector.broadcast %271 : vector<1x1xf32> to vector<1x6xf32>
    %278 = arith.subf %269, %277 : vector<1x6xf32>
    %279 = math.log %276 : vector<1x1xf32>
    %280 = vector.broadcast %279 : vector<1x1xf32> to vector<1x6xf32>
    %281 = arith.subf %278, %280 : vector<1x6xf32>
    %c0_189 = arith.constant 0 : index
    %c0_190 = arith.constant 0 : index
    %282 = vector.load %arg21[%c0_189, %c0_190] : memref<1x6xf32, #tpu.memory_space<vmem>>, vector<1x6xf32>
    tpu.vector_store %arg21[%c0_189, %c0_190], %281 {strides = array<i32>} : memref<1x6xf32, #tpu.memory_space<vmem>>, vector<1x6xf32>,
    %c0_191 = arith.constant 0 : index
    %c0_192 = arith.constant 0 : index
    %283 = vector.load %arg19[%c0_191, %c0_192] : memref<256x1xf32, #tpu.memory_space<vmem>>, vector<256x1xf32>
    %cst_193 = arith.constant dense<0.000000e+00> : vector<1x1xf32>
    %284 = tpu.matmul %264, %283, %cst_193 {dimension_numbers = #tpu.dot_dimension_numbers<[1], [0], [0], [1], [0, 0, 1, 1], [], []>} : vector<1x256xf32>, vector<256x1xf32>, vector<1x1xf32> -> vector<1x1xf32>
    %c0_194 = arith.constant 0 : index
    %c0_195 = arith.constant 0 : index
    %285 = vector.load %arg20[%c0_194, %c0_195] : memref<1x1xf32, #tpu.memory_space<vmem>>, vector<1x1xf32>
    %286 = arith.addf %284, %285 : vector<1x1xf32>
    %c0_196 = arith.constant 0 : index
    %c0_197 = arith.constant 0 : index
    %287 = vector.load %arg22[%c0_196, %c0_197] : memref<1x1xf32, #tpu.memory_space<vmem>>, vector<1x1xf32>
    tpu.vector_store %arg22[%c0_196, %c0_197], %286 {strides = array<i32>} : memref<1x1xf32, #tpu.memory_space<vmem>>, vector<1x1xf32>,
    return
  }
}

</mosaic_0001>

<bundles_post_ra>
// kernel: actor_critic_forward.1
= control target key start
LH: loop header
LB: loop body
LE: loop exit
PB: predicated region body
PF: predicated region fallthrough
CT: control target
= control target key end

     0   :  { %s20011_s0 = inlined_call_operand.vmem [shape: f32[441,9], index: 0, kind: input, shape index: {}]   ;;  %s20012_s1 = inlined_call_operand.vmem [shape: f32[9,32], index: 1, kind: input, shape index: {}]   ;;  %s20013_s2 = inlined_call_operand.vmem [shape: f32[1,32], index: 2, kind: input, shape index: {}]   ;;  %s20014_s3 = inlined_call_operand.vmem [shape: bf16[1152,441], index: 3, kind: input, shape index: {}]   ;;  %s20015_s4 = inlined_call_operand.vmem [shape: f32[9,32,32], index: 4, kind: input, shape index: {}]   ;;  %s20016_s5 = inlined_call_operand.vmem [shape: f32[1,32], index: 5, kind: input, shape index: {}]   ;;  %s20017_s6 = inlined_call_operand.vmem [shape: bf16[360,128], index: 6, kind: input, shape index: {}]   ;;  %s20018_s7 = inlined_call_operand.vmem [shape: f32[9,32,32], index: 7, kind: input, shape index: {}]   ;;  %s20019_s8 = inlined_call_operand.vmem [shape: f32[1,32], index: 8, kind: input, shape index: {}]   ;;  %s20020_s9 = inlined_call_operand.vmem [shape: bf16[144,40], index: 9, kind: input, shape index: {}]   ;;  %s20021_s10 = inlined_call_operand.vmem [shape: f32[9,32,32], index: 10, kind: input, shape index: {}]   ;;  %s20022_s11 = inlined_call_operand.vmem [shape: f32[1,32], index: 11, kind: input, shape index: {}]   ;;  %s20023_s12 = inlined_call_operand.vmem [shape: f32[1,256], index: 12, kind: input, shape index: {}]   ;;  %s20024_s13 = inlined_call_operand.vmem [shape: f32[9,32,768], index: 13, kind: input, shape index: {}]   ;;  %s20025_s14 = inlined_call_operand.vmem [shape: f32[256,768], index: 14, kind: input, shape index: {}]   ;;  %s20026_s15 = inlined_call_operand.vmem [shape: f32[1,768], index: 15, kind: input, shape index: {}]   ;;  %s20027_s16 = inlined_call_operand.vmem [shape: f32[1,768], index: 16, kind: input, shape index: {}]   ;;  %s20028_s17 = inlined_call_operand.vmem [shape: f32[256,6], index: 17, kind: input, shape index: {}]   ;;  %s20029_s18 = inlined_call_operand.vmem [shape: f32[1,6], index: 18, kind: input, shape index: {}]   ;;  %s20030_s19 = inlined_call_operand.vmem [shape: f32[256,1], index: 19, kind: input, shape index: {}]   ;;  %s20031_s20 = inlined_call_operand.<no memory space> [shape: f32[1,1], index: 20, kind: input, shape index: {}]   ;;  %s20032_s21 = inlined_call_operand.vmem [shape: f32[1,6], index: 21, kind: output, shape index: {0}]   ;;  %s20033_s22 = inlined_call_operand.hbm [shape: f32[1,1], index: 22, kind: output, shape index: {1}]   ;;  %s20034_s23 = inlined_call_operand.hbm [shape: f32[1,256], index: 23, kind: output, shape index: {2}]  }
   0x1   :  { %20042 = sst [smem:[#allocation9_spill]] %s20011_s0  ;;  %v29_v0 = vstv %s20031_s20 }
   0x2   :  { %20043 = sst [smem:[#allocation10_spill]] %s20012_s1  ;;  %30 = vst [vmem:[#allocation2] sm:$0x1] %v29_v0 }
   0x3   :  { %20044 = sst [smem:[#allocation11_spill]] %s20013_s2 }
   0x4   :  { %20045 = sst [smem:[#allocation12_spill]] %s20014_s3 }
   0x5   :  { %20046 = sst [smem:[#allocation13_spill]] %s20015_s4 }
   0x6   :  { %20047 = sst [smem:[#allocation14_spill]] %s20016_s5 }
   0x7   :  { %20048 = sst [smem:[#allocation15_spill]] %s20017_s6 }
   0x8   :  { %20049 = sst [smem:[#allocation16_spill]] %s20018_s7 }
   0x9   :  { %31 = vsyncpa [#allocation4], 0  ;;  %s20050_s5 = sld [smem:[#allocation10_spill]]  ;;  %vm309_vm0 = vcmask 1040384   ;;  %s20051_s27 = sld [smem:[#allocation9_spill]]  ;;  %vm15734_vm1 = vmmov 1  }
   0xa   :  { %vm15873_vm2 = vmpackc.low %vm309_vm0, %vm15734_vm1  ;;  %vm140_vm3 = vcmask 72704  }
   0xf   :  { %v131_v1 = vld [vmem:[%s20050_s5] sm:$0xff]  ;;  %v132_v2 = vld [vmem:[%s20050_s5 + $0x8] sm:$0x1]  ;;  %v77_v7 = vld [vmem:[%s20051_s27 + $0x10] sm:$0xff] }
  0x10   :  { %v75_v3 = vld [vmem:[%s20051_s27] sm:$0xff]  ;;  %v14193_v4 = vpack.c.bf16 %v132_v2, %v131_v1  ;;  %v76_v6 = vld [vmem:[%s20051_s27 + $0x8] sm:$0xff]  ;;  %v78_v8 = vld [vmem:[%s20051_s27 + $0x18] sm:$0xff] }
  0x11   :  { %13311 = vmatprep.mubr.msk.f32.mxu0 %vm140_vm3, %v75_v3  ;;  %v79_v9 = vld [vmem:[%s20051_s27 + $0x20] sm:$0xff]  ;;  %v80_v10 = vld [vmem:[%s20051_s27 + $0x28] sm:$0xff]  ;;  %v81_v11 = vld [vmem:[%s20051_s27 + $0x30] sm:$0xff] }
  0x12   :  { %14195 = vmatprep.subr.msk.bf16.mxu0 %vm15873_vm2, %v14193_v4 }
  0x13   :  { %14198 = vmatpush3.bf16.msk.msra.mxu0 %vm15873_vm2, %v14193_v4 }
  0x16   :  { %13312 = vmatmul.mubr.msk.f32.vlgmr.msra.gmra.mrb[0].mxu0 %vm140_vm3, %v76_v6 }
  0x17   :  { %13314 = vmatprep.mubr.msk.f32.mxu0 %vm140_vm3, %v77_v7 }
  0x1a   :  { %13315 = vmatmul.mubr.msk.f32.gmra.mrb[2].mxu0 %vm140_vm3, %v78_v8 }
  0x1b   :  { %13317 = vmatprep.mubr.msk.f32.mxu0 %vm140_vm3, %v79_v9 }
  0x1c   :  { %32 = vsyncpa [#allocation6], 0  ;;  %v82_v12 = vld [vmem:[%s20051_s27 + $0x38] sm:$0xff]  ;;  %v83_v13 = vld [vmem:[%s20051_s27 + $0x40] sm:$0xff]  ;;  %v15735_v45 = vmov 0.0|0.0   ;;  %s20054_s25 = sld [smem:[#allocation12_spill]] }
  0x1d   :  { %v84_v14 = vld [vmem:[%s20051_s27 + $0x48] sm:$0xff]  ;;  %v85_v15 = vld [vmem:[%s20051_s27 + $0x50] sm:$0xff]  ;;  %v86_v16 = vld [vmem:[%s20051_s27 + $0x58] sm:$0xff]  ;;  %14199 = vmatprep.subr.bf16.mxu1 %v15735_v45  ;;  %s20055_s7 = sld [smem:[#allocation11_spill]]  ;;  %s20056_s26 = sld [smem:[#allocation13_spill]] }
  0x1e   :  { %13318 = vmatmul.mubr.msk.f32.gmra.mrb[4].mxu0 %vm140_vm3, %v80_v10  ;;  %v87_v17 = vld [vmem:[%s20051_s27 + $0x60] sm:$0xff]  ;;  %v88_v18 = vld [vmem:[%s20051_s27 + $0x68] sm:$0xff]  ;;  %v89_v19 = vld [vmem:[%s20051_s27 + $0x70] sm:$0xff]  ;;  %s20058_s0 = sld [smem:[#allocation15_spill]]  ;;  %s20059_s24 = sld [smem:[#allocation16_spill]] }
  0x1f   :  { %13320 = vmatprep.mubr.msk.f32.mxu0 %vm140_vm3, %v81_v11  ;;  %v90_v20 = vld [vmem:[%s20051_s27 + $0x78] sm:$0xff]  ;;  %v91_v21 = vld [vmem:[%s20051_s27 + $0x80] sm:$0xff]  ;;  %v92_v22 = vld [vmem:[%s20051_s27 + $0x88] sm:$0xff] }
  0x20   :  { %v93_v23 = vld [vmem:[%s20051_s27 + $0x90] sm:$0xff]  ;;  %v94_v24 = vld [vmem:[%s20051_s27 + $0x98] sm:$0xff]  ;;  %v95_v25 = vld [vmem:[%s20051_s27 + $0xa0] sm:$0xff] }
  0x21   :  { %v96_v26 = vld [vmem:[%s20051_s27 + $0xa8] sm:$0xff]  ;;  %v97_v27 = vld [vmem:[%s20051_s27 + $0xb0] sm:$0xff]  ;;  %v98_v28 = vld [vmem:[%s20051_s27 + $0xb8] sm:$0xff] }
  0x22   :  { %13321 = vmatmul.mubr.msk.f32.gmra.mrb[6].mxu0 %vm140_vm3, %v82_v12  ;;  %v99_v29 = vld [vmem:[%s20051_s27 + $0xc0] sm:$0xff]  ;;  %v100_v30 = vld [vmem:[%s20051_s27 + $0xc8] sm:$0xff]  ;;  %v101_v31 = vld [vmem:[%s20051_s27 + $0xd0] sm:$0xff] }
  0x23   :  { %13323 = vmatprep.mubr.msk.f32.mxu0 %vm140_vm3, %v83_v13  ;;  %v102_v32 = vld [vmem:[%s20051_s27 + $0xd8] sm:$0xff]  ;;  %v103_v33 = vld [vmem:[%s20051_s27 + $0xe0] sm:$0xff]  ;;  %v104_v34 = vld [vmem:[%s20051_s27 + $0xe8] sm:$0xff] }
  0x24   :  { %v105_v35 = vld [vmem:[%s20051_s27 + $0xf0] sm:$0xff]  ;;  %v106_v36 = vld [vmem:[%s20051_s27 + $0xf8] sm:$0xff]  ;;  %v107_v37 = vld [vmem:[%s20051_s27 + $0x100] sm:$0xff] }
  0x25   :  { %v108_v38 = vld [vmem:[%s20051_s27 + $0x108] sm:$0xff]  ;;  %v109_v39 = vld [vmem:[%s20051_s27 + $0x110] sm:$0xff]  ;;  %v110_v40 = vld [vmem:[%s20051_s27 + $0x118] sm:$0xff] }
  0x26   :  { %13324 = vmatmul.mubr.msk.f32.gmra.mrb[8].mxu0 %vm140_vm3, %v84_v14  ;;  %v111_v41 = vld [vmem:[%s20051_s27 + $0x120] sm:$0xff]  ;;  %v112_v42 = vld [vmem:[%s20051_s27 + $0x128] sm:$0xff]  ;;  %v113_v43 = vld [vmem:[%s20051_s27 + $0x130] sm:$0xff] }
  0x27   :  { %13326 = vmatprep.mubr.msk.f32.mxu0 %vm140_vm3, %v85_v15  ;;  %v114_v44 = vld [vmem:[%s20051_s27 + $0x138] sm:$0xff]  ;;  %v115_v46 = vld [vmem:[%s20051_s27 + $0x140] sm:$0xff]  ;;  %v116_v47 = vld [vmem:[%s20051_s27 + $0x148] sm:$0xff] }
  0x28   :  { %v16050_v48 = vld [vmem:[%s20054_s25] sm:$0xff]  ;;  %v117_v50 = vld [vmem:[%s20051_s27 + $0x150] sm:$0xff]  ;;  %v118_v51 = vld [vmem:[%s20051_s27 + $0x158] sm:$0xff] }
  0x29   :  { %v1283_v49 = vunpack.c.h.bf16 %v16050_v48  ;;  %v16064_v52 = vld [vmem:[%s20055_s7] ss:$0 sm:$0xff]  ;;  %v120_v54 = vld [vmem:[%s20051_s27 + $0x168] sm:$0xff] }
  0x2a   :  { %13327 = vmatmul.mubr.msk.f32.gmra.mrb[10].mxu0 %vm140_vm3, %v86_v16  ;;  %v119_v53 = vld [vmem:[%s20051_s27 + $0x160] sm:$0xff] }
  0x2b   :  { %13329 = vmatprep.mubr.msk.f32.mxu0 %vm140_vm3, %v87_v17  ;;  %2358 = vmatprep.mubr.f32.mxu1 %v1283_v49  ;;  %v1198_v5 = vld [vmem:[%s20054_s25 + $0x660] sm:$0xff] }
  0x2e   :  { %13330 = vmatmul.mubr.msk.f32.gmra.mrb[12].mxu0 %vm140_vm3, %v88_v18 }
  0x2f   :  { %13332 = vmatprep.mubr.msk.f32.mxu0 %vm140_vm3, %v89_v19 }
  0x32   :  { %13333 = vmatmul.mubr.msk.f32.gmra.mrb[14].mxu0 %vm140_vm3, %v90_v20 }
  0x33   :  { %13335 = vmatprep.mubr.msk.f32.mxu0 %vm140_vm3, %v91_v21 }
  0x36   :  { %13336 = vmatmul.mubr.msk.f32.gmra.mrb[16].mxu0 %vm140_vm3, %v92_v22 }
  0x37   :  { %13338 = vmatprep.mubr.msk.f32.mxu0 %vm140_vm3, %v93_v23 }
  0x3a   :  { %13339 = vmatmul.mubr.msk.f32.gmra.mrb[18].mxu0 %vm140_vm3, %v94_v24 }
  0x3b   :  { %13341 = vmatprep.mubr.msk.f32.mxu0 %vm140_vm3, %v95_v25 }
  0x3e   :  { %13342 = vmatmul.mubr.msk.f32.gmra.mrb[20].mxu0 %vm140_vm3, %v96_v26 }
  0x3f   :  { %13344 = vmatprep.mubr.msk.f32.mxu0 %vm140_vm3, %v97_v27 }
  0x42   :  { %13345 = vmatmul.mubr.msk.f32.gmra.mrb[22].mxu0 %vm140_vm3, %v98_v28 }
  0x43   :  { %13347 = vmatprep.mubr.msk.f32.mxu0 %vm140_vm3, %v99_v29 }
  0x46   :  { %13348 = vmatmul.mubr.msk.f32.gmra.mrb[24].mxu0 %vm140_vm3, %v100_v30 }
  0x47   :  { %13350 = vmatprep.mubr.msk.f32.mxu0 %vm140_vm3, %v101_v31 }
  0x4a   :  { %13351 = vmatmul.mubr.msk.f32.gmra.mrb[26].mxu0 %vm140_vm3, %v102_v32 }
  0x4b   :  { %13353 = vmatprep.mubr.msk.f32.mxu0 %vm140_vm3, %v103_v33 }
  0x4e   :  { %13354 = vmatmul.mubr.msk.f32.gmra.mrb[28].mxu0 %vm140_vm3, %v104_v34 }
  0x4f   :  { %13356 = vmatprep.mubr.msk.f32.mxu0 %vm140_vm3, %v105_v35 }
  0x52   :  { %13357 = vmatmul.mubr.msk.f32.gmra.mrb[30].mxu0 %vm140_vm3, %v106_v36 }
  0x53   :  { %13359 = vmatprep.mubr.msk.f32.mxu0 %vm140_vm3, %v107_v37 }
  0x56   :  { %13360 = vmatmul.mubr.msk.f32.gmra.mrb[32].mxu0 %vm140_vm3, %v108_v38 }
  0x57   :  { %13362 = vmatprep.mubr.msk.f32.mxu0 %vm140_vm3, %v109_v39 }
  0x5a   :  { %13363 = vmatmul.mubr.msk.f32.gmra.mrb[34].mxu0 %vm140_vm3, %v110_v40 }
  0x5b   :  { %13365 = vmatprep.mubr.msk.f32.mxu0 %vm140_vm3, %v111_v41 }
  0x5e   :  { %13366 = vmatmul.mubr.msk.f32.gmra.mrb[36].mxu0 %vm140_vm3, %v112_v42 }
  0x5f   :  { %13368 = vmatprep.mubr.msk.f32.mxu0 %vm140_vm3, %v113_v43 }
  0x62   :  { %13369 = vmatmul.mubr.msk.f32.gmra.mrb[38].mxu0 %vm140_vm3, %v114_v44 }
  0x63   :  { %13371 = vmatprep.mubr.msk.f32.mxu0 %vm140_vm3, %v115_v46 }
  0x66   :  { %13372 = vmatmul.mubr.msk.f32.gmra.mrb[40].mxu0 %vm140_vm3, %v116_v47 }
  0x67   :  { %13374 = vmatprep.mubr.msk.f32.mxu0 %vm140_vm3, %v117_v50 }
  0x6a   :  { %13375 = vmatmul.mubr.msk.f32.gmra.mrb[42].mxu0 %vm140_vm3, %v118_v51 }
  0x6b   :  { %13377 = vmatprep.mubr.msk.f32.mxu0 %vm140_vm3, %v119_v53 }
  0x6e   :  { %13378 = vmatmul.mubr.msk.f32.gmra.mrb[44].mxu0 %vm140_vm3, %v120_v54 }
  0xe9   :  { %v13313_v55 = vpop.f32.mrb[0].mxu0 }
  0xea   :  { %v385_v56 = vadd.f32 %v13313_v55, %v16064_v52  ;;  %v379_v57 = vpop.f32.mrb[1].mxu0 }
  0xeb   :  { %v380_v58 = vadd.f32 %v16064_v52, %v379_v57 }
  0xec   :  { %v715_v59 = vmin.f32 %v385_v56, 0.0  ;;  %vm659_vm4 = vcmp.gt.f32.partialorder %v385_v56, 0.0 }
  0xed   :  { %v714_v60 = vmin.f32 %v380_v58, 0.0  ;;  %v13316_v61 = vpop.f32.mrb[2].mxu0  ;;  %vm658_vm5 = vcmp.gt.f32.partialorder %v380_v58, 0.0 }
  0xee   :  { %v772_v62 = vmul.f32 1.442695, %v715_v59  ;;  %v16077_v63 = vadd.f32 %v13316_v61, %v16064_v52  ;;  %v389_v0 = vpop.f32.mrb[3].mxu0 }
  0xef   :  { %v770_v1 = vmul.f32 1.442695, %v714_v60  ;;  %v16080_v2 = vadd.f32 %v16064_v52, %v389_v0 }
  0xf0   :  { %15512 = vpow2.f32 %v772_v62  ;;  %v717_v3 = vmin.f32 %v16077_v63, 0.0  ;;  %vm661_vm6 = vcmp.gt.f32.partialorder %v16077_v63, 0.0 }
  0xf1   :  { %15514 = vpow2.f32 %v770_v1  ;;  %v716_v4 = vmin.f32 %v16080_v2, 0.0  ;;  %v13319_v6 = vpop.f32.mrb[4].mxu0  ;;  %vm660_vm7 = vcmp.gt.f32.partialorder %v16080_v2, 0.0 }
  0xf2   :  { %v776_v7 = vmul.f32 1.442695, %v717_v3  ;;  %v16085_v8 = vadd.f32 %v13319_v6, %v16064_v52  ;;  %v399_v9 = vpop.f32.mrb[5].mxu0 }
  0xf3   :  { %v774_v10 = vmul.f32 1.442695, %v716_v4  ;;  %v16088_v11 = vadd.f32 %v16064_v52, %v399_v9 }
  0xf4   :  { %15516 = vpow2.f32 %v776_v7  ;;  %v719_v12 = vmin.f32 %v16085_v8, 0.0  ;;  %vm663_vm8 = vcmp.gt.f32.partialorder %v16085_v8, 0.0 }
  0xf5   :  { %15518 = vpow2.f32 %v774_v10  ;;  %v718_v13 = vmin.f32 %v16088_v11, 0.0  ;;  %v13322_v14 = vpop.f32.mrb[6].mxu0  ;;  %vm662_vm9 = vcmp.gt.f32.partialorder %v16088_v11, 0.0 }
  0xf6   :  { %v780_v15 = vmul.f32 1.442695, %v719_v12  ;;  %v16093_v16 = vadd.f32 %v13322_v14, %v16064_v52  ;;  %v409_v17 = vpop.f32.mrb[7].mxu0 }
  0xf7   :  { %v778_v18 = vmul.f32 1.442695, %v718_v13  ;;  %v16096_v19 = vadd.f32 %v16064_v52, %v409_v17 }
  0xf8   :  { %15520 = vpow2.f32 %v780_v15  ;;  %v721_v20 = vmin.f32 %v16093_v16, 0.0  ;;  %vm665_vm10 = vcmp.gt.f32.partialorder %v16093_v16, 0.0 }
  0xf9   :  { %15522 = vpow2.f32 %v778_v18  ;;  %v720_v21 = vmin.f32 %v16096_v19, 0.0  ;;  %v13325_v22 = vpop.f32.mrb[8].mxu0  ;;  %vm664_vm11 = vcmp.gt.f32.partialorder %v16096_v19, 0.0 }
  0xfa   :  { %v15513_v23 = vpop.eup %15512  ;;  %v784_v24 = vmul.f32 1.442695, %v721_v20  ;;  %v16101_v25 = vadd.f32 %v13325_v22, %v16064_v52  ;;  %v419_v26 = vpop.f32.mrb[9].mxu0 }
  0xfb   :  { %v15515_v27 = vpop.eup %15514  ;;  %v782_v28 = vmul.f32 1.442695, %v720_v21  ;;  %v16104_v29 = vadd.f32 %v16064_v52, %v419_v26  ;;  %v11859_v30 = vadd.f32 -1.0, %v15513_v23 }
  0xfc   :  { %15524 = vpow2.f32 %v784_v24  ;;  %v723_v31 = vmin.f32 %v16101_v25, 0.0  ;;  %v11858_v32 = vadd.f32 -1.0, %v15515_v27  ;;  %vm667_vm12 = vcmp.gt.f32.partialorder %v16101_v25, 0.0 }
  0xfd   :  { %15526 = vpow2.f32 %v782_v28  ;;  %v722_v33 = vmin.f32 %v16104_v29, 0.0  ;;  %v13328_v34 = vpop.f32.mrb[10].mxu0  ;;  %v939_v35 = vsel %vm659_vm4, %v385_v56, %v11859_v30  ;;  %vm666_vm13 = vcmp.gt.f32.partialorder %v16104_v29, 0.0 }
  0xfe   :  { %v15517_v36 = vpop.eup %15516  ;;  %v788_v37 = vmul.f32 1.442695, %v723_v31  ;;  %v16109_v38 = vadd.f32 %v13328_v34, %v16064_v52  ;;  %v429_v39 = vpop.f32.mrb[11].mxu0  ;;  %v938_v40 = vsel %vm658_vm5, %v380_v58, %v11858_v32 }
  0xff   :  { %v15519_v41 = vpop.eup %15518  ;;  %v11861_v42 = vadd.f32 -1.0, %v15517_v36  ;;  %v786_v43 = vmul.f32 1.442695, %v722_v33  ;;  %v16112_v44 = vadd.f32 %v16064_v52, %v429_v39  ;;  %v14200_v46 = vpack.c.bf16 %v939_v35, %v938_v40 }
 0x100   :  { %v11860_v47 = vadd.f32 -1.0, %v15519_v41  ;;  %15528 = vpow2.f32 %v788_v37  ;;  %v725_v49 = vmin.f32 %v16109_v38, 0.0  ;;  %vm669_vm14 = vcmp.gt.f32.partialorder %v16109_v38, 0.0 }
 0x101   :  { %15530 = vpow2.f32 %v786_v43  ;;  %v724_v50 = vmin.f32 %v16112_v44, 0.0  ;;  %v13331_v51 = vpop.f32.mrb[12].mxu0  ;;  %14201 = vmatpush1.bf16.msra.mxu1 %v14200_v46  ;;  %v941_v53 = vsel %vm661_vm6, %v16077_v63, %v11861_v42  ;;  %vm668_vm15 = vcmp.gt.f32.partialorder %v16112_v44, 0.0 }
 0x102   :  { %v15521_v54 = vpop.eup %15520  ;;  %v792_v55 = vmul.f32 1.442695, %v725_v49  ;;  %v16120_v56 = vadd.f32 %v13331_v51, %v16064_v52  ;;  %v439_v57 = vpop.f32.mrb[13].mxu0  ;;  %14202 = vmatprep.subr.bf16.mxu1 %v15735_v45  ;;  %v940_v58 = vsel %vm660_vm7, %v16080_v2, %v11860_v47 }
 0x103   :  { %v15523_v59 = vpop.eup %15522  ;;  %v11863_v60 = vadd.f32 -1.0, %v15521_v54  ;;  %v790_v61 = vmul.f32 1.442695, %v724_v50  ;;  %v16125_v62 = vadd.f32 %v16064_v52, %v439_v57  ;;  %v14203_v0 = vpack.c.bf16 %v941_v53, %v940_v58 }
 0x104   :  { %v11862_v63 = vadd.f32 -1.0, %v15523_v59  ;;  %15532 = vpow2.f32 %v792_v55  ;;  %v727_v1 = vmin.f32 %v16120_v56, 0.0  ;;  %vm671_vm0 = vcmp.gt.f32.partialorder %v16120_v56, 0.0 }
 0x105   :  { %15534 = vpow2.f32 %v790_v61  ;;  %v726_v3 = vmin.f32 %v16125_v62, 0.0  ;;  %v13334_v4 = vpop.f32.mrb[14].mxu0  ;;  %14204 = vmatpush1.bf16.msra.mxu1 %v14203_v0  ;;  %v943_v2 = vsel %vm663_vm8, %v16085_v8, %v11863_v60  ;;  %vm670_vm1 = vcmp.gt.f32.partialorder %v16125_v62, 0.0 }
 0x106   :  { %v15525_v6 = vpop.eup %15524  ;;  %v796_v7 = vmul.f32 1.442695, %v727_v1  ;;  %v16133_v9 = vadd.f32 %v13334_v4, %v16064_v52  ;;  %v449_v10 = vpop.f32.mrb[15].mxu0  ;;  %14205 = vmatprep.subr.bf16.mxu1 %v15735_v45  ;;  %v942_v12 = vsel %vm662_vm9, %v16088_v11, %v11862_v63 }
 0x107   :  { %v15527_v13 = vpop.eup %15526  ;;  %v11865_v14 = vadd.f32 -1.0, %v15525_v6  ;;  %v794_v15 = vmul.f32 1.442695, %v726_v3  ;;  %v16138_v17 = vadd.f32 %v16064_v52, %v449_v10  ;;  %v14206_v18 = vpack.c.bf16 %v943_v2, %v942_v12 }
 0x108   :  { %v11864_v8 = vadd.f32 -1.0, %v15527_v13  ;;  %15536 = vpow2.f32 %v796_v7  ;;  %v729_v20 = vmin.f32 %v16133_v9, 0.0  ;;  %vm673_vm4 = vcmp.gt.f32.partialorder %v16133_v9, 0.0 }
 0x109   :  { %15538 = vpow2.f32 %v794_v15  ;;  %v728_v21 = vmin.f32 %v16138_v17, 0.0  ;;  %v13337_v22 = vpop.f32.mrb[16].mxu0  ;;  %14207 = vmatpush1.bf16.msra.mxu1 %v14206_v18  ;;  %v945_v11 = vsel %vm665_vm10, %v16093_v16, %v11865_v14  ;;  %vm672_vm5 = vcmp.gt.f32.partialorder %v16138_v17, 0.0 }
 0x10a   :  { %v15529_v23 = vpop.eup %15528  ;;  %v800_v24 = vmul.f32 1.442695, %v729_v20  ;;  %v16146_v26 = vadd.f32 %v13337_v22, %v16064_v52  ;;  %v459_v27 = vpop.f32.mrb[17].mxu0  ;;  %14208 = vmatprep.subr.bf16.mxu1 %v15735_v45  ;;  %v944_v28 = vsel %vm664_vm11, %v16096_v19, %v11864_v8 }
 0x10b   :  { %v15531_v30 = vpop.eup %15530  ;;  %v11867_v31 = vadd.f32 -1.0, %v15529_v23  ;;  %v798_v32 = vmul.f32 1.442695, %v728_v21  ;;  %v16151_v33 = vadd.f32 %v16064_v52, %v459_v27  ;;  %v14209_v34 = vpack.c.bf16 %v945_v11, %v944_v28  ;;  %v121_v23 = vld [vmem:[%s20051_s27 + $0x170] sm:$0xff] }
 0x10c   :  { %v11866_v16 = vadd.f32 -1.0, %v15531_v30  ;;  %15540 = vpow2.f32 %v800_v24  ;;  %v731_v35 = vmin.f32 %v16146_v26, 0.0  ;;  %13380 = vmatprep.mubr.msk.f32.mxu0 %vm140_vm3, %v121_v23  ;;  %vm675_vm6 = vcmp.gt.f32.partialorder %v16146_v26, 0.0 }
 0x10d   :  { %15542 = vpow2.f32 %v798_v32  ;;  %v730_v36 = vmin.f32 %v16151_v33, 0.0  ;;  %v13340_v37 = vpop.f32.mrb[18].mxu0  ;;  %14210 = vmatpush1.bf16.msra.mxu1 %v14209_v34  ;;  %v947_v19 = vsel %vm667_vm12, %v16101_v25, %v11867_v31  ;;  %vm674_vm7 = vcmp.gt.f32.partialorder %v16151_v33, 0.0 }
 0x10e   :  { %v15533_v39 = vpop.eup %15532  ;;  %v804_v40 = vmul.f32 1.442695, %v731_v35  ;;  %v16159_v41 = vadd.f32 %v13340_v37, %v16064_v52  ;;  %v469_v42 = vpop.f32.mrb[19].mxu0  ;;  %14211 = vmatprep.subr.bf16.mxu1 %v15735_v45  ;;  %v946_v43 = vsel %vm666_vm13, %v16104_v29, %v11866_v16 }
 0x10f   :  { %v15535_v46 = vpop.eup %15534  ;;  %v11869_v47 = vadd.f32 -1.0, %v15533_v39  ;;  %v802_v49 = vmul.f32 1.442695, %v730_v36  ;;  %v16164_v50 = vadd.f32 %v16064_v52, %v469_v42  ;;  %v14212_v51 = vpack.c.bf16 %v947_v19, %v946_v43 }
 0x110   :  { %v11868_v25 = vadd.f32 -1.0, %v15535_v46  ;;  %15544 = vpow2.f32 %v804_v40  ;;  %v733_v53 = vmin.f32 %v16159_v41, 0.0  ;;  %vm677_vm8 = vcmp.gt.f32.partialorder %v16159_v41, 0.0 }
 0x111   :  { %15546 = vpow2.f32 %v802_v49  ;;  %v732_v54 = vmin.f32 %v16164_v50, 0.0  ;;  %v13343_v55 = vpop.f32.mrb[20].mxu0  ;;  %14213 = vmatpush1.bf16.msra.mxu1 %v14212_v51  ;;  %v949_v29 = vsel %vm669_vm14, %v16109_v38, %v11869_v47  ;;  %vm676_vm9 = vcmp.gt.f32.partialorder %v16164_v50, 0.0 }
 0x112   :  { %v15537_v57 = vpop.eup %15536  ;;  %v808_v58 = vmul.f32 1.442695, %v733_v53  ;;  %v16172_v59 = vadd.f32 %v13343_v55, %v16064_v52  ;;  %v479_v60 = vpop.f32.mrb[21].mxu0  ;;  %14214 = vmatprep.subr.bf16.mxu1 %v15735_v45  ;;  %v948_v61 = vsel %vm668_vm15, %v16112_v44, %v11868_v25 }
 0x113   :  { %v15539_v0 = vpop.eup %15538  ;;  %v11871_v63 = vadd.f32 -1.0, %v15537_v57  ;;  %v806_v1 = vmul.f32 1.442695, %v732_v54  ;;  %v16177_v3 = vadd.f32 %v16064_v52, %v479_v60  ;;  %v14215_v4 = vpack.c.bf16 %v949_v29, %v948_v61 }
 0x114   :  { %v11870_v38 = vadd.f32 -1.0, %v15539_v0  ;;  %15548 = vpow2.f32 %v808_v58  ;;  %v735_v2 = vmin.f32 %v16172_v59, 0.0  ;;  %vm679_vm10 = vcmp.gt.f32.partialorder %v16172_v59, 0.0 }
 0x115   :  { %15550 = vpow2.f32 %v806_v1  ;;  %v734_v6 = vmin.f32 %v16177_v3, 0.0  ;;  %v13346_v7 = vpop.f32.mrb[22].mxu0  ;;  %14216 = vmatpush1.bf16.msra.mxu1 %v14215_v4  ;;  %v951_v44 = vsel %vm671_vm0, %v16120_v56, %v11871_v63  ;;  %vm678_vm11 = vcmp.gt.f32.partialorder %v16177_v3, 0.0 }
 0x116   :  { %v15541_v10 = vpop.eup %15540  ;;  %v812_v12 = vmul.f32 1.442695, %v735_v2  ;;  %v16185_v13 = vadd.f32 %v13346_v7, %v16064_v52  ;;  %v489_v14 = vpop.f32.mrb[23].mxu0  ;;  %14217 = vmatprep.subr.bf16.mxu1 %v15735_v45  ;;  %v950_v15 = vsel %vm670_vm1, %v16125_v62, %v11870_v38  ;;  %v122_v62 = vld [vmem:[%s20051_s27 + $0x178] sm:$0xff] }
 0x117   :  { %v15543_v18 = vpop.eup %15542  ;;  %v11873_v8 = vadd.f32 -1.0, %v15541_v10  ;;  %v810_v20 = vmul.f32 1.442695, %v734_v6  ;;  %v16190_v21 = vadd.f32 %v16064_v52, %v489_v14  ;;  %v14218_v22 = vpack.c.bf16 %v951_v44, %v950_v15  ;;  %13381 = vmatmul.mubr.msk.f32.gmra.mrb[46].mxu0 %vm140_vm3, %v122_v62 }
 0x118   :  { %v11872_v56 = vadd.f32 -1.0, %v15543_v18  ;;  %15552 = vpow2.f32 %v812_v12  ;;  %v737_v11 = vmin.f32 %v16185_v13, 0.0  ;;  %vm681_vm12 = vcmp.gt.f32.partialorder %v16185_v13, 0.0 }
 0x119   :  { %15554 = vpow2.f32 %v810_v20  ;;  %v736_v24 = vmin.f32 %v16190_v21, 0.0  ;;  %v13349_v27 = vpop.f32.mrb[24].mxu0  ;;  %14219 = vmatpush1.bf16.msra.mxu1 %v14218_v22  ;;  %v953_v28 = vsel %vm673_vm4, %v16133_v9, %v11873_v8  ;;  %vm680_vm13 = vcmp.gt.f32.partialorder %v16190_v21, 0.0 }
 0x11a   :  { %v15545_v30 = vpop.eup %15544  ;;  %v816_v31 = vmul.f32 1.442695, %v737_v11  ;;  %v16205_v32 = vadd.f32 %v13349_v27, %v16064_v52  ;;  %v499_v34 = vpop.f32.mrb[25].mxu0  ;;  %14220 = vmatprep.subr.bf16.mxu1 %v15735_v45  ;;  %v952_v16 = vsel %vm672_vm5, %v16138_v17, %v11872_v56 }
 0x11b   :  { %v15547_v35 = vpop.eup %15546  ;;  %v11875_v36 = vadd.f32 -1.0, %v15545_v30  ;;  %v814_v37 = vmul.f32 1.442695, %v736_v24  ;;  %v16211_v19 = vadd.f32 %v16064_v52, %v499_v34  ;;  %v14221_v9 = vpack.c.bf16 %v953_v28, %v952_v16 }
 0x11c   :  { %v11874_v39 = vadd.f32 -1.0, %v15547_v35  ;;  %15556 = vpow2.f32 %v816_v31  ;;  %v739_v40 = vmin.f32 %v16205_v32, 0.0  ;;  %vm683_vm14 = vcmp.gt.f32.partialorder %v16205_v32, 0.0 }
 0x11d   :  { %15558 = vpow2.f32 %v814_v37  ;;  %v738_v17 = vmin.f32 %v16211_v19, 0.0  ;;  %v13352_v42 = vpop.f32.mrb[26].mxu0  ;;  %14222 = vmatpush1.bf16.msra.mxu1 %v14221_v9  ;;  %v955_v43 = vsel %vm675_vm6, %v16146_v26, %v11875_v36  ;;  %vm682_vm15 = vcmp.gt.f32.partialorder %v16211_v19, 0.0 }
 0x11e   :  { %v15549_v46 = vpop.eup %15548  ;;  %v820_v47 = vmul.f32 1.442695, %v739_v40  ;;  %v16219_v49 = vadd.f32 %v13352_v42, %v16064_v52  ;;  %v509_v51 = vpop.f32.mrb[27].mxu0  ;;  %14223 = vmatprep.subr.bf16.mxu1 %v15735_v45  ;;  %v954_v25 = vsel %vm674_vm7, %v16151_v33, %v11874_v39 }
 0x11f   :  { %v15551_v53 = vpop.eup %15550  ;;  %v11877_v54 = vadd.f32 -1.0, %v15549_v46  ;;  %v818_v55 = vmul.f32 1.442695, %v738_v17  ;;  %v16224_v29 = vadd.f32 %v16064_v52, %v509_v51  ;;  %v14224_v57 = vpack.c.bf16 %v955_v43, %v954_v25 }
 0x120   :  { %v11876_v26 = vadd.f32 -1.0, %v15551_v53  ;;  %15560 = vpow2.f32 %v820_v47  ;;  %v741_v58 = vmin.f32 %v16219_v49, 0.0  ;;  %vm685_vm0 = vcmp.gt.f32.partialorder %v16219_v49, 0.0 }
 0x121   :  { %15562 = vpow2.f32 %v818_v55  ;;  %v740_v60 = vmin.f32 %v16224_v29, 0.0  ;;  %v13355_v61 = vpop.f32.mrb[28].mxu0  ;;  %14225 = vmatpush1.bf16.msra.mxu1 %v14224_v57  ;;  %v957_v33 = vsel %vm677_vm8, %v16159_v41, %v11877_v54  ;;  %vm684_vm1 = vcmp.gt.f32.partialorder %v16224_v29, 0.0 }
 0x122   :  { %v15553_v0 = vpop.eup %15552  ;;  %v824_v63 = vmul.f32 1.442695, %v741_v58  ;;  %v16232_v1 = vadd.f32 %v13355_v61, %v16064_v52  ;;  %v519_v4 = vpop.f32.mrb[29].mxu0  ;;  %14226 = vmatprep.subr.bf16.mxu1 %v15735_v45  ;;  %v956_v38 = vsel %vm676_vm9, %v16164_v50, %v11876_v26 }
 0x123   :  { %v15555_v2 = vpop.eup %15554  ;;  %v11879_v6 = vadd.f32 -1.0, %v15553_v0  ;;  %v822_v7 = vmul.f32 1.442695, %v740_v60  ;;  %v16237_v44 = vadd.f32 %v16064_v52, %v519_v4  ;;  %v14227_v10 = vpack.c.bf16 %v957_v33, %v956_v38 }
 0x124   :  { %v11878_v41 = vadd.f32 -1.0, %v15555_v2  ;;  %15564 = vpow2.f32 %v824_v63  ;;  %v743_v12 = vmin.f32 %v16232_v1, 0.0  ;;  %vm687_vm4 = vcmp.gt.f32.partialorder %v16232_v1, 0.0 }
 0x125   :  { %15566 = vpow2.f32 %v822_v7  ;;  %v742_v14 = vmin.f32 %v16237_v44, 0.0  ;;  %v13358_v15 = vpop.f32.mrb[30].mxu0  ;;  %14228 = vmatpush1.bf16.msra.mxu1 %v14227_v10  ;;  %v959_v50 = vsel %vm679_vm10, %v16172_v59, %v11879_v6  ;;  %vm686_vm5 = vcmp.gt.f32.partialorder %v16237_v44, 0.0 }
 0x126   :  { %v15557_v18 = vpop.eup %15556  ;;  %v828_v8 = vmul.f32 1.442695, %v743_v12  ;;  %v16245_v20 = vadd.f32 %v13358_v15, %v16064_v52  ;;  %v529_v22 = vpop.f32.mrb[31].mxu0  ;;  %14229 = vmatprep.subr.bf16.mxu1 %v15735_v45  ;;  %v958_v56 = vsel %vm678_vm11, %v16177_v3, %v11878_v41 }
 0x127   :  { %v15559_v11 = vpop.eup %15558  ;;  %v11881_v23 = vadd.f32 -1.0, %v15557_v18  ;;  %v826_v62 = vmul.f32 1.442695, %v742_v14  ;;  %v16250_v24 = vadd.f32 %v16064_v52, %v529_v22  ;;  %v14230_v27 = vpack.c.bf16 %v959_v50, %v958_v56 }
 0x128   :  { %v11880_v59 = vadd.f32 -1.0, %v15559_v11  ;;  %15568 = vpow2.f32 %v828_v8  ;;  %v745_v28 = vmin.f32 %v16245_v20, 0.0  ;;  %vm689_vm6 = vcmp.gt.f32.partialorder %v16245_v20, 0.0 }
 0x129   :  { %15570 = vpow2.f32 %v826_v62  ;;  %v744_v30 = vmin.f32 %v16250_v24, 0.0  ;;  %v13361_v31 = vpop.f32.mrb[32].mxu0  ;;  %14231 = vmatpush1.bf16.msra.mxu1 %v14230_v27  ;;  %v961_v3 = vsel %vm681_vm12, %v16185_v13, %v11881_v23  ;;  %vm688_vm7 = vcmp.gt.f32.partialorder %v16250_v24, 0.0 }
 0x12a   :  { %v15561_v34 = vpop.eup %15560  ;;  %v832_v16 = vmul.f32 1.442695, %v745_v28  ;;  %v16258_v35 = vadd.f32 %v13361_v31, %v16064_v52  ;;  %v539_v36 = vpop.f32.mrb[33].mxu0  ;;  %14232 = vmatprep.subr.bf16.mxu1 %v15735_v45  ;;  %v960_v37 = vsel %vm680_vm13, %v16190_v21, %v11880_v59 }
 0x12b   :  { %v15563_v9 = vpop.eup %15562  ;;  %v11883_v39 = vadd.f32 -1.0, %v15561_v34  ;;  %v830_v40 = vmul.f32 1.442695, %v744_v30  ;;  %v16263_v17 = vadd.f32 %v16064_v52, %v539_v36  ;;  %v14233_v42 = vpack.c.bf16 %v961_v3, %v960_v37  ;;  %v996_v3 = vld [vmem:[%s20054_s25 + $0x10] sm:$0xff] }
 0x12c   :  { %v11882_v13 = vadd.f32 -1.0, %v15563_v9  ;;  %15572 = vpow2.f32 %v832_v16  ;;  %v747_v43 = vmin.f32 %v16258_v35, 0.0  ;;  %vm691_vm8 = vcmp.gt.f32.partialorder %v16258_v35, 0.0 }
 0x12d   :  { %15574 = vpow2.f32 %v830_v40  ;;  %v746_v46 = vmin.f32 %v16263_v17, 0.0  ;;  %14234 = vmatpush1.bf16.msra.mxu1 %v14233_v42  ;;  %v963_v21 = vsel %vm683_vm14, %v16205_v32, %v11883_v39  ;;  %v13364_v47 = vpop.f32.mrb[34].mxu0  ;;  %vm690_vm9 = vcmp.gt.f32.partialorder %v16263_v17, 0.0 }
 0x12e   :  { %v15565_v51 = vpop.eup %15564  ;;  %v836_v25 = vmul.f32 1.442695, %v747_v43  ;;  %14235 = vmatprep.subr.bf16.mxu1 %v15735_v45  ;;  %v962_v53 = vsel %vm682_vm15, %v16211_v19, %v11882_v13  ;;  %v16273_v54 = vadd.f32 %v13364_v47, %v16064_v52  ;;  %v549_v55 = vpop.f32.mrb[35].mxu0  ;;  %v1282_v39 = vunpack.c.l.bf16 %v16050_v48 }
 0x12f   :  { %v15567_v57 = vpop.eup %15566  ;;  %v11885_v26 = vadd.f32 -1.0, %v15565_v51  ;;  %v834_v58 = vmul.f32 1.442695, %v746_v46  ;;  %v14236_v60 = vpack.c.bf16 %v963_v21, %v962_v53  ;;  %v16276_v61 = vadd.f32 %v16064_v52, %v549_v55  ;;  %v998_v46 = vld [vmem:[%s20054_s25 + $0x20] sm:$0xff] }
 0x130   :  { %v11884_v32 = vadd.f32 -1.0, %v15567_v57  ;;  %15576 = vpow2.f32 %v836_v25  ;;  %v749_v33 = vmin.f32 %v16273_v54, 0.0  ;;  %vm693_vm10 = vcmp.gt.f32.partialorder %v16273_v54, 0.0 }
 0x131   :  { %15578 = vpow2.f32 %v834_v58  ;;  %14237 = vmatpush1.bf16.msra.mxu1 %v14236_v60  ;;  %v965_v19 = vsel %vm685_vm0, %v16219_v49, %v11885_v26  ;;  %v748_v0 = vmin.f32 %v16276_v61, 0.0  ;;  %v13367_v63 = vpop.f32.mrb[36].mxu0  ;;  %vm692_vm11 = vcmp.gt.f32.partialorder %v16276_v61, 0.0  ;;  %v1000_v58 = vld [vmem:[%s20054_s25 + $0x30] sm:$0xff] }
 0x132   :  { %v15569_v4 = vpop.eup %15568  ;;  %14238 = vmatprep.subr.bf16.mxu1 %v15735_v45  ;;  %v964_v38 = vsel %vm684_vm1, %v16224_v29, %v11884_v32  ;;  %v840_v2 = vmul.f32 1.442695, %v749_v33  ;;  %v16286_v6 = vadd.f32 %v13367_v63, %v16064_v52  ;;  %v559_v7 = vpop.f32.mrb[37].mxu0  ;;  %v1286_v25 = vunpack.c.l.bf16 %v996_v3 }
 0x133   :  { %v15571_v10 = vpop.eup %15570  ;;  %v11887_v41 = vadd.f32 -1.0, %v15569_v4  ;;  %v14239_v12 = vpack.c.bf16 %v965_v19, %v964_v38  ;;  %v838_v14 = vmul.f32 1.442695, %v748_v0  ;;  %v16289_v15 = vadd.f32 %v16064_v52, %v559_v7 }
 0x134   :  { %v11886_v49 = vadd.f32 -1.0, %v15571_v10  ;;  %15580 = vpow2.f32 %v840_v2  ;;  %v751_v50 = vmin.f32 %v16286_v6, 0.0  ;;  %v1291_v55 = vunpack.c.h.bf16 %v998_v46  ;;  %v123_v10 = vld [vmem:[%s20051_s27 + $0x180] sm:$0xff] }
 0x135   :  { %14240 = vmatpush1.bf16.msra.mxu1 %v14239_v12  ;;  %v967_v29 = vsel %vm687_vm4, %v16232_v1, %v11887_v41  ;;  %15582 = vpow2.f32 %v838_v14  ;;  %v750_v18 = vmin.f32 %v16289_v15, 0.0  ;;  %v13370_v8 = vpop.f32.mrb[38].mxu0  ;;  %vm695_vm12 = vcmp.gt.f32.partialorder %v16286_v6, 0.0  ;;  %v124_v41 = vld [vmem:[%s20051_s27 + $0x188] sm:$0xff]  ;;  %v1004_v12 = vld [vmem:[%s20054_s25 + $0x50] sm:$0xff]  ;;  %13383 = vmatprep.mubr.msk.f32.mxu0 %vm140_vm3, %v123_v10 }
 0x136   :  { %v15573_v22 = vpop.eup %15572  ;;  %14241 = vmatprep.subr.bf16.mxu1 %v15735_v45  ;;  %v966_v56 = vsel %vm686_vm5, %v16237_v44, %v11886_v49  ;;  %v844_v11 = vmul.f32 1.442695, %v751_v50  ;;  %v569_v23 = vpop.f32.mrb[39].mxu0  ;;  %v16309_v37 = vadd.f32 %v13370_v8, %v16064_v52  ;;  %vm694_vm13 = vcmp.gt.f32.partialorder %v16289_v15, 0.0  ;;  %13384 = vmatmul.mubr.msk.f32.gmra.mrb[48].mxu0 %vm140_vm3, %v124_v41  ;;  %v1006_v8 = vld [vmem:[%s20054_s25 + $0x60] sm:$0xff]  ;;  %v1032_v41 = vld [vmem:[%s20054_s25 + $0x130] sm:$0xff] }
 0x137   :  { %v15575_v62 = vpop.eup %15574  ;;  %v11889_v27 = vadd.f32 -1.0, %v15573_v22  ;;  %v14242_v59 = vpack.c.bf16 %v967_v29, %v966_v56  ;;  %v842_v28 = vmul.f32 1.442695, %v750_v18  ;;  %v1295_v63 = vunpack.c.h.bf16 %v1000_v58 }
 0x138   :  { %v11888_v30 = vadd.f32 -1.0, %v15575_v62  ;;  %15584 = vpow2.f32 %v844_v11  ;;  %v753_v42 = vmin.f32 %v16309_v37, 0.0  ;;  %v1294_v7 = vunpack.c.l.bf16 %v1000_v58 }
 0x139   :  { %14243 = vmatpush1.bf16.msra.mxu1 %v14242_v59  ;;  %v969_v1 = vsel %vm689_vm6, %v16245_v20, %v11889_v27  ;;  %15586 = vpow2.f32 %v842_v28  ;;  %v16312_v20 = vadd.f32 %v16064_v52, %v569_v23  ;;  %vm697_vm14 = vcmp.gt.f32.partialorder %v16309_v37, 0.0  ;;  %v1008_v27 = vld [vmem:[%s20054_s25 + $0x70] sm:$0xff] }
 0x13a   :  { %v15577_v31 = vpop.eup %15576  ;;  %14244 = vmatprep.subr.bf16.mxu1 %v15735_v45  ;;  %v968_v44 = vsel %vm688_vm7, %v16250_v24, %v11888_v30  ;;  %v1287_v24 = vunpack.c.h.bf16 %v996_v3  ;;  %v848_v51 = vmul.f32 1.442695, %v753_v42  ;;  %v1303_v29 = vunpack.c.h.bf16 %v1004_v12  ;;  %v1010_v30 = vld [vmem:[%s20054_s25 + $0x80] sm:$0xff] }
 0x13b   :  { %v15579_v34 = vpop.eup %15578  ;;  %v11891_v16 = vadd.f32 -1.0, %v15577_v31  ;;  %v14245_v36 = vpack.c.bf16 %v969_v1, %v968_v44  ;;  %v752_v48 = vmin.f32 %v16312_v20, 0.0  ;;  %vm696_vm15 = vcmp.gt.f32.partialorder %v16312_v20, 0.0  ;;  %v1012_v44 = vld [vmem:[%s20054_s25 + $0x90] sm:$0xff] }
 0x13c   :  { %v11890_v9 = vadd.f32 -1.0, %v15579_v34  ;;  %15588 = vpow2.f32 %v848_v51  ;;  %v1302_v11 = vunpack.c.l.bf16 %v1004_v12  ;;  %v1307_v62 = vunpack.c.h.bf16 %v1006_v8  ;;  %v1024_v51 = vld [vmem:[%s20054_s25 + $0xf0] sm:$0xff] }
 0x13d   :  { %v971_v40 = vsel %vm691_vm8, %v16258_v35, %v11891_v16  ;;  %14246 = vmatpush1.bf16.msra.mxu1 %v14245_v36  ;;  %v1306_v59 = vunpack.c.l.bf16 %v1006_v8  ;;  %v1311_v28 = vunpack.c.h.bf16 %v1008_v27  ;;  %v1310_v1 = vunpack.c.l.bf16 %v1008_v27  ;;  %v1014_v16 = vld [vmem:[%s20054_s25 + $0xa0] sm:$0xff] }
 0x13e   :  { %v15581_v13 = vpop.eup %15580  ;;  %v970_v43 = vsel %vm690_vm9, %v16263_v17, %v11890_v9  ;;  %14247 = vmatprep.subr.bf16.mxu1 %v15735_v45  ;;  %v846_v17 = vmul.f32 1.442695, %v752_v48  ;;  %v1315_v31 = vunpack.c.h.bf16 %v1010_v30  ;;  %v1314_v3 = vunpack.c.l.bf16 %v1010_v30  ;;  %v1022_v48 = vld [vmem:[%s20054_s25 + $0xe0] sm:$0xff]  ;;  %v1040_v30 = vld [vmem:[%s20054_s25 + $0x170] sm:$0xff] }
 0x13f   :  { %v15583_v35 = vpop.eup %15582  ;;  %v14248_v21 = vpack.c.bf16 %v971_v40, %v970_v43  ;;  %v11893_v47 = vadd.f32 -1.0, %v15581_v13  ;;  %v1319_v34 = vunpack.c.h.bf16 %v1012_v44  ;;  %v1318_v36 = vunpack.c.l.bf16 %v1012_v44  ;;  %v1018_v40 = vld [vmem:[%s20054_s25 + $0xc0] sm:$0xff]  ;;  %v1020_v13 = vld [vmem:[%s20054_s25 + $0xd0] sm:$0xff] }
 0x140   :  { %2359 = vmatmul.mubr.f32.vlgmr.msra.gmra.mrb[0].mxu1 %v1282_v39  ;;  %v11892_v53 = vadd.f32 -1.0, %v15583_v35  ;;  %15590 = vpow2.f32 %v846_v17  ;;  %v1322_v9 = vunpack.c.l.bf16 %v1014_v16  ;;  %v1331_v42 = vunpack.c.h.bf16 %v1018_v40  ;;  %v1038_v27 = vld [vmem:[%s20054_s25 + $0x160] sm:$0xff] }
 0x141   :  { %14249 = vmatpush1.bf16.msra.mxu1 %v14248_v21  ;;  %2363 = vmatprep.mubr.f32.mxu1 %v1287_v24  ;;  %v973_v57 = vsel %vm693_vm10, %v16273_v54, %v11893_v47  ;;  %v1290_v54 = vunpack.c.l.bf16 %v998_v46  ;;  %v1330_v43 = vunpack.c.l.bf16 %v1018_v40  ;;  %v1335_v46 = vunpack.c.h.bf16 %v1020_v13  ;;  %v13373_v47 = vpop.f32.mrb[40].mxu0 }
 0x142   :  { %v15585_v26 = vpop.eup %15584  ;;  %v972_v60 = vsel %vm692_vm11, %v16276_v61, %v11892_v53  ;;  %14250 = vmatprep.subr.bf16.mxu1 %v15735_v45  ;;  %v1002_v61 = vld [vmem:[%s20054_s25 + $0x40] sm:$0xff]  ;;  %v1334_v35 = vunpack.c.l.bf16 %v1020_v13  ;;  %v1339_v21 = vunpack.c.h.bf16 %v1022_v48  ;;  %v579_v53 = vpop.f32.mrb[41].mxu0  ;;  %v1375_v44 = vunpack.c.h.bf16 %v1040_v30 }
 0x143   :  { %v15587_v32 = vpop.eup %15586  ;;  %v14251_v33 = vpack.c.bf16 %v973_v57, %v972_v60  ;;  %v11895_v19 = vadd.f32 -1.0, %v15585_v26  ;;  %v1298_v49 = vunpack.c.l.bf16 %v1002_v61  ;;  %v580_v17 = vadd.f32 %v16064_v52, %v579_v53  ;;  %v1026_v60 = vld [vmem:[%s20054_s25 + $0x100] sm:$0xff] }
 0x144   :  { %2364 = vmatmul.mubr.f32.gmra.mrb[2].mxu1 %v1286_v25  ;;  %v11894_v0 = vadd.f32 -1.0, %v15587_v32  ;;  %v585_v25 = vadd.f32 %v13373_v47, %v16064_v52  ;;  %v1343_v26 = vunpack.c.h.bf16 %v1024_v51  ;;  %v126_v52 = vld [vmem:[%s20051_s27 + $0x198] sm:$0xff]  ;;  %v1048_v47 = vld [vmem:[%s20054_s25 + $0x1b0] sm:$0xff] }
 0x145   :  { %2368 = vmatprep.mubr.f32.mxu1 %v1291_v55  ;;  %14252 = vmatpush1.bf16.msra.mxu1 %v14251_v33  ;;  %v975_v4 = vsel %vm695_vm12, %v16286_v6, %v11895_v19  ;;  %v1299_v6 = vunpack.c.h.bf16 %v1002_v61  ;;  %v1338_v55 = vunpack.c.l.bf16 %v1022_v48  ;;  %v754_v58 = vmin.f32 %v580_v17, 0.0  ;;  %v1046_v48 = vld [vmem:[%s20054_s25 + $0x1a0] sm:$0xff] }
 0x146   :  { %v974_v38 = vsel %vm694_vm13, %v16289_v15, %v11894_v0  ;;  %14253 = vmatprep.subr.bf16.mxu1 %v15735_v45  ;;  %v15589_v14 = vpop.eup %15588  ;;  %v755_v57 = vmin.f32 %v585_v25, 0.0  ;;  %v1342_v19 = vunpack.c.l.bf16 %v1024_v51  ;;  %v1347_v0 = vunpack.c.h.bf16 %v1026_v60 }
 0x147   :  { %v14254_v2 = vpack.c.bf16 %v975_v4, %v974_v38  ;;  %v11897_v50 = vadd.f32 -1.0, %v15589_v14  ;;  %v850_v33 = vmul.f32 1.442695, %v754_v58  ;;  %v1346_v4 = vunpack.c.l.bf16 %v1026_v60  ;;  %v1030_v38 = vld [vmem:[%s20054_s25 + $0x120] sm:$0xff] }
 0x148   :  { %2369 = vmatmul.mubr.f32.gmra.mrb[4].mxu1 %v1290_v54  ;;  %v852_v32 = vmul.f32 1.442695, %v755_v57  ;;  %v125_v54 = vld [vmem:[%s20051_s27 + $0x190] sm:$0xff]  ;;  %vm699_vm0 = vcmp.gt.f32.partialorder %v585_v25, 0.0  ;;  %vm698_vm1 = vcmp.gt.f32.partialorder %v580_v17, 0.0  ;;  %v1354_v14 = vunpack.c.l.bf16 %v1030_v38 }
 0x149   :  { %2373 = vmatprep.mubr.f32.mxu1 %v1295_v63  ;;  %14255 = vmatpush1.bf16.msra.mxu1 %v14254_v2  ;;  %v977_v22 = vsel %vm697_vm14, %v16309_v37, %v11897_v50  ;;  %v1323_v37 = vunpack.c.h.bf16 %v1014_v16  ;;  %v1028_v63 = vld [vmem:[%s20054_s25 + $0x110] sm:$0xff]  ;;  %v1386_v51 = vunpack.c.l.bf16 %v1046_v48  ;;  %v1391_v53 = vunpack.c.h.bf16 %v1048_v47 }
 0x14a   :  { %14256 = vmatprep.subr.bf16.mxu1 %v15735_v45  ;;  %v15591_v15 = vpop.eup %15590  ;;  %15592 = vpow2.f32 %v852_v32  ;;  %13386 = vmatprep.mubr.msk.f32.mxu0 %vm140_vm3, %v125_v54  ;;  %v1351_v61 = vunpack.c.h.bf16 %v1028_v63  ;;  %v1350_v2 = vunpack.c.l.bf16 %v1028_v63  ;;  %v1390_v58 = vunpack.c.l.bf16 %v1048_v47  ;;  %v127_v32 = vld [vmem:[%s20051_s27 + $0x1a0] sm:$0xff] }
 0x14b   :  { %v11896_v18 = vadd.f32 -1.0, %v15591_v15  ;;  %15594 = vpow2.f32 %v850_v33  ;;  %13387 = vmatmul.mubr.msk.f32.gmra.mrb[50].mxu0 %vm140_vm3, %v126_v52  ;;  %v128_v33 = vld [vmem:[%s20051_s27 + $0x1a8] sm:$0xff]  ;;  %v1052_v52 = vld [vmem:[%s20054_s25 + $0x1d0] sm:$0xff] }
 0x14c   :  { %2374 = vmatmul.mubr.f32.gmra.mrb[6].mxu1 %v1294_v7  ;;  %v1355_v7 = vunpack.c.h.bf16 %v1030_v38  ;;  %13389 = vmatprep.mubr.msk.f32.mxu0 %vm140_vm3, %v127_v32  ;;  %v1398_v38 = vunpack.c.l.bf16 %v1052_v52  ;;  %v1078_v32 = vld [vmem:[%s20054_s25 + $0x2a0] sm:$0xff] }
 0x14d   :  { %2378 = vmatprep.mubr.f32.mxu1 %v1299_v6  ;;  %v976_v56 = vsel %vm696_vm15, %v16312_v20, %v11896_v18  ;;  %v1016_v20 = vld [vmem:[%s20054_s25 + $0xb0] sm:$0xff] }
 0x14e   :  { %v14257_v23 = vpack.c.bf16 %v977_v22, %v976_v56  ;;  %v1327_v39 = vunpack.c.h.bf16 %v1016_v20  ;;  %v1326_v24 = vunpack.c.l.bf16 %v1016_v20  ;;  %v1358_v22 = vunpack.c.l.bf16 %v1032_v41 }
 0x14f   :  { %13390 = vmatmul.mubr.msk.f32.gmra.mrb[52].mxu0 %vm140_vm3, %v128_v33 }
 0x150   :  { %2379 = vmatmul.mubr.f32.gmra.mrb[8].mxu1 %v1298_v49  ;;  %v1359_v49 = vunpack.c.h.bf16 %v1032_v41 }
 0x151   :  { %2383 = vmatprep.mubr.f32.mxu1 %v1303_v29  ;;  %14258 = vmatpush1.bf16.msra.mxu1 %v14257_v23  ;;  %v1034_v29 = vld [vmem:[%s20054_s25 + $0x140] sm:$0xff] }
 0x152   :  { %14259 = vmatprep.subr.bf16.mxu1 %v15735_v45  ;;  %v1363_v56 = vunpack.c.h.bf16 %v1034_v29  ;;  %v1362_v23 = vunpack.c.l.bf16 %v1034_v29 }
 0x154   :  { %2384 = vmatmul.mubr.f32.gmra.mrb[10].mxu1 %v1302_v11  ;;  %v15593_v10 = vpop.eup %15592  ;;  %v1036_v11 = vld [vmem:[%s20054_s25 + $0x150] sm:$0xff] }
 0x155   :  { %2388 = vmatprep.mubr.f32.mxu1 %v1307_v62  ;;  %v15595_v6 = vpop.eup %15594  ;;  %v11899_v12 = vadd.f32 -1.0, %v15593_v10  ;;  %v1367_v62 = vunpack.c.h.bf16 %v1036_v11 }
 0x156   :  { %v11898_v15 = vadd.f32 -1.0, %v15595_v6  ;;  %v1058_v6 = vld [vmem:[%s20054_s25 + $0x200] sm:$0xff] }
 0x157   :  { %v979_v50 = vsel %vm699_vm0, %v585_v25, %v11899_v12 }
 0x158   :  { %2389 = vmatmul.mubr.f32.gmra.mrb[12].mxu1 %v1306_v59  ;;  %v978_v18 = vsel %vm698_vm1, %v580_v17, %v11898_v15  ;;  %v1366_v59 = vunpack.c.l.bf16 %v1036_v11  ;;  %v1060_v15 = vld [vmem:[%s20054_s25 + $0x210] sm:$0xff]  ;;  %vm3869_vm1 = vcmask 261120  }
 0x159   :  { %2393 = vmatprep.mubr.f32.mxu1 %v1311_v28  ;;  %v14260_v8 = vpack.c.bf16 %v979_v50, %v978_v18  ;;  %v1371_v28 = vunpack.c.h.bf16 %v1038_v27  ;;  %v1415_v50 = vunpack.c.h.bf16 %v1060_v15  ;;  %v1062_v18 = vld [vmem:[%s20054_s25 + $0x220] sm:$0xff]  ;;  %v1414_v11 = vunpack.c.l.bf16 %v1060_v15 }
 0x15b   :  { %14261 = vmatpush1.bf16.msra.mxu1 %v14260_v8 }
 0x15c   :  { %2394 = vmatmul.mubr.f32.gmra.mrb[14].mxu1 %v1310_v1  ;;  %14262 = vmatprep.subr.bf16.mxu1 %v15735_v45  ;;  %v1370_v1 = vunpack.c.l.bf16 %v1038_v27 }
 0x15d   :  { %2398 = vmatprep.mubr.f32.mxu1 %v1315_v31  ;;  %v13376_v31 = vpop.f32.mrb[42].mxu0 }
 0x15e   :  { %v589_v16 = vpop.f32.mrb[43].mxu0 }
 0x15f   :  { %v13379_v29 = vpop.f32.mrb[44].mxu0 }
 0x160   :  { %2399 = vmatmul.mubr.f32.gmra.mrb[16].mxu1 %v1314_v3  ;;  %v16426_v3 = vld [vmem:[%s20055_s7] ss:$0 sm:$0xff] }
 0x161   :  { %2403 = vmatprep.mubr.f32.mxu1 %v1319_v34  ;;  %v595_v34 = vadd.f32 %v16426_v3, %v13376_v31  ;;  %v605_v8 = vadd.f32 %v16426_v3, %v13379_v29 }
 0x163   :  { %v757_v20 = vmin.f32 %v595_v34, 0.0  ;;  %vm701_vm4 = vcmp.gt.f32.partialorder %v595_v34, 0.0  ;;  %vm703_vm6 = vcmp.gt.f32.partialorder %v605_v8, 0.0 }
 0x164   :  { %2404 = vmatmul.mubr.f32.gmra.mrb[18].mxu1 %v1318_v36  ;;  %v1042_v36 = vld [vmem:[%s20054_s25 + $0x180] sm:$0xff] }
 0x165   :  { %2408 = vmatprep.mubr.f32.mxu1 %v1323_v37  ;;  %v590_v37 = vadd.f32 %v16426_v3, %v589_v16  ;;  %v1379_v40 = vunpack.c.h.bf16 %v1042_v36 }
 0x167   :  { %vm700_vm5 = vcmp.gt.f32.partialorder %v590_v37, 0.0 }
 0x168   :  { %2409 = vmatmul.mubr.f32.gmra.mrb[20].mxu1 %v1322_v9  ;;  %v1374_v9 = vunpack.c.l.bf16 %v1040_v30 }
 0x169   :  { %2413 = vmatprep.mubr.f32.mxu1 %v1327_v39  ;;  %v756_v39 = vmin.f32 %v590_v37, 0.0 }
 0x16b   :  { %v854_v13 = vmul.f32 1.442695, %v756_v39  ;;  %v1070_v39 = vld [vmem:[%s20054_s25 + $0x260] sm:$0xff] }
 0x16c   :  { %2414 = vmatmul.mubr.f32.gmra.mrb[22].mxu1 %v1326_v24  ;;  %v856_v24 = vmul.f32 1.442695, %v757_v20  ;;  %v1434_v47 = vunpack.c.l.bf16 %v1070_v39 }
 0x16d   :  { %2418 = vmatprep.mubr.f32.mxu1 %v1331_v42  ;;  %v1044_v42 = vld [vmem:[%s20054_s25 + $0x190] sm:$0xff] }
 0x16e   :  { %15596 = vpow2.f32 %v856_v24 }
 0x16f   :  { %15598 = vpow2.f32 %v854_v13 }
 0x170   :  { %2419 = vmatmul.mubr.f32.gmra.mrb[24].mxu1 %v1330_v43  ;;  %v1378_v43 = vunpack.c.l.bf16 %v1042_v36  ;;  %v1068_v36 = vld [vmem:[%s20054_s25 + $0x250] sm:$0xff] }
 0x171   :  { %2423 = vmatprep.mubr.f32.mxu1 %v1335_v46  ;;  %v1383_v46 = vunpack.c.h.bf16 %v1044_v42  ;;  %v1431_v20 = vunpack.c.h.bf16 %v1068_v36 }
 0x174   :  { %2424 = vmatmul.mubr.f32.gmra.mrb[26].mxu1 %v1334_v35  ;;  %v1382_v35 = vunpack.c.l.bf16 %v1044_v42  ;;  %v1430_v42 = vunpack.c.l.bf16 %v1068_v36 }
 0x175   :  { %2428 = vmatprep.mubr.f32.mxu1 %v1339_v21  ;;  %v1387_v21 = vunpack.c.h.bf16 %v1046_v48  ;;  %v1072_v48 = vld [vmem:[%s20054_s25 + $0x270] sm:$0xff] }
 0x178   :  { %2429 = vmatmul.mubr.f32.gmra.mrb[28].mxu1 %v1338_v55  ;;  %v15597_v25 = vpop.eup %15596  ;;  %v1050_v55 = vld [vmem:[%s20054_s25 + $0x1c0] sm:$0xff] }
 0x179   :  { %2433 = vmatprep.mubr.f32.mxu1 %v1343_v26  ;;  %v15599_v17 = vpop.eup %15598  ;;  %v11901_v57 = vadd.f32 -1.0, %v15597_v25  ;;  %v1394_v63 = vunpack.c.l.bf16 %v1050_v55  ;;  %v1074_v25 = vld [vmem:[%s20054_s25 + $0x280] sm:$0xff] }
 0x17a   :  { %v11900_v26 = vadd.f32 -1.0, %v15599_v17  ;;  %v129_v17 = vld [vmem:[%s20051_s27 + $0x1b0] sm:$0xff] }
 0x17b   :  { %v981_v60 = vsel %vm701_vm4, %v595_v34, %v11901_v57  ;;  %v1443_v57 = vunpack.c.h.bf16 %v1074_v25  ;;  %13392 = vmatprep.mubr.msk.f32.mxu0 %vm140_vm3, %v129_v17  ;;  %vm15736_vm4 = vmmov 0  }
 0x17c   :  { %2434 = vmatmul.mubr.f32.gmra.mrb[30].mxu1 %v1342_v19  ;;  %v1395_v19 = vunpack.c.h.bf16 %v1050_v55  ;;  %v980_v54 = vsel %vm700_vm5, %v590_v37, %v11900_v26  ;;  %v130_v55 = vld [vmem:[%s20051_s27 + $0x1b8] sm:$0x1]  ;;  %v1076_v26 = vld [vmem:[%s20054_s25 + $0x290] sm:$0xff]  ;;  %s20057_s27 = sld [smem:[#allocation14_spill]] }
 0x17d   :  { %2438 = vmatprep.mubr.f32.mxu1 %v1347_v0  ;;  %v14263_v0 = vpack.c.bf16 %v981_v60, %v980_v54  ;;  %13393 = vmatmul.mubr.msk.f32.gmra.mrb[54].mxu0 %vm140_vm3, %v130_v55  ;;  %v1447_v60 = vunpack.c.h.bf16 %v1076_v26  ;;  %v1446_v33 = vunpack.c.l.bf16 %v1076_v26  ;;  %v1080_v54 = vld [vmem:[%s20054_s25 + $0x2b0] sm:$0xff] }
 0x17f   :  { %14264 = vmatpush1.bf16.msra.mxu1 %v14263_v0  ;;  %v1455_v0 = vunpack.c.h.bf16 %v1080_v54 }
 0x180   :  { %2439 = vmatmul.mubr.f32.gmra.mrb[32].mxu1 %v1346_v4  ;;  %v1399_v4 = vunpack.c.h.bf16 %v1052_v52  ;;  %14265 = vmatprep.subr.bf16.mxu1 %v15735_v45  ;;  %v1450_v52 = vunpack.c.l.bf16 %v1078_v32 }
 0x181   :  { %2443 = vmatprep.mubr.f32.mxu1 %v1351_v61  ;;  %v1054_v61 = vld [vmem:[%s20054_s25 + $0x1e0] sm:$0xff] }
 0x182   :  { %v1402_v10 = vunpack.c.l.bf16 %v1054_v61 }
 0x184   :  { %2444 = vmatmul.mubr.f32.gmra.mrb[34].mxu1 %v1350_v2  ;;  %v1403_v2 = vunpack.c.h.bf16 %v1054_v61 }
 0x185   :  { %2448 = vmatprep.mubr.f32.mxu1 %v1355_v7  ;;  %v1056_v7 = vld [vmem:[%s20054_s25 + $0x1f0] sm:$0xff] }
 0x186   :  { %v1407_v41 = vunpack.c.h.bf16 %v1056_v7  ;;  %v1406_v12 = vunpack.c.l.bf16 %v1056_v7 }
 0x188   :  { %2449 = vmatmul.mubr.f32.gmra.mrb[36].mxu1 %v1354_v14  ;;  %v1411_v14 = vunpack.c.h.bf16 %v1058_v6 }
 0x189   :  { %2453 = vmatprep.mubr.f32.mxu1 %v1359_v49  ;;  %v1410_v49 = vunpack.c.l.bf16 %v1058_v6 }
 0x18c   :  { %2454 = vmatmul.mubr.f32.gmra.mrb[38].mxu1 %v1358_v22  ;;  %v599_v22 = vpop.f32.mrb[45].mxu0 }
 0x18d   :  { %2458 = vmatprep.mubr.f32.mxu1 %v1363_v56  ;;  %v600_v56 = vadd.f32 %v16426_v3, %v599_v22 }
 0x18f   :  { %v758_v27 = vmin.f32 %v600_v56, 0.0  ;;  %vm702_vm7 = vcmp.gt.f32.partialorder %v600_v56, 0.0 }
 0x190   :  { %2459 = vmatmul.mubr.f32.gmra.mrb[40].mxu1 %v1362_v23  ;;  %v759_v23 = vmin.f32 %v605_v8, 0.0 }
 0x191   :  { %2463 = vmatprep.mubr.f32.mxu1 %v1367_v62  ;;  %v1419_v62 = vunpack.c.h.bf16 %v1062_v18  ;;  %v858_v30 = vmul.f32 1.442695, %v758_v27 }
 0x194   :  { %2464 = vmatmul.mubr.f32.gmra.mrb[42].mxu1 %v1366_v59  ;;  %v1064_v59 = vld [vmem:[%s20054_s25 + $0x230] sm:$0xff] }
 0x195   :  { %2468 = vmatprep.mubr.f32.mxu1 %v1371_v28  ;;  %v860_v28 = vmul.f32 1.442695, %v759_v23  ;;  %v1423_v31 = vunpack.c.h.bf16 %v1064_v59  ;;  %v1422_v34 = vunpack.c.l.bf16 %v1064_v59  ;;  %v1090_v23 = vld [vmem:[%s20054_s25 + $0x300] sm:$0xff]  ;;  %v1092_v59 = vld [vmem:[%s20054_s25 + $0x310] sm:$0xff] }
 0x196   :  { %v1475_v27 = vunpack.c.h.bf16 %v1090_v23 }
 0x197   :  { %15600 = vpow2.f32 %v860_v28  ;;  %v1474_v28 = vunpack.c.l.bf16 %v1090_v23 }
 0x198   :  { %2469 = vmatmul.mubr.f32.gmra.mrb[44].mxu1 %v1370_v1  ;;  %v1418_v1 = vunpack.c.l.bf16 %v1062_v18  ;;  %15602 = vpow2.f32 %v858_v30  ;;  %v1088_v18 = vld [vmem:[%s20054_s25 + $0x2f0] sm:$0xff]  ;;  %v1479_v30 = vunpack.c.h.bf16 %v1092_v59 }
 0x199   :  { %2473 = vmatprep.mubr.f32.mxu1 %v1375_v44  ;;  %v1066_v44 = vld [vmem:[%s20054_s25 + $0x240] sm:$0xff] }
 0x19a   :  { %v1427_v16 = vunpack.c.h.bf16 %v1066_v44  ;;  %v1426_v37 = vunpack.c.l.bf16 %v1066_v44 }
 0x19c   :  { %2474 = vmatmul.mubr.f32.gmra.mrb[46].mxu1 %v1374_v9 }
 0x19d   :  { %2478 = vmatprep.mubr.f32.mxu1 %v1379_v40 }
 0x1a0   :  { %2479 = vmatmul.mubr.f32.gmra.mrb[48].mxu1 %v1378_v43  ;;  %v1435_v43 = vunpack.c.h.bf16 %v1070_v39 }
 0x1a1   :  { %2483 = vmatprep.mubr.f32.mxu1 %v1383_v46  ;;  %v15601_v9 = vpop.eup %15600 }
 0x1a2   :  { %v15603_v40 = vpop.eup %15602  ;;  %v11903_v24 = vadd.f32 -1.0, %v15601_v9  ;;  %v1096_v9 = vld [vmem:[%s20054_s25 + $0x330] sm:$0xff] }
 0x1a3   :  { %v11902_v13 = vadd.f32 -1.0, %v15603_v40 }
 0x1a4   :  { %2484 = vmatmul.mubr.f32.gmra.mrb[50].mxu1 %v1382_v35  ;;  %v983_v46 = vsel %vm703_vm6, %v605_v8, %v11903_v24 }
 0x1a5   :  { %2488 = vmatprep.mubr.f32.mxu1 %v1387_v21  ;;  %v982_v35 = vsel %vm702_vm7, %v600_v56, %v11902_v13  ;;  %v1098_v13 = vld [vmem:[%s20054_s25 + $0x340] sm:$0xff] }
 0x1a6   :  { %v14266_v21 = vpack.c.bf16 %v983_v46, %v982_v35  ;;  %v1491_v46 = vunpack.c.h.bf16 %v1098_v13  ;;  %v1490_v35 = vunpack.c.l.bf16 %v1098_v13 }
 0x1a8   :  { %2489 = vmatmul.mubr.f32.gmra.mrb[52].mxu1 %v1386_v51  ;;  %v1439_v51 = vunpack.c.h.bf16 %v1072_v48 }
 0x1a9   :  { %2493 = vmatprep.mubr.f32.mxu1 %v1391_v53  ;;  %14267 = vmatpush1.bf16.msra.mxu1 %v14266_v21  ;;  %v1438_v53 = vunpack.c.l.bf16 %v1072_v48  ;;  %v1100_v48 = vld [vmem:[%s20054_s25 + $0x350] sm:$0xff] }
 0x1aa   :  { %14268 = vmatprep.subr.bf16.mxu1 %v15735_v45  ;;  %v1495_v21 = vunpack.c.h.bf16 %v1100_v48 }
 0x1ac   :  { %2494 = vmatmul.mubr.f32.gmra.mrb[54].mxu1 %v1390_v58  ;;  %v1442_v58 = vunpack.c.l.bf16 %v1074_v25 }
 0x1ad   :  { %2498 = vmatprep.mubr.f32.mxu1 %v1395_v19  ;;  %v1451_v19 = vunpack.c.h.bf16 %v1078_v32 }
 0x1b0   :  { %2499 = vmatmul.mubr.f32.gmra.mrb[56].mxu1 %v1394_v63  ;;  %v1082_v63 = vld [vmem:[%s20054_s25 + $0x2c0] sm:$0xff] }
 0x1b1   :  { %2503 = vmatprep.mubr.f32.mxu1 %v1399_v4  ;;  %v1454_v4 = vunpack.c.l.bf16 %v1080_v54  ;;  %v1459_v61 = vunpack.c.h.bf16 %v1082_v63 }
 0x1b4   :  { %2504 = vmatmul.mubr.f32.gmra.mrb[58].mxu1 %v1398_v38  ;;  %v1084_v38 = vld [vmem:[%s20054_s25 + $0x2d0] sm:$0xff] }
 0x1b5   :  { %2508 = vmatprep.mubr.f32.mxu1 %v1403_v2  ;;  %v1458_v2 = vunpack.c.l.bf16 %v1082_v63  ;;  %v1463_v7 = vunpack.c.h.bf16 %v1084_v38  ;;  %v1462_v15 = vunpack.c.l.bf16 %v1084_v38 }
 0x1b8   :  { %2509 = vmatmul.mubr.f32.gmra.mrb[60].mxu1 %v1402_v10 }
 0x1b9   :  { %2513 = vmatprep.mubr.f32.mxu1 %v1407_v41  ;;  %v1086_v41 = vld [vmem:[%s20054_s25 + $0x2e0] sm:$0xff] }
 0x1ba   :  { %v1466_v56 = vunpack.c.l.bf16 %v1086_v41 }
 0x1bc   :  { %2514 = vmatmul.mubr.f32.gmra.mrb[62].mxu1 %v1406_v12 }
 0x1bd   :  { %2518 = vmatprep.mubr.f32.mxu1 %v1411_v14 }
 0x1c0   :  { %2519 = vmatmul.mubr.f32.gmra.mrb[64].mxu1 %v1410_v49 }
 0x1c1   :  { %2523 = vmatprep.mubr.f32.mxu1 %v1415_v50  ;;  %v1467_v50 = vunpack.c.h.bf16 %v1086_v41 }
 0x1c4   :  { %2524 = vmatmul.mubr.f32.gmra.mrb[66].mxu1 %v1414_v11  ;;  %v1471_v11 = vunpack.c.h.bf16 %v1088_v18 }
 0x1c5   :  { %2528 = vmatprep.mubr.f32.mxu1 %v1419_v62  ;;  %v1470_v62 = vunpack.c.l.bf16 %v1088_v18 }
 0x1c8   :  { %2529 = vmatmul.mubr.f32.gmra.mrb[68].mxu1 %v1418_v1 }
 0x1c9   :  { %2533 = vmatprep.mubr.f32.mxu1 %v1423_v31  ;;  %v1094_v31 = vld [vmem:[%s20054_s25 + $0x320] sm:$0xff] }
 0x1ca   :  { %v1482_v24 = vunpack.c.l.bf16 %v1094_v31 }
 0x1cc   :  { %2534 = vmatmul.mubr.f32.gmra.mrb[70].mxu1 %v1422_v34 }
 0x1cd   :  { %2538 = vmatprep.mubr.f32.mxu1 %v1427_v16  ;;  %v1478_v16 = vunpack.c.l.bf16 %v1092_v59  ;;  %v1120_v59 = vld [vmem:[%s20054_s25 + $0x3f0] sm:$0xff] }
 0x1d0   :  { %2539 = vmatmul.mubr.f32.gmra.mrb[72].mxu1 %v1426_v37  ;;  %v1483_v37 = vunpack.c.h.bf16 %v1094_v31 }
 0x1d1   :  { %2543 = vmatprep.mubr.f32.mxu1 %v1431_v20 }
 0x1d4   :  { %2544 = vmatmul.mubr.f32.gmra.mrb[74].mxu1 %v1430_v42  ;;  %v1487_v42 = vunpack.c.h.bf16 %v1096_v9 }
 0x1d5   :  { %2548 = vmatprep.mubr.f32.mxu1 %v1435_v43  ;;  %v1486_v43 = vunpack.c.l.bf16 %v1096_v9 }
 0x1d8   :  { %2549 = vmatmul.mubr.f32.gmra.mrb[76].mxu1 %v1434_v47  ;;  %v1102_v47 = vld [vmem:[%s20054_s25 + $0x360] sm:$0xff] }
 0x1d9   :  { %2553 = vmatprep.mubr.f32.mxu1 %v1439_v51  ;;  %v1494_v51 = vunpack.c.l.bf16 %v1100_v48  ;;  %v1499_v25 = vunpack.c.h.bf16 %v1102_v47  ;;  %v1498_v17 = vunpack.c.l.bf16 %v1102_v47 }
 0x1dc   :  { %2554 = vmatmul.mubr.f32.gmra.mrb[78].mxu1 %v1438_v53  ;;  %v1104_v53 = vld [vmem:[%s20054_s25 + $0x370] sm:$0xff] }
 0x1dd   :  { %2558 = vmatprep.mubr.f32.mxu1 %v1443_v57  ;;  %v1503_v55 = vunpack.c.h.bf16 %v1104_v53  ;;  %v1106_v57 = vld [vmem:[%s20054_s25 + $0x380] sm:$0xff]  ;;  %v1502_v26 = vunpack.c.l.bf16 %v1104_v53 }
 0x1de   :  { %v1506_v32 = vunpack.c.l.bf16 %v1106_v57  ;;  %v1134_v53 = vld [vmem:[%s20054_s25 + $0x460] sm:$0xff] }
 0x1e0   :  { %2559 = vmatmul.mubr.f32.gmra.mrb[80].mxu1 %v1442_v58  ;;  %v1507_v58 = vunpack.c.h.bf16 %v1106_v57 }
 0x1e1   :  { %2563 = vmatprep.mubr.f32.mxu1 %v1447_v60  ;;  %v1108_v60 = vld [vmem:[%s20054_s25 + $0x390] sm:$0xff] }
 0x1e2   :  { %v1510_v63 = vunpack.c.l.bf16 %v1108_v60 }
 0x1e4   :  { %2564 = vmatmul.mubr.f32.gmra.mrb[82].mxu1 %v1446_v33  ;;  %v1511_v33 = vunpack.c.h.bf16 %v1108_v60  ;;  %v1563_v60 = vunpack.c.h.bf16 %v1134_v53 }
 0x1e5   :  { %2568 = vmatprep.mubr.f32.mxu1 %v1451_v19  ;;  %v1110_v19 = vld [vmem:[%s20054_s25 + $0x3a0] sm:$0xff] }
 0x1e6   :  { %v1514_v41 = vunpack.c.l.bf16 %v1110_v19 }
 0x1e8   :  { %2569 = vmatmul.mubr.f32.gmra.mrb[84].mxu1 %v1450_v52 }
 0x1e9   :  { %2573 = vmatprep.mubr.f32.mxu1 %v1455_v0 }
 0x1ea   :  { %v13382_v10 = vpop.f32.mrb[46].mxu0 }
 0x1eb   :  { %v615_v6 = vadd.f32 %v16426_v3, %v13382_v10  ;;  %v609_v12 = vpop.f32.mrb[47].mxu0 }
 0x1ec   :  { %2574 = vmatmul.mubr.f32.gmra.mrb[86].mxu1 %v1454_v4  ;;  %v610_v14 = vadd.f32 %v16426_v3, %v609_v12 }
 0x1ed   :  { %2578 = vmatprep.mubr.f32.mxu1 %v1459_v61  ;;  %v761_v49 = vmin.f32 %v615_v6, 0.0  ;;  %vm705_vm3 = vcmp.gt.f32.partialorder %v615_v6, 0.0  ;;  %v1515_v61 = vunpack.c.h.bf16 %v1110_v19 }
 0x1ee   :  { %v760_v29 = vmin.f32 %v610_v14, 0.0  ;;  %vm704_vm8 = vcmp.gt.f32.partialorder %v610_v14, 0.0 }
 0x1ef   :  { %v864_v8 = vmul.f32 1.442695, %v761_v49 }
 0x1f0   :  { %2579 = vmatmul.mubr.f32.gmra.mrb[88].mxu1 %v1458_v2  ;;  %v862_v22 = vmul.f32 1.442695, %v760_v29  ;;  %v1112_v2 = vld [vmem:[%s20054_s25 + $0x3b0] sm:$0xff] }
 0x1f1   :  { %2583 = vmatprep.mubr.f32.mxu1 %v1463_v7  ;;  %15604 = vpow2.f32 %v864_v8  ;;  %v1519_v12 = vunpack.c.h.bf16 %v1112_v2  ;;  %v1118_v8 = vld [vmem:[%s20054_s25 + $0x3e0] sm:$0xff] }
 0x1f2   :  { %15606 = vpow2.f32 %v862_v22 }
 0x1f4   :  { %2584 = vmatmul.mubr.f32.gmra.mrb[90].mxu1 %v1462_v15  ;;  %v1518_v15 = vunpack.c.l.bf16 %v1112_v2 }
 0x1f5   :  { %2588 = vmatprep.mubr.f32.mxu1 %v1467_v50  ;;  %v1116_v50 = vld [vmem:[%s20054_s25 + $0x3d0] sm:$0xff] }
 0x1f6   :  { %v1527_v18 = vunpack.c.h.bf16 %v1116_v50 }
 0x1f8   :  { %2589 = vmatmul.mubr.f32.gmra.mrb[92].mxu1 %v1466_v56 }
 0x1f9   :  { %2593 = vmatprep.mubr.f32.mxu1 %v1471_v11  ;;  %v1526_v11 = vunpack.c.l.bf16 %v1116_v50 }
 0x1fb   :  { %v15605_v1 = vpop.eup %15604 }
 0x1fc   :  { %2594 = vmatmul.mubr.f32.gmra.mrb[94].mxu1 %v1470_v62  ;;  %v15607_v44 = vpop.eup %15606  ;;  %v11905_v34 = vadd.f32 -1.0, %v15605_v1  ;;  %v1531_v62 = vunpack.c.h.bf16 %v1118_v8  ;;  %v1530_v1 = vunpack.c.l.bf16 %v1118_v8 }
 0x1fd   :  { %2598 = vmatprep.mubr.f32.mxu1 %v1475_v27  ;;  %v11904_v36 = vadd.f32 -1.0, %v15607_v44  ;;  %v1535_v44 = vunpack.c.h.bf16 %v1120_v59 }
 0x1fe   :  { %v985_v20 = vsel %vm705_vm3, %v615_v6, %v11905_v34  ;;  %v1122_v34 = vld [vmem:[%s20054_s25 + $0x400] sm:$0xff] }
 0x1ff   :  { %v984_v39 = vsel %vm704_vm8, %v610_v14, %v11904_v36  ;;  %v1114_v14 = vld [vmem:[%s20054_s25 + $0x3c0] sm:$0xff]  ;;  %v1539_v36 = vunpack.c.h.bf16 %v1122_v34 }
 0x200   :  { %2599 = vmatmul.mubr.f32.gmra.mrb[96].mxu1 %v1474_v28  ;;  %v14269_v40 = vpack.c.bf16 %v985_v20, %v984_v39  ;;  %v1523_v49 = vunpack.c.h.bf16 %v1114_v14  ;;  %v1522_v29 = vunpack.c.l.bf16 %v1114_v14  ;;  %v1538_v20 = vunpack.c.l.bf16 %v1122_v34  ;;  %v1126_v39 = vld [vmem:[%s20054_s25 + $0x420] sm:$0xff] }
 0x201   :  { %2603 = vmatprep.mubr.f32.mxu1 %v1479_v30  ;;  %v1546_v13 = vunpack.c.l.bf16 %v1126_v39 }
 0x202   :  { %14270 = vmatpush1.bf16.msra.mxu1 %v14269_v40 }
 0x203   :  { %14271 = vmatprep.subr.bf16.mxu1 %v15735_v45 }
 0x204   :  { %2604 = vmatmul.mubr.f32.gmra.mrb[98].mxu1 %v1478_v16  ;;  %v1534_v16 = vunpack.c.l.bf16 %v1120_v59 }
 0x205   :  { %2608 = vmatprep.mubr.f32.mxu1 %v1483_v37  ;;  %v1124_v37 = vld [vmem:[%s20054_s25 + $0x410] sm:$0xff] }
 0x206   :  { %v1543_v9 = vunpack.c.h.bf16 %v1124_v37  ;;  %v1542_v40 = vunpack.c.l.bf16 %v1124_v37 }
 0x208   :  { %2609 = vmatmul.mubr.f32.gmra.mrb[100].mxu1 %v1482_v24  ;;  %v1547_v24 = vunpack.c.h.bf16 %v1126_v39 }
 0x209   :  { %2613 = vmatprep.mubr.f32.mxu1 %v1487_v42  ;;  %v13385_v54 = vpop.f32.mrb[48].mxu0  ;;  %v1128_v42 = vld [vmem:[%s20054_s25 + $0x430] sm:$0xff] }
 0x20a   :  { %v625_v52 = vadd.f32 %v16426_v3, %v13385_v54  ;;  %v619_v0 = vpop.f32.mrb[49].mxu0  ;;  %v1550_v48 = vunpack.c.l.bf16 %v1128_v42 }
 0x20b   :  { %v620_v4 = vadd.f32 %v16426_v3, %v619_v0 }
 0x20c   :  { %2614 = vmatmul.mubr.f32.gmra.mrb[102].mxu1 %v1486_v43  ;;  %v763_v38 = vmin.f32 %v625_v52, 0.0  ;;  %vm707_vm9 = vcmp.gt.f32.partialorder %v625_v52, 0.0  ;;  %v1551_v43 = vunpack.c.h.bf16 %v1128_v42  ;;  %v1158_v42 = vld [vmem:[%s20054_s25 + $0x520] sm:$0xff] }
 0x20d   :  { %2618 = vmatprep.mubr.f32.mxu1 %v1491_v46  ;;  %v762_v7 = vmin.f32 %v620_v4, 0.0  ;;  %vm706_vm10 = vcmp.gt.f32.partialorder %v620_v4, 0.0  ;;  %v1130_v46 = vld [vmem:[%s20054_s25 + $0x440] sm:$0xff] }
 0x20e   :  { %v868_v10 = vmul.f32 1.442695, %v763_v38  ;;  %v1554_v47 = vunpack.c.l.bf16 %v1130_v46  ;;  %v1140_v38 = vld [vmem:[%s20054_s25 + $0x490] sm:$0xff] }
 0x20f   :  { %v866_v6 = vmul.f32 1.442695, %v762_v7  ;;  %v1575_v7 = vunpack.c.h.bf16 %v1140_v38  ;;  %v1574_v14 = vunpack.c.l.bf16 %v1140_v38 }
 0x210   :  { %2619 = vmatmul.mubr.f32.gmra.mrb[104].mxu1 %v1490_v35  ;;  %15608 = vpow2.f32 %v868_v10  ;;  %v1555_v35 = vunpack.c.h.bf16 %v1130_v46 }
 0x211   :  { %2623 = vmatprep.mubr.f32.mxu1 %v1495_v21  ;;  %15610 = vpow2.f32 %v866_v6  ;;  %v1132_v21 = vld [vmem:[%s20054_s25 + $0x450] sm:$0xff] }
 0x214   :  { %2624 = vmatmul.mubr.f32.gmra.mrb[106].mxu1 %v1494_v51  ;;  %v1559_v51 = vunpack.c.h.bf16 %v1132_v21 }
 0x215   :  { %2628 = vmatprep.mubr.f32.mxu1 %v1499_v25 }
 0x218   :  { %2629 = vmatmul.mubr.f32.gmra.mrb[108].mxu1 %v1498_v17 }
 0x219   :  { %2633 = vmatprep.mubr.f32.mxu1 %v1503_v55 }
 0x21a   :  { %v15609_v22 = vpop.eup %15608 }
 0x21b   :  { %v15611_v56 = vpop.eup %15610  ;;  %v11907_v23 = vadd.f32 -1.0, %v15609_v22 }
 0x21c   :  { %2634 = vmatmul.mubr.f32.gmra.mrb[110].mxu1 %v1502_v26  ;;  %v11906_v27 = vadd.f32 -1.0, %v15611_v56  ;;  %v1558_v26 = vunpack.c.l.bf16 %v1132_v21  ;;  %v1611_v21 = vunpack.c.h.bf16 %v1158_v42 }
 0x21d   :  { %2638 = vmatprep.mubr.f32.mxu1 %v1507_v58  ;;  %v987_v28 = vsel %vm707_vm9, %v625_v52, %v11907_v23  ;;  %v1562_v52 = vunpack.c.l.bf16 %v1134_v53 }
 0x21e   :  { %v986_v30 = vsel %vm706_vm10, %v620_v4, %v11906_v27  ;;  %v13388_v25 = vpop.f32.mrb[50].mxu0  ;;  %v1148_v27 = vld [vmem:[%s20054_s25 + $0x4d0] sm:$0xff] }
 0x21f   :  { %v14272_v31 = vpack.c.bf16 %v987_v28, %v986_v30  ;;  %v635_v17 = vadd.f32 %v16426_v3, %v13388_v25  ;;  %v629_v55 = vpop.f32.mrb[51].mxu0  ;;  %v1591_v28 = vunpack.c.h.bf16 %v1148_v27  ;;  %v1150_v30 = vld [vmem:[%s20054_s25 + $0x4e0] sm:$0xff] }
 0x220   :  { %2639 = vmatmul.mubr.f32.gmra.mrb[112].mxu1 %v1506_v32  ;;  %v630_v57 = vadd.f32 %v16426_v3, %v629_v55  ;;  %v1594_v34 = vunpack.c.l.bf16 %v1150_v30 }
 0x221   :  { %2643 = vmatprep.mubr.f32.mxu1 %v1511_v33  ;;  %14273 = vmatpush1.bf16.msra.mxu1 %v14272_v31  ;;  %v765_v58 = vmin.f32 %v635_v17, 0.0  ;;  %v1136_v33 = vld [vmem:[%s20054_s25 + $0x470] sm:$0xff]  ;;  %vm709_vm11 = vcmp.gt.f32.partialorder %v635_v17, 0.0  ;;  %v1595_v31 = vunpack.c.h.bf16 %v1150_v30 }
 0x222   :  { %14274 = vmatprep.subr.bf16.mxu1 %v15735_v45  ;;  %v764_v32 = vmin.f32 %v630_v57, 0.0  ;;  %v1567_v0 = vunpack.c.h.bf16 %v1136_v33  ;;  %v1566_v4 = vunpack.c.l.bf16 %v1136_v33  ;;  %vm708_vm12 = vcmp.gt.f32.partialorder %v630_v57, 0.0 }
 0x223   :  { %v872_v19 = vmul.f32 1.442695, %v765_v58 }
 0x224   :  { %2644 = vmatmul.mubr.f32.gmra.mrb[114].mxu1 %v1510_v63  ;;  %v870_v54 = vmul.f32 1.442695, %v764_v32  ;;  %v1138_v63 = vld [vmem:[%s20054_s25 + $0x480] sm:$0xff] }
 0x225   :  { %2648 = vmatprep.mubr.f32.mxu1 %v1515_v61  ;;  %15612 = vpow2.f32 %v872_v19  ;;  %v1571_v61 = vunpack.c.h.bf16 %v1138_v63  ;;  %v1570_v2 = vunpack.c.l.bf16 %v1138_v63 }
 0x226   :  { %15614 = vpow2.f32 %v870_v54  ;;  %v1166_v54 = vld [vmem:[%s20054_s25 + $0x560] sm:$0xff] }
 0x228   :  { %2649 = vmatmul.mubr.f32.gmra.mrb[116].mxu1 %v1514_v41  ;;  %v1142_v41 = vld [vmem:[%s20054_s25 + $0x4a0] sm:$0xff] }
 0x229   :  { %2653 = vmatprep.mubr.f32.mxu1 %v1519_v12  ;;  %v1578_v22 = vunpack.c.l.bf16 %v1142_v41 }
 0x22c   :  { %2654 = vmatmul.mubr.f32.gmra.mrb[118].mxu1 %v1518_v15 }
 0x22d   :  { %2658 = vmatprep.mubr.f32.mxu1 %v1523_v49  ;;  %v1579_v49 = vunpack.c.h.bf16 %v1142_v41  ;;  %v1626_v41 = vunpack.c.l.bf16 %v1166_v54 }
 0x22f   :  { %v15613_v10 = vpop.eup %15612 }
 0x230   :  { %2659 = vmatmul.mubr.f32.gmra.mrb[120].mxu1 %v1522_v29  ;;  %v15615_v6 = vpop.eup %15614  ;;  %v11909_v12 = vadd.f32 -1.0, %v15613_v10  ;;  %v1144_v29 = vld [vmem:[%s20054_s25 + $0x4b0] sm:$0xff] }
 0x231   :  { %2663 = vmatprep.mubr.f32.mxu1 %v1527_v18  ;;  %v11908_v15 = vadd.f32 -1.0, %v15615_v6  ;;  %v1583_v56 = vunpack.c.h.bf16 %v1144_v29  ;;  %v1582_v23 = vunpack.c.l.bf16 %v1144_v29 }
 0x232   :  { %v989_v50 = vsel %vm709_vm11, %v635_v17, %v11909_v12  ;;  %v1610_v17 = vunpack.c.l.bf16 %v1158_v42  ;;  %v1170_v12 = vld [vmem:[%s20054_s25 + $0x580] sm:$0xff] }
 0x233   :  { %v988_v18 = vsel %vm708_vm12, %v630_v57, %v11908_v15  ;;  %v1162_v57 = vld [vmem:[%s20054_s25 + $0x540] sm:$0xff]  ;;  %v1635_v15 = vunpack.c.h.bf16 %v1170_v12 }
 0x234   :  { %2664 = vmatmul.mubr.f32.gmra.mrb[122].mxu1 %v1526_v11  ;;  %v14275_v8 = vpack.c.bf16 %v989_v50, %v988_v18  ;;  %v1146_v11 = vld [vmem:[%s20054_s25 + $0x4c0] sm:$0xff]  ;;  %v1619_v58 = vunpack.c.h.bf16 %v1162_v57  ;;  %v1618_v32 = vunpack.c.l.bf16 %v1162_v57  ;;  %v1634_v50 = vunpack.c.l.bf16 %v1170_v12 }
 0x235   :  { %2668 = vmatprep.mubr.f32.mxu1 %v1531_v62  ;;  %v1587_v62 = vunpack.c.h.bf16 %v1146_v11  ;;  %v1586_v59 = vunpack.c.l.bf16 %v1146_v11  ;;  %v1174_v18 = vld [vmem:[%s20054_s25 + $0x5a0] sm:$0xff] }
 0x236   :  { %14276 = vmatpush1.bf16.msra.mxu1 %v14275_v8  ;;  %v1642_v11 = vunpack.c.l.bf16 %v1174_v18  ;;  %v1202_v12 = vld [vmem:[%s20054_s25 + $0x680] sm:$0xff] }
 0x237   :  { %14277 = vmatprep.subr.bf16.mxu1 %v15735_v45 }
 0x238   :  { %2669 = vmatmul.mubr.f32.gmra.mrb[124].mxu1 %v1530_v1  ;;  %v1590_v1 = vunpack.c.l.bf16 %v1148_v27 }
 0x239   :  { %2673 = vmatprep.mubr.f32.mxu1 %v1535_v44  ;;  %v1152_v44 = vld [vmem:[%s20054_s25 + $0x4f0] sm:$0xff] }
 0x23a   :  { %v1598_v37 = vunpack.c.l.bf16 %v1152_v44 }
 0x23c   :  { %2674 = vmatmul.mubr.f32.gmra.mrb[126].mxu1 %v1534_v16  ;;  %v1599_v16 = vunpack.c.h.bf16 %v1152_v44  ;;  %v1182_v44 = vld [vmem:[%s20054_s25 + $0x5e0] sm:$0xff] }
 0x23d   :  { %2678 = vmatprep.mubr.f32.mxu1 %v1539_v36  ;;  %v1154_v36 = vld [vmem:[%s20054_s25 + $0x500] sm:$0xff] }
 0x23e   :  { %v1602_v39 = vunpack.c.l.bf16 %v1154_v36 }
 0x240   :  { %2679 = vmatmul.mubr.f32.gmra.mrb[128].mxu1 %v1538_v20  ;;  %v1603_v20 = vunpack.c.h.bf16 %v1154_v36 }
 0x241   :  { %2683 = vmatprep.mubr.f32.mxu1 %v1543_v9  ;;  %v1156_v9 = vld [vmem:[%s20054_s25 + $0x510] sm:$0xff] }
 0x244   :  { %2684 = vmatmul.mubr.f32.gmra.mrb[130].mxu1 %v1542_v40  ;;  %v1607_v40 = vunpack.c.h.bf16 %v1156_v9 }
 0x245   :  { %2688 = vmatprep.mubr.f32.mxu1 %v1547_v24  ;;  %v13391_v24 = vpop.f32.mrb[52].mxu0 }
 0x248   :  { %2689 = vmatmul.mubr.f32.gmra.mrb[132].mxu1 %v1546_v13  ;;  %v645_v13 = vadd.f32 %v16426_v3, %v13391_v24 }
 0x249   :  { %2693 = vmatprep.mubr.f32.mxu1 %v1551_v43  ;;  %v639_v43 = vpop.f32.mrb[53].mxu0 }
 0x24a   :  { %v640_v46 = vadd.f32 %v16426_v3, %v639_v43  ;;  %vm711_vm13 = vcmp.gt.f32.partialorder %v645_v13, 0.0 }
 0x24c   :  { %2694 = vmatmul.mubr.f32.gmra.mrb[134].mxu1 %v1550_v48  ;;  %v1606_v48 = vunpack.c.l.bf16 %v1156_v9  ;;  %vm710_vm14 = vcmp.gt.f32.partialorder %v640_v46, 0.0  ;;  %v1659_v9 = vunpack.c.h.bf16 %v1182_v44 }
 0x24d   :  { %2698 = vmatprep.mubr.f32.mxu1 %v1555_v35  ;;  %v767_v35 = vmin.f32 %v645_v13, 0.0 }
 0x24f   :  { %v876_v25 = vmul.f32 1.442695, %v767_v35  ;;  %v1188_v35 = vld [vmem:[%s20054_s25 + $0x610] sm:$0xff] }
 0x250   :  { %2699 = vmatmul.mubr.f32.gmra.mrb[136].mxu1 %v1554_v47  ;;  %v766_v47 = vmin.f32 %v640_v46, 0.0 }
 0x251   :  { %2703 = vmatprep.mubr.f32.mxu1 %v1559_v51  ;;  %v1160_v51 = vld [vmem:[%s20054_s25 + $0x530] sm:$0xff]  ;;  %15616 = vpow2.f32 %v876_v25  ;;  %v1190_v25 = vld [vmem:[%s20054_s25 + $0x620] sm:$0xff] }
 0x252   :  { %v874_v53 = vmul.f32 1.442695, %v766_v47  ;;  %v1615_v55 = vunpack.c.h.bf16 %v1160_v51  ;;  %v1671_v47 = vunpack.c.h.bf16 %v1188_v35 }
 0x254   :  { %2704 = vmatmul.mubr.f32.gmra.mrb[138].mxu1 %v1558_v26  ;;  %15618 = vpow2.f32 %v874_v53  ;;  %v1614_v26 = vunpack.c.l.bf16 %v1160_v51 }
 0x255   :  { %2708 = vmatprep.mubr.f32.mxu1 %v1563_v60  ;;  %v1164_v60 = vld [vmem:[%s20054_s25 + $0x550] sm:$0xff] }
 0x256   :  { %v1623_v33 = vunpack.c.h.bf16 %v1164_v60  ;;  %v1622_v63 = vunpack.c.l.bf16 %v1164_v60  ;;  %v1192_v60 = vld [vmem:[%s20054_s25 + $0x630] sm:$0xff] }
 0x258   :  { %2709 = vmatmul.mubr.f32.gmra.mrb[140].mxu1 %v1562_v52 }
 0x259   :  { %2713 = vmatprep.mubr.f32.mxu1 %v1567_v0 }
 0x25b   :  { %v15617_v19 = vpop.eup %15616 }
 0x25c   :  { %2714 = vmatmul.mubr.f32.gmra.mrb[142].mxu1 %v1566_v4  ;;  %v11911_v0 = vadd.f32 -1.0, %v15617_v19  ;;  %v1674_v19 = vunpack.c.l.bf16 %v1190_v25 }
 0x25d   :  { %2718 = vmatprep.mubr.f32.mxu1 %v1571_v61  ;;  %v1627_v61 = vunpack.c.h.bf16 %v1166_v54  ;;  %v1679_v54 = vunpack.c.h.bf16 %v1192_v60 }
 0x25e   :  { %v15619_v52 = vpop.eup %15618  ;;  %v991_v38 = vsel %vm711_vm13, %v645_v13, %v11911_v0  ;;  %v1658_v13 = vunpack.c.l.bf16 %v1182_v44  ;;  %v1678_v0 = vunpack.c.l.bf16 %v1192_v60 }
 0x25f   :  { %v11910_v4 = vadd.f32 -1.0, %v15619_v52  ;;  %v1194_v52 = vld [vmem:[%s20054_s25 + $0x640] sm:$0xff] }
 0x260   :  { %2719 = vmatmul.mubr.f32.gmra.mrb[144].mxu1 %v1570_v2  ;;  %v1168_v2 = vld [vmem:[%s20054_s25 + $0x570] sm:$0xff] }
 0x261   :  { %2723 = vmatprep.mubr.f32.mxu1 %v1575_v7  ;;  %v990_v7 = vsel %vm710_vm14, %v640_v46, %v11910_v4  ;;  %v1631_v6 = vunpack.c.h.bf16 %v1168_v2  ;;  %v1196_v4 = vld [vmem:[%s20054_s25 + $0x650] sm:$0xff] }
 0x262   :  { %v14278_v10 = vpack.c.bf16 %v991_v38, %v990_v7  ;;  %v1687_v38 = vunpack.c.h.bf16 %v1196_v4  ;;  %v1691_v7 = vunpack.c.h.bf16 %v1198_v5 }
 0x264   :  { %2724 = vmatmul.mubr.f32.gmra.mrb[146].mxu1 %v1574_v14  ;;  %v1630_v14 = vunpack.c.l.bf16 %v1168_v2  ;;  %v1686_v2 = vunpack.c.l.bf16 %v1196_v4  ;;  %v1238_v4 = vld [vmem:[%s20054_s25 + $0x7a0] sm:$0xff] }
 0x265   :  { %2728 = vmatprep.mubr.f32.mxu1 %v1579_v49  ;;  %14279 = vmatpush1.bf16.msra.mxu1 %v14278_v10  ;;  %v1172_v49 = vld [vmem:[%s20054_s25 + $0x590] sm:$0xff] }
 0x266   :  { %14280 = vmatprep.subr.bf16.mxu1 %v15735_v45  ;;  %v1639_v29 = vunpack.c.h.bf16 %v1172_v49  ;;  %v1638_v8 = vunpack.c.l.bf16 %v1172_v49  ;;  %v1200_v10 = vld [vmem:[%s20054_s25 + $0x670] sm:$0xff] }
 0x267   :  { %v1204_v49 = vld [vmem:[%s20054_s25 + $0x690] sm:$0xff] }
 0x268   :  { %2729 = vmatmul.mubr.f32.gmra.mrb[148].mxu1 %v1578_v22  ;;  %v1643_v22 = vunpack.c.h.bf16 %v1174_v18  ;;  %v1206_v18 = vld [vmem:[%s20054_s25 + $0x6a0] sm:$0xff] }
 0x269   :  { %2733 = vmatprep.mubr.f32.mxu1 %v1583_v56  ;;  %v1176_v56 = vld [vmem:[%s20054_s25 + $0x5b0] sm:$0xff] }
 0x26a   :  { %v1646_v27 = vunpack.c.l.bf16 %v1176_v56 }
 0x26c   :  { %2734 = vmatmul.mubr.f32.gmra.mrb[150].mxu1 %v1582_v23  ;;  %v1647_v23 = vunpack.c.h.bf16 %v1176_v56  ;;  %v1208_v56 = vld [vmem:[%s20054_s25 + $0x6b0] sm:$0xff] }
 0x26d   :  { %2738 = vmatprep.mubr.f32.mxu1 %v1587_v62  ;;  %v1178_v62 = vld [vmem:[%s20054_s25 + $0x5c0] sm:$0xff] }
 0x26e   :  { %v1650_v30 = vunpack.c.l.bf16 %v1178_v62 }
 0x270   :  { %2739 = vmatmul.mubr.f32.gmra.mrb[152].mxu1 %v1586_v59  ;;  %v1651_v59 = vunpack.c.h.bf16 %v1178_v62  ;;  %v1210_v62 = vld [vmem:[%s20054_s25 + $0x6c0] sm:$0xff] }
 0x271   :  { %2743 = vmatprep.mubr.f32.mxu1 %v1591_v28  ;;  %v1180_v28 = vld [vmem:[%s20054_s25 + $0x5d0] sm:$0xff] }
 0x274   :  { %2744 = vmatmul.mubr.f32.gmra.mrb[154].mxu1 %v1590_v1  ;;  %v1655_v1 = vunpack.c.h.bf16 %v1180_v28 }
 0x275   :  { %2748 = vmatprep.mubr.f32.mxu1 %v1595_v31  ;;  %v13394_v31 = vpop.f32.mrb[54].mxu0 }
 0x278   :  { %2749 = vmatmul.mubr.f32.gmra.mrb[156].mxu1 %v1594_v34  ;;  %v655_v34 = vadd.f32 %v16426_v3, %v13394_v31  ;;  %v1214_v31 = vld [vmem:[%s20054_s25 + $0x6e0] sm:$0xff] }
 0x279   :  { %2753 = vmatprep.mubr.f32.mxu1 %v1599_v16  ;;  %v649_v16 = vpop.f32.mrb[55].mxu0 }
 0x27a   :  { %v650_v36 = vadd.f32 %v16426_v3, %v649_v16  ;;  %v1186_v3 = vld [vmem:[%s20054_s25 + $0x600] sm:$0xff]  ;;  %vm713_vm15 = vcmp.gt.f32.partialorder %v655_v34, 0.0  ;;  %v1216_v16 = vld [vmem:[%s20054_s25 + $0x6f0] sm:$0xff] }
 0x27c   :  { %2754 = vmatmul.mubr.f32.gmra.mrb[158].mxu1 %v1598_v37  ;;  %v1654_v37 = vunpack.c.l.bf16 %v1180_v28  ;;  %vm712_vm0 = vcmp.gt.f32.partialorder %v650_v36, 0.0  ;;  %v1212_v28 = vld [vmem:[%s20054_s25 + $0x6d0] sm:$0xff] }
 0x27d   :  { %2758 = vmatprep.mubr.f32.mxu1 %v1603_v20  ;;  %v769_v20 = vmin.f32 %v655_v34, 0.0  ;;  %v1718_v44 = vunpack.c.l.bf16 %v1212_v28 }
 0x27f   :  { %v880_v24 = vmul.f32 1.442695, %v769_v20  ;;  %v1218_v20 = vld [vmem:[%s20054_s25 + $0x700] sm:$0xff] }
 0x280   :  { %2759 = vmatmul.mubr.f32.gmra.mrb[160].mxu1 %v1602_v39  ;;  %v768_v39 = vmin.f32 %v650_v36, 0.0 }
 0x281   :  { %2763 = vmatprep.mubr.f32.mxu1 %v1607_v40  ;;  %v1184_v40 = vld [vmem:[%s20054_s25 + $0x5f0] sm:$0xff]  ;;  %15620 = vpow2.f32 %v880_v24  ;;  %v1730_v24 = vunpack.c.l.bf16 %v1218_v20 }
 0x282   :  { %v878_v42 = vmul.f32 1.442695, %v768_v39  ;;  %v1663_v43 = vunpack.c.h.bf16 %v1184_v40  ;;  %v1662_v46 = vunpack.c.l.bf16 %v1184_v40  ;;  %v1731_v39 = vunpack.c.h.bf16 %v1218_v20  ;;  %v1220_v40 = vld [vmem:[%s20054_s25 + $0x710] sm:$0xff] }
 0x284   :  { %2764 = vmatmul.mubr.f32.gmra.mrb[162].mxu1 %v1606_v48  ;;  %15622 = vpow2.f32 %v878_v42  ;;  %v1667_v48 = vunpack.c.h.bf16 %v1186_v3  ;;  %v1735_v42 = vunpack.c.h.bf16 %v1220_v40 }
 0x285   :  { %2768 = vmatprep.mubr.f32.mxu1 %v1611_v21  ;;  %v1666_v21 = vunpack.c.l.bf16 %v1186_v3 }
 0x288   :  { %2769 = vmatmul.mubr.f32.gmra.mrb[164].mxu1 %v1610_v17 }
 0x289   :  { %2773 = vmatprep.mubr.f32.mxu1 %v1615_v55  ;;  %v1670_v55 = vunpack.c.l.bf16 %v1188_v35 }
 0x28b   :  { %v15621_v51 = vpop.eup %15620 }
 0x28c   :  { %2774 = vmatmul.mubr.f32.gmra.mrb[166].mxu1 %v1614_v26  ;;  %v11913_v17 = vadd.f32 -1.0, %v15621_v51  ;;  %v1675_v26 = vunpack.c.h.bf16 %v1190_v25  ;;  %v1228_v25 = vld [vmem:[%s20054_s25 + $0x750] sm:$0xff] }
 0x28d   :  { %2778 = vmatprep.mubr.f32.mxu1 %v1619_v58 }
 0x28e   :  { %v15623_v53 = vpop.eup %15622  ;;  %v993_v58 = vsel %vm713_vm15, %v655_v34, %v11913_v17  ;;  %v1723_v34 = vunpack.c.h.bf16 %v1214_v31  ;;  %v1751_v17 = vunpack.c.h.bf16 %v1228_v25 }
 0x28f   :  { %v11912_v57 = vadd.f32 -1.0, %v15623_v53 }
 0x290   :  { %2779 = vmatmul.mubr.f32.gmra.mrb[168].mxu1 %v1618_v32 }
 0x291   :  { %2783 = vmatprep.mubr.f32.mxu1 %v1623_v33  ;;  %v992_v32 = vsel %vm712_vm0, %v650_v36, %v11912_v57  ;;  %v1722_v36 = vunpack.c.l.bf16 %v1214_v31  ;;  %v1750_v57 = vunpack.c.l.bf16 %v1228_v25 }
 0x292   :  { %v14281_v33 = vpack.c.bf16 %v993_v58, %v992_v32  ;;  %v1232_v58 = vld [vmem:[%s20054_s25 + $0x770] sm:$0xff] }
 0x293   :  { %v1759_v32 = vunpack.c.h.bf16 %v1232_v58 }
 0x294   :  { %2784 = vmatmul.mubr.f32.gmra.mrb[170].mxu1 %v1622_v63  ;;  %v1683_v63 = vunpack.c.h.bf16 %v1194_v52 }
 0x295   :  { %2788 = vmatprep.mubr.f32.mxu1 %v1627_v61  ;;  %14283 = vmatpush1.bf16.msk.msra.mxu1 %vm15873_vm2, %v14281_v33  ;;  %v1682_v61 = vunpack.c.l.bf16 %v1194_v52  ;;  %v1234_v33 = vld [vmem:[%s20054_s25 + $0x780] sm:$0xff]  ;;  %v1236_v52 = vld [vmem:[%s20054_s25 + $0x790] sm:$0xff]  ;;  %vm1858_vm2 = vcmask 465920  }
 0x298   :  { %2789 = vmatmul.mubr.f32.gmra.mrb[172].mxu1 %v1626_v41  ;;  %v1690_v41 = vunpack.c.l.bf16 %v1198_v5  ;;  %v1240_v5 = vld [vmem:[%s20054_s25 + $0x7b0] sm:$0xff] }
 0x299   :  { %2793 = vmatprep.mubr.f32.mxu1 %v1631_v6  ;;  %v1695_v6 = vunpack.c.h.bf16 %v1200_v10 }
 0x29c   :  { %2794 = vmatmul.mubr.f32.gmra.mrb[174].mxu1 %v1630_v14  ;;  %v1694_v14 = vunpack.c.l.bf16 %v1200_v10  ;;  %v1242_v10 = vld [vmem:[%s20054_s25 + $0x7c0] sm:$0xff] }
 0x29d   :  { %2798 = vmatprep.mubr.f32.mxu1 %v1635_v15  ;;  %v1699_v15 = vunpack.c.h.bf16 %v1202_v12 }
 0x2a0   :  { %2799 = vmatmul.mubr.f32.gmra.mrb[176].mxu1 %v1634_v50  ;;  %v1698_v50 = vunpack.c.l.bf16 %v1202_v12  ;;  %v1244_v12 = vld [vmem:[%s20054_s25 + $0x7d0] sm:$0xff] }
 0x2a1   :  { %2803 = vmatprep.mubr.f32.mxu1 %v1639_v29  ;;  %v1703_v29 = vunpack.c.h.bf16 %v1204_v49 }
 0x2a4   :  { %2804 = vmatmul.mubr.f32.gmra.mrb[178].mxu1 %v1638_v8  ;;  %v1702_v8 = vunpack.c.l.bf16 %v1204_v49  ;;  %v1246_v49 = vld [vmem:[%s20054_s25 + $0x7e0] sm:$0xff] }
 0x2a5   :  { %2808 = vmatprep.mubr.f32.mxu1 %v1643_v22  ;;  %v1707_v22 = vunpack.c.h.bf16 %v1206_v18 }
 0x2a8   :  { %2809 = vmatmul.mubr.f32.gmra.mrb[180].mxu1 %v1642_v11  ;;  %v1706_v11 = vunpack.c.l.bf16 %v1206_v18  ;;  %v1248_v18 = vld [vmem:[%s20054_s25 + $0x7f0] sm:$0xff] }
 0x2a9   :  { %2813 = vmatprep.mubr.f32.mxu1 %v1647_v23  ;;  %v1711_v23 = vunpack.c.h.bf16 %v1208_v56 }
 0x2ac   :  { %2814 = vmatmul.mubr.f32.gmra.mrb[182].mxu1 %v1646_v27  ;;  %v1710_v27 = vunpack.c.l.bf16 %v1208_v56  ;;  %v1250_v56 = vld [vmem:[%s20054_s25 + $0x800] sm:$0xff] }
 0x2ad   :  { %2818 = vmatprep.mubr.f32.mxu1 %v1651_v59  ;;  %v1715_v59 = vunpack.c.h.bf16 %v1210_v62 }
 0x2b0   :  { %2819 = vmatmul.mubr.f32.gmra.mrb[184].mxu1 %v1650_v30  ;;  %v1714_v30 = vunpack.c.l.bf16 %v1210_v62  ;;  %v1252_v62 = vld [vmem:[%s20054_s25 + $0x810] sm:$0xff] }
 0x2b1   :  { %2823 = vmatprep.mubr.f32.mxu1 %v1655_v1  ;;  %v1719_v1 = vunpack.c.h.bf16 %v1212_v28  ;;  %v1254_v28 = vld [vmem:[%s20054_s25 + $0x820] sm:$0xff]  ;;  %v1798_v31 = vunpack.c.l.bf16 %v1252_v62 }
 0x2b4   :  { %2824 = vmatmul.mubr.f32.gmra.mrb[186].mxu1 %v1654_v37  ;;  %v1727_v37 = vunpack.c.h.bf16 %v1216_v16 }
 0x2b5   :  { %2828 = vmatprep.mubr.f32.mxu1 %v1659_v9  ;;  %v1726_v9 = vunpack.c.l.bf16 %v1216_v16 }
 0x2b8   :  { %2829 = vmatmul.mubr.f32.gmra.mrb[188].mxu1 %v1658_v13  ;;  %v1222_v13 = vld [vmem:[%s20054_s25 + $0x720] sm:$0xff] }
 0x2b9   :  { %2833 = vmatprep.mubr.f32.mxu1 %v1663_v43  ;;  %v1734_v43 = vunpack.c.l.bf16 %v1220_v40  ;;  %v1739_v3 = vunpack.c.h.bf16 %v1222_v13 }
 0x2bc   :  { %2834 = vmatmul.mubr.f32.gmra.mrb[190].mxu1 %v1662_v46  ;;  %v1224_v46 = vld [vmem:[%s20054_s25 + $0x730] sm:$0xff] }
 0x2bd   :  { %2838 = vmatprep.mubr.f32.mxu1 %v1667_v48  ;;  %v1738_v48 = vunpack.c.l.bf16 %v1222_v13  ;;  %v1743_v35 = vunpack.c.h.bf16 %v1224_v46  ;;  %v1260_v13 = vld [vmem:[%s20054_s25 + $0x850] sm:$0xff] }
 0x2c0   :  { %2839 = vmatmul.mubr.f32.gmra.mrb[192].mxu1 %v1666_v21  ;;  %v1226_v21 = vld [vmem:[%s20054_s25 + $0x740] sm:$0xff] }
 0x2c1   :  { %2843 = vmatprep.mubr.f32.mxu1 %v1671_v47  ;;  %v1742_v47 = vunpack.c.l.bf16 %v1224_v46  ;;  %v1747_v51 = vunpack.c.h.bf16 %v1226_v21  ;;  %v1746_v53 = vunpack.c.l.bf16 %v1226_v21 }
 0x2c4   :  { %2844 = vmatmul.mubr.f32.gmra.mrb[194].mxu1 %v1670_v55  ;;  %v1230_v55 = vld [vmem:[%s20054_s25 + $0x760] sm:$0xff] }
 0x2c5   :  { %2848 = vmatprep.mubr.f32.mxu1 %v1675_v26  ;;  %v1755_v26 = vunpack.c.h.bf16 %v1230_v55  ;;  %v1754_v60 = vunpack.c.l.bf16 %v1230_v55 }
 0x2c8   :  { %2849 = vmatmul.mubr.f32.gmra.mrb[196].mxu1 %v1674_v19  ;;  %v1758_v19 = vunpack.c.l.bf16 %v1232_v58  ;;  %v1266_v58 = vld [vmem:[%s20054_s25 + $0x880] sm:$0xff] }
 0x2c9   :  { %2853 = vmatprep.mubr.f32.mxu1 %v1679_v54  ;;  %v1763_v54 = vunpack.c.h.bf16 %v1234_v33 }
 0x2cc   :  { %2854 = vmatmul.mubr.f32.gmra.mrb[198].mxu1 %v1678_v0  ;;  %v1762_v0 = vunpack.c.l.bf16 %v1234_v33 }
 0x2cd   :  { %2858 = vmatprep.mubr.f32.mxu1 %v1683_v63  ;;  %v1767_v63 = vunpack.c.h.bf16 %v1236_v52 }
 0x2d0   :  { %2859 = vmatmul.mubr.f32.gmra.mrb[200].mxu1 %v1682_v61  ;;  %v1766_v61 = vunpack.c.l.bf16 %v1236_v52 }
 0x2d1   :  { %2863 = vmatprep.mubr.f32.mxu1 %v1687_v38  ;;  %v1771_v38 = vunpack.c.h.bf16 %v1238_v4 }
 0x2d4   :  { %2864 = vmatmul.mubr.f32.gmra.mrb[202].mxu1 %v1686_v2  ;;  %v1770_v2 = vunpack.c.l.bf16 %v1238_v4 }
 0x2d5   :  { %2868 = vmatprep.mubr.f32.mxu1 %v1691_v7  ;;  %v1775_v7 = vunpack.c.h.bf16 %v1240_v5 }
 0x2d8   :  { %2869 = vmatmul.mubr.f32.gmra.mrb[204].mxu1 %v1690_v41  ;;  %v1774_v41 = vunpack.c.l.bf16 %v1240_v5 }
 0x2d9   :  { %2873 = vmatprep.mubr.f32.mxu1 %v1695_v6  ;;  %v1779_v6 = vunpack.c.h.bf16 %v1242_v10 }
 0x2dc   :  { %2874 = vmatmul.mubr.f32.gmra.mrb[206].mxu1 %v1694_v14  ;;  %v1778_v14 = vunpack.c.l.bf16 %v1242_v10  ;;  %v1272_v10 = vld [vmem:[%s20054_s25 + $0x8b0] sm:$0xff] }
 0x2dd   :  { %2878 = vmatprep.mubr.f32.mxu1 %v1699_v15  ;;  %v1783_v15 = vunpack.c.h.bf16 %v1244_v12 }
 0x2e0   :  { %2879 = vmatmul.mubr.f32.gmra.mrb[208].mxu1 %v1698_v50  ;;  %v1782_v50 = vunpack.c.l.bf16 %v1244_v12 }
 0x2e1   :  { %2883 = vmatprep.mubr.f32.mxu1 %v1703_v29  ;;  %v1787_v29 = vunpack.c.h.bf16 %v1246_v49 }
 0x2e4   :  { %2884 = vmatmul.mubr.f32.gmra.mrb[210].mxu1 %v1702_v8  ;;  %v1786_v8 = vunpack.c.l.bf16 %v1246_v49 }
 0x2e5   :  { %2888 = vmatprep.mubr.f32.mxu1 %v1707_v22  ;;  %v1791_v22 = vunpack.c.h.bf16 %v1248_v18 }
 0x2e8   :  { %2889 = vmatmul.mubr.f32.gmra.mrb[212].mxu1 %v1706_v11  ;;  %v1790_v11 = vunpack.c.l.bf16 %v1248_v18 }
 0x2e9   :  { %2893 = vmatprep.mubr.f32.mxu1 %v1711_v23  ;;  %v1795_v23 = vunpack.c.h.bf16 %v1250_v56 }
 0x2ec   :  { %2894 = vmatmul.mubr.f32.gmra.mrb[214].mxu1 %v1710_v27  ;;  %v1794_v27 = vunpack.c.l.bf16 %v1250_v56 }
 0x2ed   :  { %2898 = vmatprep.mubr.f32.mxu1 %v1715_v59  ;;  %v1799_v59 = vunpack.c.h.bf16 %v1252_v62  ;;  %v1278_v62 = vld [vmem:[%s20054_s25 + $0x8e0] sm:$0xff] }
 0x2f0   :  { %2899 = vmatmul.mubr.f32.gmra.mrb[216].mxu1 %v1714_v30 }
 0x2f1   :  { %2903 = vmatprep.mubr.f32.mxu1 %v1719_v1 }
 0x2f4   :  { %2904 = vmatmul.mubr.f32.gmra.mrb[218].mxu1 %v1718_v44  ;;  %v1803_v44 = vunpack.c.h.bf16 %v1254_v28 }
 0x2f5   :  { %2908 = vmatprep.mubr.f32.mxu1 %v1723_v34  ;;  %v1256_v34 = vld [vmem:[%s20054_s25 + $0x830] sm:$0xff] }
 0x2f6   :  { %v1807_v20 = vunpack.c.h.bf16 %v1256_v34 }
 0x2f8   :  { %2909 = vmatmul.mubr.f32.gmra.mrb[220].mxu1 %v1722_v36 }
 0x2f9   :  { %2913 = vmatprep.mubr.f32.mxu1 %v1727_v37  ;;  %v1802_v37 = vunpack.c.l.bf16 %v1254_v28 }
 0x2fc   :  { %2914 = vmatmul.mubr.f32.gmra.mrb[222].mxu1 %v1726_v9  ;;  %v1258_v9 = vld [vmem:[%s20054_s25 + $0x840] sm:$0xff] }
 0x2fd   :  { %2918 = vmatprep.mubr.f32.mxu1 %v1731_v39  ;;  %v1810_v46 = vunpack.c.l.bf16 %v1258_v9 }
 0x300   :  { %2919 = vmatmul.mubr.f32.gmra.mrb[224].mxu1 %v1730_v24  ;;  %v1806_v24 = vunpack.c.l.bf16 %v1256_v34 }
 0x301   :  { %2923 = vmatprep.mubr.f32.mxu1 %v1735_v42  ;;  %v1811_v42 = vunpack.c.h.bf16 %v1258_v9 }
 0x304   :  { %2924 = vmatmul.mubr.f32.gmra.mrb[226].mxu1 %v1734_v43 }
 0x305   :  { %2928 = vmatprep.mubr.f32.mxu1 %v1739_v3 }
 0x308   :  { %2929 = vmatmul.mubr.f32.gmra.mrb[228].mxu1 %v1738_v48  ;;  %v1815_v48 = vunpack.c.h.bf16 %v1260_v13 }
 0x309   :  { %2933 = vmatprep.mubr.f32.mxu1 %v1743_v35  ;;  %v1262_v35 = vld [vmem:[%s20054_s25 + $0x860] sm:$0xff] }
 0x30a   :  { %v1819_v25 = vunpack.c.h.bf16 %v1262_v35 }
 0x30c   :  { %2934 = vmatmul.mubr.f32.gmra.mrb[230].mxu1 %v1742_v47 }
 0x30d   :  { %2938 = vmatprep.mubr.f32.mxu1 %v1747_v51  ;;  %v1814_v51 = vunpack.c.l.bf16 %v1260_v13  ;;  %v997_v13 = vld [vmem:[%s20054_s25 + $0x18] sm:$0xff] }
 0x310   :  { %2939 = vmatmul.mubr.f32.gmra.mrb[232].mxu1 %v1746_v53  ;;  %v1264_v53 = vld [vmem:[%s20054_s25 + $0x870] sm:$0xff] }
 0x311   :  { %2943 = vmatprep.mubr.f32.mxu1 %v1751_v17  ;;  %v1822_v33 = vunpack.c.l.bf16 %v1264_v53 }
 0x314   :  { %2944 = vmatmul.mubr.f32.gmra.mrb[234].mxu1 %v1750_v57  ;;  %v1818_v57 = vunpack.c.l.bf16 %v1262_v35  ;;  %v1289_v35 = vunpack.c.h.bf16 %v997_v13 }
 0x315   :  { %2948 = vmatprep.mubr.f32.mxu1 %v1755_v26  ;;  %v1823_v26 = vunpack.c.h.bf16 %v1264_v53  ;;  %v1001_v53 = vld [vmem:[%s20054_s25 + $0x38] sm:$0xff] }
 0x318   :  { %2949 = vmatmul.mubr.f32.gmra.mrb[236].mxu1 %v1754_v60 }
 0x319   :  { %2953 = vmatprep.mubr.f32.mxu1 %v1759_v32 }
 0x31c   :  { %2954 = vmatmul.mubr.f32.gmra.mrb[238].mxu1 %v1758_v19  ;;  %v1827_v19 = vunpack.c.h.bf16 %v1266_v58 }
 0x31d   :  { %2958 = vmatprep.mubr.f32.mxu1 %v1763_v54  ;;  %v1268_v54 = vld [vmem:[%s20054_s25 + $0x890] sm:$0xff] }
 0x31e   :  { %v1831_v4 = vunpack.c.h.bf16 %v1268_v54 }
 0x320   :  { %2959 = vmatmul.mubr.f32.gmra.mrb[240].mxu1 %v1762_v0 }
 0x321   :  { %2963 = vmatprep.mubr.f32.mxu1 %v1767_v63  ;;  %v1826_v63 = vunpack.c.l.bf16 %v1266_v58  ;;  %v1296_v58 = vunpack.c.l.bf16 %v1001_v53 }
 0x324   :  { %2964 = vmatmul.mubr.f32.gmra.mrb[242].mxu1 %v1766_v61  ;;  %v1270_v61 = vld [vmem:[%s20054_s25 + $0x8a0] sm:$0xff] }
 0x325   :  { %2968 = vmatprep.mubr.f32.mxu1 %v1771_v38  ;;  %v1834_v12 = vunpack.c.l.bf16 %v1270_v61 }
 0x328   :  { %2969 = vmatmul.mubr.f32.gmra.mrb[244].mxu1 %v1770_v2  ;;  %v1830_v2 = vunpack.c.l.bf16 %v1268_v54 }
 0x329   :  { %2973 = vmatprep.mubr.f32.mxu1 %v1775_v7  ;;  %v1835_v7 = vunpack.c.h.bf16 %v1270_v61  ;;  %v1009_v61 = vld [vmem:[%s20054_s25 + $0x78] sm:$0xff] }
 0x32c   :  { %2974 = vmatmul.mubr.f32.gmra.mrb[246].mxu1 %v1774_v41 }
 0x32d   :  { %2978 = vmatprep.mubr.f32.mxu1 %v1779_v6 }
 0x330   :  { %2979 = vmatmul.mubr.f32.gmra.mrb[248].mxu1 %v1778_v14  ;;  %v1839_v14 = vunpack.c.h.bf16 %v1272_v10 }
 0x331   :  { %2983 = vmatprep.mubr.f32.mxu1 %v1783_v15  ;;  %v1274_v15 = vld [vmem:[%s20054_s25 + $0x8c0] sm:$0xff] }
 0x332   :  { %v1843_v18 = vunpack.c.h.bf16 %v1274_v15 }
 0x334   :  { %2984 = vmatmul.mubr.f32.gmra.mrb[250].mxu1 %v1782_v50 }
 0x335   :  { %2988 = vmatprep.mubr.f32.mxu1 %v1787_v29  ;;  %v1838_v29 = vunpack.c.l.bf16 %v1272_v10  ;;  %v1312_v10 = vunpack.c.l.bf16 %v1009_v61 }
 0x338   :  { %2989 = vmatmul.mubr.f32.gmra.mrb[252].mxu1 %v1786_v8  ;;  %v1276_v8 = vld [vmem:[%s20054_s25 + $0x8d0] sm:$0xff] }
 0x339   :  { %2993 = vmatprep.mubr.f32.mxu1 %v1791_v22  ;;  %v1846_v28 = vunpack.c.l.bf16 %v1276_v8 }
 0x33c   :  { %2994 = vmatmul.mubr.f32.gmra.mrb[254].mxu1 %v1790_v11  ;;  %v1842_v11 = vunpack.c.l.bf16 %v1274_v15 }
 0x33d   :  { %2998 = vmatprep.mubr.f32.mxu1 %v1795_v23  ;;  %v1847_v23 = vunpack.c.h.bf16 %v1276_v8  ;;  %v1017_v8 = vld [vmem:[%s20054_s25 + $0xb8] sm:$0xff] }
 0x33f   :  { %v16787_v30 = vpop.f32.mrb[150].mxu1 }
 0x340   :  { %v2737_v1 = vpop.f32.mrb[151].mxu1  ;;  %2999 = vmatmul.mubr.f32.gmra.mrb[150].mxu1 %v1794_v27 }
 0x341   :  { %3003 = vmatprep.mubr.f32.mxu1 %v1799_v59  ;;  %v1851_v1 = vunpack.c.h.bf16 %v1278_v62 }
 0x343   :  { %v16792_v16 = vpop.f32.mrb[152].mxu1 }
 0x344   :  { %v2742_v36 = vpop.f32.mrb[153].mxu1  ;;  %3004 = vmatmul.mubr.f32.gmra.mrb[152].mxu1 %v1798_v31  ;;  %v1280_v31 = vld [vmem:[%s20054_s25 + $0x8f0] sm:$0xff] }
 0x345   :  { %3008 = vmatprep.mubr.f32.mxu1 %v1803_v44  ;;  %v1850_v36 = vunpack.c.l.bf16 %v1278_v62  ;;  %v1328_v62 = vunpack.c.l.bf16 %v1017_v8 }
 0x347   :  { %v16797_v39 = vpop.f32.mrb[154].mxu1 }
 0x348   :  { %v2747_v40 = vpop.f32.mrb[155].mxu1  ;;  %3009 = vmatmul.mubr.f32.gmra.mrb[154].mxu1 %v1802_v37  ;;  %v1855_v37 = vunpack.c.h.bf16 %v1280_v31 }
 0x349   :  { %3013 = vmatprep.mubr.f32.mxu1 %v1807_v20  ;;  %v995_v20 = vld [vmem:[%s20054_s25 + $0x8] sm:$0xff] }
 0x34b   :  { %v16802_v43 = vpop.f32.mrb[156].mxu1 }
 0x34c   :  { %v2752_v3 = vpop.f32.mrb[157].mxu1  ;;  %3014 = vmatmul.mubr.f32.gmra.mrb[156].mxu1 %v1806_v24  ;;  %v1854_v24 = vunpack.c.l.bf16 %v1280_v31 }
 0x34d   :  { %3018 = vmatprep.mubr.f32.mxu1 %v1811_v42  ;;  %v1285_v42 = vunpack.c.h.bf16 %v995_v20 }
 0x34f   :  { %v16807_v21 = vpop.f32.mrb[158].mxu1 }
 0x350   :  { %v2757_v47 = vpop.f32.mrb[159].mxu1  ;;  %3019 = vmatmul.mubr.f32.gmra.mrb[158].mxu1 %v1810_v46 }
 0x351   :  { %3023 = vmatprep.mubr.f32.mxu1 %v1815_v48  ;;  %v1284_v48 = vunpack.c.l.bf16 %v995_v20  ;;  %v999_v47 = vld [vmem:[%s20054_s25 + $0x28] sm:$0xff]  ;;  %v1025_v20 = vld [vmem:[%s20054_s25 + $0xf8] sm:$0xff] }
 0x353   :  { %v16812_v17 = vpop.f32.mrb[160].mxu1 }
 0x354   :  { %v2762_v55 = vpop.f32.mrb[161].mxu1  ;;  %3024 = vmatmul.mubr.f32.gmra.mrb[160].mxu1 %v1814_v51  ;;  %v1288_v51 = vunpack.c.l.bf16 %v997_v13  ;;  %v1344_v13 = vunpack.c.l.bf16 %v1025_v20 }
 0x355   :  { %3028 = vmatprep.mubr.f32.mxu1 %v1819_v25  ;;  %v1293_v25 = vunpack.c.h.bf16 %v999_v47  ;;  %v1292_v55 = vunpack.c.l.bf16 %v999_v47 }
 0x357   :  { %v16817_v60 = vpop.f32.mrb[162].mxu1 }
 0x358   :  { %v2767_v32 = vpop.f32.mrb[163].mxu1  ;;  %3029 = vmatmul.mubr.f32.gmra.mrb[162].mxu1 %v1818_v57  ;;  %v1297_v57 = vunpack.c.h.bf16 %v1001_v53 }
 0x359   :  { %3033 = vmatprep.mubr.f32.mxu1 %v1823_v26  ;;  %v1003_v26 = vld [vmem:[%s20054_s25 + $0x48] sm:$0xff] }
 0x35a   :  { %v1301_v32 = vunpack.c.h.bf16 %v1003_v26 }
 0x35b   :  { %v16822_v52 = vpop.f32.mrb[164].mxu1 }
 0x35c   :  { %v2772_v0 = vpop.f32.mrb[165].mxu1  ;;  %3034 = vmatmul.mubr.f32.gmra.mrb[164].mxu1 %v1822_v33  ;;  %v1005_v33 = vld [vmem:[%s20054_s25 + $0x58] sm:$0xff] }
 0x35d   :  { %3038 = vmatprep.mubr.f32.mxu1 %v1827_v19  ;;  %v1300_v19 = vunpack.c.l.bf16 %v1003_v26  ;;  %v1305_v54 = vunpack.c.h.bf16 %v1005_v33  ;;  %v1007_v0 = vld [vmem:[%s20054_s25 + $0x68] sm:$0xff] }
 0x35f   :  { %v16827_v38 = vpop.f32.mrb[166].mxu1 }
 0x360   :  { %v2777_v5 = vpop.f32.mrb[167].mxu1  ;;  %3039 = vmatmul.mubr.f32.gmra.mrb[166].mxu1 %v1826_v63  ;;  %v1304_v63 = vunpack.c.l.bf16 %v1005_v33 }
 0x361   :  { %3043 = vmatprep.mubr.f32.mxu1 %v1831_v4  ;;  %v1309_v4 = vunpack.c.h.bf16 %v1007_v0  ;;  %v1308_v5 = vunpack.c.l.bf16 %v1007_v0 }
 0x363   :  { %v16832_v41 = vpop.f32.mrb[168].mxu1 }
 0x364   :  { %v2782_v6 = vpop.f32.mrb[169].mxu1  ;;  %3044 = vmatmul.mubr.f32.gmra.mrb[168].mxu1 %v1830_v2  ;;  %v1313_v2 = vunpack.c.h.bf16 %v1009_v61  ;;  %v1039_v61 = vld [vmem:[%s20054_s25 + $0x168] sm:$0xff] }
 0x365   :  { %3048 = vmatprep.mubr.f32.mxu1 %v1835_v7  ;;  %v1011_v7 = vld [vmem:[%s20054_s25 + $0x88] sm:$0xff] }
 0x366   :  { %v1317_v6 = vunpack.c.h.bf16 %v1011_v7 }
 0x367   :  { %v16837_v49 = vpop.f32.mrb[170].mxu1 }
 0x368   :  { %v2787_v50 = vpop.f32.mrb[171].mxu1  ;;  %3049 = vmatmul.mubr.f32.gmra.mrb[170].mxu1 %v1834_v12  ;;  %v1013_v12 = vld [vmem:[%s20054_s25 + $0x98] sm:$0xff] }
 0x369   :  { %3053 = vmatprep.mubr.f32.mxu1 %v1839_v14  ;;  %v1316_v14 = vunpack.c.l.bf16 %v1011_v7  ;;  %v1321_v15 = vunpack.c.h.bf16 %v1013_v12  ;;  %v1015_v50 = vld [vmem:[%s20054_s25 + $0xa8] sm:$0xff]  ;;  %v1373_v7 = vunpack.c.h.bf16 %v1039_v61 }
 0x36b   :  { %v16842_v22 = vpop.f32.mrb[172].mxu1 }
 0x36c   :  { %v2792_v56 = vpop.f32.mrb[173].mxu1  ;;  %3054 = vmatmul.mubr.f32.gmra.mrb[172].mxu1 %v1838_v29  ;;  %v1320_v29 = vunpack.c.l.bf16 %v1013_v12  ;;  %v1041_v12 = vld [vmem:[%s20054_s25 + $0x178] sm:$0xff] }
 0x36d   :  { %3058 = vmatprep.mubr.f32.mxu1 %v1843_v18  ;;  %v1325_v18 = vunpack.c.h.bf16 %v1015_v50  ;;  %v1324_v56 = vunpack.c.l.bf16 %v1015_v50  ;;  %v1377_v50 = vunpack.c.h.bf16 %v1041_v12 }
 0x36f   :  { %v16847_v27 = vpop.f32.mrb[174].mxu1 }
 0x370   :  { %v2797_v59 = vpop.f32.mrb[175].mxu1  ;;  %3059 = vmatmul.mubr.f32.gmra.mrb[174].mxu1 %v1842_v11  ;;  %v1329_v11 = vunpack.c.h.bf16 %v1017_v8 }
 0x371   :  { %3063 = vmatprep.mubr.f32.mxu1 %v1847_v23  ;;  %v1019_v23 = vld [vmem:[%s20054_s25 + $0xc8] sm:$0xff] }
 0x372   :  { %v1333_v59 = vunpack.c.h.bf16 %v1019_v23 }
 0x373   :  { %v16852_v44 = vpop.f32.mrb[176].mxu1 }
 0x374   :  { %v2802_v34 = vpop.f32.mrb[177].mxu1  ;;  %3064 = vmatmul.mubr.f32.gmra.mrb[176].mxu1 %v1846_v28  ;;  %v1021_v28 = vld [vmem:[%s20054_s25 + $0xd8] sm:$0xff] }
 0x375   :  { %3068 = vmatprep.mubr.f32.mxu1 %v1851_v1  ;;  %v1332_v1 = vunpack.c.l.bf16 %v1019_v23  ;;  %v1337_v31 = vunpack.c.h.bf16 %v1021_v28  ;;  %v1023_v34 = vld [vmem:[%s20054_s25 + $0xe8] sm:$0xff] }
 0x377   :  { %v16857_v9 = vpop.f32.mrb[178].mxu1 }
 0x378   :  { %v2807_v40 = vpop.f32.mrb[179].mxu1  ;;  %3069 = vmatmul.mubr.f32.gmra.mrb[178].mxu1 %v1850_v36  ;;  %v1336_v36 = vunpack.c.l.bf16 %v1021_v28 }
 0x379   :  { %3073 = vmatprep.mubr.f32.mxu1 %v1855_v37  ;;  %v1341_v37 = vunpack.c.h.bf16 %v1023_v34  ;;  %v1340_v40 = vunpack.c.l.bf16 %v1023_v34 }
 0x37b   :  { %v16862_v3 = vpop.f32.mrb[180].mxu1 }
 0x37c   :  { %v2812_v46 = vpop.f32.mrb[181].mxu1  ;;  %3074 = vmatmul.mubr.f32.gmra.mrb[180].mxu1 %v1854_v24  ;;  %v1345_v24 = vunpack.c.h.bf16 %v1025_v20 }
 0x37d   :  { %11915 = vmatprep.mubr.msk.f32.mxu1 %vm1858_vm2, %v1285_v42  ;;  %v1027_v42 = vld [vmem:[%s20054_s25 + $0x108] sm:$0xff] }
 0x37e   :  { %v1349_v46 = vunpack.c.h.bf16 %v1027_v42 }
 0x380   :  { %3144 = vmatmul.mubr.f32.vlgmr.msra.gmra.mrb[0].mxu1 %v1284_v48  ;;  %v1029_v48 = vld [vmem:[%s20054_s25 + $0x118] sm:$0xff] }
 0x381   :  { %11916 = vmatprep.mubr.msk.f32.mxu1 %vm1858_vm2, %v1289_v35  ;;  %v1348_v35 = vunpack.c.l.bf16 %v1027_v42  ;;  %v1353_v47 = vunpack.c.h.bf16 %v1029_v48 }
 0x384   :  { %3149 = vmatmul.mubr.f32.gmra.mrb[2].mxu1 %v1288_v51  ;;  %v1031_v51 = vld [vmem:[%s20054_s25 + $0x128] sm:$0xff] }
 0x385   :  { %11917 = vmatprep.mubr.msk.f32.mxu1 %vm1858_vm2, %v1293_v25  ;;  %v1352_v25 = vunpack.c.l.bf16 %v1029_v48  ;;  %v1357_v53 = vunpack.c.h.bf16 %v1031_v51 }
 0x388   :  { %3154 = vmatmul.mubr.f32.gmra.mrb[4].mxu1 %v1292_v55  ;;  %v1033_v55 = vld [vmem:[%s20054_s25 + $0x138] sm:$0xff] }
 0x389   :  { %11918 = vmatprep.mubr.msk.f32.mxu1 %vm1858_vm2, %v1297_v57  ;;  %v1356_v57 = vunpack.c.l.bf16 %v1031_v51  ;;  %v1361_v26 = vunpack.c.h.bf16 %v1033_v55 }
 0x38c   :  { %3159 = vmatmul.mubr.f32.gmra.mrb[6].mxu1 %v1296_v58  ;;  %v1035_v58 = vld [vmem:[%s20054_s25 + $0x148] sm:$0xff] }
 0x38d   :  { %11919 = vmatprep.mubr.msk.f32.mxu1 %vm1858_vm2, %v1301_v32  ;;  %v1360_v32 = vunpack.c.l.bf16 %v1033_v55  ;;  %v1365_v33 = vunpack.c.h.bf16 %v1035_v58 }
 0x390   :  { %3164 = vmatmul.mubr.f32.gmra.mrb[8].mxu1 %v1300_v19  ;;  %v1037_v19 = vld [vmem:[%s20054_s25 + $0x158] sm:$0xff] }
 0x391   :  { %11920 = vmatprep.mubr.msk.f32.mxu1 %vm1858_vm2, %v1305_v54  ;;  %v1364_v54 = vunpack.c.l.bf16 %v1035_v58  ;;  %v1369_v0 = vunpack.c.h.bf16 %v1037_v19 }
 0x394   :  { %3169 = vmatmul.mubr.f32.gmra.mrb[10].mxu1 %v1304_v63  ;;  %v3865_v63 = vld [vmem:[%s20056_s26] sm:$0xff] }
 0x395   :  { %11921 = vmatprep.mubr.msk.f32.mxu1 %vm1858_vm2, %v1309_v4  ;;  %v3866_v4 = vld [vmem:[%s20056_s26 + $0x8] sm:$0xff] }
 0x398   :  { %3174 = vmatmul.mubr.f32.gmra.mrb[12].mxu1 %v1308_v5  ;;  %v14284_v5 = vpack.c.bf16 %v3866_v4, %v3865_v63  ;;  %v1067_v4 = vld [vmem:[%s20054_s25 + $0x248] sm:$0xff] }
 0x399   :  { %11922 = vmatprep.mubr.msk.f32.mxu1 %vm1858_vm2, %v1313_v2  ;;  %v1368_v2 = vunpack.c.l.bf16 %v1037_v19 }
 0x39a   :  { %14285 = vmatprep.subr.bf16.mxu0 %v14284_v5 }
 0x39b   :  { %14287 = vmatpush3.bf16.msra.mxu0 %v14284_v5  ;;  %v1429_v5 = vunpack.c.h.bf16 %v1067_v4 }
 0x39c   :  { %3179 = vmatmul.mubr.f32.gmra.mrb[14].mxu1 %v1312_v10  ;;  %v3867_v10 = vld [vmem:[%s20056_s26 + $0x10] sm:$0xff] }
 0x39d   :  { %11923 = vmatprep.mubr.msk.f32.mxu1 %vm1858_vm2, %v1317_v6  ;;  %v3868_v6 = vld [vmem:[%s20056_s26 + $0x18] sm:$0xff] }
 0x3a0   :  { %3184 = vmatmul.mubr.f32.gmra.mrb[16].mxu1 %v1316_v14  ;;  %v14288_v14 = vpack.c.bf16 %v3868_v6, %v3867_v10  ;;  %v12076_v6 = vld [vmem:[%s20056_s26 + $0x20] sm:$0xff] }
 0x3a1   :  { %11924 = vmatprep.mubr.msk.f32.mxu1 %vm1858_vm2, %v1321_v15  ;;  %v1372_v15 = vunpack.c.l.bf16 %v1039_v61 }
 0x3a2   :  { %14289 = vmatprep.subr.bf16.mxu0 %v14288_v14 }
 0x3a3   :  { %14291 = vmatpush3.bf16.msra.mxu0 %v14288_v14  ;;  %v1071_v14 = vld [vmem:[%s20054_s25 + $0x268] sm:$0xff] }
 0x3a4   :  { %3189 = vmatmul.mubr.f32.gmra.mrb[18].mxu1 %v1320_v29  ;;  %v1043_v29 = vld [vmem:[%s20054_s25 + $0x188] sm:$0xff] }
 0x3a5   :  { %11925 = vmatprep.mubr.msk.f32.mxu1 %vm1858_vm2, %v1325_v18  ;;  %v1376_v18 = vunpack.c.l.bf16 %v1041_v12  ;;  %v1381_v8 = vunpack.c.h.bf16 %v1043_v29  ;;  %v12077_v12 = vld [vmem:[%s20056_s26 + $0x28] sm:$0xff] }
 0x3a8   :  { %3194 = vmatmul.mubr.f32.gmra.mrb[20].mxu1 %v1324_v56  ;;  %v1045_v56 = vld [vmem:[%s20054_s25 + $0x198] sm:$0xff] }
 0x3a9   :  { %11926 = vmatprep.mubr.msk.f32.mxu1 %vm1858_vm2, %v1329_v11  ;;  %v1380_v11 = vunpack.c.l.bf16 %v1043_v29  ;;  %v1385_v23 = vunpack.c.h.bf16 %v1045_v56  ;;  %v1437_v29 = vunpack.c.h.bf16 %v1071_v14 }
 0x3ac   :  { %3199 = vmatmul.mubr.f32.gmra.mrb[22].mxu1 %v1328_v62  ;;  %v1047_v62 = vld [vmem:[%s20054_s25 + $0x1a8] sm:$0xff] }
 0x3ad   :  { %11927 = vmatprep.mubr.msk.f32.mxu1 %vm1858_vm2, %v1333_v59  ;;  %v1384_v59 = vunpack.c.l.bf16 %v1045_v56  ;;  %v1389_v28 = vunpack.c.h.bf16 %v1047_v62 }
 0x3b0   :  { %3204 = vmatmul.mubr.f32.gmra.mrb[24].mxu1 %v1332_v1  ;;  %v1049_v1 = vld [vmem:[%s20054_s25 + $0x1b8] sm:$0xff] }
 0x3b1   :  { %11928 = vmatprep.mubr.msk.f32.mxu1 %vm1858_vm2, %v1337_v31  ;;  %v1388_v31 = vunpack.c.l.bf16 %v1047_v62  ;;  %v1393_v34 = vunpack.c.h.bf16 %v1049_v1 }
 0x3b4   :  { %3209 = vmatmul.mubr.f32.gmra.mrb[26].mxu1 %v1336_v36  ;;  %v1051_v36 = vld [vmem:[%s20054_s25 + $0x1c8] sm:$0xff] }
 0x3b5   :  { %11929 = vmatprep.mubr.msk.f32.mxu1 %vm1858_vm2, %v1341_v37  ;;  %v1392_v37 = vunpack.c.l.bf16 %v1049_v1  ;;  %v1397_v20 = vunpack.c.h.bf16 %v1051_v36 }
 0x3b8   :  { %3214 = vmatmul.mubr.f32.gmra.mrb[28].mxu1 %v1340_v40  ;;  %v1053_v40 = vld [vmem:[%s20054_s25 + $0x1d8] sm:$0xff] }
 0x3b9   :  { %11930 = vmatprep.mubr.msk.f32.mxu1 %vm1858_vm2, %v1345_v24  ;;  %v1396_v24 = vunpack.c.l.bf16 %v1051_v36  ;;  %v1401_v42 = vunpack.c.h.bf16 %v1053_v40 }
 0x3bc   :  { %3219 = vmatmul.mubr.f32.gmra.mrb[30].mxu1 %v1344_v13  ;;  %v1055_v13 = vld [vmem:[%s20054_s25 + $0x1e8] sm:$0xff] }
 0x3bd   :  { %11931 = vmatprep.mubr.msk.f32.mxu1 %vm1858_vm2, %v1349_v46  ;;  %v1400_v46 = vunpack.c.l.bf16 %v1053_v40  ;;  %v1405_v48 = vunpack.c.h.bf16 %v1055_v13 }
 0x3c0   :  { %3224 = vmatmul.mubr.f32.gmra.mrb[32].mxu1 %v1348_v35  ;;  %v1057_v35 = vld [vmem:[%s20054_s25 + $0x1f8] sm:$0xff] }
 0x3c1   :  { %11932 = vmatprep.mubr.msk.f32.mxu1 %vm1858_vm2, %v1353_v47  ;;  %v1404_v47 = vunpack.c.l.bf16 %v1055_v13  ;;  %v1409_v51 = vunpack.c.h.bf16 %v1057_v35 }
 0x3c4   :  { %3229 = vmatmul.mubr.f32.gmra.mrb[34].mxu1 %v1352_v25  ;;  %v1059_v25 = vld [vmem:[%s20054_s25 + $0x208] sm:$0xff] }
 0x3c5   :  { %11933 = vmatprep.mubr.msk.f32.mxu1 %vm1858_vm2, %v1357_v53  ;;  %v1408_v53 = vunpack.c.l.bf16 %v1057_v35  ;;  %v1413_v55 = vunpack.c.h.bf16 %v1059_v25 }
 0x3c8   :  { %3234 = vmatmul.mubr.f32.gmra.mrb[36].mxu1 %v1356_v57  ;;  %v1061_v57 = vld [vmem:[%s20054_s25 + $0x218] sm:$0xff] }
 0x3c9   :  { %11934 = vmatprep.mubr.msk.f32.mxu1 %vm1858_vm2, %v1361_v26  ;;  %v1412_v26 = vunpack.c.l.bf16 %v1059_v25  ;;  %v1417_v58 = vunpack.c.h.bf16 %v1061_v57 }
 0x3cc   :  { %3239 = vmatmul.mubr.f32.gmra.mrb[38].mxu1 %v1360_v32  ;;  %v1063_v32 = vld [vmem:[%s20054_s25 + $0x228] sm:$0xff] }
 0x3cd   :  { %11935 = vmatprep.mubr.msk.f32.mxu1 %vm1858_vm2, %v1365_v33  ;;  %v1416_v33 = vunpack.c.l.bf16 %v1061_v57  ;;  %v1421_v19 = vunpack.c.h.bf16 %v1063_v32 }
 0x3d0   :  { %3244 = vmatmul.mubr.f32.gmra.mrb[40].mxu1 %v1364_v54  ;;  %v1065_v54 = vld [vmem:[%s20054_s25 + $0x238] sm:$0xff] }
 0x3d1   :  { %11936 = vmatprep.mubr.msk.f32.mxu1 %vm1858_vm2, %v1369_v0  ;;  %v1420_v0 = vunpack.c.l.bf16 %v1063_v32  ;;  %v1425_v63 = vunpack.c.h.bf16 %v1065_v54  ;;  %v1424_v61 = vunpack.c.l.bf16 %v1065_v54 }
 0x3d4   :  { %3249 = vmatmul.mubr.f32.gmra.mrb[42].mxu1 %v1368_v2  ;;  %v1069_v2 = vld [vmem:[%s20054_s25 + $0x258] sm:$0xff] }
 0x3d5   :  { %11937 = vmatprep.mubr.msk.f32.mxu1 %vm1858_vm2, %v1373_v7  ;;  %v1428_v7 = vunpack.c.l.bf16 %v1067_v4  ;;  %v1433_v10 = vunpack.c.h.bf16 %v1069_v2 }
 0x3d8   :  { %3254 = vmatmul.mubr.f32.gmra.mrb[44].mxu1 %v1372_v15  ;;  %v17030_v15 = vpack.c.bf16 %v12077_v12, %v12076_v6  ;;  %v1101_v12 = vld [vmem:[%s20054_s25 + $0x358] sm:$0xff] }
 0x3d9   :  { %11938 = vmatprep.mubr.msk.f32.mxu1 %vm1858_vm2, %v1377_v50  ;;  %v1432_v50 = vunpack.c.l.bf16 %v1069_v2 }
 0x3da   :  { %14293 = vmatprep.subr.bf16.mxu0 %v17030_v15 }
 0x3dc   :  { %3259 = vmatmul.mubr.f32.gmra.mrb[46].mxu1 %v1376_v18  ;;  %v1073_v18 = vld [vmem:[%s20054_s25 + $0x278] sm:$0xff] }
 0x3dd   :  { %11939 = vmatprep.mubr.msk.f32.mxu1 %vm1858_vm2, %v1381_v8  ;;  %v1436_v8 = vunpack.c.l.bf16 %v1071_v14  ;;  %v1441_v56 = vunpack.c.h.bf16 %v1073_v18 }
 0x3e0   :  { %3264 = vmatmul.mubr.f32.gmra.mrb[48].mxu1 %v1380_v11  ;;  %v1075_v11 = vld [vmem:[%s20054_s25 + $0x288] sm:$0xff] }
 0x3e1   :  { %11940 = vmatprep.mubr.msk.f32.mxu1 %vm1858_vm2, %v1385_v23  ;;  %v1440_v23 = vunpack.c.l.bf16 %v1073_v18  ;;  %v1445_v62 = vunpack.c.h.bf16 %v1075_v11  ;;  %v1496_v18 = vunpack.c.l.bf16 %v1101_v12 }
 0x3e4   :  { %3269 = vmatmul.mubr.f32.gmra.mrb[50].mxu1 %v1384_v59  ;;  %v1077_v59 = vld [vmem:[%s20054_s25 + $0x298] sm:$0xff] }
 0x3e5   :  { %11941 = vmatprep.mubr.msk.f32.mxu1 %vm1858_vm2, %v1389_v28  ;;  %v1444_v28 = vunpack.c.l.bf16 %v1075_v11  ;;  %v1449_v1 = vunpack.c.h.bf16 %v1077_v59 }
 0x3e8   :  { %3274 = vmatmul.mubr.f32.gmra.mrb[52].mxu1 %v1388_v31  ;;  %v1079_v31 = vld [vmem:[%s20054_s25 + $0x2a8] sm:$0xff] }
 0x3e9   :  { %11942 = vmatprep.mubr.msk.f32.mxu1 %vm1858_vm2, %v1393_v34  ;;  %v1448_v34 = vunpack.c.l.bf16 %v1077_v59  ;;  %v1453_v36 = vunpack.c.h.bf16 %v1079_v31 }
 0x3ec   :  { %3279 = vmatmul.mubr.f32.gmra.mrb[54].mxu1 %v1392_v37  ;;  %v1081_v37 = vld [vmem:[%s20054_s25 + $0x2b8] sm:$0xff] }
 0x3ed   :  { %11943 = vmatprep.mubr.msk.f32.mxu1 %vm1858_vm2, %v1397_v20  ;;  %v1452_v20 = vunpack.c.l.bf16 %v1079_v31  ;;  %v1457_v40 = vunpack.c.h.bf16 %v1081_v37  ;;  %v1107_v31 = vld [vmem:[%s20054_s25 + $0x388] sm:$0xff] }
 0x3f0   :  { %3284 = vmatmul.mubr.f32.gmra.mrb[56].mxu1 %v1396_v24  ;;  %v1083_v24 = vld [vmem:[%s20054_s25 + $0x2c8] sm:$0xff] }
 0x3f1   :  { %11944 = vmatprep.mubr.msk.f32.mxu1 %vm1858_vm2, %v1401_v42  ;;  %v1456_v42 = vunpack.c.l.bf16 %v1081_v37  ;;  %v1461_v13 = vunpack.c.h.bf16 %v1083_v24  ;;  %v12096_v37 = vld [vmem:[%s20056_s26 + $0x40] sm:$0xff] }
 0x3f4   :  { %3289 = vmatmul.mubr.f32.gmra.mrb[58].mxu1 %v1400_v46  ;;  %v1085_v46 = vld [vmem:[%s20054_s25 + $0x2d8] sm:$0xff] }
 0x3f5   :  { %11945 = vmatprep.mubr.msk.f32.mxu1 %vm1858_vm2, %v1405_v48  ;;  %v1460_v48 = vunpack.c.l.bf16 %v1083_v24  ;;  %v1465_v35 = vunpack.c.h.bf16 %v1085_v46 }
 0x3f8   :  { %3294 = vmatmul.mubr.f32.gmra.mrb[60].mxu1 %v1404_v47  ;;  %v1087_v47 = vld [vmem:[%s20054_s25 + $0x2e8] sm:$0xff] }
 0x3f9   :  { %11946 = vmatprep.mubr.msk.f32.mxu1 %vm1858_vm2, %v1409_v51  ;;  %v1464_v51 = vunpack.c.l.bf16 %v1085_v46  ;;  %v1469_v25 = vunpack.c.h.bf16 %v1087_v47 }
 0x3fc   :  { %3299 = vmatmul.mubr.f32.gmra.mrb[62].mxu1 %v1408_v53  ;;  %v1089_v53 = vld [vmem:[%s20054_s25 + $0x2f8] sm:$0xff] }
 0x3fd   :  { %11947 = vmatprep.mubr.msk.f32.mxu1 %vm1858_vm2, %v1413_v55  ;;  %v1468_v55 = vunpack.c.l.bf16 %v1087_v47  ;;  %v1473_v57 = vunpack.c.h.bf16 %v1089_v53  ;;  %v1508_v47 = vunpack.c.l.bf16 %v1107_v31 }
 0x400   :  { %3304 = vmatmul.mubr.f32.gmra.mrb[64].mxu1 %v1412_v26  ;;  %v1091_v26 = vld [vmem:[%s20054_s25 + $0x308] sm:$0xff] }
 0x401   :  { %11948 = vmatprep.mubr.msk.f32.mxu1 %vm1858_vm2, %v1417_v58  ;;  %v1472_v58 = vunpack.c.l.bf16 %v1089_v53  ;;  %v1477_v32 = vunpack.c.h.bf16 %v1091_v26 }
 0x404   :  { %3309 = vmatmul.mubr.f32.gmra.mrb[66].mxu1 %v1416_v33  ;;  %v1093_v33 = vld [vmem:[%s20054_s25 + $0x318] sm:$0xff] }
 0x405   :  { %11949 = vmatprep.mubr.msk.f32.mxu1 %vm1858_vm2, %v1421_v19  ;;  %v1476_v19 = vunpack.c.l.bf16 %v1091_v26  ;;  %v1481_v54 = vunpack.c.h.bf16 %v1093_v33  ;;  %v1113_v26 = vld [vmem:[%s20054_s25 + $0x3b8] sm:$0xff] }
 0x408   :  { %3314 = vmatmul.mubr.f32.gmra.mrb[68].mxu1 %v1420_v0  ;;  %v1095_v0 = vld [vmem:[%s20054_s25 + $0x328] sm:$0xff] }
 0x409   :  { %11950 = vmatprep.mubr.msk.f32.mxu1 %vm1858_vm2, %v1425_v63  ;;  %v1480_v63 = vunpack.c.l.bf16 %v1093_v33  ;;  %v1485_v4 = vunpack.c.h.bf16 %v1095_v0 }
 0x40c   :  { %3319 = vmatmul.mubr.f32.gmra.mrb[70].mxu1 %v1424_v61  ;;  %v1097_v61 = vld [vmem:[%s20054_s25 + $0x338] sm:$0xff] }
 0x40d   :  { %11951 = vmatprep.mubr.msk.f32.mxu1 %vm1858_vm2, %v1429_v5  ;;  %v1484_v5 = vunpack.c.l.bf16 %v1095_v0  ;;  %v1489_v2 = vunpack.c.h.bf16 %v1097_v61 }
 0x410   :  { %3324 = vmatmul.mubr.f32.gmra.mrb[72].mxu1 %v1428_v7  ;;  %v1099_v7 = vld [vmem:[%s20054_s25 + $0x348] sm:$0xff] }
 0x411   :  { %11952 = vmatprep.mubr.msk.f32.mxu1 %vm1858_vm2, %v1433_v10  ;;  %v1488_v10 = vunpack.c.l.bf16 %v1097_v61  ;;  %v1493_v6 = vunpack.c.h.bf16 %v1099_v7  ;;  %v1492_v14 = vunpack.c.l.bf16 %v1099_v7 }
 0x414   :  { %3329 = vmatmul.mubr.f32.gmra.mrb[74].mxu1 %v1432_v50  ;;  %v1497_v50 = vunpack.c.h.bf16 %v1101_v12  ;;  %v1119_v12 = vld [vmem:[%s20054_s25 + $0x3e8] sm:$0xff] }
 0x415   :  { %11953 = vmatprep.mubr.msk.f32.mxu1 %vm1858_vm2, %v1437_v29  ;;  %v1103_v29 = vld [vmem:[%s20054_s25 + $0x368] sm:$0xff] }
 0x418   :  { %3334 = vmatmul.mubr.f32.gmra.mrb[76].mxu1 %v1436_v8  ;;  %v1501_v8 = vunpack.c.h.bf16 %v1103_v29 }
 0x419   :  { %11954 = vmatprep.mubr.msk.f32.mxu1 %vm1858_vm2, %v1441_v56  ;;  %v1105_v56 = vld [vmem:[%s20054_s25 + $0x378] sm:$0xff] }
 0x41a   :  { %v1504_v24 = vunpack.c.l.bf16 %v1105_v56 }
 0x41c   :  { %3339 = vmatmul.mubr.f32.gmra.mrb[78].mxu1 %v1440_v23  ;;  %v12078_v23 = vld [vmem:[%s20056_s26 + $0x30] sm:$0xff] }
 0x41d   :  { %11955 = vmatprep.mubr.msk.f32.mxu1 %vm1858_vm2, %v1445_v62  ;;  %v12079_v62 = vld [vmem:[%s20056_s26 + $0x38] sm:$0xff] }
 0x420   :  { %3344 = vmatmul.mubr.f32.gmra.mrb[80].mxu1 %v1444_v28  ;;  %v1500_v28 = vunpack.c.l.bf16 %v1103_v29 }
 0x421   :  { %11956 = vmatprep.mubr.msk.f32.mxu1 %vm1858_vm2, %v1449_v1  ;;  %v1505_v1 = vunpack.c.h.bf16 %v1105_v56 }
 0x424   :  { %3349 = vmatmul.mubr.f32.gmra.mrb[82].mxu1 %v1448_v34  ;;  %v14296_v34 = vpack.c.bf16 %v12079_v62, %v12078_v23  ;;  %v1532_v23 = vunpack.c.l.bf16 %v1119_v12 }
 0x425   :  { %11957 = vmatprep.mubr.msk.f32.mxu1 %vm1858_vm2, %v1453_v36 }
 0x428   :  { %3354 = vmatmul.mubr.f32.gmra.mrb[84].mxu1 %v1452_v20  ;;  %v12097_v20 = vld [vmem:[%s20056_s26 + $0x48] sm:$0xff] }
 0x429   :  { %11958 = vmatprep.mubr.msk.f32.mxu1 %vm1858_vm2, %v1457_v40  ;;  %v17124_v46 = vpack.c.bf16 %v12097_v20, %v12096_v37 }
 0x42c   :  { %3359 = vmatmul.mubr.f32.gmra.mrb[86].mxu1 %v1456_v42  ;;  %v1509_v42 = vunpack.c.h.bf16 %v1107_v31 }
 0x42d   :  { %11959 = vmatprep.mubr.msk.f32.mxu1 %vm1858_vm2, %v1461_v13  ;;  %v1109_v13 = vld [vmem:[%s20054_s25 + $0x398] sm:$0xff] }
 0x430   :  { %3364 = vmatmul.mubr.f32.gmra.mrb[88].mxu1 %v1460_v48 }
 0x431   :  { %11960 = vmatprep.mubr.msk.f32.mxu1 %vm1858_vm2, %v1465_v35 }
 0x434   :  { %3369 = vmatmul.mubr.f32.gmra.mrb[90].mxu1 %v1464_v51  ;;  %v1513_v51 = vunpack.c.h.bf16 %v1109_v13 }
 0x435   :  { %11961 = vmatprep.mubr.msk.f32.mxu1 %vm1858_vm2, %v1469_v25 }
 0x438   :  { %3374 = vmatmul.mubr.f32.gmra.mrb[92].mxu1 %v1468_v55  ;;  %v1512_v55 = vunpack.c.l.bf16 %v1109_v13 }
 0x439   :  { %11962 = vmatprep.mubr.msk.f32.mxu1 %vm1858_vm2, %v1473_v57 }
 0x43c   :  { %3379 = vmatmul.mubr.f32.gmra.mrb[94].mxu1 %v1472_v58 }
 0x43d   :  { %11963 = vmatprep.mubr.msk.f32.mxu1 %vm1858_vm2, %v1477_v32 }
 0x440   :  { %3384 = vmatmul.mubr.f32.gmra.mrb[96].mxu1 %v1476_v19  ;;  %v1521_v19 = vunpack.c.h.bf16 %v1113_v26 }
 0x441   :  { %11964 = vmatprep.mubr.msk.f32.mxu1 %vm1858_vm2, %v1481_v54  ;;  %v1115_v54 = vld [vmem:[%s20054_s25 + $0x3c8] sm:$0xff] }
 0x442   :  { %v1525_v61 = vunpack.c.h.bf16 %v1115_v54 }
 0x444   :  { %3389 = vmatmul.mubr.f32.gmra.mrb[98].mxu1 %v1480_v63 }
 0x445   :  { %11965 = vmatprep.mubr.msk.f32.mxu1 %vm1858_vm2, %v1485_v4  ;;  %v1520_v4 = vunpack.c.l.bf16 %v1113_v26 }
 0x448   :  { %3394 = vmatmul.mubr.f32.gmra.mrb[100].mxu1 %v1484_v5  ;;  %v1117_v5 = vld [vmem:[%s20054_s25 + $0x3d8] sm:$0xff] }
 0x449   :  { %11966 = vmatprep.mubr.msk.f32.mxu1 %vm1858_vm2, %v1489_v2  ;;  %v1528_v29 = vunpack.c.l.bf16 %v1117_v5 }
 0x44c   :  { %3399 = vmatmul.mubr.f32.gmra.mrb[102].mxu1 %v1488_v10  ;;  %v1524_v10 = vunpack.c.l.bf16 %v1115_v54 }
 0x44d   :  { %11967 = vmatprep.mubr.msk.f32.mxu1 %vm1858_vm2, %v1493_v6  ;;  %v1529_v6 = vunpack.c.h.bf16 %v1117_v5 }
 0x450   :  { %3404 = vmatmul.mubr.f32.gmra.mrb[104].mxu1 %v1492_v14 }
 0x451   :  { %11968 = vmatprep.mubr.msk.f32.mxu1 %vm1858_vm2, %v1497_v50 }
 0x453   :  { %v3145_v11 = vpop.f32.mrb[0].mxu1 }
 0x454   :  { %v3147_v59 = vpop.f32.mrb[1].mxu1  ;;  %3409 = vmatmul.mubr.f32.gmra.mrb[106].mxu1 %v1496_v18  ;;  %13403 = vmatprep.mubr.msk.f32.mxu0 %vm3869_vm1, %v3145_v11  ;;  %v1533_v18 = vunpack.c.h.bf16 %v1119_v12 }
 0x455   :  { %11969 = vmatprep.mubr.msk.f32.mxu1 %vm1858_vm2, %v1501_v8  ;;  %v1121_v8 = vld [vmem:[%s20054_s25 + $0x3f8] sm:$0xff]  ;;  %v1123_v59 = vld [vmem:[%s20054_s25 + $0x408] sm:$0xff] }
 0x456   :  { %v1537_v62 = vunpack.c.h.bf16 %v1121_v8  ;;  %v1536_v31 = vunpack.c.l.bf16 %v1121_v8 }
 0x457   :  { %v3150_v36 = vpop.f32.mrb[2].mxu1 }
 0x458   :  { %v3152_v40 = vpop.f32.mrb[3].mxu1  ;;  %3414 = vmatmul.mubr.f32.gmra.mrb[108].mxu1 %v1500_v28  ;;  %13404 = vmatmul.mubr.msk.f32.vlgmr.msra.gmra.mrb[56].mxu0 %vm3869_vm1, %v3150_v36  ;;  %v1125_v36 = vld [vmem:[%s20054_s25 + $0x418] sm:$0xff] }
 0x459   :  { %11970 = vmatprep.mubr.msk.f32.mxu1 %vm1858_vm2, %v1505_v1  ;;  %14295 = vmatpush3.bf16.msra.mxu0 %v17030_v15  ;;  %v1111_v15 = vld [vmem:[%s20054_s25 + $0x3a8] sm:$0xff]  ;;  %v1540_v40 = vunpack.c.l.bf16 %v1123_v59 }
 0x45a   :  { %14297 = vmatprep.subr.bf16.mxu0 %v14296_v34  ;;  %v1517_v57 = vunpack.c.h.bf16 %v1111_v15  ;;  %v1516_v33 = vunpack.c.l.bf16 %v1111_v15 }
 0x45b   :  { %v3155_v48 = vpop.f32.mrb[4].mxu1 }
 0x45c   :  { %v3157_v35 = vpop.f32.mrb[5].mxu1  ;;  %3419 = vmatmul.mubr.f32.gmra.mrb[110].mxu1 %v1504_v24  ;;  %13406 = vmatprep.mubr.msk.f32.mxu0 %vm3869_vm1, %v3155_v48  ;;  %v1545_v24 = vunpack.c.h.bf16 %v1125_v36 }
 0x45d   :  { %11971 = vmatprep.mubr.msk.f32.mxu1 %vm1858_vm2, %v1509_v42  ;;  %14299 = vmatpush3.bf16.msra.mxu0 %v14296_v34  ;;  %v1541_v34 = vunpack.c.h.bf16 %v1123_v59  ;;  %v1127_v42 = vld [vmem:[%s20054_s25 + $0x428] sm:$0xff]  ;;  %v1544_v35 = vunpack.c.l.bf16 %v1125_v36 }
 0x45e   :  { %14301 = vmatprep.subr.bf16.mxu0 %v17124_v46  ;;  %v12117_v59 = vld [vmem:[%s20056_s26 + $0x68] sm:$0xff] }
 0x45f   :  { %v3160_v25 = vpop.f32.mrb[6].mxu1 }
 0x460   :  { %v3162_v53 = vpop.f32.mrb[7].mxu1  ;;  %3424 = vmatmul.mubr.f32.gmra.mrb[112].mxu1 %v1508_v47  ;;  %13407 = vmatmul.mubr.msk.f32.gmra.mrb[58].mxu0 %vm3869_vm1, %v3160_v25  ;;  %v1549_v47 = vunpack.c.h.bf16 %v1127_v42 }
 0x461   :  { %11972 = vmatprep.mubr.msk.f32.mxu1 %vm1858_vm2, %v1513_v51  ;;  %v1129_v51 = vld [vmem:[%s20054_s25 + $0x438] sm:$0xff]  ;;  %v1548_v53 = vunpack.c.l.bf16 %v1127_v42 }
 0x463   :  { %v3165_v58 = vpop.f32.mrb[8].mxu1 }
 0x464   :  { %v3167_v32 = vpop.f32.mrb[9].mxu1  ;;  %3429 = vmatmul.mubr.f32.gmra.mrb[114].mxu1 %v1512_v55  ;;  %13409 = vmatprep.mubr.msk.f32.mxu0 %vm3869_vm1, %v3165_v58  ;;  %v1553_v55 = vunpack.c.h.bf16 %v1129_v51 }
 0x465   :  { %11973 = vmatprep.mubr.msk.f32.mxu1 %vm1858_vm2, %v1517_v57  ;;  %v1131_v57 = vld [vmem:[%s20054_s25 + $0x448] sm:$0xff]  ;;  %v1552_v32 = vunpack.c.l.bf16 %v1129_v51 }
 0x467   :  { %v3170_v0 = vpop.f32.mrb[10].mxu1 }
 0x468   :  { %v3172_v63 = vpop.f32.mrb[11].mxu1  ;;  %3434 = vmatmul.mubr.f32.gmra.mrb[116].mxu1 %v1516_v33  ;;  %13410 = vmatmul.mubr.msk.f32.gmra.mrb[60].mxu0 %vm3869_vm1, %v3170_v0  ;;  %v1557_v33 = vunpack.c.h.bf16 %v1131_v57 }
 0x469   :  { %11974 = vmatprep.mubr.msk.f32.mxu1 %vm1858_vm2, %v1521_v19  ;;  %v1133_v19 = vld [vmem:[%s20054_s25 + $0x458] sm:$0xff]  ;;  %v1556_v63 = vunpack.c.l.bf16 %v1131_v57 }
 0x46b   :  { %v3175_v2 = vpop.f32.mrb[12].mxu1 }
 0x46c   :  { %v3177_v7 = vpop.f32.mrb[13].mxu1  ;;  %3439 = vmatmul.mubr.f32.gmra.mrb[118].mxu1 %v1520_v4  ;;  %13412 = vmatprep.mubr.msk.f32.mxu0 %vm3869_vm1, %v3175_v2  ;;  %v1561_v4 = vunpack.c.h.bf16 %v1133_v19 }
 0x46d   :  { %11975 = vmatprep.mubr.msk.f32.mxu1 %vm1858_vm2, %v1525_v61  ;;  %v1135_v61 = vld [vmem:[%s20054_s25 + $0x468] sm:$0xff]  ;;  %v1560_v7 = vunpack.c.l.bf16 %v1133_v19 }
 0x46f   :  { %v3180_v14 = vpop.f32.mrb[14].mxu1 }
 0x470   :  { %v3182_v50 = vpop.f32.mrb[15].mxu1  ;;  %3444 = vmatmul.mubr.f32.gmra.mrb[120].mxu1 %v1524_v10  ;;  %13413 = vmatmul.mubr.msk.f32.gmra.mrb[62].mxu0 %vm3869_vm1, %v3180_v14  ;;  %v1565_v10 = vunpack.c.h.bf16 %v1135_v61  ;;  %v12098_v14 = vld [vmem:[%s20056_s26 + $0x50] sm:$0xff] }
 0x471   :  { %11976 = vmatprep.mubr.msk.f32.mxu1 %vm1858_vm2, %v1529_v6  ;;  %v1137_v6 = vld [vmem:[%s20054_s25 + $0x478] sm:$0xff] }
 0x472   :  { %v12099_v50 = vld [vmem:[%s20056_s26 + $0x58] sm:$0xff]  ;;  %v1569_v8 = vunpack.c.h.bf16 %v1137_v6 }
 0x473   :  { %v3185_v56 = vpop.f32.mrb[16].mxu1 }
 0x474   :  { %v3187_v11 = vpop.f32.mrb[17].mxu1  ;;  %3449 = vmatmul.mubr.f32.gmra.mrb[122].mxu1 %v1528_v29  ;;  %13415 = vmatprep.mubr.msk.f32.mxu0 %vm3869_vm1, %v3185_v56  ;;  %v1139_v56 = vld [vmem:[%s20054_s25 + $0x488] sm:$0xff] }
 0x475   :  { %11977 = vmatprep.mubr.msk.f32.mxu1 %vm1858_vm2, %v1533_v18  ;;  %v1564_v18 = vunpack.c.l.bf16 %v1135_v61  ;;  %v14304_v11 = vpack.c.bf16 %v12099_v50, %v12098_v14 }
 0x477   :  { %v3190_v28 = vpop.f32.mrb[18].mxu1 }
 0x478   :  { %v3192_v1 = vpop.f32.mrb[19].mxu1  ;;  %3454 = vmatmul.mubr.f32.gmra.mrb[124].mxu1 %v1532_v23  ;;  %13416 = vmatmul.mubr.msk.f32.gmra.mrb[64].mxu0 %vm3869_vm1, %v3190_v28 }
 0x479   :  { %11978 = vmatprep.mubr.msk.f32.mxu1 %vm1858_vm2, %v1537_v62  ;;  %v12116_v62 = vld [vmem:[%s20056_s26 + $0x60] sm:$0xff]  ;;  %v1568_v1 = vunpack.c.l.bf16 %v1137_v6 }
 0x47a   :  { %v17220_v36 = vpack.c.bf16 %v12117_v59, %v12116_v62 }
 0x47b   :  { %v3195_v37 = vpop.f32.mrb[20].mxu1 }
 0x47c   :  { %v3197_v20 = vpop.f32.mrb[21].mxu1  ;;  %3459 = vmatmul.mubr.f32.gmra.mrb[126].mxu1 %v1536_v31  ;;  %13418 = vmatprep.mubr.msk.f32.mxu0 %vm3869_vm1, %v3195_v37  ;;  %v1573_v31 = vunpack.c.h.bf16 %v1139_v56 }
 0x47d   :  { %11979 = vmatprep.mubr.msk.f32.mxu1 %vm1858_vm2, %v1541_v34  ;;  %v1141_v34 = vld [vmem:[%s20054_s25 + $0x498] sm:$0xff] }
 0x47f   :  { %v3200_v13 = vpop.f32.mrb[22].mxu1 }
 0x480   :  { %v3202_v48 = vpop.f32.mrb[23].mxu1  ;;  %3464 = vmatmul.mubr.f32.gmra.mrb[128].mxu1 %v1540_v40  ;;  %13419 = vmatmul.mubr.msk.f32.gmra.mrb[66].mxu0 %vm3869_vm1, %v3200_v13  ;;  %v1572_v40 = vunpack.c.l.bf16 %v1139_v56 }
 0x481   :  { %11980 = vmatprep.mubr.msk.f32.mxu1 %vm1858_vm2, %v1545_v24  ;;  %v1577_v24 = vunpack.c.h.bf16 %v1141_v34  ;;  %v1576_v48 = vunpack.c.l.bf16 %v1141_v34 }
 0x483   :  { %v3205_v15 = vpop.f32.mrb[24].mxu1 }
 0x484   :  { %v3207_v25 = vpop.f32.mrb[25].mxu1  ;;  %3469 = vmatmul.mubr.f32.gmra.mrb[130].mxu1 %v1544_v35  ;;  %13421 = vmatprep.mubr.msk.f32.mxu0 %vm3869_vm1, %v3205_v15 }
 0x485   :  { %11981 = vmatprep.mubr.msk.f32.mxu1 %vm1858_vm2, %v1549_v47  ;;  %v1145_v47 = vld [vmem:[%s20054_s25 + $0x4b8] sm:$0xff] }
 0x487   :  { %v3210_v26 = vpop.f32.mrb[26].mxu1 }
 0x488   :  { %v3212_v58 = vpop.f32.mrb[27].mxu1  ;;  %3474 = vmatmul.mubr.f32.gmra.mrb[132].mxu1 %v1548_v53  ;;  %13422 = vmatmul.mubr.msk.f32.gmra.mrb[68].mxu0 %vm3869_vm1, %v3210_v26  ;;  %v1585_v53 = vunpack.c.h.bf16 %v1145_v47 }
 0x489   :  { %11982 = vmatprep.mubr.msk.f32.mxu1 %vm1858_vm2, %v1553_v55  ;;  %v1147_v55 = vld [vmem:[%s20054_s25 + $0x4c8] sm:$0xff]  ;;  %v1584_v58 = vunpack.c.l.bf16 %v1145_v47 }
 0x48b   :  { %v3215_v54 = vpop.f32.mrb[28].mxu1 }
 0x48c   :  { %v3217_v0 = vpop.f32.mrb[29].mxu1  ;;  %3479 = vmatmul.mubr.f32.gmra.mrb[134].mxu1 %v1552_v32  ;;  %13424 = vmatprep.mubr.msk.f32.mxu0 %vm3869_vm1, %v3215_v54  ;;  %v1589_v32 = vunpack.c.h.bf16 %v1147_v55 }
 0x48d   :  { %11983 = vmatprep.mubr.msk.f32.mxu1 %vm1858_vm2, %v1557_v33  ;;  %v1149_v33 = vld [vmem:[%s20054_s25 + $0x4d8] sm:$0xff]  ;;  %v1588_v0 = vunpack.c.l.bf16 %v1147_v55 }
 0x48f   :  { %v3220_v5 = vpop.f32.mrb[30].mxu1 }
 0x490   :  { %v3222_v2 = vpop.f32.mrb[31].mxu1  ;;  %3484 = vmatmul.mubr.f32.gmra.mrb[136].mxu1 %v1556_v63  ;;  %13425 = vmatmul.mubr.msk.f32.gmra.mrb[70].mxu0 %vm3869_vm1, %v3220_v5  ;;  %v1593_v63 = vunpack.c.h.bf16 %v1149_v33 }
 0x491   :  { %11984 = vmatprep.mubr.msk.f32.mxu1 %vm1858_vm2, %v1561_v4  ;;  %v1151_v4 = vld [vmem:[%s20054_s25 + $0x4e8] sm:$0xff]  ;;  %v1592_v2 = vunpack.c.l.bf16 %v1149_v33 }
 0x492   :  { %v1596_v14 = vunpack.c.l.bf16 %v1151_v4 }
 0x493   :  { %v3225_v12 = vpop.f32.mrb[32].mxu1 }
 0x494   :  { %v3227_v29 = vpop.f32.mrb[33].mxu1  ;;  %3489 = vmatmul.mubr.f32.gmra.mrb[138].mxu1 %v1560_v7  ;;  %13435 = vmatprep.mubr.msk.f32.mxu0 %vm3869_vm1, %v3225_v12  ;;  %v1597_v7 = vunpack.c.h.bf16 %v1151_v4 }
 0x495   :  { %11985 = vmatprep.mubr.msk.f32.mxu1 %vm1858_vm2, %v1565_v10  ;;  %v1153_v10 = vld [vmem:[%s20054_s25 + $0x4f8] sm:$0xff]  ;;  %v1155_v29 = vld [vmem:[%s20054_s25 + $0x508] sm:$0xff] }
 0x496   :  { %v1601_v50 = vunpack.c.h.bf16 %v1153_v10  ;;  %v1600_v56 = vunpack.c.l.bf16 %v1153_v10 }
 0x497   :  { %v3230_v23 = vpop.f32.mrb[34].mxu1 }
 0x498   :  { %v3232_v28 = vpop.f32.mrb[35].mxu1  ;;  %3494 = vmatmul.mubr.f32.gmra.mrb[140].mxu1 %v1564_v18  ;;  %13436 = vmatmul.mubr.msk.f32.vlgmr.msra.gmra.mrb[56].mxu0 %vm3869_vm1, %v3230_v23  ;;  %v1157_v23 = vld [vmem:[%s20054_s25 + $0x518] sm:$0xff] }
 0x499   :  { %11986 = vmatprep.mubr.msk.f32.mxu1 %vm1858_vm2, %v1569_v8  ;;  %14303 = vmatpush3.bf16.msra.mxu0 %v17124_v46  ;;  %v1143_v46 = vld [vmem:[%s20054_s25 + $0x4a8] sm:$0xff]  ;;  %v1604_v28 = vunpack.c.l.bf16 %v1155_v29 }
 0x49a   :  { %14305 = vmatprep.subr.bf16.mxu0 %v14304_v11  ;;  %v1581_v35 = vunpack.c.h.bf16 %v1143_v46  ;;  %v1580_v25 = vunpack.c.l.bf16 %v1143_v46 }
 0x49b   :  { %v3235_v37 = vpop.f32.mrb[36].mxu1 }
 0x49c   :  { %v3237_v20 = vpop.f32.mrb[37].mxu1  ;;  %3499 = vmatmul.mubr.f32.gmra.mrb[142].mxu1 %v1568_v1  ;;  %13438 = vmatprep.mubr.msk.f32.mxu0 %vm3869_vm1, %v3235_v37  ;;  %v1609_v1 = vunpack.c.h.bf16 %v1157_v23 }
 0x49d   :  { %11987 = vmatprep.mubr.msk.f32.mxu1 %vm1858_vm2, %v1573_v31  ;;  %14307 = vmatpush3.bf16.msra.mxu0 %v14304_v11  ;;  %v1605_v11 = vunpack.c.h.bf16 %v1155_v29  ;;  %v1159_v31 = vld [vmem:[%s20054_s25 + $0x528] sm:$0xff]  ;;  %v1608_v20 = vunpack.c.l.bf16 %v1157_v23 }
 0x49e   :  { %14309 = vmatprep.subr.bf16.mxu0 %v17220_v36  ;;  %v12137_v29 = vld [vmem:[%s20056_s26 + $0x88] sm:$0xff] }
 0x49f   :  { %v3240_v42 = vpop.f32.mrb[38].mxu1 }
 0x4a0   :  { %v3242_v13 = vpop.f32.mrb[39].mxu1  ;;  %3504 = vmatmul.mubr.f32.gmra.mrb[144].mxu1 %v1572_v40  ;;  %13439 = vmatmul.mubr.msk.f32.gmra.mrb[58].mxu0 %vm3869_vm1, %v3240_v42  ;;  %v1613_v40 = vunpack.c.h.bf16 %v1159_v31 }
 0x4a1   :  { %11988 = vmatprep.mubr.msk.f32.mxu1 %vm1858_vm2, %v1577_v24  ;;  %v1161_v24 = vld [vmem:[%s20054_s25 + $0x538] sm:$0xff]  ;;  %v1612_v13 = vunpack.c.l.bf16 %v1159_v31 }
 0x4a3   :  { %v3245_v51 = vpop.f32.mrb[40].mxu1 }
 0x4a4   :  { %v3247_v15 = vpop.f32.mrb[41].mxu1  ;;  %3509 = vmatmul.mubr.f32.gmra.mrb[146].mxu1 %v1576_v48  ;;  %13441 = vmatprep.mubr.msk.f32.mxu0 %vm3869_vm1, %v3245_v51  ;;  %v1617_v48 = vunpack.c.h.bf16 %v1161_v24 }
 0x4a5   :  { %11989 = vmatprep.mubr.msk.f32.mxu1 %vm1858_vm2, %v1581_v35  ;;  %v1163_v35 = vld [vmem:[%s20054_s25 + $0x548] sm:$0xff]  ;;  %v1616_v15 = vunpack.c.l.bf16 %v1161_v24 }
 0x4a7   :  { %v3250_v57 = vpop.f32.mrb[42].mxu1 }
 0x4a8   :  { %v3252_v26 = vpop.f32.mrb[43].mxu1  ;;  %3514 = vmatmul.mubr.f32.gmra.mrb[148].mxu1 %v1580_v25  ;;  %13442 = vmatmul.mubr.msk.f32.gmra.mrb[60].mxu0 %vm3869_vm1, %v3250_v57  ;;  %v1621_v25 = vunpack.c.h.bf16 %v1163_v35 }
 0x4a9   :  { %11990 = vmatprep.mubr.msk.f32.mxu1 %vm1858_vm2, %v1585_v53  ;;  %v1165_v53 = vld [vmem:[%s20054_s25 + $0x558] sm:$0xff]  ;;  %v1620_v26 = vunpack.c.l.bf16 %v1163_v35 }
 0x4ab   :  { %v3255_v19 = vpop.f32.mrb[44].mxu1 }
 0x4ac   :  { %v3257_v54 = vpop.f32.mrb[45].mxu1  ;;  %3519 = vmatmul.mubr.f32.gmra.mrb[0].mxu1 %v1584_v58  ;;  %13444 = vmatprep.mubr.msk.f32.mxu0 %vm3869_vm1, %v3255_v19  ;;  %v1625_v58 = vunpack.c.h.bf16 %v1165_v53 }
 0x4ad   :  { %11991 = vmatprep.mubr.msk.f32.mxu1 %vm1858_vm2, %v1589_v32  ;;  %v1167_v32 = vld [vmem:[%s20054_s25 + $0x568] sm:$0xff]  ;;  %v1624_v54 = vunpack.c.l.bf16 %v1165_v53 }
 0x4af   :  { %v3260_v61 = vpop.f32.mrb[46].mxu1 }
 0x4b0   :  { %v3262_v5 = vpop.f32.mrb[47].mxu1  ;;  %3524 = vmatmul.mubr.f32.gmra.mrb[2].mxu1 %v1588_v0  ;;  %13445 = vmatmul.mubr.msk.f32.gmra.mrb[62].mxu0 %vm3869_vm1, %v3260_v61  ;;  %v1629_v0 = vunpack.c.h.bf16 %v1167_v32  ;;  %v12118_v61 = vld [vmem:[%s20056_s26 + $0x70] sm:$0xff] }
 0x4b1   :  { %11992 = vmatprep.mubr.msk.f32.mxu1 %vm1858_vm2, %v1593_v63  ;;  %v1169_v63 = vld [vmem:[%s20054_s25 + $0x578] sm:$0xff] }
 0x4b2   :  { %v12119_v5 = vld [vmem:[%s20056_s26 + $0x78] sm:$0xff]  ;;  %v1633_v10 = vunpack.c.h.bf16 %v1169_v63 }
 0x4b3   :  { %v3265_v6 = vpop.f32.mrb[48].mxu1 }
 0x4b4   :  { %v3267_v12 = vpop.f32.mrb[49].mxu1  ;;  %3529 = vmatmul.mubr.f32.gmra.mrb[4].mxu1 %v1592_v2  ;;  %13447 = vmatprep.mubr.msk.f32.mxu0 %vm3869_vm1, %v3265_v6  ;;  %v1171_v6 = vld [vmem:[%s20054_s25 + $0x588] sm:$0xff] }
 0x4b5   :  { %11993 = vmatprep.mubr.msk.f32.mxu1 %vm1858_vm2, %v1597_v7  ;;  %v1628_v7 = vunpack.c.l.bf16 %v1167_v32  ;;  %v14312_v12 = vpack.c.bf16 %v12119_v5, %v12118_v61 }
 0x4b7   :  { %v3270_v18 = vpop.f32.mrb[50].mxu1 }
 0x4b8   :  { %v3272_v8 = vpop.f32.mrb[51].mxu1  ;;  %3534 = vmatmul.mubr.f32.gmra.mrb[6].mxu1 %v1596_v14  ;;  %13448 = vmatmul.mubr.msk.f32.gmra.mrb[64].mxu0 %vm3869_vm1, %v3270_v18 }
 0x4b9   :  { %11994 = vmatprep.mubr.msk.f32.mxu1 %vm1858_vm2, %v1601_v50  ;;  %v12136_v50 = vld [vmem:[%s20056_s26 + $0x80] sm:$0xff]  ;;  %v1632_v8 = vunpack.c.l.bf16 %v1169_v63 }
 0x4ba   :  { %v17316_v23 = vpack.c.bf16 %v12137_v29, %v12136_v50 }
 0x4bb   :  { %v3275_v62 = vpop.f32.mrb[52].mxu1 }
 0x4bc   :  { %v3277_v59 = vpop.f32.mrb[53].mxu1  ;;  %3539 = vmatmul.mubr.f32.gmra.mrb[8].mxu1 %v1600_v56  ;;  %13450 = vmatprep.mubr.msk.f32.mxu0 %vm3869_vm1, %v3275_v62  ;;  %v1637_v56 = vunpack.c.h.bf16 %v1171_v6 }
 0x4bd   :  { %11995 = vmatprep.mubr.msk.f32.mxu1 %vm1858_vm2, %v1605_v11  ;;  %v1173_v11 = vld [vmem:[%s20054_s25 + $0x598] sm:$0xff] }
 0x4bf   :  { %v3280_v34 = vpop.f32.mrb[54].mxu1 }
 0x4c0   :  { %v3282_v37 = vpop.f32.mrb[55].mxu1  ;;  %3544 = vmatmul.mubr.f32.gmra.mrb[10].mxu1 %v1604_v28  ;;  %13451 = vmatmul.mubr.msk.f32.gmra.mrb[66].mxu0 %vm3869_vm1, %v3280_v34  ;;  %v1636_v28 = vunpack.c.l.bf16 %v1171_v6 }
 0x4c1   :  { %11996 = vmatprep.mubr.msk.f32.mxu1 %vm1858_vm2, %v1609_v1  ;;  %v1641_v1 = vunpack.c.h.bf16 %v1173_v11  ;;  %v1640_v37 = vunpack.c.l.bf16 %v1173_v11 }
 0x4c3   :  { %v3285_v46 = vpop.f32.mrb[56].mxu1 }
 0x4c4   :  { %v3287_v42 = vpop.f32.mrb[57].mxu1  ;;  %3549 = vmatmul.mubr.f32.gmra.mrb[12].mxu1 %v1608_v20  ;;  %13453 = vmatprep.mubr.msk.f32.mxu0 %vm3869_vm1, %v3285_v46 }
 0x4c5   :  { %11997 = vmatprep.mubr.msk.f32.mxu1 %vm1858_vm2, %v1613_v40  ;;  %v1177_v40 = vld [vmem:[%s20054_s25 + $0x5b8] sm:$0xff] }
 0x4c7   :  { %v3290_v47 = vpop.f32.mrb[58].mxu1 }
 0x4c8   :  { %v3292_v51 = vpop.f32.mrb[59].mxu1  ;;  %3554 = vmatmul.mubr.f32.gmra.mrb[14].mxu1 %v1612_v13  ;;  %13454 = vmatmul.mubr.msk.f32.gmra.mrb[68].mxu0 %vm3869_vm1, %v3290_v47  ;;  %v1649_v13 = vunpack.c.h.bf16 %v1177_v40 }
 0x4c9   :  { %11998 = vmatprep.mubr.msk.f32.mxu1 %vm1858_vm2, %v1617_v48  ;;  %v1179_v48 = vld [vmem:[%s20054_s25 + $0x5c8] sm:$0xff]  ;;  %v1648_v51 = vunpack.c.l.bf16 %v1177_v40 }
 0x4cb   :  { %v3295_v55 = vpop.f32.mrb[60].mxu1 }
 0x4cc   :  { %v3297_v57 = vpop.f32.mrb[61].mxu1  ;;  %3559 = vmatmul.mubr.f32.gmra.mrb[16].mxu1 %v1616_v15  ;;  %13456 = vmatprep.mubr.msk.f32.mxu0 %vm3869_vm1, %v3295_v55  ;;  %v1653_v15 = vunpack.c.h.bf16 %v1179_v48 }
 0x4cd   :  { %11999 = vmatprep.mubr.msk.f32.mxu1 %vm1858_vm2, %v1621_v25  ;;  %v1181_v25 = vld [vmem:[%s20054_s25 + $0x5d8] sm:$0xff]  ;;  %v1652_v57 = vunpack.c.l.bf16 %v1179_v48 }
 0x4cf   :  { %v3300_v33 = vpop.f32.mrb[62].mxu1 }
 0x4d0   :  { %v3302_v19 = vpop.f32.mrb[63].mxu1  ;;  %3564 = vmatmul.mubr.f32.gmra.mrb[18].mxu1 %v1620_v26  ;;  %13457 = vmatmul.mubr.msk.f32.gmra.mrb[70].mxu0 %vm3869_vm1, %v3300_v33  ;;  %v1657_v26 = vunpack.c.h.bf16 %v1181_v25 }
 0x4d1   :  { %12000 = vmatprep.mubr.msk.f32.mxu1 %vm1858_vm2, %v1625_v58  ;;  %v1183_v58 = vld [vmem:[%s20054_s25 + $0x5e8] sm:$0xff]  ;;  %v1656_v19 = vunpack.c.l.bf16 %v1181_v25 }
 0x4d2   :  { %v1660_v61 = vunpack.c.l.bf16 %v1183_v58 }
 0x4d3   :  { %v3305_v4 = vpop.f32.mrb[64].mxu1 }
 0x4d4   :  { %v3307_v2 = vpop.f32.mrb[65].mxu1  ;;  %3569 = vmatmul.mubr.f32.gmra.mrb[20].mxu1 %v1624_v54  ;;  %13467 = vmatprep.mubr.msk.f32.mxu0 %vm3869_vm1, %v3305_v4  ;;  %v1661_v54 = vunpack.c.h.bf16 %v1183_v58 }
 0x4d5   :  { %12001 = vmatprep.mubr.msk.f32.mxu1 %vm1858_vm2, %v1629_v0  ;;  %v1185_v0 = vld [vmem:[%s20054_s25 + $0x5f8] sm:$0xff]  ;;  %v1187_v2 = vld [vmem:[%s20054_s25 + $0x608] sm:$0xff] }
 0x4d6   :  { %v1665_v5 = vunpack.c.h.bf16 %v1185_v0  ;;  %v1664_v6 = vunpack.c.l.bf16 %v1185_v0 }
 0x4d7   :  { %v3310_v14 = vpop.f32.mrb[66].mxu1 }
 0x4d8   :  { %v3312_v18 = vpop.f32.mrb[67].mxu1  ;;  %3574 = vmatmul.mubr.f32.gmra.mrb[22].mxu1 %v1628_v7  ;;  %13468 = vmatmul.mubr.msk.f32.vlgmr.msra.gmra.mrb[56].mxu0 %vm3869_vm1, %v3310_v14  ;;  %v1189_v14 = vld [vmem:[%s20054_s25 + $0x618] sm:$0xff] }
 0x4d9   :  { %12002 = vmatprep.mubr.msk.f32.mxu1 %vm1858_vm2, %v1633_v10  ;;  %14311 = vmatpush3.bf16.msra.mxu0 %v17220_v36  ;;  %v1175_v36 = vld [vmem:[%s20054_s25 + $0x5a8] sm:$0xff]  ;;  %v1668_v18 = vunpack.c.l.bf16 %v1187_v2 }
 0x4da   :  { %14313 = vmatprep.subr.bf16.mxu0 %v14312_v12  ;;  %v1645_v20 = vunpack.c.h.bf16 %v1175_v36  ;;  %v1644_v42 = vunpack.c.l.bf16 %v1175_v36 }
 0x4db   :  { %v3315_v62 = vpop.f32.mrb[68].mxu1 }
 0x4dc   :  { %v3317_v59 = vpop.f32.mrb[69].mxu1  ;;  %3579 = vmatmul.mubr.f32.gmra.mrb[24].mxu1 %v1632_v8  ;;  %13470 = vmatprep.mubr.msk.f32.mxu0 %vm3869_vm1, %v3315_v62  ;;  %v1673_v8 = vunpack.c.h.bf16 %v1189_v14 }
 0x4dd   :  { %12003 = vmatprep.mubr.msk.f32.mxu1 %vm1858_vm2, %v1637_v56  ;;  %14315 = vmatpush3.bf16.msra.mxu0 %v14312_v12  ;;  %v1669_v12 = vunpack.c.h.bf16 %v1187_v2  ;;  %v1191_v56 = vld [vmem:[%s20054_s25 + $0x628] sm:$0xff]  ;;  %v1672_v59 = vunpack.c.l.bf16 %v1189_v14 }
 0x4de   :  { %14317 = vmatprep.subr.bf16.mxu0 %v17316_v23  ;;  %v12157_v2 = vld [vmem:[%s20056_s26 + $0xa8] sm:$0xff] }
 0x4df   :  { %v3320_v31 = vpop.f32.mrb[70].mxu1 }
 0x4e0   :  { %v3322_v34 = vpop.f32.mrb[71].mxu1  ;;  %3584 = vmatmul.mubr.f32.gmra.mrb[26].mxu1 %v1636_v28  ;;  %13471 = vmatmul.mubr.msk.f32.gmra.mrb[58].mxu0 %vm3869_vm1, %v3320_v31  ;;  %v1677_v28 = vunpack.c.h.bf16 %v1191_v56 }
 0x4e1   :  { %12004 = vmatprep.mubr.msk.f32.mxu1 %vm1858_vm2, %v1641_v1  ;;  %v1193_v1 = vld [vmem:[%s20054_s25 + $0x638] sm:$0xff]  ;;  %v1676_v34 = vunpack.c.l.bf16 %v1191_v56 }
 0x4e3   :  { %v3325_v24 = vpop.f32.mrb[72].mxu1 }
 0x4e4   :  { %v3327_v46 = vpop.f32.mrb[73].mxu1  ;;  %3589 = vmatmul.mubr.f32.gmra.mrb[28].mxu1 %v1640_v37  ;;  %13473 = vmatprep.mubr.msk.f32.mxu0 %vm3869_vm1, %v3325_v24  ;;  %v1681_v37 = vunpack.c.h.bf16 %v1193_v1 }
 0x4e5   :  { %12005 = vmatprep.mubr.msk.f32.mxu1 %vm1858_vm2, %v1645_v20  ;;  %v1195_v20 = vld [vmem:[%s20054_s25 + $0x648] sm:$0xff]  ;;  %v1680_v46 = vunpack.c.l.bf16 %v1193_v1 }
 0x4e7   :  { %v3330_v35 = vpop.f32.mrb[74].mxu1 }
 0x4e8   :  { %v3332_v47 = vpop.f32.mrb[75].mxu1  ;;  %3594 = vmatmul.mubr.f32.gmra.mrb[30].mxu1 %v1644_v42  ;;  %13474 = vmatmul.mubr.msk.f32.gmra.mrb[60].mxu0 %vm3869_vm1, %v3330_v35  ;;  %v1685_v42 = vunpack.c.h.bf16 %v1195_v20 }
 0x4e9   :  { %12006 = vmatprep.mubr.msk.f32.mxu1 %vm1858_vm2, %v1649_v13  ;;  %v1197_v13 = vld [vmem:[%s20054_s25 + $0x658] sm:$0xff]  ;;  %v1684_v47 = vunpack.c.l.bf16 %v1195_v20 }
 0x4eb   :  { %v3335_v53 = vpop.f32.mrb[76].mxu1 }
 0x4ec   :  { %v3337_v55 = vpop.f32.mrb[77].mxu1  ;;  %3599 = vmatmul.mubr.f32.gmra.mrb[182].mxu1 %v1648_v51  ;;  %13476 = vmatprep.mubr.msk.f32.mxu0 %vm3869_vm1, %v3335_v53  ;;  %v1689_v51 = vunpack.c.h.bf16 %v1197_v13 }
 0x4ed   :  { %12007 = vmatprep.mubr.msk.f32.mxu1 %vm1858_vm2, %v1653_v15  ;;  %v1199_v15 = vld [vmem:[%s20054_s25 + $0x668] sm:$0xff]  ;;  %v1688_v55 = vunpack.c.l.bf16 %v1197_v13 }
 0x4ef   :  { %v3340_v32 = vpop.f32.mrb[78].mxu1 }
 0x4f0   :  { %v3342_v33 = vpop.f32.mrb[79].mxu1  ;;  %3604 = vmatmul.mubr.f32.gmra.mrb[184].mxu1 %v1652_v57  ;;  %13477 = vmatmul.mubr.msk.f32.gmra.mrb[62].mxu0 %vm3869_vm1, %v3340_v32  ;;  %v1693_v57 = vunpack.c.h.bf16 %v1199_v15  ;;  %v12138_v32 = vld [vmem:[%s20056_s26 + $0x90] sm:$0xff] }
 0x4f1   :  { %12008 = vmatprep.mubr.msk.f32.mxu1 %vm1858_vm2, %v1657_v26  ;;  %v1201_v26 = vld [vmem:[%s20054_s25 + $0x678] sm:$0xff] }
 0x4f2   :  { %v12139_v33 = vld [vmem:[%s20056_s26 + $0x98] sm:$0xff]  ;;  %v1697_v0 = vunpack.c.h.bf16 %v1201_v26 }
 0x4f3   :  { %v3345_v63 = vpop.f32.mrb[80].mxu1 }
 0x4f4   :  { %v3347_v4 = vpop.f32.mrb[81].mxu1  ;;  %3609 = vmatmul.mubr.f32.gmra.mrb[186].mxu1 %v1656_v19  ;;  %13479 = vmatprep.mubr.msk.f32.mxu0 %vm3869_vm1, %v3345_v63  ;;  %v1203_v63 = vld [vmem:[%s20054_s25 + $0x688] sm:$0xff] }
 0x4f5   :  { %12009 = vmatprep.mubr.msk.f32.mxu1 %vm1858_vm2, %v1661_v54  ;;  %v1692_v54 = vunpack.c.l.bf16 %v1199_v15  ;;  %v14320_v4 = vpack.c.bf16 %v12139_v33, %v12138_v32 }
 0x4f7   :  { %v3350_v7 = vpop.f32.mrb[82].mxu1 }
 0x4f8   :  { %v3352_v10 = vpop.f32.mrb[83].mxu1  ;;  %3614 = vmatmul.mubr.f32.gmra.mrb[188].mxu1 %v1660_v61  ;;  %13480 = vmatmul.mubr.msk.f32.gmra.mrb[64].mxu0 %vm3869_vm1, %v3350_v7 }
 0x4f9   :  { %12010 = vmatprep.mubr.msk.f32.mxu1 %vm1858_vm2, %v1665_v5  ;;  %v12156_v5 = vld [vmem:[%s20056_s26 + $0xa0] sm:$0xff]  ;;  %v1696_v10 = vunpack.c.l.bf16 %v1201_v26 }
 0x4fa   :  { %v17412_v14 = vpack.c.bf16 %v12157_v2, %v12156_v5 }
 0x4fb   :  { %v3355_v50 = vpop.f32.mrb[84].mxu1 }
 0x4fc   :  { %v3357_v29 = vpop.f32.mrb[85].mxu1  ;;  %3619 = vmatmul.mubr.f32.gmra.mrb[190].mxu1 %v1664_v6  ;;  %13482 = vmatprep.mubr.msk.f32.mxu0 %vm3869_vm1, %v3355_v50  ;;  %v1701_v6 = vunpack.c.h.bf16 %v1203_v63 }
 0x4fd   :  { %12011 = vmatprep.mubr.msk.f32.mxu1 %vm1858_vm2, %v1669_v12  ;;  %v1205_v12 = vld [vmem:[%s20054_s25 + $0x698] sm:$0xff] }
 0x4ff   :  { %v3360_v11 = vpop.f32.mrb[86].mxu1 }
 0x500   :  { %v3362_v62 = vpop.f32.mrb[87].mxu1  ;;  %3624 = vmatmul.mubr.f32.gmra.mrb[192].mxu1 %v1668_v18  ;;  %13483 = vmatmul.mubr.msk.f32.gmra.mrb[66].mxu0 %vm3869_vm1, %v3360_v11  ;;  %v1700_v18 = vunpack.c.l.bf16 %v1203_v63 }
 0x501   :  { %12012 = vmatprep.mubr.msk.f32.mxu1 %vm1858_vm2, %v1673_v8  ;;  %v1705_v8 = vunpack.c.h.bf16 %v1205_v12  ;;  %v1704_v62 = vunpack.c.l.bf16 %v1205_v12 }
 0x503   :  { %v3365_v36 = vpop.f32.mrb[88].mxu1 }
 0x504   :  { %v3367_v31 = vpop.f32.mrb[89].mxu1  ;;  %3629 = vmatmul.mubr.f32.gmra.mrb[194].mxu1 %v1672_v59  ;;  %13485 = vmatprep.mubr.msk.f32.mxu0 %vm3869_vm1, %v3365_v36 }
 0x505   :  { %12013 = vmatprep.mubr.msk.f32.mxu1 %vm1858_vm2, %v1677_v28  ;;  %v1209_v28 = vld [vmem:[%s20054_s25 + $0x6b8] sm:$0xff] }
 0x507   :  { %v3370_v40 = vpop.f32.mrb[90].mxu1 }
 0x508   :  { %v3372_v24 = vpop.f32.mrb[91].mxu1  ;;  %3634 = vmatmul.mubr.f32.gmra.mrb[196].mxu1 %v1676_v34  ;;  %13486 = vmatmul.mubr.msk.f32.gmra.mrb[68].mxu0 %vm3869_vm1, %v3370_v40  ;;  %v1713_v34 = vunpack.c.h.bf16 %v1209_v28 }
 0x509   :  { %12014 = vmatprep.mubr.msk.f32.mxu1 %vm1858_vm2, %v1681_v37  ;;  %v1211_v37 = vld [vmem:[%s20054_s25 + $0x6c8] sm:$0xff]  ;;  %v1712_v24 = vunpack.c.l.bf16 %v1209_v28 }
 0x50b   :  { %v3375_v48 = vpop.f32.mrb[92].mxu1 }
 0x50c   :  { %v3377_v35 = vpop.f32.mrb[93].mxu1  ;;  %3639 = vmatmul.mubr.f32.gmra.mrb[198].mxu1 %v1680_v46  ;;  %13488 = vmatprep.mubr.msk.f32.mxu0 %vm3869_vm1, %v3375_v48  ;;  %v1717_v46 = vunpack.c.h.bf16 %v1211_v37 }
 0x50d   :  { %12015 = vmatprep.mubr.msk.f32.mxu1 %vm1858_vm2, %v1685_v42  ;;  %v1213_v42 = vld [vmem:[%s20054_s25 + $0x6d8] sm:$0xff]  ;;  %v1716_v35 = vunpack.c.l.bf16 %v1211_v37 }
 0x50f   :  { %v3380_v25 = vpop.f32.mrb[94].mxu1 }
 0x510   :  { %v3382_v53 = vpop.f32.mrb[95].mxu1  ;;  %3644 = vmatmul.mubr.f32.gmra.mrb[200].mxu1 %v1684_v47  ;;  %13489 = vmatmul.mubr.msk.f32.gmra.mrb[70].mxu0 %vm3869_vm1, %v3380_v25  ;;  %v1721_v47 = vunpack.c.h.bf16 %v1213_v42 }
 0x511   :  { %12016 = vmatprep.mubr.msk.f32.mxu1 %vm1858_vm2, %v1689_v51  ;;  %v1215_v51 = vld [vmem:[%s20054_s25 + $0x6e8] sm:$0xff]  ;;  %v1720_v53 = vunpack.c.l.bf16 %v1213_v42 }
 0x512   :  { %v1724_v32 = vunpack.c.l.bf16 %v1215_v51 }
 0x513   :  { %v3385_v58 = vpop.f32.mrb[96].mxu1 }
 0x514   :  { %v3387_v19 = vpop.f32.mrb[97].mxu1  ;;  %3649 = vmatmul.mubr.f32.gmra.mrb[202].mxu1 %v1688_v55  ;;  %13499 = vmatprep.mubr.msk.f32.mxu0 %vm3869_vm1, %v3385_v58  ;;  %v1725_v55 = vunpack.c.h.bf16 %v1215_v51 }
 0x515   :  { %12017 = vmatprep.mubr.msk.f32.mxu1 %vm1858_vm2, %v1693_v57  ;;  %v1217_v57 = vld [vmem:[%s20054_s25 + $0x6f8] sm:$0xff]  ;;  %v1219_v19 = vld [vmem:[%s20054_s25 + $0x708] sm:$0xff] }
 0x516   :  { %v1729_v33 = vunpack.c.h.bf16 %v1217_v57  ;;  %v1728_v63 = vunpack.c.l.bf16 %v1217_v57 }
 0x517   :  { %v3390_v61 = vpop.f32.mrb[98].mxu1 }
 0x518   :  { %v3392_v7 = vpop.f32.mrb[99].mxu1  ;;  %3654 = vmatmul.mubr.f32.gmra.mrb[204].mxu1 %v1692_v54  ;;  %13500 = vmatmul.mubr.msk.f32.vlgmr.msra.gmra.mrb[56].mxu0 %vm3869_vm1, %v3390_v61  ;;  %v1221_v61 = vld [vmem:[%s20054_s25 + $0x718] sm:$0xff] }
 0x519   :  { %12018 = vmatprep.mubr.msk.f32.mxu1 %vm1858_vm2, %v1697_v0  ;;  %14319 = vmatpush3.bf16.msra.mxu0 %v17316_v23  ;;  %v1207_v23 = vld [vmem:[%s20054_s25 + $0x6a8] sm:$0xff]  ;;  %v1732_v7 = vunpack.c.l.bf16 %v1219_v19 }
 0x51a   :  { %14321 = vmatprep.subr.bf16.mxu0 %v14320_v4  ;;  %v1709_v59 = vunpack.c.h.bf16 %v1207_v23  ;;  %v1708_v31 = vunpack.c.l.bf16 %v1207_v23 }
 0x51b   :  { %v3395_v50 = vpop.f32.mrb[100].mxu1 }
 0x51c   :  { %v3397_v29 = vpop.f32.mrb[101].mxu1  ;;  %3659 = vmatmul.mubr.f32.gmra.mrb[206].mxu1 %v1696_v10  ;;  %13502 = vmatprep.mubr.msk.f32.mxu0 %vm3869_vm1, %v3395_v50  ;;  %v1737_v10 = vunpack.c.h.bf16 %v1221_v61 }
 0x51d   :  { %12019 = vmatprep.mubr.msk.f32.mxu1 %vm1858_vm2, %v1701_v6  ;;  %14323 = vmatpush3.bf16.msra.mxu0 %v14320_v4  ;;  %v1733_v4 = vunpack.c.h.bf16 %v1219_v19  ;;  %v1223_v6 = vld [vmem:[%s20054_s25 + $0x728] sm:$0xff]  ;;  %v1736_v29 = vunpack.c.l.bf16 %v1221_v61 }
 0x51e   :  { %14325 = vmatprep.subr.bf16.mxu0 %v17412_v14  ;;  %v12177_v19 = vld [vmem:[%s20056_s26 + $0xc8] sm:$0xff] }
 0x51f   :  { %v3400_v56 = vpop.f32.mrb[102].mxu1 }
 0x520   :  { %v3402_v11 = vpop.f32.mrb[103].mxu1  ;;  %3664 = vmatmul.mubr.f32.gmra.mrb[208].mxu1 %v1700_v18  ;;  %13503 = vmatmul.mubr.msk.f32.gmra.mrb[58].mxu0 %vm3869_vm1, %v3400_v56  ;;  %v1741_v18 = vunpack.c.h.bf16 %v1223_v6 }
 0x521   :  { %12020 = vmatprep.mubr.msk.f32.mxu1 %vm1858_vm2, %v1705_v8  ;;  %v1225_v8 = vld [vmem:[%s20054_s25 + $0x738] sm:$0xff]  ;;  %v1740_v11 = vunpack.c.l.bf16 %v1223_v6 }
 0x523   :  { %v3405_v1 = vpop.f32.mrb[104].mxu1 }
 0x524   :  { %v3407_v36 = vpop.f32.mrb[105].mxu1  ;;  %3669 = vmatmul.mubr.f32.gmra.mrb[210].mxu1 %v1704_v62  ;;  %13505 = vmatprep.mubr.msk.f32.mxu0 %vm3869_vm1, %v3405_v1  ;;  %v1745_v62 = vunpack.c.h.bf16 %v1225_v8 }
 0x525   :  { %12021 = vmatprep.mubr.msk.f32.mxu1 %vm1858_vm2, %v1709_v59  ;;  %v1227_v59 = vld [vmem:[%s20054_s25 + $0x748] sm:$0xff]  ;;  %v1744_v36 = vunpack.c.l.bf16 %v1225_v8 }
 0x527   :  { %v3410_v20 = vpop.f32.mrb[106].mxu1 }
 0x528   :  { %v3412_v40 = vpop.f32.mrb[107].mxu1  ;;  %3674 = vmatmul.mubr.f32.gmra.mrb[212].mxu1 %v1708_v31  ;;  %13506 = vmatmul.mubr.msk.f32.gmra.mrb[60].mxu0 %vm3869_vm1, %v3410_v20  ;;  %v1749_v31 = vunpack.c.h.bf16 %v1227_v59 }
 0x529   :  { %12022 = vmatprep.mubr.msk.f32.mxu1 %vm1858_vm2, %v1713_v34  ;;  %v1229_v34 = vld [vmem:[%s20054_s25 + $0x758] sm:$0xff]  ;;  %v1748_v40 = vunpack.c.l.bf16 %v1227_v59 }
 0x52b   :  { %v3415_v13 = vpop.f32.mrb[108].mxu1 }
 0x52c   :  { %v3417_v48 = vpop.f32.mrb[109].mxu1  ;;  %3679 = vmatmul.mubr.f32.gmra.mrb[214].mxu1 %v1712_v24  ;;  %13508 = vmatprep.mubr.msk.f32.mxu0 %vm3869_vm1, %v3415_v13  ;;  %v1753_v24 = vunpack.c.h.bf16 %v1229_v34 }
 0x52d   :  { %12023 = vmatprep.mubr.msk.f32.mxu1 %vm1858_vm2, %v1717_v46  ;;  %v1231_v46 = vld [vmem:[%s20054_s25 + $0x768] sm:$0xff]  ;;  %v1752_v48 = vunpack.c.l.bf16 %v1229_v34 }
 0x52f   :  { %v3420_v15 = vpop.f32.mrb[110].mxu1 }
 0x530   :  { %v3422_v25 = vpop.f32.mrb[111].mxu1  ;;  %3684 = vmatmul.mubr.f32.gmra.mrb[216].mxu1 %v1716_v35  ;;  %13509 = vmatmul.mubr.msk.f32.gmra.mrb[62].mxu0 %vm3869_vm1, %v3420_v15  ;;  %v1757_v35 = vunpack.c.h.bf16 %v1231_v46  ;;  %v12158_v15 = vld [vmem:[%s20056_s26 + $0xb0] sm:$0xff] }
 0x531   :  { %12024 = vmatprep.mubr.msk.f32.mxu1 %vm1858_vm2, %v1721_v47  ;;  %v1233_v47 = vld [vmem:[%s20054_s25 + $0x778] sm:$0xff] }
 0x532   :  { %v12159_v25 = vld [vmem:[%s20056_s26 + $0xb8] sm:$0xff]  ;;  %v1761_v57 = vunpack.c.h.bf16 %v1233_v47 }
 0x533   :  { %v3425_v26 = vpop.f32.mrb[112].mxu1 }
 0x534   :  { %v3427_v58 = vpop.f32.mrb[113].mxu1  ;;  %3689 = vmatmul.mubr.f32.gmra.mrb[218].mxu1 %v1720_v53  ;;  %13511 = vmatprep.mubr.msk.f32.mxu0 %vm3869_vm1, %v3425_v26  ;;  %v1235_v26 = vld [vmem:[%s20054_s25 + $0x788] sm:$0xff] }
 0x535   :  { %12025 = vmatprep.mubr.msk.f32.mxu1 %vm1858_vm2, %v1725_v55  ;;  %v1756_v55 = vunpack.c.l.bf16 %v1231_v46  ;;  %v14328_v58 = vpack.c.bf16 %v12159_v25, %v12158_v15 }
 0x537   :  { %v3430_v54 = vpop.f32.mrb[114].mxu1 }
 0x538   :  { %v3432_v0 = vpop.f32.mrb[115].mxu1  ;;  %3694 = vmatmul.mubr.f32.gmra.mrb[220].mxu1 %v1724_v32  ;;  %13512 = vmatmul.mubr.msk.f32.gmra.mrb[64].mxu0 %vm3869_vm1, %v3430_v54 }
 0x539   :  { %12026 = vmatprep.mubr.msk.f32.mxu1 %vm1858_vm2, %v1729_v33  ;;  %v12176_v33 = vld [vmem:[%s20056_s26 + $0xc0] sm:$0xff]  ;;  %v1760_v0 = vunpack.c.l.bf16 %v1233_v47 }
 0x53a   :  { %v17508_v61 = vpack.c.bf16 %v12177_v19, %v12176_v33 }
 0x53b   :  { %v3435_v5 = vpop.f32.mrb[116].mxu1 }
 0x53c   :  { %v3437_v2 = vpop.f32.mrb[117].mxu1  ;;  %3699 = vmatmul.mubr.f32.gmra.mrb[222].mxu1 %v1728_v63  ;;  %13514 = vmatprep.mubr.msk.f32.mxu0 %vm3869_vm1, %v3435_v5  ;;  %v1765_v63 = vunpack.c.h.bf16 %v1235_v26 }
 0x53d   :  { %12027 = vmatprep.mubr.msk.f32.mxu1 %vm1858_vm2, %v1733_v4  ;;  %v1237_v4 = vld [vmem:[%s20054_s25 + $0x798] sm:$0xff] }
 0x53f   :  { %v3440_v12 = vpop.f32.mrb[118].mxu1 }
 0x540   :  { %v3442_v50 = vpop.f32.mrb[119].mxu1  ;;  %3704 = vmatmul.mubr.f32.gmra.mrb[224].mxu1 %v1732_v7  ;;  %13515 = vmatmul.mubr.msk.f32.gmra.mrb[66].mxu0 %vm3869_vm1, %v3440_v12  ;;  %v1764_v7 = vunpack.c.l.bf16 %v1235_v26 }
 0x541   :  { %12028 = vmatprep.mubr.msk.f32.mxu1 %vm1858_vm2, %v1737_v10  ;;  %v1769_v10 = vunpack.c.h.bf16 %v1237_v4  ;;  %v1768_v50 = vunpack.c.l.bf16 %v1237_v4 }
 0x543   :  { %v3445_v23 = vpop.f32.mrb[120].mxu1 }
 0x544   :  { %v3447_v56 = vpop.f32.mrb[121].mxu1  ;;  %3709 = vmatmul.mubr.f32.gmra.mrb[226].mxu1 %v1736_v29  ;;  %13517 = vmatprep.mubr.msk.f32.mxu0 %vm3869_vm1, %v3445_v23 }
 0x545   :  { %12029 = vmatprep.mubr.msk.f32.mxu1 %vm1858_vm2, %v1741_v18  ;;  %v1241_v18 = vld [vmem:[%s20054_s25 + $0x7b8] sm:$0xff] }
 0x547   :  { %v3450_v28 = vpop.f32.mrb[122].mxu1 }
 0x548   :  { %v3452_v1 = vpop.f32.mrb[123].mxu1  ;;  %3714 = vmatmul.mubr.f32.gmra.mrb[228].mxu1 %v1740_v11  ;;  %13518 = vmatmul.mubr.msk.f32.gmra.mrb[68].mxu0 %vm3869_vm1, %v3450_v28  ;;  %v1777_v11 = vunpack.c.h.bf16 %v1241_v18 }
 0x549   :  { %12030 = vmatprep.mubr.msk.f32.mxu1 %vm1858_vm2, %v1745_v62  ;;  %v1243_v62 = vld [vmem:[%s20054_s25 + $0x7c8] sm:$0xff]  ;;  %v1776_v1 = vunpack.c.l.bf16 %v1241_v18 }
 0x54a   :  { %v1259_v18 = vld [vmem:[%s20054_s25 + $0x848] sm:$0xff] }
 0x54b   :  { %v3455_v37 = vpop.f32.mrb[124].mxu1 }
 0x54c   :  { %v3457_v20 = vpop.f32.mrb[125].mxu1  ;;  %3719 = vmatmul.mubr.f32.gmra.mrb[230].mxu1 %v1744_v36  ;;  %13520 = vmatprep.mubr.msk.f32.mxu0 %vm3869_vm1, %v3455_v37  ;;  %v1781_v36 = vunpack.c.h.bf16 %v1243_v62 }
 0x54d   :  { %12031 = vmatprep.mubr.msk.f32.mxu1 %vm1858_vm2, %v1749_v31  ;;  %v1245_v31 = vld [vmem:[%s20054_s25 + $0x7d8] sm:$0xff]  ;;  %v1780_v20 = vunpack.c.l.bf16 %v1243_v62 }
 0x54e   :  { %v1261_v62 = vld [vmem:[%s20054_s25 + $0x858] sm:$0xff] }
 0x54f   :  { %v3460_v42 = vpop.f32.mrb[126].mxu1 }
 0x550   :  { %v3462_v13 = vpop.f32.mrb[127].mxu1  ;;  %3724 = vmatmul.mubr.f32.gmra.mrb[232].mxu1 %v1748_v40  ;;  %13521 = vmatmul.mubr.msk.f32.gmra.mrb[70].mxu0 %vm3869_vm1, %v3460_v42  ;;  %v1785_v40 = vunpack.c.h.bf16 %v1245_v31 }
 0x551   :  { %12032 = vmatprep.mubr.msk.f32.mxu1 %vm1858_vm2, %v1753_v24  ;;  %v1247_v24 = vld [vmem:[%s20054_s25 + $0x7e8] sm:$0xff]  ;;  %v1784_v13 = vunpack.c.l.bf16 %v1245_v31 }
 0x552   :  { %v1788_v15 = vunpack.c.l.bf16 %v1247_v24  ;;  %v1263_v31 = vld [vmem:[%s20054_s25 + $0x868] sm:$0xff] }
 0x553   :  { %v3465_v51 = vpop.f32.mrb[128].mxu1 }
 0x554   :  { %v3467_v53 = vpop.f32.mrb[129].mxu1  ;;  %3729 = vmatmul.mubr.f32.gmra.mrb[234].mxu1 %v1752_v48  ;;  %13531 = vmatprep.mubr.msk.f32.mxu0 %vm3869_vm1, %v3465_v51  ;;  %v1789_v48 = vunpack.c.h.bf16 %v1247_v24  ;;  %v1265_v24 = vld [vmem:[%s20054_s25 + $0x878] sm:$0xff] }
 0x555   :  { %12033 = vmatprep.mubr.msk.f32.mxu1 %vm1858_vm2, %v1757_v35  ;;  %v1249_v35 = vld [vmem:[%s20054_s25 + $0x7f8] sm:$0xff]  ;;  %v1251_v53 = vld [vmem:[%s20054_s25 + $0x808] sm:$0xff] }
 0x556   :  { %v1793_v25 = vunpack.c.h.bf16 %v1249_v35  ;;  %v1792_v26 = vunpack.c.l.bf16 %v1249_v35  ;;  %v12178_v35 = vld [vmem:[%s20056_s26 + $0xd0] sm:$0xff] }
 0x557   :  { %v3470_v32 = vpop.f32.mrb[130].mxu1 }
 0x558   :  { %v3472_v54 = vpop.f32.mrb[131].mxu1  ;;  %3734 = vmatmul.mubr.f32.gmra.mrb[236].mxu1 %v1756_v55  ;;  %13532 = vmatmul.mubr.msk.f32.vlgmr.msra.gmra.mrb[56].mxu0 %vm3869_vm1, %v3470_v32  ;;  %v1253_v32 = vld [vmem:[%s20054_s25 + $0x818] sm:$0xff] }
 0x559   :  { %12034 = vmatprep.mubr.msk.f32.mxu1 %vm1858_vm2, %v1761_v57  ;;  %14327 = vmatpush3.bf16.msra.mxu0 %v17412_v14  ;;  %v1239_v14 = vld [vmem:[%s20054_s25 + $0x7a8] sm:$0xff]  ;;  %v1796_v54 = vunpack.c.l.bf16 %v1251_v53 }
 0x55a   :  { %14329 = vmatprep.subr.bf16.mxu0 %v14328_v58  ;;  %v1773_v29 = vunpack.c.h.bf16 %v1239_v14  ;;  %v1772_v56 = vunpack.c.l.bf16 %v1239_v14  ;;  %v1257_v14 = vld [vmem:[%s20054_s25 + $0x838] sm:$0xff] }
 0x55b   :  { %v3475_v5 = vpop.f32.mrb[132].mxu1 }
 0x55c   :  { %v3477_v2 = vpop.f32.mrb[133].mxu1  ;;  %3739 = vmatmul.mubr.f32.gmra.mrb[238].mxu1 %v1760_v0  ;;  %13534 = vmatprep.mubr.msk.f32.mxu0 %vm3869_vm1, %v3475_v5  ;;  %v1801_v0 = vunpack.c.h.bf16 %v1253_v32 }
 0x55d   :  { %12035 = vmatprep.mubr.msk.f32.mxu1 %vm1858_vm2, %v1765_v63  ;;  %14331 = vmatpush3.bf16.msra.mxu0 %v14328_v58  ;;  %v1797_v58 = vunpack.c.h.bf16 %v1251_v53  ;;  %v1255_v63 = vld [vmem:[%s20054_s25 + $0x828] sm:$0xff]  ;;  %v1824_v53 = vunpack.c.l.bf16 %v1265_v24 }
 0x55e   :  { %14333 = vmatprep.subr.bf16.mxu0 %v17508_v61 }
 0x55f   :  { %v3480_v6 = vpop.f32.mrb[134].mxu1 }
 0x560   :  { %v3482_v12 = vpop.f32.mrb[135].mxu1  ;;  %3744 = vmatmul.mubr.f32.gmra.mrb[240].mxu1 %v1764_v7  ;;  %13535 = vmatmul.mubr.msk.f32.gmra.mrb[58].mxu0 %vm3869_vm1, %v3480_v6  ;;  %v1800_v7 = vunpack.c.l.bf16 %v1253_v32 }
 0x561   :  { %12036 = vmatprep.mubr.msk.f32.mxu1 %vm1858_vm2, %v1769_v10  ;;  %v1805_v10 = vunpack.c.h.bf16 %v1255_v63 }
 0x563   :  { %v3485_v8 = vpop.f32.mrb[136].mxu1 }
 0x564   :  { %v3487_v23 = vpop.f32.mrb[137].mxu1  ;;  %3749 = vmatmul.mubr.f32.gmra.mrb[242].mxu1 %v1768_v50  ;;  %13537 = vmatprep.mubr.msk.f32.mxu0 %vm3869_vm1, %v3485_v8 }
 0x565   :  { %12037 = vmatprep.mubr.msk.f32.mxu1 %vm1858_vm2, %v1773_v29  ;;  %v1804_v29 = vunpack.c.l.bf16 %v1255_v63 }
 0x567   :  { %v3490_v59 = vpop.f32.mrb[138].mxu1 }
 0x568   :  { %v3492_v28 = vpop.f32.mrb[139].mxu1  ;;  %3754 = vmatmul.mubr.f32.gmra.mrb[244].mxu1 %v1772_v56  ;;  %13538 = vmatmul.mubr.msk.f32.gmra.mrb[60].mxu0 %vm3869_vm1, %v3490_v59 }
 0x569   :  { %12038 = vmatprep.mubr.msk.f32.mxu1 %vm1858_vm2, %v1777_v11  ;;  %v1808_v11 = vunpack.c.l.bf16 %v1257_v14 }
 0x56b   :  { %v3495_v34 = vpop.f32.mrb[140].mxu1 }
 0x56c   :  { %v3497_v37 = vpop.f32.mrb[141].mxu1  ;;  %3759 = vmatmul.mubr.f32.gmra.mrb[246].mxu1 %v1776_v1  ;;  %13540 = vmatprep.mubr.msk.f32.mxu0 %vm3869_vm1, %v3495_v34 }
 0x56d   :  { %12039 = vmatprep.mubr.msk.f32.mxu1 %vm1858_vm2, %v1781_v36  ;;  %v1812_v36 = vunpack.c.l.bf16 %v1259_v18 }
 0x56f   :  { %v3500_v46 = vpop.f32.mrb[142].mxu1 }
 0x570   :  { %v3502_v42 = vpop.f32.mrb[143].mxu1  ;;  %3764 = vmatmul.mubr.f32.gmra.mrb[248].mxu1 %v1780_v20  ;;  %13541 = vmatmul.mubr.msk.f32.gmra.mrb[62].mxu0 %vm3869_vm1, %v3500_v46 }
 0x571   :  { %12040 = vmatprep.mubr.msk.f32.mxu1 %vm1858_vm2, %v1785_v40  ;;  %v1816_v40 = vunpack.c.l.bf16 %v1261_v62 }
 0x573   :  { %v3505_v47 = vpop.f32.mrb[144].mxu1 }
 0x574   :  { %v3507_v51 = vpop.f32.mrb[145].mxu1  ;;  %3769 = vmatmul.mubr.f32.gmra.mrb[250].mxu1 %v1784_v13  ;;  %13543 = vmatprep.mubr.msk.f32.mxu0 %vm3869_vm1, %v3505_v47  ;;  %v12179_v47 = vld [vmem:[%s20056_s26 + $0xd8] sm:$0xff] }
 0x575   :  { %12041 = vmatprep.mubr.msk.f32.mxu1 %vm1858_vm2, %v1789_v48  ;;  %v1820_v48 = vunpack.c.l.bf16 %v1263_v31 }
 0x577   :  { %v3510_v55 = vpop.f32.mrb[146].mxu1 }
 0x578   :  { %v3512_v57 = vpop.f32.mrb[147].mxu1  ;;  %3774 = vmatmul.mubr.f32.gmra.mrb[252].mxu1 %v1788_v15  ;;  %13544 = vmatmul.mubr.msk.f32.gmra.mrb[64].mxu0 %vm3869_vm1, %v3510_v55  ;;  %v14336_v55 = vpack.c.bf16 %v12179_v47, %v12178_v35 }
 0x579   :  { %12042 = vmatprep.mubr.msk.f32.mxu1 %vm1858_vm2, %v1793_v25 }
 0x57b   :  { %v3515_v33 = vpop.f32.mrb[148].mxu1 }
 0x57c   :  { %v3517_v19 = vpop.f32.mrb[149].mxu1  ;;  %3779 = vmatmul.mubr.f32.gmra.mrb[254].mxu1 %v1792_v26  ;;  %13546 = vmatprep.mubr.msk.f32.mxu0 %vm3869_vm1, %v3515_v33  ;;  %v12196_v26 = vld [vmem:[%s20056_s26 + $0xe0] sm:$0xff] }
 0x57d   :  { %12043 = vmatprep.mubr.msk.f32.mxu1 %vm1858_vm2, %v1797_v58  ;;  %v12197_v58 = vld [vmem:[%s20056_s26 + $0xe8] sm:$0xff] }
 0x57f   :  { %v3520_v4 = vpop.f32.mrb[0].mxu1 }
 0x580   :  { %v3521_v5 = vadd.f32 %v3520_v4, %v16787_v30  ;;  %v3522_v2 = vpop.f32.mrb[1].mxu1  ;;  %3784 = vmatmul.mubr.f32.gmra.mrb[150].mxu1 %v1796_v54  ;;  %v1809_v30 = vunpack.c.h.bf16 %v1257_v14  ;;  %v1271_v4 = vld [vmem:[%s20054_s25 + $0x8a8] sm:$0xff] }
 0x581   :  { %12044 = vmatprep.mubr.msk.f32.mxu1 %vm1858_vm2, %v1801_v0  ;;  %v17612_v0 = vpack.c.bf16 %v12197_v58, %v12196_v26  ;;  %v12198_v26 = vld [vmem:[%s20056_s26 + $0xf0] sm:$0xff]  ;;  %v12199_v58 = vld [vmem:[%s20056_s26 + $0xf8] sm:$0xff] }
 0x582   :  { %13547 = vmatmul.mubr.msk.f32.gmra.mrb[66].mxu0 %vm3869_vm1, %v3521_v5 }
 0x583   :  { %v3525_v6 = vpop.f32.mrb[2].mxu1 }
 0x584   :  { %v3526_v12 = vadd.f32 %v3525_v6, %v16792_v16  ;;  %v3527_v50 = vpop.f32.mrb[3].mxu1  ;;  %3789 = vmatmul.mubr.f32.gmra.mrb[152].mxu1 %v1800_v7  ;;  %v1813_v16 = vunpack.c.h.bf16 %v1259_v18  ;;  %v1837_v7 = vunpack.c.h.bf16 %v1271_v4 }
 0x585   :  { %12045 = vmatprep.mubr.msk.f32.mxu1 %vm1858_vm2, %v1805_v10  ;;  %v1273_v10 = vld [vmem:[%s20054_s25 + $0x8b8] sm:$0xff] }
 0x586   :  { %13549 = vmatprep.mubr.msk.f32.mxu0 %vm3869_vm1, %v3526_v12  ;;  %v1841_v50 = vunpack.c.h.bf16 %v1273_v10 }
 0x587   :  { %v3530_v8 = vpop.f32.mrb[4].mxu1 }
 0x588   :  { %v3531_v23 = vadd.f32 %v3530_v8, %v16797_v39  ;;  %v3532_v56 = vpop.f32.mrb[5].mxu1  ;;  %3794 = vmatmul.mubr.f32.gmra.mrb[154].mxu1 %v1804_v29  ;;  %v1817_v39 = vunpack.c.h.bf16 %v1261_v62  ;;  %v1275_v29 = vld [vmem:[%s20054_s25 + $0x8c8] sm:$0xff] }
 0x589   :  { %12046 = vmatprep.mubr.msk.f32.mxu1 %vm1858_vm2, %v1809_v30  ;;  %v1277_v56 = vld [vmem:[%s20054_s25 + $0x8d8] sm:$0xff] }
 0x58a   :  { %13550 = vmatmul.mubr.msk.f32.gmra.mrb[68].mxu0 %vm3869_vm1, %v3531_v23  ;;  %v1840_v23 = vunpack.c.l.bf16 %v1273_v10 }
 0x58b   :  { %v3535_v59 = vpop.f32.mrb[6].mxu1 }
 0x58c   :  { %v3536_v28 = vadd.f32 %v3535_v59, %v16802_v43  ;;  %v3537_v1 = vpop.f32.mrb[7].mxu1  ;;  %3799 = vmatmul.mubr.f32.gmra.mrb[156].mxu1 %v1808_v11  ;;  %v1821_v43 = vunpack.c.h.bf16 %v1263_v31  ;;  %v1844_v59 = vunpack.c.l.bf16 %v1275_v29  ;;  %v1848_v31 = vunpack.c.l.bf16 %v1277_v56 }
 0x58d   :  { %12047 = vmatprep.mubr.msk.f32.mxu1 %vm1858_vm2, %v1813_v16 }
 0x58e   :  { %13552 = vmatprep.mubr.msk.f32.mxu0 %vm3869_vm1, %v3536_v28  ;;  %v1279_v28 = vld [vmem:[%s20054_s25 + $0x8e8] sm:$0xff] }
 0x58f   :  { %v3540_v34 = vpop.f32.mrb[8].mxu1 }
 0x590   :  { %v3541_v37 = vadd.f32 %v3540_v34, %v16807_v21  ;;  %v3542_v20 = vpop.f32.mrb[9].mxu1  ;;  %3804 = vmatmul.mubr.f32.gmra.mrb[158].mxu1 %v1812_v36  ;;  %v1825_v21 = vunpack.c.h.bf16 %v1265_v24  ;;  %v1281_v34 = vld [vmem:[%s20054_s25 + $0x8f8] sm:$0xff] }
 0x591   :  { %12048 = vmatprep.mubr.msk.f32.mxu1 %vm1858_vm2, %v1817_v39 }
 0x592   :  { %13553 = vmatmul.mubr.msk.f32.gmra.mrb[70].mxu0 %vm3869_vm1, %v3541_v37 }
 0x593   :  { %v3545_v46 = vpop.f32.mrb[10].mxu1 }
 0x594   :  { %v3546_v42 = vadd.f32 %v3545_v46, %v16812_v17  ;;  %v3547_v13 = vpop.f32.mrb[11].mxu1  ;;  %3809 = vmatmul.mubr.f32.gmra.mrb[160].mxu1 %v1816_v40  ;;  %v1267_v17 = vld [vmem:[%s20054_s25 + $0x888] sm:$0xff] }
 0x595   :  { %12049 = vmatprep.mubr.msk.f32.mxu1 %vm1858_vm2, %v1821_v43  ;;  %v1829_v57 = vunpack.c.h.bf16 %v1267_v17  ;;  %v1828_v54 = vunpack.c.l.bf16 %v1267_v17  ;;  %v1852_v43 = vunpack.c.l.bf16 %v1279_v28  ;;  %v1856_v13 = vunpack.c.l.bf16 %v1281_v34 }
 0x596   :  { %13563 = vmatprep.mubr.msk.f32.mxu0 %vm3869_vm1, %v3546_v42 }
 0x597   :  { %v3550_v51 = vpop.f32.mrb[12].mxu1 }
 0x598   :  { %v3551_v15 = vadd.f32 %v3550_v51, %v16817_v60  ;;  %v3552_v25 = vpop.f32.mrb[13].mxu1  ;;  %3814 = vmatmul.mubr.f32.gmra.mrb[162].mxu1 %v1820_v48  ;;  %v1269_v60 = vld [vmem:[%s20054_s25 + $0x898] sm:$0xff] }
 0x599   :  { %12050 = vmatprep.mubr.msk.f32.mxu1 %vm1858_vm2, %v1825_v21  ;;  %v1833_v63 = vunpack.c.h.bf16 %v1269_v60  ;;  %v1832_v2 = vunpack.c.l.bf16 %v1269_v60 }
 0x59a   :  { %13564 = vmatmul.mubr.msk.f32.vlgmr.msra.gmra.mrb[56].mxu0 %vm3869_vm1, %v3551_v15 }
 0x59b   :  { %v3555_v32 = vpop.f32.mrb[14].mxu1  ;;  %14335 = vmatpush3.bf16.msra.mxu0 %v17508_v61 }
 0x59c   :  { %v3556_v33 = vadd.f32 %v3555_v32, %v16822_v52  ;;  %v3557_v19 = vpop.f32.mrb[15].mxu1  ;;  %3819 = vmatmul.mubr.f32.gmra.mrb[164].mxu1 %v1824_v53  ;;  %14337 = vmatprep.subr.bf16.mxu0 %v14336_v55  ;;  %v14344_v32 = vpack.c.bf16 %v12199_v58, %v12198_v26 }
 0x59d   :  { %12051 = vmatprep.mubr.msk.f32.mxu1 %vm1858_vm2, %v1829_v57  ;;  %v12216_v19 = vld [vmem:[%s20056_s26 + $0x100] sm:$0xff] }
 0x59e   :  { %13566 = vmatprep.mubr.msk.f32.mxu0 %vm3869_vm1, %v3556_v33 }
 0x59f   :  { %v3560_v5 = vpop.f32.mrb[16].mxu1  ;;  %14339 = vmatpush3.bf16.msra.mxu0 %v14336_v55 }
 0x5a0   :  { %v3561_v61 = vadd.f32 %v3560_v5, %v16827_v38  ;;  %v3562_v52 = vpop.f32.mrb[17].mxu1  ;;  %3824 = vmatmul.mubr.f32.gmra.mrb[166].mxu1 %v1828_v54  ;;  %14341 = vmatprep.subr.bf16.mxu0 %v17612_v0  ;;  %v1836_v38 = vunpack.c.l.bf16 %v1271_v4  ;;  %v12217_v54 = vld [vmem:[%s20056_s26 + $0x108] sm:$0xff] }
 0x5a1   :  { %12052 = vmatprep.mubr.msk.f32.mxu1 %vm1858_vm2, %v1833_v63  ;;  %v14348_v4 = vpack.c.bf16 %v12217_v54, %v12216_v19 }
 0x5a2   :  { %13567 = vmatmul.mubr.msk.f32.gmra.mrb[58].mxu0 %vm3869_vm1, %v3561_v61 }
 0x5a3   :  { %v3565_v14 = vpop.f32.mrb[18].mxu1 }
 0x5a4   :  { %v3566_v6 = vadd.f32 %v3565_v14, %v16832_v41  ;;  %v3567_v12 = vpop.f32.mrb[19].mxu1  ;;  %3829 = vmatmul.mubr.f32.gmra.mrb[168].mxu1 %v1832_v2  ;;  %v1845_v41 = vunpack.c.h.bf16 %v1275_v29 }
 0x5a5   :  { %12053 = vmatprep.mubr.msk.f32.mxu1 %vm1858_vm2, %v1837_v7 }
 0x5a6   :  { %13569 = vmatprep.mubr.msk.f32.mxu0 %vm3869_vm1, %v3566_v6 }
 0x5a7   :  { %v3570_v30 = vpop.f32.mrb[20].mxu1 }
 0x5a8   :  { %v3571_v18 = vadd.f32 %v3570_v30, %v16837_v49  ;;  %v3572_v8 = vpop.f32.mrb[21].mxu1  ;;  %3834 = vmatmul.mubr.f32.gmra.mrb[170].mxu1 %v1836_v38  ;;  %v1849_v49 = vunpack.c.h.bf16 %v1277_v56 }
 0x5a9   :  { %12054 = vmatprep.mubr.msk.f32.mxu1 %vm1858_vm2, %v1841_v50 }
 0x5aa   :  { %13570 = vmatmul.mubr.msk.f32.gmra.mrb[60].mxu0 %vm3869_vm1, %v3571_v18 }
 0x5ab   :  { %v3575_v11 = vpop.f32.mrb[22].mxu1 }
 0x5ac   :  { %v3576_v16 = vadd.f32 %v3575_v11, %v16842_v22  ;;  %v3577_v62 = vpop.f32.mrb[23].mxu1  ;;  %3839 = vmatmul.mubr.f32.gmra.mrb[172].mxu1 %v1840_v23  ;;  %v1853_v22 = vunpack.c.h.bf16 %v1279_v28 }
 0x5ad   :  { %12055 = vmatprep.mubr.msk.f32.mxu1 %vm1858_vm2, %v1845_v41 }
 0x5ae   :  { %13572 = vmatprep.mubr.msk.f32.mxu0 %vm3869_vm1, %v3576_v16 }
 0x5af   :  { %v3580_v1 = vpop.f32.mrb[24].mxu1 }
 0x5b0   :  { %v3581_v36 = vadd.f32 %v3580_v1, %v16847_v27  ;;  %v3582_v39 = vpop.f32.mrb[25].mxu1  ;;  %3844 = vmatmul.mubr.f32.gmra.mrb[174].mxu1 %v1844_v59  ;;  %v1857_v27 = vunpack.c.h.bf16 %v1281_v34  ;;  %v12219_v34 = vld [vmem:[%s20056_s26 + $0x118] sm:$0xff] }
 0x5b1   :  { %12056 = vmatprep.mubr.msk.f32.mxu1 %vm1858_vm2, %v1849_v49 }
 0x5b2   :  { %13573 = vmatmul.mubr.msk.f32.gmra.mrb[62].mxu0 %vm3869_vm1, %v3581_v36 }
 0x5b3   :  { %v3585_v37 = vpop.f32.mrb[26].mxu1 }
 0x5b4   :  { %v3586_v20 = vadd.f32 %v3585_v37, %v16852_v44  ;;  %v3587_v40 = vpop.f32.mrb[27].mxu1  ;;  %3849 = vmatmul.mubr.f32.gmra.mrb[176].mxu1 %v1848_v31 }
 0x5b5   :  { %12057 = vmatprep.mubr.msk.f32.mxu1 %vm1858_vm2, %v1853_v22  ;;  %v12218_v22 = vld [vmem:[%s20056_s26 + $0x110] sm:$0xff] }
 0x5b6   :  { %13575 = vmatprep.mubr.msk.f32.mxu0 %vm3869_vm1, %v3586_v20  ;;  %v14352_v20 = vpack.c.bf16 %v12219_v34, %v12218_v22 }
 0x5b7   :  { %v3590_v24 = vpop.f32.mrb[28].mxu1 }
 0x5b8   :  { %v3591_v46 = vadd.f32 %v3590_v24, %v16857_v9  ;;  %v3592_v42 = vpop.f32.mrb[29].mxu1  ;;  %3854 = vmatmul.mubr.f32.gmra.mrb[178].mxu1 %v1852_v43 }
 0x5b9   :  { %12058 = vmatprep.mubr.msk.f32.mxu1 %vm1858_vm2, %v1857_v27 }
 0x5ba   :  { %13576 = vmatmul.mubr.msk.f32.gmra.mrb[64].mxu0 %vm3869_vm1, %v3591_v46 }
 0x5bb   :  { %v3595_v48 = vpop.f32.mrb[30].mxu1 }
 0x5bc   :  { %v3596_v44 = vadd.f32 %v3595_v48, %v16862_v3  ;;  %v3597_v21 = vpop.f32.mrb[31].mxu1  ;;  %3859 = vmatmul.mubr.f32.gmra.mrb[180].mxu1 %v1856_v13 }
 0x5be   :  { %13578 = vmatprep.mubr.msk.f32.mxu0 %vm3869_vm1, %v3596_v44 }
 0x5bf   :  { %v3600_v35 = vpop.f32.mrb[182].mxu1 }
 0x5c0   :  { %v3602_v47 = vpop.f32.mrb[183].mxu1  ;;  %13579 = vmatmul.mubr.msk.f32.gmra.mrb[66].mxu0 %vm3869_vm1, %v3600_v35 }
 0x5c3   :  { %v3605_v17 = vpop.f32.mrb[184].mxu1 }
 0x5c4   :  { %v3607_v9 = vpop.f32.mrb[185].mxu1  ;;  %13581 = vmatprep.mubr.msk.f32.mxu0 %vm3869_vm1, %v3605_v17 }
 0x5c7   :  { %v3610_v51 = vpop.f32.mrb[186].mxu1 }
 0x5c8   :  { %v3612_v15 = vpop.f32.mrb[187].mxu1  ;;  %13582 = vmatmul.mubr.msk.f32.gmra.mrb[68].mxu0 %vm3869_vm1, %v3610_v51 }
 0x5cb   :  { %v3615_v25 = vpop.f32.mrb[188].mxu1 }
 0x5cc   :  { %v3617_v53 = vpop.f32.mrb[189].mxu1  ;;  %13584 = vmatprep.mubr.msk.f32.mxu0 %vm3869_vm1, %v3615_v25 }
 0x5cf   :  { %v3620_v3 = vpop.f32.mrb[190].mxu1 }
 0x5d0   :  { %v3622_v55 = vpop.f32.mrb[191].mxu1  ;;  %13585 = vmatmul.mubr.msk.f32.gmra.mrb[70].mxu0 %vm3869_vm1, %v3620_v3 }
 0x5d3   :  { %v3625_v57 = vpop.f32.mrb[192].mxu1 }
 0x5d4   :  { %v3627_v60 = vpop.f32.mrb[193].mxu1  ;;  %13595 = vmatprep.mubr.msk.f32.mxu0 %vm3869_vm1, %v3625_v57 }
 0x5d7   :  { %v3630_v33 = vpop.f32.mrb[194].mxu1 }
 0x5d8   :  { %v3632_v63 = vpop.f32.mrb[195].mxu1  ;;  %13596 = vmatmul.mubr.msk.f32.vlgmr.msra.gmra.mrb[56].mxu0 %vm3869_vm1, %v3630_v33 }
 0x5d9   :  { %14343 = vmatpush3.bf16.msra.mxu0 %v17612_v0 }
 0x5da   :  { %14345 = vmatprep.subr.bf16.mxu0 %v14344_v32 }
 0x5db   :  { %v3635_v5 = vpop.f32.mrb[196].mxu1 }
 0x5dc   :  { %v3637_v61 = vpop.f32.mrb[197].mxu1  ;;  %13598 = vmatprep.mubr.msk.f32.mxu0 %vm3869_vm1, %v3635_v5 }
 0x5dd   :  { %14347 = vmatpush3.bf16.msra.mxu0 %v14344_v32 }
 0x5de   :  { %14349 = vmatprep.subr.bf16.mxu0 %v14348_v4 }
 0x5df   :  { %v3640_v52 = vpop.f32.mrb[198].mxu1 }
 0x5e0   :  { %v3642_v2 = vpop.f32.mrb[199].mxu1  ;;  %13599 = vmatmul.mubr.msk.f32.gmra.mrb[58].mxu0 %vm3869_vm1, %v3640_v52 }
 0x5e3   :  { %v3645_v7 = vpop.f32.mrb[200].mxu1 }
 0x5e4   :  { %v3647_v10 = vpop.f32.mrb[201].mxu1  ;;  %13601 = vmatprep.mubr.msk.f32.mxu0 %vm3869_vm1, %v3645_v7 }
 0x5e7   :  { %v3650_v14 = vpop.f32.mrb[202].mxu1 }
 0x5e8   :  { %v3652_v6 = vpop.f32.mrb[203].mxu1  ;;  %13602 = vmatmul.mubr.msk.f32.gmra.mrb[60].mxu0 %vm3869_vm1, %v3650_v14 }
 0x5eb   :  { %v3655_v0 = vpop.f32.mrb[204].mxu1 }
 0x5ec   :  { %v3657_v12 = vpop.f32.mrb[205].mxu1  ;;  %13604 = vmatprep.mubr.msk.f32.mxu0 %vm3869_vm1, %v3655_v0 }
 0x5ef   :  { %v3660_v38 = vpop.f32.mrb[206].mxu1 }
 0x5f0   :  { %v3662_v50 = vpop.f32.mrb[207].mxu1  ;;  %13605 = vmatmul.mubr.msk.f32.gmra.mrb[62].mxu0 %vm3869_vm1, %v3660_v38 }
 0x5f3   :  { %v3665_v29 = vpop.f32.mrb[208].mxu1 }
 0x5f4   :  { %v3667_v30 = vpop.f32.mrb[209].mxu1  ;;  %13607 = vmatprep.mubr.msk.f32.mxu0 %vm3869_vm1, %v3665_v29 }
 0x5f7   :  { %v3670_v18 = vpop.f32.mrb[210].mxu1 }
 0x5f8   :  { %v3672_v8 = vpop.f32.mrb[211].mxu1  ;;  %13608 = vmatmul.mubr.msk.f32.gmra.mrb[64].mxu0 %vm3869_vm1, %v3670_v18 }
 0x5fb   :  { %v3675_v23 = vpop.f32.mrb[212].mxu1 }
 0x5fc   :  { %v3677_v41 = vpop.f32.mrb[213].mxu1  ;;  %13610 = vmatprep.mubr.msk.f32.mxu0 %vm3869_vm1, %v3675_v23 }
 0x5ff   :  { %v3680_v56 = vpop.f32.mrb[214].mxu1 }
 0x600   :  { %v3682_v11 = vpop.f32.mrb[215].mxu1  ;;  %13611 = vmatmul.mubr.msk.f32.gmra.mrb[66].mxu0 %vm3869_vm1, %v3680_v56 }
 0x603   :  { %v3685_v16 = vpop.f32.mrb[216].mxu1 }
 0x604   :  { %v3687_v62 = vpop.f32.mrb[217].mxu1  ;;  %13613 = vmatprep.mubr.msk.f32.mxu0 %vm3869_vm1, %v3685_v16 }
 0x607   :  { %v3690_v59 = vpop.f32.mrb[218].mxu1 }
 0x608   :  { %v3692_v49 = vpop.f32.mrb[219].mxu1  ;;  %13614 = vmatmul.mubr.msk.f32.gmra.mrb[68].mxu0 %vm3869_vm1, %v3690_v59 }
 0x60b   :  { %v3695_v28 = vpop.f32.mrb[220].mxu1 }
 0x60c   :  { %v3697_v1 = vpop.f32.mrb[221].mxu1  ;;  %13616 = vmatprep.mubr.msk.f32.mxu0 %vm3869_vm1, %v3695_v28 }
 0x60f   :  { %v3700_v36 = vpop.f32.mrb[222].mxu1 }
 0x610   :  { %v3702_v39 = vpop.f32.mrb[223].mxu1  ;;  %13617 = vmatmul.mubr.msk.f32.gmra.mrb[70].mxu0 %vm3869_vm1, %v3700_v36 }
 0x613   :  { %v3705_v31 = vpop.f32.mrb[224].mxu1 }
 0x614   :  { %v3707_v37 = vpop.f32.mrb[225].mxu1  ;;  %13627 = vmatprep.mubr.msk.f32.mxu0 %vm3869_vm1, %v3705_v31 }
 0x617   :  { %v3710_v40 = vpop.f32.mrb[226].mxu1 }
 0x618   :  { %v3712_v43 = vpop.f32.mrb[227].mxu1  ;;  %13628 = vmatmul.mubr.msk.f32.vlgmr.msra.gmra.mrb[56].mxu0 %vm3869_vm1, %v3710_v40  ;;  %v17736_v40 = vld [vmem:[%s20057_s27] ss:$0 sm:$0xff] }
 0x619   :  { %14351 = vmatpush3.bf16.msra.mxu0 %v14348_v4 }
 0x61a   :  { %14353 = vmatprep.subr.bf16.mxu0 %v14352_v20 }
 0x61b   :  { %v3715_v27 = vpop.f32.mrb[228].mxu1 }
 0x61c   :  { %v3717_v24 = vpop.f32.mrb[229].mxu1  ;;  %13630 = vmatprep.mubr.msk.f32.mxu0 %vm3869_vm1, %v3715_v27 }
 0x61d   :  { %14355 = vmatpush3.bf16.msra.mxu0 %v14352_v20  ;;  %v15737_v20 = vmov 0.0  }
 0x61e   :  { %14356 = vmatprep.subr.bf16.mxu0 %v15735_v45 }
 0x61f   :  { %v3720_v46 = vpop.f32.mrb[230].mxu1 }
 0x620   :  { %v3722_v42 = vpop.f32.mrb[231].mxu1  ;;  %13631 = vmatmul.mubr.msk.f32.gmra.mrb[58].mxu0 %vm3869_vm1, %v3720_v46 }
 0x623   :  { %v3725_v13 = vpop.f32.mrb[232].mxu1 }
 0x624   :  { %v3727_v48 = vpop.f32.mrb[233].mxu1  ;;  %13633 = vmatprep.mubr.msk.f32.mxu0 %vm3869_vm1, %v3725_v13 }
 0x627   :  { %v3730_v44 = vpop.f32.mrb[234].mxu1 }
 0x628   :  { %v3732_v21 = vpop.f32.mrb[235].mxu1  ;;  %13634 = vmatmul.mubr.msk.f32.gmra.mrb[60].mxu0 %vm3869_vm1, %v3730_v44 }
 0x62b   :  { %v3735_v35 = vpop.f32.mrb[236].mxu1 }
 0x62c   :  { %v3737_v47 = vpop.f32.mrb[237].mxu1  ;;  %13636 = vmatprep.mubr.msk.f32.mxu0 %vm3869_vm1, %v3735_v35 }
 0x62f   :  { %v3740_v17 = vpop.f32.mrb[238].mxu1 }
 0x630   :  { %v3742_v9 = vpop.f32.mrb[239].mxu1  ;;  %13637 = vmatmul.mubr.msk.f32.gmra.mrb[62].mxu0 %vm3869_vm1, %v3740_v17 }
 0x633   :  { %v3745_v51 = vpop.f32.mrb[240].mxu1 }
 0x634   :  { %v3747_v15 = vpop.f32.mrb[241].mxu1  ;;  %13639 = vmatprep.mubr.msk.f32.mxu0 %vm3869_vm1, %v3745_v51 }
 0x637   :  { %v3750_v25 = vpop.f32.mrb[242].mxu1 }
 0x638   :  { %v3752_v53 = vpop.f32.mrb[243].mxu1  ;;  %13640 = vmatmul.mubr.msk.f32.gmra.mrb[64].mxu0 %vm3869_vm1, %v3750_v25 }
 0x63b   :  { %v3755_v3 = vpop.f32.mrb[244].mxu1 }
 0x63c   :  { %v3757_v55 = vpop.f32.mrb[245].mxu1  ;;  %13642 = vmatprep.mubr.msk.f32.mxu0 %vm3869_vm1, %v3755_v3 }
 0x63f   :  { %v3760_v57 = vpop.f32.mrb[246].mxu1 }
 0x640   :  { %v3762_v26 = vpop.f32.mrb[247].mxu1  ;;  %13643 = vmatmul.mubr.msk.f32.gmra.mrb[66].mxu0 %vm3869_vm1, %v3760_v57 }
 0x643   :  { %v3765_v58 = vpop.f32.mrb[248].mxu1 }
 0x644   :  { %v3767_v60 = vpop.f32.mrb[249].mxu1  ;;  %13645 = vmatprep.mubr.msk.f32.mxu0 %vm3869_vm1, %v3765_v58 }
 0x647   :  { %v3770_v32 = vpop.f32.mrb[250].mxu1 }
 0x648   :  { %v3772_v33 = vpop.f32.mrb[251].mxu1  ;;  %13646 = vmatmul.mubr.msk.f32.gmra.mrb[68].mxu0 %vm3869_vm1, %v3770_v32 }
 0x64b   :  { %v3775_v19 = vpop.f32.mrb[252].mxu1 }
 0x64c   :  { %v3777_v54 = vpop.f32.mrb[253].mxu1  ;;  %13648 = vmatprep.mubr.msk.f32.mxu0 %vm3869_vm1, %v3775_v19 }
 0x64f   :  { %v3780_v63 = vpop.f32.mrb[254].mxu1 }
 0x650   :  { %v3782_v4 = vpop.f32.mrb[255].mxu1  ;;  %13649 = vmatmul.mubr.msk.f32.gmra.mrb[70].mxu0 %vm3869_vm1, %v3780_v63 }
 0x653   :  { %v3785_v5 = vpop.f32.mrb[150].mxu1 }
 0x654   :  { %v3787_v61 = vpop.f32.mrb[151].mxu1  ;;  %13659 = vmatprep.mubr.msk.f32.mxu0 %vm3869_vm1, %v3785_v5 }
 0x657   :  { %v3790_v52 = vpop.f32.mrb[152].mxu1 }
 0x658   :  { %v3792_v2 = vpop.f32.mrb[153].mxu1  ;;  %13660 = vmatmul.mubr.msk.f32.vlgmr.msra.gmra.mrb[56].mxu0 %vm3869_vm1, %v3790_v52 }
 0x65b   :  { %v3795_v7 = vpop.f32.mrb[154].mxu1 }
 0x65c   :  { %v3797_v10 = vpop.f32.mrb[155].mxu1  ;;  %13662 = vmatprep.mubr.msk.f32.mxu0 %vm3869_vm1, %v3795_v7 }
 0x65f   :  { %v3800_v14 = vpop.f32.mrb[156].mxu1 }
 0x660   :  { %v3802_v6 = vpop.f32.mrb[157].mxu1  ;;  %13663 = vmatmul.mubr.msk.f32.gmra.mrb[58].mxu0 %vm3869_vm1, %v3800_v14 }
 0x663   :  { %v3805_v0 = vpop.f32.mrb[158].mxu1 }
 0x664   :  { %v3807_v12 = vpop.f32.mrb[159].mxu1  ;;  %13665 = vmatprep.mubr.msk.f32.mxu0 %vm3869_vm1, %v3805_v0 }
 0x667   :  { %v3810_v38 = vpop.f32.mrb[160].mxu1 }
 0x668   :  { %v3812_v50 = vpop.f32.mrb[161].mxu1  ;;  %13666 = vmatmul.mubr.msk.f32.gmra.mrb[60].mxu0 %vm3869_vm1, %v3810_v38 }
 0x66b   :  { %v3815_v29 = vpop.f32.mrb[162].mxu1 }
 0x66c   :  { %v3817_v30 = vpop.f32.mrb[163].mxu1  ;;  %13668 = vmatprep.mubr.msk.f32.mxu0 %vm3869_vm1, %v3815_v29 }
 0x66f   :  { %v3820_v18 = vpop.f32.mrb[164].mxu1 }
 0x670   :  { %v3822_v8 = vpop.f32.mrb[165].mxu1  ;;  %13669 = vmatmul.mubr.msk.f32.gmra.mrb[62].mxu0 %vm3869_vm1, %v3820_v18 }
 0x673   :  { %v3825_v23 = vpop.f32.mrb[166].mxu1 }
 0x674   :  { %v3827_v41 = vpop.f32.mrb[167].mxu1  ;;  %13671 = vmatprep.mubr.msk.f32.mxu0 %vm3869_vm1, %v3825_v23 }
 0x677   :  { %v3830_v56 = vpop.f32.mrb[168].mxu1 }
 0x678   :  { %v3832_v11 = vpop.f32.mrb[169].mxu1  ;;  %13672 = vmatmul.mubr.msk.f32.gmra.mrb[64].mxu0 %vm3869_vm1, %v3830_v56 }
 0x67b   :  { %v3835_v16 = vpop.f32.mrb[170].mxu1 }
 0x67c   :  { %v3837_v62 = vpop.f32.mrb[171].mxu1  ;;  %13674 = vmatprep.mubr.msk.f32.mxu0 %vm3869_vm1, %v3835_v16 }
 0x67f   :  { %v3840_v59 = vpop.f32.mrb[172].mxu1 }
 0x680   :  { %v3842_v49 = vpop.f32.mrb[173].mxu1  ;;  %13675 = vmatmul.mubr.msk.f32.gmra.mrb[66].mxu0 %vm3869_vm1, %v3840_v59 }
 0x683   :  { %v3845_v28 = vpop.f32.mrb[174].mxu1 }
 0x684   :  { %v3847_v1 = vpop.f32.mrb[175].mxu1  ;;  %13677 = vmatprep.mubr.msk.f32.mxu0 %vm3869_vm1, %v3845_v28 }
 0x687   :  { %v3850_v36 = vpop.f32.mrb[176].mxu1 }
 0x688   :  { %v3852_v39 = vpop.f32.mrb[177].mxu1  ;;  %13678 = vmatmul.mubr.msk.f32.gmra.mrb[68].mxu0 %vm3869_vm1, %v3850_v36 }
 0x68b   :  { %v3855_v31 = vpop.f32.mrb[178].mxu1 }
 0x68c   :  { %v3857_v22 = vpop.f32.mrb[179].mxu1  ;;  %13680 = vmatprep.mubr.msk.f32.mxu0 %vm3869_vm1, %v3855_v31 }
 0x68f   :  { %v3860_v34 = vpop.f32.mrb[180].mxu1 }
 0x690   :  { %v3862_v37 = vpop.f32.mrb[181].mxu1  ;;  %13681 = vmatmul.mubr.msk.f32.gmra.mrb[70].mxu0 %vm3869_vm1, %v3860_v34 }
 0x691   :  { %13715 = vmatprep.mubr.msk.f32.mxu0 %vm15736_vm4, %v15737_v20 }
 0x72b   :  { %v13661_v43 = vpop.f32.mrb[56].mxu0 }
 0x72c   :  { %v15002_v27 = vadd.f32 %v13661_v43, %v17736_v40  ;;  %v5702_v24 = vpop.f32.mrb[57].mxu0 }
 0x72d   :  { %v15003_v46 = vadd.f32 %v17736_v40, %v5702_v24 }
 0x72e   :  { %v5814_v42 = vmin.f32 %v15002_v27, 0.0  ;;  %vm5798_vm5 = vcmp.gt.f32.partialorder %v15002_v27, 0.0 }
 0x72f   :  { %v5813_v13 = vmin.f32 %v15003_v46, 0.0  ;;  %vm5797_vm6 = vcmp.gt.f32.partialorder %v15003_v46, 0.0 }
 0x730   :  { %v5831_v48 = vmul.f32 1.442695, %v5814_v42 }
 0x731   :  { %v5829_v44 = vmul.f32 1.442695, %v5813_v13 }
 0x732   :  { %15624 = vpow2.f32 %v5831_v48 }
 0x733   :  { %15626 = vpow2.f32 %v5829_v44  ;;  %v13664_v21 = vpop.f32.mrb[58].mxu0 }
 0x734   :  { %v15004_v35 = vadd.f32 %v13664_v21, %v17736_v40  ;;  %v5712_v47 = vpop.f32.mrb[59].mxu0 }
 0x735   :  { %v15005_v17 = vadd.f32 %v17736_v40, %v5712_v47 }
 0x736   :  { %v5816_v9 = vmin.f32 %v15004_v35, 0.0  ;;  %vm5800_vm7 = vcmp.gt.f32.partialorder %v15004_v35, 0.0 }
 0x737   :  { %v5815_v51 = vmin.f32 %v15005_v17, 0.0  ;;  %vm5799_vm3 = vcmp.gt.f32.partialorder %v15005_v17, 0.0 }
 0x738   :  { %v5835_v15 = vmul.f32 1.442695, %v5816_v9 }
 0x739   :  { %v5833_v25 = vmul.f32 1.442695, %v5815_v51 }
 0x73a   :  { %15628 = vpow2.f32 %v5835_v15 }
 0x73b   :  { %15630 = vpow2.f32 %v5833_v25  ;;  %v13667_v53 = vpop.f32.mrb[60].mxu0 }
 0x73c   :  { %v15625_v3 = vpop.eup %15624  ;;  %v15006_v55 = vadd.f32 %v13667_v53, %v17736_v40  ;;  %v5722_v57 = vpop.f32.mrb[61].mxu0 }
 0x73d   :  { %v15627_v26 = vpop.eup %15626  ;;  %v12237_v58 = vadd.f32 -1.0, %v15625_v3  ;;  %v15007_v60 = vadd.f32 %v17736_v40, %v5722_v57 }
 0x73e   :  { %v12236_v32 = vadd.f32 -1.0, %v15627_v26  ;;  %v5818_v33 = vmin.f32 %v15006_v55, 0.0  ;;  %vm5802_vm8 = vcmp.gt.f32.partialorder %v15006_v55, 0.0 }
 0x73f   :  { %v5878_v19 = vsel %vm5798_vm5, %v15002_v27, %v12237_v58  ;;  %v5817_v54 = vmin.f32 %v15007_v60, 0.0  ;;  %vm5801_vm9 = vcmp.gt.f32.partialorder %v15007_v60, 0.0 }
 0x740   :  { %v5877_v63 = vsel %vm5797_vm6, %v15003_v46, %v12236_v32  ;;  %v5839_v4 = vmul.f32 1.442695, %v5818_v33 }
 0x741   :  { %v14357_v5 = vpack.c.bf16 %v5878_v19, %v5877_v63  ;;  %v5837_v61 = vmul.f32 1.442695, %v5817_v54 }
 0x742   :  { %15632 = vpow2.f32 %v5839_v4 }
 0x743   :  { %15634 = vpow2.f32 %v5837_v61  ;;  %v13670_v52 = vpop.f32.mrb[62].mxu0  ;;  %14358 = vmatpush3.bf16.msra.mxu0 %v14357_v5 }
 0x744   :  { %v15629_v2 = vpop.eup %15628  ;;  %v15008_v7 = vadd.f32 %v13670_v52, %v17736_v40  ;;  %v5732_v10 = vpop.f32.mrb[63].mxu0  ;;  %14359 = vmatprep.subr.bf16.mxu0 %v15735_v45 }
 0x745   :  { %v15631_v14 = vpop.eup %15630  ;;  %v12239_v6 = vadd.f32 -1.0, %v15629_v2  ;;  %v15009_v0 = vadd.f32 %v17736_v40, %v5732_v10 }
 0x746   :  { %v12238_v12 = vadd.f32 -1.0, %v15631_v14  ;;  %v5820_v38 = vmin.f32 %v15008_v7, 0.0  ;;  %vm5804_vm10 = vcmp.gt.f32.partialorder %v15008_v7, 0.0 }
 0x747   :  { %v5880_v50 = vsel %vm5800_vm7, %v15004_v35, %v12239_v6  ;;  %v5819_v29 = vmin.f32 %v15009_v0, 0.0  ;;  %vm5803_vm11 = vcmp.gt.f32.partialorder %v15009_v0, 0.0  ;;  %vm7380_vm7 = vcmask 326656  }
 0x748   :  { %v5879_v30 = vsel %vm5799_vm3, %v15005_v17, %v12238_v12  ;;  %v5843_v18 = vmul.f32 1.442695, %v5820_v38 }
 0x749   :  { %v14360_v8 = vpack.c.bf16 %v5880_v50, %v5879_v30  ;;  %v5841_v23 = vmul.f32 1.442695, %v5819_v29 }
 0x74a   :  { %15636 = vpow2.f32 %v5843_v18 }
 0x74b   :  { %15638 = vpow2.f32 %v5841_v23  ;;  %v13673_v41 = vpop.f32.mrb[64].mxu0  ;;  %14361 = vmatpush3.bf16.msra.mxu0 %v14360_v8 }
 0x74c   :  { %v15633_v56 = vpop.eup %15632  ;;  %v15010_v11 = vadd.f32 %v13673_v41, %v17736_v40  ;;  %v5742_v16 = vpop.f32.mrb[65].mxu0  ;;  %14362 = vmatprep.subr.bf16.mxu0 %v15735_v45 }
 0x74d   :  { %v15635_v62 = vpop.eup %15634  ;;  %v12241_v59 = vadd.f32 -1.0, %v15633_v56  ;;  %v15011_v49 = vadd.f32 %v17736_v40, %v5742_v16 }
 0x74e   :  { %v12240_v28 = vadd.f32 -1.0, %v15635_v62  ;;  %v5822_v1 = vmin.f32 %v15010_v11, 0.0  ;;  %vm5806_vm12 = vcmp.gt.f32.partialorder %v15010_v11, 0.0 }
 0x74f   :  { %v5882_v36 = vsel %vm5802_vm8, %v15006_v55, %v12241_v59  ;;  %v5821_v39 = vmin.f32 %v15011_v49, 0.0  ;;  %vm5805_vm13 = vcmp.gt.f32.partialorder %v15011_v49, 0.0 }
 0x750   :  { %v5881_v31 = vsel %vm5801_vm9, %v15007_v60, %v12240_v28  ;;  %v5847_v22 = vmul.f32 1.442695, %v5822_v1 }
 0x751   :  { %v14363_v34 = vpack.c.bf16 %v5882_v36, %v5881_v31  ;;  %v5845_v37 = vmul.f32 1.442695, %v5821_v39  ;;  %v12628_v39 = vld [vmem:[%s20058_s0] sm:$0xff]  }
 0x752   :  { %15640 = vpow2.f32 %v5847_v22  ;;  %v6274_v22 = vld [vmem:[%s20059_s24] sm:$0xff] }
 0x753   :  { %15642 = vpow2.f32 %v5845_v37  ;;  %v13676_v43 = vpop.f32.mrb[66].mxu0  ;;  %14364 = vmatpush3.bf16.msra.mxu0 %v14363_v34  ;;  %v6275_v34 = vld [vmem:[%s20059_s24 + $0x8] sm:$0xff] }
 0x754   :  { %v15637_v27 = vpop.eup %15636  ;;  %v15012_v24 = vadd.f32 %v13676_v43, %v17736_v40  ;;  %v5752_v46 = vpop.f32.mrb[67].mxu0  ;;  %14365 = vmatprep.subr.bf16.mxu0 %v15735_v45  ;;  %v12629_v43 = vunpack.c.l.bf16 %v12628_v39 }
 0x755   :  { %v15639_v42 = vpop.eup %15638  ;;  %v12243_v13 = vadd.f32 -1.0, %v15637_v27  ;;  %v15013_v48 = vadd.f32 %v17736_v40, %v5752_v46  ;;  %v14381_v27 = vpack.c.bf16 %v6275_v34, %v6274_v22  ;;  %v6276_v46 = vld [vmem:[%s20059_s24 + $0x10] sm:$0xff]  ;;  %v12769_v34 = vld [vmem:[%s20058_s0 + $0x98] sm:$0xff]  }
 0x756   :  { %v12242_v44 = vadd.f32 -1.0, %v15639_v42  ;;  %v5824_v21 = vmin.f32 %v15012_v24, 0.0  ;;  %vm5808_vm14 = vcmp.gt.f32.partialorder %v15012_v24, 0.0  ;;  %v6277_v42 = vld [vmem:[%s20059_s24 + $0x18] sm:$0xff] }
 0x757   :  { %v5884_v35 = vsel %vm5804_vm10, %v15008_v7, %v12243_v13  ;;  %v5823_v47 = vmin.f32 %v15013_v48, 0.0  ;;  %vm5807_vm15 = vcmp.gt.f32.partialorder %v15013_v48, 0.0  ;;  %v12751_v13 = vld [vmem:[%s20058_s0 + $0x8] sm:$0xff]  }
 0x758   :  { %v5883_v17 = vsel %vm5803_vm11, %v15009_v0, %v12242_v44  ;;  %v5851_v9 = vmul.f32 1.442695, %v5824_v21  ;;  %v12633_v44 = vunpack.c.l.bf16 %v12751_v13  ;;  %v12634_v21 = vunpack.c.h.bf16 %v12751_v13 }
 0x759   :  { %v14366_v51 = vpack.c.bf16 %v5884_v35, %v5883_v17  ;;  %v5849_v15 = vmul.f32 1.442695, %v5823_v47  ;;  %v12752_v35 = vld [vmem:[%s20058_s0 + $0x10] sm:$0xff]  }
 0x75a   :  { %15644 = vpow2.f32 %v5851_v9  ;;  %v12637_v47 = vunpack.c.l.bf16 %v12752_v35  ;;  %v12638_v17 = vunpack.c.h.bf16 %v12752_v35  ;;  %v12753_v9 = vld [vmem:[%s20058_s0 + $0x18] sm:$0xff]   ;;  %v12258_v35 = vld [vmem:[%s20059_s24 + $0x20] sm:$0xff] }
 0x75b   :  { %15646 = vpow2.f32 %v5849_v15  ;;  %v13679_v25 = vpop.f32.mrb[68].mxu0  ;;  %14367 = vmatpush3.bf16.msra.mxu0 %v14366_v51  ;;  %v12641_v51 = vunpack.c.l.bf16 %v12753_v9  ;;  %v12642_v15 = vunpack.c.h.bf16 %v12753_v9  ;;  %v12260_v9 = vld [vmem:[%s20059_s24 + $0x30] sm:$0xff] }
 0x75c   :  { %v15641_v53 = vpop.eup %15640  ;;  %v15014_v3 = vadd.f32 %v13679_v25, %v17736_v40  ;;  %v5762_v55 = vpop.f32.mrb[69].mxu0  ;;  %14368 = vmatprep.subr.bf16.mxu0 %v15735_v45  ;;  %v12754_v25 = vld [vmem:[%s20058_s0 + $0x20] sm:$0xff]  }
 0x75d   :  { %v15643_v57 = vpop.eup %15642  ;;  %v12245_v26 = vadd.f32 -1.0, %v15641_v53  ;;  %v15015_v58 = vadd.f32 %v17736_v40, %v5762_v55  ;;  %v12645_v53 = vunpack.c.l.bf16 %v12754_v25  ;;  %v12755_v55 = vld [vmem:[%s20058_s0 + $0x28] sm:$0xff]  }
 0x75e   :  { %v12244_v60 = vadd.f32 -1.0, %v15643_v57  ;;  %v5826_v32 = vmin.f32 %v15014_v3, 0.0  ;;  %vm5810_vm0 = vcmp.gt.f32.partialorder %v15014_v3, 0.0  ;;  %v12649_v57 = vunpack.c.l.bf16 %v12755_v55 }
 0x75f   :  { %v5886_v33 = vsel %vm5806_vm12, %v15010_v11, %v12245_v26  ;;  %v5825_v19 = vmin.f32 %v15015_v58, 0.0  ;;  %vm5809_vm2 = vcmp.gt.f32.partialorder %v15015_v58, 0.0  ;;  %v12650_v26 = vunpack.c.h.bf16 %v12755_v55 }
 0x760   :  { %v5885_v54 = vsel %vm5805_vm13, %v15011_v49, %v12244_v60  ;;  %v5855_v63 = vmul.f32 1.442695, %v5826_v32  ;;  %vm11649_vm13 = vcmask 40960  }
 0x761   :  { %v14369_v4 = vpack.c.bf16 %v5886_v33, %v5885_v54  ;;  %v5853_v5 = vmul.f32 1.442695, %v5825_v19  ;;  %v12757_v33 = vld [vmem:[%s20058_s0 + $0x38] sm:$0xff]  }
 0x762   :  { %15648 = vpow2.f32 %v5855_v63  ;;  %v12657_v19 = vunpack.c.l.bf16 %v12757_v33  ;;  %v12658_v54 = vunpack.c.h.bf16 %v12757_v33  ;;  %v12758_v63 = vld [vmem:[%s20058_s0 + $0x40] sm:$0xff]   ;;  %v12268_v33 = vld [vmem:[%s20059_s24 + $0x48] sm:$0xff] }
 0x763   :  { %15650 = vpow2.f32 %v5853_v5  ;;  %v13682_v61 = vpop.f32.mrb[70].mxu0  ;;  %14370 = vmatpush3.bf16.msra.mxu0 %v14369_v4  ;;  %v12661_v4 = vunpack.c.l.bf16 %v12758_v63  ;;  %v12662_v5 = vunpack.c.h.bf16 %v12758_v63 }
 0x764   :  { %v15645_v52 = vpop.eup %15644  ;;  %v15016_v2 = vadd.f32 %v13682_v61, %v17736_v40  ;;  %v5772_v7 = vpop.f32.mrb[71].mxu0  ;;  %14371 = vmatprep.subr.bf16.mxu0 %v15735_v45  ;;  %v12759_v61 = vld [vmem:[%s20058_s0 + $0x48] sm:$0xff]  }
 0x765   :  { %v15647_v10 = vpop.eup %15646  ;;  %v12247_v14 = vadd.f32 -1.0, %v15645_v52  ;;  %v15017_v6 = vadd.f32 %v17736_v40, %v5772_v7  ;;  %v12665_v52 = vunpack.c.l.bf16 %v12759_v61  ;;  %v12760_v7 = vld [vmem:[%s20058_s0 + $0x50] sm:$0xff]  }
 0x766   :  { %v12246_v0 = vadd.f32 -1.0, %v15647_v10  ;;  %v5828_v12 = vmin.f32 %v15016_v2, 0.0  ;;  %vm5812_vm5 = vcmp.gt.f32.partialorder %v15016_v2, 0.0  ;;  %v12669_v10 = vunpack.c.l.bf16 %v12760_v7 }
 0x767   :  { %v5888_v38 = vsel %vm5808_vm14, %v15012_v24, %v12247_v14  ;;  %v5827_v50 = vmin.f32 %v15017_v6, 0.0  ;;  %vm5811_vm6 = vcmp.gt.f32.partialorder %v15017_v6, 0.0  ;;  %v12630_v24 = vunpack.c.h.bf16 %v12628_v39  ;;  %v12768_v39 = vld [vmem:[%s20058_s0 + $0x90] sm:$0xff]  }
 0x768   :  { %v5887_v29 = vsel %vm5807_vm15, %v15013_v48, %v12246_v0  ;;  %v5859_v30 = vmul.f32 1.442695, %v5828_v12  ;;  %v14384_v48 = vpack.c.bf16 %v6277_v42, %v6276_v46  ;;  %v12670_v14 = vunpack.c.h.bf16 %v12760_v7  ;;  %v12771_v42 = vld [vmem:[%s20058_s0 + $0xa8] sm:$0xff]  }
 0x769   :  { %v14372_v18 = vpack.c.bf16 %v5888_v38, %v5887_v29  ;;  %v5857_v8 = vmul.f32 1.442695, %v5827_v50  ;;  %v12762_v38 = vld [vmem:[%s20058_s0 + $0x60] sm:$0xff]   ;;  %v12702_v22 = vunpack.c.h.bf16 %v12768_v39  ;;  %v12713_v13 = vunpack.c.l.bf16 %v12771_v42 }
 0x76a   :  { %15652 = vpow2.f32 %v5859_v30  ;;  %v12677_v50 = vunpack.c.l.bf16 %v12762_v38  ;;  %v12678_v29 = vunpack.c.h.bf16 %v12762_v38  ;;  %v12763_v30 = vld [vmem:[%s20058_s0 + $0x68] sm:$0xff]   ;;  %v12276_v38 = vld [vmem:[%s20059_s24 + $0x60] sm:$0xff]  ;;  %vm11766_vm14 = vcmask 0  }
 0x76b   :  { %15654 = vpow2.f32 %v5857_v8  ;;  %14373 = vmatpush3.bf16.msra.mxu0 %v14372_v18  ;;  %v12681_v18 = vunpack.c.l.bf16 %v12763_v30  ;;  %v12682_v8 = vunpack.c.h.bf16 %v12763_v30 }
 0x76c   :  { %v15649_v23 = vpop.eup %15648  ;;  %14374 = vmatprep.subr.bf16.mxu0 %v15735_v45 }
 0x76d   :  { %v15651_v41 = vpop.eup %15650  ;;  %v12249_v56 = vadd.f32 -1.0, %v15649_v23  ;;  %v12764_v23 = vld [vmem:[%s20058_s0 + $0x70] sm:$0xff]  }
 0x76e   :  { %v12248_v40 = vadd.f32 -1.0, %v15651_v41  ;;  %v12685_v41 = vunpack.c.l.bf16 %v12764_v23 }
 0x76f   :  { %v5890_v11 = vsel %vm5810_vm0, %v15014_v3, %v12249_v56  ;;  %v12646_v3 = vunpack.c.h.bf16 %v12754_v25  ;;  %v12686_v56 = vunpack.c.h.bf16 %v12764_v23  ;;  %v12279_v23 = vld [vmem:[%s20059_s24 + $0x78] sm:$0xff] }
 0x770   :  { %v5889_v16 = vsel %vm5809_vm2, %v15015_v58, %v12248_v40  ;;  %v12756_v58 = vld [vmem:[%s20058_s0 + $0x30] sm:$0xff]   ;;  %v12765_v40 = vld [vmem:[%s20058_s0 + $0x78] sm:$0xff]  }
 0x771   :  { %v14375_v62 = vpack.c.bf16 %v5890_v11, %v5889_v16  ;;  %v12653_v60 = vunpack.c.l.bf16 %v12756_v58  ;;  %v12654_v32 = vunpack.c.h.bf16 %v12756_v58  ;;  %v12689_v11 = vunpack.c.l.bf16 %v12765_v40 }
 0x772   :  { %v12690_v16 = vunpack.c.h.bf16 %v12765_v40 }
 0x773   :  { %14376 = vmatpush3.bf16.msra.mxu0 %v14375_v62  ;;  %v12766_v62 = vld [vmem:[%s20058_s0 + $0x80] sm:$0xff]  }
 0x774   :  { %v15653_v59 = vpop.eup %15652  ;;  %14377 = vmatprep.subr.bf16.mxu0 %v15735_v45 }
 0x775   :  { %v15655_v49 = vpop.eup %15654  ;;  %v12251_v28 = vadd.f32 -1.0, %v15653_v59  ;;  %v12693_v59 = vunpack.c.l.bf16 %v12766_v62 }
 0x776   :  { %v12250_v1 = vadd.f32 -1.0, %v15655_v49  ;;  %v12694_v49 = vunpack.c.h.bf16 %v12766_v62 }
 0x777   :  { %v5892_v36 = vsel %vm5812_vm5, %v15016_v2, %v12251_v28  ;;  %v12666_v2 = vunpack.c.h.bf16 %v12759_v61  ;;  %v12767_v28 = vld [vmem:[%s20058_s0 + $0x88] sm:$0xff]  }
 0x778   :  { %v5891_v31 = vsel %vm5811_vm6, %v15017_v6, %v12250_v1  ;;  %v12761_v6 = vld [vmem:[%s20058_s0 + $0x58] sm:$0xff]   ;;  %v12697_v1 = vunpack.c.l.bf16 %v12767_v28 }
 0x779   :  { %v14378_v37 = vpack.c.bf16 %v5892_v36, %v5891_v31  ;;  %v12673_v0 = vunpack.c.l.bf16 %v12761_v6  ;;  %v12674_v12 = vunpack.c.h.bf16 %v12761_v6  ;;  %v12698_v36 = vunpack.c.h.bf16 %v12767_v28 }
 0x77a   :  { %v12701_v31 = vunpack.c.l.bf16 %v12768_v39 }
 0x77b   :  { %14379 = vmatpush3.bf16.msra.mxu0 %v14378_v37  ;;  %v12705_v37 = vunpack.c.l.bf16 %v12769_v34 }
 0x77c   :  { %14380 = vmatprep.subr.bf16.mxu0 %v15735_v45 }
 0x77e   :  { %13716 = vmatmul.mubr.f32.vlgmr.msra.gmra.mrb[72].mxu0 %v12629_v43  ;;  %v12706_v43 = vunpack.c.h.bf16 %v12769_v34  ;;  %v12287_v34 = vld [vmem:[%s20059_s24 + $0x90] sm:$0xff] }
 0x77f   :  { %13718 = vmatprep.mubr.msk.f32.mxu0 %vm15736_vm4, %v15737_v20  ;;  %14382 = vmatpush3.bf16.msra.mxu0 %v14381_v27  ;;  %v12770_v27 = vld [vmem:[%s20058_s0 + $0xa0] sm:$0xff]  }
 0x780   :  { %14383 = vmatprep.subr.bf16.mxu0 %v15735_v45  ;;  %v12710_v46 = vunpack.c.h.bf16 %v12770_v27 }
 0x782   :  { %13719 = vmatmul.mubr.f32.gmra.mrb[74].mxu0 %v12630_v24  ;;  %v12709_v24 = vunpack.c.l.bf16 %v12770_v27 }
 0x783   :  { %13721 = vmatprep.mubr.msk.f32.mxu0 %vm15736_vm4, %v15737_v20  ;;  %14385 = vmatpush3.bf16.msra.mxu0 %v14384_v48  ;;  %v12714_v48 = vunpack.c.h.bf16 %v12771_v42 }
 0x784   :  { %14386 = vmatprep.subr.bf16.mxu0 %v15735_v45 }
 0x786   :  { %13722 = vmatmul.mubr.f32.gmra.mrb[76].mxu0 %v12633_v44  ;;  %v5937_v44 = vld [vmem:[%s20058_s0 + $0xb0] sm:$0xf]  ;;  %s15740_s0 = smov [#allocation5]  }
 0x787   :  { %13724 = vmatprep.mubr.msk.f32.mxu0 %vm15736_vm4, %v15737_v20  ;;  %s11786_s30 = sshll.u32 %s15740_s0, 4  ;;  %s11787_s30 = int_to_ptr.vmem [resolvable:$true] %s11786_s30 }
 0x78a   :  { %13725 = vmatmul.mubr.f32.gmra.mrb[78].mxu0 %v12634_v21  ;;  %v5982_v21 = vunpack.c.l.bf16 %v5937_v44 }
 0x78b   :  { %13727 = vmatprep.mubr.msk.f32.mxu0 %vm15736_vm4, %v15737_v20 }
 0x78e   :  { %13728 = vmatmul.mubr.f32.gmra.mrb[80].mxu0 %v12637_v47  ;;  %v12259_v47 = vld [vmem:[%s20059_s24 + $0x28] sm:$0xff] }
 0x78f   :  { %13730 = vmatprep.mubr.msk.f32.mxu0 %vm15736_vm4, %v15737_v20 }
 0x792   :  { %13731 = vmatmul.mubr.f32.gmra.mrb[82].mxu0 %v12638_v17  ;;  %v14387_v17 = vpack.c.bf16 %v12259_v47, %v12258_v35  ;;  %v12294_v35 = vld [vmem:[%s20059_s24 + $0xa0] sm:$0xff]  ;;  %v12295_v47 = vld [vmem:[%s20059_s24 + $0xa8] sm:$0xff] }
 0x793   :  { %13733 = vmatprep.mubr.msk.f32.mxu0 %vm15736_vm4, %v15737_v20 }
 0x796   :  { %13734 = vmatmul.mubr.f32.gmra.mrb[84].mxu0 %v12641_v51  ;;  %v12261_v51 = vld [vmem:[%s20059_s24 + $0x38] sm:$0xff] }
 0x797   :  { %13736 = vmatprep.mubr.msk.f32.mxu0 %vm15736_vm4, %v15737_v20 }
 0x79a   :  { %13737 = vmatmul.mubr.f32.gmra.mrb[86].mxu0 %v12642_v15 }
 0x79b   :  { %13739 = vmatprep.mubr.msk.f32.mxu0 %vm15736_vm4, %v15737_v20 }
 0x79e   :  { %13740 = vmatmul.mubr.f32.gmra.mrb[88].mxu0 %v12645_v53  ;;  %v14390_v53 = vpack.c.bf16 %v12261_v51, %v12260_v9  ;;  %v14411_v51 = vpack.c.bf16 %v12295_v47, %v12294_v35 }
 0x79f   :  { %13742 = vmatprep.mubr.msk.f32.mxu0 %vm15736_vm4, %v15737_v20 }
 0x7a2   :  { %13743 = vmatmul.mubr.f32.gmra.mrb[90].mxu0 %v12646_v3 }
 0x7a3   :  { %13745 = vmatprep.mubr.msk.f32.mxu0 %vm15736_vm4, %v15737_v20 }
 0x7a6   :  { %13746 = vmatmul.mubr.f32.gmra.mrb[92].mxu0 %v12649_v57 }
 0x7a7   :  { %13748 = vmatprep.mubr.msk.f32.mxu0 %vm15736_vm4, %v15737_v20 }
 0x7aa   :  { %13749 = vmatmul.mubr.f32.gmra.mrb[94].mxu0 %v12650_v26 }
 0x7ab   :  { %13751 = vmatprep.mubr.msk.f32.mxu0 %vm15736_vm4, %v15737_v20 }
 0x7ae   :  { %13752 = vmatmul.mubr.f32.gmra.mrb[96].mxu0 %v12653_v60 }
 0x7af   :  { %13754 = vmatprep.mubr.msk.f32.mxu0 %vm15736_vm4, %v15737_v20 }
 0x7b2   :  { %13755 = vmatmul.mubr.f32.gmra.mrb[98].mxu0 %v12654_v32  ;;  %v12267_v32 = vld [vmem:[%s20059_s24 + $0x40] sm:$0xff] }
 0x7b3   :  { %13757 = vmatprep.mubr.msk.f32.mxu0 %vm15736_vm4, %v15737_v20  ;;  %v14393_v63 = vpack.c.bf16 %v12268_v33, %v12267_v32 }
 0x7b6   :  { %13758 = vmatmul.mubr.f32.gmra.mrb[100].mxu0 %v12657_v19 }
 0x7b7   :  { %13760 = vmatprep.mubr.msk.f32.mxu0 %vm15736_vm4, %v15737_v20 }
 0x7ba   :  { %13761 = vmatmul.mubr.f32.gmra.mrb[102].mxu0 %v12658_v54 }
 0x7bb   :  { %13763 = vmatprep.mubr.msk.f32.mxu0 %vm15736_vm4, %v15737_v20 }
 0x7be   :  { %13764 = vmatmul.mubr.f32.gmra.mrb[104].mxu0 %v12661_v4  ;;  %v12269_v4 = vld [vmem:[%s20059_s24 + $0x50] sm:$0xff] }
 0x7bf   :  { %13766 = vmatprep.mubr.msk.f32.mxu0 %vm15736_vm4, %v15737_v20 }
 0x7c2   :  { %13767 = vmatmul.mubr.f32.gmra.mrb[106].mxu0 %v12662_v5  ;;  %v12270_v5 = vld [vmem:[%s20059_s24 + $0x58] sm:$0xff] }
 0x7c3   :  { %13769 = vmatprep.mubr.msk.f32.mxu0 %vm15736_vm4, %v15737_v20 }
 0x7c6   :  { %13770 = vmatmul.mubr.f32.gmra.mrb[108].mxu0 %v12665_v52 }
 0x7c7   :  { %13772 = vmatprep.mubr.msk.f32.mxu0 %vm15736_vm4, %v15737_v20 }
 0x7ca   :  { %13773 = vmatmul.mubr.f32.gmra.mrb[110].mxu0 %v12666_v2  ;;  %v14396_v2 = vpack.c.bf16 %v12270_v5, %v12269_v4 }
 0x7cb   :  { %13775 = vmatprep.mubr.msk.f32.mxu0 %vm15736_vm4, %v15737_v20 }
 0x7ce   :  { %13776 = vmatmul.mubr.f32.gmra.mrb[112].mxu0 %v12669_v10 }
 0x7cf   :  { %13778 = vmatprep.mubr.msk.f32.mxu0 %vm15736_vm4, %v15737_v20 }
 0x7d2   :  { %13779 = vmatmul.mubr.f32.gmra.mrb[114].mxu0 %v12670_v14 }
 0x7d3   :  { %13781 = vmatprep.mubr.msk.f32.mxu0 %vm15736_vm4, %v15737_v20 }
 0x7d6   :  { %13782 = vmatmul.mubr.f32.gmra.mrb[116].mxu0 %v12673_v0 }
 0x7d7   :  { %13784 = vmatprep.mubr.msk.f32.mxu0 %vm15736_vm4, %v15737_v20 }
 0x7da   :  { %13785 = vmatmul.mubr.f32.gmra.mrb[118].mxu0 %v12674_v12 }
 0x7db   :  { %13787 = vmatprep.mubr.msk.f32.mxu0 %vm15736_vm4, %v15737_v20 }
 0x7de   :  { %13788 = vmatmul.mubr.f32.gmra.mrb[120].mxu0 %v12677_v50  ;;  %v12277_v50 = vld [vmem:[%s20059_s24 + $0x68] sm:$0xff] }
 0x7df   :  { %13790 = vmatprep.mubr.msk.f32.mxu0 %vm15736_vm4, %v15737_v20 }
 0x7e2   :  { %13791 = vmatmul.mubr.f32.gmra.mrb[122].mxu0 %v12678_v29 }
 0x7e3   :  { %13793 = vmatprep.mubr.msk.f32.mxu0 %vm15736_vm4, %v15737_v20 }
 0x7e6   :  { %13794 = vmatmul.mubr.f32.gmra.mrb[124].mxu0 %v12681_v18  ;;  %v14399_v18 = vpack.c.bf16 %v12277_v50, %v12276_v38 }
 0x7e7   :  { %13796 = vmatprep.mubr.msk.f32.mxu0 %vm15736_vm4, %v15737_v20 }
 0x7ea   :  { %13797 = vmatmul.mubr.f32.gmra.mrb[126].mxu0 %v12682_v8  ;;  %v12278_v8 = vld [vmem:[%s20059_s24 + $0x70] sm:$0xff] }
 0x7eb   :  { %13799 = vmatprep.mubr.msk.f32.mxu0 %vm15736_vm4, %v15737_v20  ;;  %v14402_v40 = vpack.c.bf16 %v12279_v23, %v12278_v8 }
 0x7ee   :  { %13800 = vmatmul.mubr.f32.gmra.mrb[128].mxu0 %v12685_v41 }
 0x7ef   :  { %13802 = vmatprep.mubr.msk.f32.mxu0 %vm15736_vm4, %v15737_v20 }
 0x7f2   :  { %13803 = vmatmul.mubr.f32.gmra.mrb[130].mxu0 %v12686_v56 }
 0x7f3   :  { %13805 = vmatprep.mubr.msk.f32.mxu0 %vm15736_vm4, %v15737_v20 }
 0x7f6   :  { %13806 = vmatmul.mubr.f32.gmra.mrb[132].mxu0 %v12689_v11 }
 0x7f7   :  { %13808 = vmatprep.mubr.msk.f32.mxu0 %vm15736_vm4, %v15737_v20 }
 0x7fa   :  { %13809 = vmatmul.mubr.f32.gmra.mrb[134].mxu0 %v12690_v16 }
 0x7fb   :  { %13811 = vmatprep.mubr.msk.f32.mxu0 %vm15736_vm4, %v15737_v20 }
 0x7fe   :  { %13812 = vmatmul.mubr.f32.gmra.mrb[136].mxu0 %v12693_v59 }
 0x7ff   :  { %13814 = vmatprep.mubr.msk.f32.mxu0 %vm15736_vm4, %v15737_v20 }
 0x802   :  { %13815 = vmatmul.mubr.f32.gmra.mrb[138].mxu0 %v12694_v49 }
 0x803   :  { %13817 = vmatprep.mubr.msk.f32.mxu0 %vm15736_vm4, %v15737_v20 }
 0x806   :  { %13818 = vmatmul.mubr.f32.gmra.mrb[140].mxu0 %v12697_v1  ;;  %v12285_v1 = vld [vmem:[%s20059_s24 + $0x80] sm:$0xff] }
 0x807   :  { %13820 = vmatprep.mubr.msk.f32.mxu0 %vm15736_vm4, %v15737_v20 }
 0x80a   :  { %13821 = vmatmul.mubr.f32.gmra.mrb[142].mxu0 %v12698_v36  ;;  %v12286_v36 = vld [vmem:[%s20059_s24 + $0x88] sm:$0xff] }
 0x80b   :  { %13823 = vmatprep.mubr.msk.f32.mxu0 %vm15736_vm4, %v15737_v20 }
 0x80e   :  { %13824 = vmatmul.mubr.f32.gmra.mrb[144].mxu0 %v12701_v31 }
 0x80f   :  { %13826 = vmatprep.mubr.msk.f32.mxu0 %vm15736_vm4, %v15737_v20 }
 0x812   :  { %13827 = vmatmul.mubr.f32.gmra.mrb[146].mxu0 %v12702_v22  ;;  %v14405_v22 = vpack.c.bf16 %v12286_v36, %v12285_v1 }
 0x813   :  { %13829 = vmatprep.mubr.msk.f32.mxu0 %vm15736_vm4, %v15737_v20 }
 0x816   :  { %13830 = vmatmul.mubr.f32.gmra.mrb[148].mxu0 %v12705_v37  ;;  %v12288_v37 = vld [vmem:[%s20059_s24 + $0x98] sm:$0xff] }
 0x817   :  { %13832 = vmatprep.mubr.msk.f32.mxu0 %vm15736_vm4, %v15737_v20 }
 0x81a   :  { %13833 = vmatmul.mubr.f32.gmra.mrb[150].mxu0 %v12706_v43 }
 0x81b   :  { %13835 = vmatprep.mubr.msk.f32.mxu0 %vm15736_vm4, %v15737_v20 }
 0x81e   :  { %13836 = vmatmul.mubr.f32.gmra.mrb[152].mxu0 %v12709_v24  ;;  %v14408_v24 = vpack.c.bf16 %v12288_v37, %v12287_v34 }
 0x81f   :  { %13838 = vmatprep.mubr.msk.f32.mxu0 %vm15736_vm4, %v15737_v20 }
 0x822   :  { %13839 = vmatmul.mubr.f32.gmra.mrb[154].mxu0 %v12710_v46 }
 0x823   :  { %13841 = vmatprep.mubr.msk.f32.mxu0 %vm15736_vm4, %v15737_v20 }
 0x826   :  { %13842 = vmatmul.mubr.f32.gmra.mrb[156].mxu0 %v12713_v13 }
 0x827   :  { %13844 = vmatprep.mubr.msk.f32.mxu0 %vm15736_vm4, %v15737_v20 }
 0x82a   :  { %13845 = vmatmul.mubr.f32.gmra.mrb[158].mxu0 %v12714_v48 }
 0x82b   :  { %13847 = vmatprep.mubr.msk.f32.mxu0 %vm15736_vm4, %v15737_v20 }
 0x82e   :  { %13848 = vmatmul.mubr.f32.gmra.mrb[160].mxu0 %v5982_v21 }
 0x82f   :  { %13858 = vmatprep.mubr.msk.f32.mxu0 %vm15736_vm4, %v15737_v20 }
 0x851   :  { %v6049_v15 = vpop.f32.mrb[72].mxu0 }
 0x852   :  { %v13717_v25 = vpop.f32.mrb[73].mxu0  ;;  %13859 = vmatmul.mubr.msk.f32.vlgmr.msra.gmra.mrb[162].mxu0 %vm3869_vm1, %v6049_v15  ;;  %v12296_v15 = vld [vmem:[%s20059_s24 + $0xb0] sm:$0xff] }
 0x853   :  { %13861 = vmatprep.mubr.msk.f32.mxu0 %vm15736_vm4, %v15737_v20  ;;  %14388 = vmatpush3.bf16.msra.mxu0 %v14387_v17  ;;  %v12297_v25 = vld [vmem:[%s20059_s24 + $0xb8] sm:$0xff] }
 0x854   :  { %14389 = vmatprep.subr.bf16.mxu0 %v15735_v45 }
 0x855   :  { %v6054_v3 = vpop.f32.mrb[74].mxu0 }
 0x856   :  { %v13720_v55 = vpop.f32.mrb[75].mxu0  ;;  %13862 = vmatmul.mubr.msk.f32.gmra.mrb[164].mxu0 %vm3869_vm1, %v6054_v3 }
 0x857   :  { %13864 = vmatprep.mubr.msk.f32.mxu0 %vm15736_vm4, %v15737_v20  ;;  %14391 = vmatpush3.bf16.msra.mxu0 %v14390_v53  ;;  %v14414_v55 = vpack.c.bf16 %v12297_v25, %v12296_v15 }
 0x858   :  { %14392 = vmatprep.subr.bf16.mxu0 %v15735_v45 }
 0x859   :  { %v6059_v57 = vpop.f32.mrb[76].mxu0 }
 0x85a   :  { %v13723_v26 = vpop.f32.mrb[77].mxu0  ;;  %13865 = vmatmul.mubr.msk.f32.gmra.mrb[166].mxu0 %vm3869_vm1, %v6059_v57 }
 0x85b   :  { %13867 = vmatprep.mubr.msk.f32.mxu0 %vm15736_vm4, %v15737_v20 }
 0x85d   :  { %v6064_v58 = vpop.f32.mrb[78].mxu0 }
 0x85e   :  { %v13726_v60 = vpop.f32.mrb[79].mxu0  ;;  %13868 = vmatmul.mubr.msk.f32.gmra.mrb[168].mxu0 %vm3869_vm1, %v6064_v58 }
 0x85f   :  { %13870 = vmatprep.mubr.msk.f32.mxu0 %vm15736_vm4, %v15737_v20 }
 0x861   :  { %v6069_v19 = vpop.f32.mrb[80].mxu0 }
 0x862   :  { %v13729_v54 = vpop.f32.mrb[81].mxu0  ;;  %13871 = vmatmul.mubr.msk.f32.gmra.mrb[170].mxu0 %vm3869_vm1, %v6069_v19  ;;  %v12303_v19 = vld [vmem:[%s20059_s24 + $0xc0] sm:$0xff] }
 0x863   :  { %13881 = vmatprep.mubr.msk.f32.mxu0 %vm15736_vm4, %v15737_v20  ;;  %v12304_v54 = vld [vmem:[%s20059_s24 + $0xc8] sm:$0xff] }
 0x864   :  { %v14417_v5 = vpack.c.bf16 %v12304_v54, %v12303_v19 }
 0x865   :  { %v6074_v61 = vpop.f32.mrb[82].mxu0 }
 0x866   :  { %v13732_v52 = vpop.f32.mrb[83].mxu0  ;;  %13882 = vmatmul.mubr.msk.f32.vlgmr.msra.gmra.mrb[162].mxu0 %vm3869_vm1, %v6074_v61  ;;  %v12305_v61 = vld [vmem:[%s20059_s24 + $0xd0] sm:$0xff] }
 0x867   :  { %13884 = vmatprep.mubr.msk.f32.mxu0 %vm15736_vm4, %v15737_v20  ;;  %14394 = vmatpush3.bf16.msra.mxu0 %v14393_v63  ;;  %v12306_v52 = vld [vmem:[%s20059_s24 + $0xd8] sm:$0xff] }
 0x868   :  { %14395 = vmatprep.subr.bf16.mxu0 %v15735_v45 }
 0x869   :  { %v6079_v7 = vpop.f32.mrb[84].mxu0 }
 0x86a   :  { %v13735_v10 = vpop.f32.mrb[85].mxu0  ;;  %13885 = vmatmul.mubr.msk.f32.gmra.mrb[164].mxu0 %vm3869_vm1, %v6079_v7 }
 0x86b   :  { %13887 = vmatprep.mubr.msk.f32.mxu0 %vm15736_vm4, %v15737_v20  ;;  %14397 = vmatpush3.bf16.msra.mxu0 %v14396_v2  ;;  %v14420_v10 = vpack.c.bf16 %v12306_v52, %v12305_v61 }
 0x86c   :  { %14398 = vmatprep.subr.bf16.mxu0 %v15735_v45 }
 0x86d   :  { %v6084_v14 = vpop.f32.mrb[86].mxu0 }
 0x86e   :  { %v13738_v6 = vpop.f32.mrb[87].mxu0  ;;  %13888 = vmatmul.mubr.msk.f32.gmra.mrb[166].mxu0 %vm3869_vm1, %v6084_v14 }
 0x86f   :  { %13890 = vmatprep.mubr.msk.f32.mxu0 %vm15736_vm4, %v15737_v20 }
 0x871   :  { %v6089_v0 = vpop.f32.mrb[88].mxu0 }
 0x872   :  { %v13741_v12 = vpop.f32.mrb[89].mxu0  ;;  %13891 = vmatmul.mubr.msk.f32.gmra.mrb[168].mxu0 %vm3869_vm1, %v6089_v0 }
 0x873   :  { %13893 = vmatprep.mubr.msk.f32.mxu0 %vm15736_vm4, %v15737_v20 }
 0x875   :  { %v6094_v29 = vpop.f32.mrb[90].mxu0 }
 0x876   :  { %v13744_v30 = vpop.f32.mrb[91].mxu0  ;;  %13894 = vmatmul.mubr.msk.f32.gmra.mrb[170].mxu0 %vm3869_vm1, %v6094_v29  ;;  %v12312_v29 = vld [vmem:[%s20059_s24 + $0xe0] sm:$0xff] }
 0x877   :  { %13904 = vmatprep.mubr.msk.f32.mxu0 %vm15736_vm4, %v15737_v20  ;;  %v12313_v30 = vld [vmem:[%s20059_s24 + $0xe8] sm:$0xff] }
 0x878   :  { %v14423_v23 = vpack.c.bf16 %v12313_v30, %v12312_v29 }
 0x879   :  { %v6099_v41 = vpop.f32.mrb[92].mxu0 }
 0x87a   :  { %v13747_v56 = vpop.f32.mrb[93].mxu0  ;;  %13905 = vmatmul.mubr.msk.f32.vlgmr.msra.gmra.mrb[162].mxu0 %vm3869_vm1, %v6099_v41  ;;  %v12314_v41 = vld [vmem:[%s20059_s24 + $0xf0] sm:$0xff] }
 0x87b   :  { %13907 = vmatprep.mubr.msk.f32.mxu0 %vm15736_vm4, %v15737_v20  ;;  %14400 = vmatpush3.bf16.msra.mxu0 %v14399_v18  ;;  %v12315_v56 = vld [vmem:[%s20059_s24 + $0xf8] sm:$0xff] }
 0x87c   :  { %14401 = vmatprep.subr.bf16.mxu0 %v15735_v45 }
 0x87d   :  { %v6104_v11 = vpop.f32.mrb[94].mxu0 }
 0x87e   :  { %v13750_v16 = vpop.f32.mrb[95].mxu0  ;;  %13908 = vmatmul.mubr.msk.f32.gmra.mrb[164].mxu0 %vm3869_vm1, %v6104_v11 }
 0x87f   :  { %13910 = vmatprep.mubr.msk.f32.mxu0 %vm15736_vm4, %v15737_v20  ;;  %14403 = vmatpush3.bf16.msra.mxu0 %v14402_v40  ;;  %v14426_v16 = vpack.c.bf16 %v12315_v56, %v12314_v41 }
 0x880   :  { %14404 = vmatprep.subr.bf16.mxu0 %v15735_v45 }
 0x881   :  { %v6109_v62 = vpop.f32.mrb[96].mxu0 }
 0x882   :  { %v13753_v59 = vpop.f32.mrb[97].mxu0  ;;  %13911 = vmatmul.mubr.msk.f32.gmra.mrb[166].mxu0 %vm3869_vm1, %v6109_v62 }
 0x883   :  { %13913 = vmatprep.mubr.msk.f32.mxu0 %vm15736_vm4, %v15737_v20 }
 0x885   :  { %v6114_v49 = vpop.f32.mrb[98].mxu0 }
 0x886   :  { %v13756_v28 = vpop.f32.mrb[99].mxu0  ;;  %13914 = vmatmul.mubr.msk.f32.gmra.mrb[168].mxu0 %vm3869_vm1, %v6114_v49 }
 0x887   :  { %13916 = vmatprep.mubr.msk.f32.mxu0 %vm15736_vm4, %v15737_v20 }
 0x889   :  { %v6119_v39 = vpop.f32.mrb[100].mxu0 }
 0x88a   :  { %v13759_v31 = vpop.f32.mrb[101].mxu0  ;;  %13917 = vmatmul.mubr.msk.f32.gmra.mrb[170].mxu0 %vm3869_vm1, %v6119_v39  ;;  %v12321_v39 = vld [vmem:[%s20059_s24 + $0x100] sm:$0xff] }
 0x88b   :  { %13927 = vmatprep.mubr.msk.f32.mxu0 %vm15736_vm4, %v15737_v20  ;;  %v12322_v31 = vld [vmem:[%s20059_s24 + $0x108] sm:$0xff] }
 0x88c   :  { %v14429_v37 = vpack.c.bf16 %v12322_v31, %v12321_v39 }
 0x88d   :  { %v6124_v43 = vpop.f32.mrb[102].mxu0 }
 0x88e   :  { %v13762_v27 = vpop.f32.mrb[103].mxu0  ;;  %13928 = vmatmul.mubr.msk.f32.vlgmr.msra.gmra.mrb[162].mxu0 %vm3869_vm1, %v6124_v43  ;;  %v12323_v43 = vld [vmem:[%s20059_s24 + $0x110] sm:$0xff] }
 0x88f   :  { %13930 = vmatprep.mubr.msk.f32.mxu0 %vm15736_vm4, %v15737_v20  ;;  %14406 = vmatpush3.bf16.msra.mxu0 %v14405_v22  ;;  %v12324_v27 = vld [vmem:[%s20059_s24 + $0x118] sm:$0xff] }
 0x890   :  { %14407 = vmatprep.subr.bf16.mxu0 %v15735_v45 }
 0x891   :  { %v6129_v46 = vpop.f32.mrb[104].mxu0 }
 0x892   :  { %v13765_v42 = vpop.f32.mrb[105].mxu0  ;;  %13931 = vmatmul.mubr.msk.f32.gmra.mrb[164].mxu0 %vm3869_vm1, %v6129_v46 }
 0x893   :  { %13933 = vmatprep.mubr.msk.f32.mxu0 %vm15736_vm4, %v15737_v20  ;;  %14409 = vmatpush3.bf16.msra.mxu0 %v14408_v24  ;;  %v14432_v42 = vpack.c.bf16 %v12324_v27, %v12323_v43 }
 0x894   :  { %14410 = vmatprep.subr.bf16.mxu0 %v15735_v45 }
 0x895   :  { %v6134_v13 = vpop.f32.mrb[106].mxu0 }
 0x896   :  { %v13768_v48 = vpop.f32.mrb[107].mxu0  ;;  %13934 = vmatmul.mubr.msk.f32.gmra.mrb[166].mxu0 %vm3869_vm1, %v6134_v13 }
 0x897   :  { %13936 = vmatprep.mubr.msk.f32.mxu0 %vm15736_vm4, %v15737_v20 }
 0x899   :  { %v6139_v44 = vpop.f32.mrb[108].mxu0 }
 0x89a   :  { %v13771_v21 = vpop.f32.mrb[109].mxu0  ;;  %13937 = vmatmul.mubr.msk.f32.gmra.mrb[168].mxu0 %vm3869_vm1, %v6139_v44 }
 0x89b   :  { %13939 = vmatprep.mubr.msk.f32.mxu0 %vm15736_vm4, %v15737_v20 }
 0x89d   :  { %v6144_v17 = vpop.f32.mrb[110].mxu0 }
 0x89e   :  { %v13774_v9 = vpop.f32.mrb[111].mxu0  ;;  %13940 = vmatmul.mubr.msk.f32.gmra.mrb[170].mxu0 %vm3869_vm1, %v6144_v17 }
 0x89f   :  { %13950 = vmatprep.mubr.msk.f32.mxu0 %vm15736_vm4, %v15737_v20 }
 0x8a1   :  { %v6149_v53 = vpop.f32.mrb[112].mxu0 }
 0x8a2   :  { %v13777_v3 = vpop.f32.mrb[113].mxu0  ;;  %13951 = vmatmul.mubr.msk.f32.vlgmr.msra.gmra.mrb[162].mxu0 %vm3869_vm1, %v6149_v53 }
 0x8a3   :  { %13953 = vmatprep.mubr.msk.f32.mxu0 %vm15736_vm4, %v15737_v20  ;;  %14412 = vmatpush3.bf16.msra.mxu0 %v14411_v51 }
 0x8a4   :  { %14413 = vmatprep.subr.bf16.mxu0 %v15735_v45 }
 0x8a5   :  { %v6154_v57 = vpop.f32.mrb[114].mxu0 }
 0x8a6   :  { %v13780_v26 = vpop.f32.mrb[115].mxu0  ;;  %13954 = vmatmul.mubr.msk.f32.gmra.mrb[164].mxu0 %vm3869_vm1, %v6154_v57 }
 0x8a7   :  { %13956 = vmatprep.mubr.msk.f32.mxu0 %vm15736_vm4, %v15737_v20  ;;  %14415 = vmatpush3.bf16.msra.mxu0 %v14414_v55 }
 0x8a8   :  { %14416 = vmatprep.subr.bf16.mxu0 %v15735_v45 }
 0x8a9   :  { %v6159_v58 = vpop.f32.mrb[116].mxu0 }
 0x8aa   :  { %v13783_v60 = vpop.f32.mrb[117].mxu0  ;;  %13957 = vmatmul.mubr.msk.f32.gmra.mrb[166].mxu0 %vm3869_vm1, %v6159_v58 }
 0x8ab   :  { %13959 = vmatprep.mubr.msk.f32.mxu0 %vm15736_vm4, %v15737_v20  ;;  %v18182_v60 = vld [vmem:[%s20020_s9] sm:$0xff]  }
 0x8ad   :  { %v6164_v32 = vpop.f32.mrb[118].mxu0 }
 0x8ae   :  { %v13786_v33 = vpop.f32.mrb[119].mxu0  ;;  %13960 = vmatmul.mubr.msk.f32.gmra.mrb[168].mxu0 %vm3869_vm1, %v6164_v32  ;;  %v12717_v32 = vunpack.c.l.bf16 %v18182_v60 }
 0x8af   :  { %13962 = vmatprep.mubr.msk.f32.mxu0 %vm15736_vm4, %v15737_v20  ;;  %v12257_v33 = vld [vmem:[%s20019_s8] ss:$0 sm:$0xff] }
 0x8b1   :  { %v6169_v63 = vpop.f32.mrb[120].mxu0 }
 0x8b2   :  { %v13789_v4 = vpop.f32.mrb[121].mxu0  ;;  %13963 = vmatmul.mubr.msk.f32.gmra.mrb[170].mxu0 %vm3869_vm1, %v6169_v63 }
 0x8b3   :  { %13973 = vmatprep.mubr.msk.f32.mxu0 %vm15736_vm4, %v15737_v20 }
 0x8b5   :  { %v6174_v2 = vpop.f32.mrb[122].mxu0 }
 0x8b6   :  { %v13792_v7 = vpop.f32.mrb[123].mxu0  ;;  %13974 = vmatmul.mubr.msk.f32.vlgmr.msra.gmra.mrb[162].mxu0 %vm3869_vm1, %v6174_v2 }
 0x8b7   :  { %13976 = vmatprep.mubr.msk.f32.mxu0 %vm15736_vm4, %v15737_v20  ;;  %14418 = vmatpush3.bf16.msra.mxu0 %v14417_v5 }
 0x8b8   :  { %14419 = vmatprep.subr.bf16.mxu0 %v15735_v45 }
 0x8b9   :  { %v6179_v14 = vpop.f32.mrb[124].mxu0 }
 0x8ba   :  { %v13795_v6 = vpop.f32.mrb[125].mxu0  ;;  %13977 = vmatmul.mubr.msk.f32.gmra.mrb[164].mxu0 %vm3869_vm1, %v6179_v14 }
 0x8bb   :  { %13979 = vmatprep.mubr.msk.f32.mxu0 %vm15736_vm4, %v15737_v20  ;;  %14421 = vmatpush3.bf16.msra.mxu0 %v14420_v10 }
 0x8bc   :  { %14422 = vmatprep.subr.bf16.mxu0 %v15735_v45 }
 0x8bd   :  { %v6184_v0 = vpop.f32.mrb[126].mxu0 }
 0x8be   :  { %v13798_v12 = vpop.f32.mrb[127].mxu0  ;;  %13980 = vmatmul.mubr.msk.f32.gmra.mrb[166].mxu0 %vm3869_vm1, %v6184_v0 }
 0x8bf   :  { %13982 = vmatprep.mubr.msk.f32.mxu0 %vm15736_vm4, %v15737_v20 }
 0x8c1   :  { %v6189_v38 = vpop.f32.mrb[128].mxu0 }
 0x8c2   :  { %v13801_v50 = vpop.f32.mrb[129].mxu0  ;;  %13983 = vmatmul.mubr.msk.f32.gmra.mrb[168].mxu0 %vm3869_vm1, %v6189_v38 }
 0x8c3   :  { %13985 = vmatprep.mubr.msk.f32.mxu0 %vm15736_vm4, %v15737_v20 }
 0x8c5   :  { %v6194_v18 = vpop.f32.mrb[130].mxu0 }
 0x8c6   :  { %v13804_v8 = vpop.f32.mrb[131].mxu0  ;;  %13986 = vmatmul.mubr.msk.f32.gmra.mrb[170].mxu0 %vm3869_vm1, %v6194_v18 }
 0x8c7   :  { %13996 = vmatprep.mubr.msk.f32.mxu0 %vm15736_vm4, %v15737_v20 }
 0x8c9   :  { %v6199_v40 = vpop.f32.mrb[132].mxu0 }
 0x8ca   :  { %v13807_v11 = vpop.f32.mrb[133].mxu0  ;;  %13997 = vmatmul.mubr.msk.f32.vlgmr.msra.gmra.mrb[162].mxu0 %vm3869_vm1, %v6199_v40 }
 0x8cb   :  { %13999 = vmatprep.mubr.msk.f32.mxu0 %vm15736_vm4, %v15737_v20  ;;  %14424 = vmatpush3.bf16.msra.mxu0 %v14423_v23 }
 0x8cc   :  { %14425 = vmatprep.subr.bf16.mxu0 %v15735_v45 }
 0x8cd   :  { %v6204_v62 = vpop.f32.mrb[134].mxu0 }
 0x8ce   :  { %v13810_v59 = vpop.f32.mrb[135].mxu0  ;;  %14000 = vmatmul.mubr.msk.f32.gmra.mrb[164].mxu0 %vm3869_vm1, %v6204_v62 }
 0x8cf   :  { %14002 = vmatprep.mubr.msk.f32.mxu0 %vm15736_vm4, %v15737_v20  ;;  %14427 = vmatpush3.bf16.msra.mxu0 %v14426_v16 }
 0x8d0   :  { %14428 = vmatprep.subr.bf16.mxu0 %v15735_v45 }
 0x8d1   :  { %v6209_v49 = vpop.f32.mrb[136].mxu0 }
 0x8d2   :  { %v13813_v28 = vpop.f32.mrb[137].mxu0  ;;  %14003 = vmatmul.mubr.msk.f32.gmra.mrb[166].mxu0 %vm3869_vm1, %v6209_v49 }
 0x8d3   :  { %14005 = vmatprep.mubr.msk.f32.mxu0 %vm15736_vm4, %v15737_v20 }
 0x8d5   :  { %v6214_v1 = vpop.f32.mrb[138].mxu0 }
 0x8d6   :  { %v13816_v36 = vpop.f32.mrb[139].mxu0  ;;  %14006 = vmatmul.mubr.msk.f32.gmra.mrb[168].mxu0 %vm3869_vm1, %v6214_v1 }
 0x8d7   :  { %14008 = vmatprep.mubr.msk.f32.mxu0 %vm15736_vm4, %v15737_v20 }
 0x8d9   :  { %v6219_v22 = vpop.f32.mrb[140].mxu0 }
 0x8da   :  { %v13819_v34 = vpop.f32.mrb[141].mxu0  ;;  %14009 = vmatmul.mubr.msk.f32.gmra.mrb[170].mxu0 %vm3869_vm1, %v6219_v22 }
 0x8db   :  { %14019 = vmatprep.mubr.msk.f32.mxu0 %vm15736_vm4, %v15737_v20 }
 0x8dd   :  { %v6224_v24 = vpop.f32.mrb[142].mxu0 }
 0x8de   :  { %v13822_v46 = vpop.f32.mrb[143].mxu0  ;;  %14020 = vmatmul.mubr.msk.f32.vlgmr.msra.gmra.mrb[162].mxu0 %vm3869_vm1, %v6224_v24 }
 0x8df   :  { %14022 = vmatprep.mubr.msk.f32.mxu0 %vm15736_vm4, %v15737_v20  ;;  %14430 = vmatpush3.bf16.msra.mxu0 %v14429_v37 }
 0x8e0   :  { %14431 = vmatprep.subr.bf16.mxu0 %v15735_v45 }
 0x8e1   :  { %v6229_v13 = vpop.f32.mrb[144].mxu0 }
 0x8e2   :  { %v13825_v48 = vpop.f32.mrb[145].mxu0  ;;  %14023 = vmatmul.mubr.msk.f32.gmra.mrb[164].mxu0 %vm3869_vm1, %v6229_v13  ;;  %v7592_v13 = vld [vmem:[%s20021_s10 + $0x8] sm:$0xff] }
 0x8e3   :  { %14025 = vmatprep.mubr.msk.f32.mxu0 %vm15736_vm4, %v15737_v20  ;;  %14433 = vmatpush3.bf16.msra.mxu0 %v14432_v42  ;;  %v7591_v42 = vld [vmem:[%s20021_s10] sm:$0xff]  ;;  %v12772_v48 = vld [vmem:[%s20020_s9 + $0x8] sm:$0xff]  }
 0x8e5   :  { %v6234_v44 = vpop.f32.mrb[146].mxu0 }
 0x8e6   :  { %v13828_v21 = vpop.f32.mrb[147].mxu0  ;;  %14026 = vmatmul.mubr.msk.f32.gmra.mrb[166].mxu0 %vm3869_vm1, %v6234_v44 }
 0x8e7   :  { %14028 = vmatprep.mubr.msk.f32.mxu0 %vm15736_vm4, %v15737_v20  ;;  %v7593_v21 = vld [vmem:[%s20021_s10 + $0x10] sm:$0xff] }
 0x8e9   :  { %v6239_v35 = vpop.f32.mrb[148].mxu0 }
 0x8ea   :  { %v13831_v47 = vpop.f32.mrb[149].mxu0  ;;  %14029 = vmatmul.mubr.msk.f32.gmra.mrb[168].mxu0 %vm3869_vm1, %v6239_v35  ;;  %v7594_v35 = vld [vmem:[%s20021_s10 + $0x18] sm:$0xff] }
 0x8eb   :  { %14031 = vmatprep.mubr.msk.f32.mxu0 %vm15736_vm4, %v15737_v20  ;;  %v12718_v47 = vunpack.c.h.bf16 %v18182_v60  ;;  %v12776_v60 = vld [vmem:[%s20020_s9 + $0x28] sm:$0xff]  }
 0x8ed   :  { %v6244_v45 = vpop.f32.mrb[150].mxu0 }
 0x8ee   :  { %v13834_v17 = vpop.f32.mrb[151].mxu0  ;;  %14032 = vmatmul.mubr.msk.f32.gmra.mrb[170].mxu0 %vm3869_vm1, %v6244_v45  ;;  %v14442_v45 = vpack.c.bf16 %v7592_v13, %v7591_v42  ;;  %v11060_v42 = vld [vmem:[%s20025_s14 + $0x1d0] sm:$0xff]  ;;  %v11067_v13 = vld [vmem:[%s20025_s14 + $0x208] sm:$0xff] }
 0x8ef   :  { %14042 = vmatprep.mubr.msk.f32.mxu0 %vm15736_vm4, %v15737_v20  ;;  %v12721_v17 = vunpack.c.l.bf16 %v12772_v48 }
 0x8f1   :  { %v6249_v9 = vpop.f32.mrb[152].mxu0 }
 0x8f2   :  { %v13837_v51 = vpop.f32.mrb[153].mxu0  ;;  %14043 = vmatmul.mubr.msk.f32.vlgmr.msra.gmra.mrb[162].mxu0 %vm3869_vm1, %v6249_v9  ;;  %v12773_v9 = vld [vmem:[%s20020_s9 + $0x10] sm:$0xff]  }
 0x8f3   :  { %14045 = vmatprep.mubr.msk.f32.mxu0 %vm15736_vm4, %v15737_v20  ;;  %v14446_v51 = vpack.c.bf16 %v7594_v35, %v7593_v21  ;;  %v11066_v35 = vld [vmem:[%s20025_s14 + $0x200] sm:$0xff] }
 0x8f5   :  { %v6254_v15 = vpop.f32.mrb[154].mxu0 }
 0x8f6   :  { %v13840_v25 = vpop.f32.mrb[155].mxu0  ;;  %14046 = vmatmul.mubr.msk.f32.gmra.mrb[164].mxu0 %vm3869_vm1, %v6254_v15  ;;  %v12722_v15 = vunpack.c.h.bf16 %v12772_v48  ;;  %v11073_v48 = vld [vmem:[%s20025_s14 + $0x238] sm:$0xff] }
 0x8f7   :  { %14048 = vmatprep.mubr.msk.f32.mxu0 %vm15736_vm4, %v15737_v20  ;;  %v12725_v25 = vunpack.c.l.bf16 %v12773_v9  ;;  %v14878_v21 = vpack.c.bf16 %v11073_v48, %v11067_v13  ;;  %v12398_v48 = vld [vmem:[%s20021_s10 + $0x100] sm:$0xff] }
 0x8f9   :  { %v6259_v53 = vpop.f32.mrb[156].mxu0 }
 0x8fa   :  { %v13843_v3 = vpop.f32.mrb[157].mxu0  ;;  %14049 = vmatmul.mubr.msk.f32.gmra.mrb[166].mxu0 %vm3869_vm1, %v6259_v53  ;;  %v12774_v53 = vld [vmem:[%s20020_s9 + $0x18] sm:$0xff]  }
 0x8fb   :  { %14051 = vmatprep.mubr.msk.f32.mxu0 %vm15736_vm4, %v15737_v20  ;;  %v12726_v3 = vunpack.c.h.bf16 %v12773_v9  ;;  %v12359_v9 = vld [vmem:[%s20021_s10 + $0x38] sm:$0xff] }
 0x8fd   :  { %v6264_v55 = vpop.f32.mrb[158].mxu0 }
 0x8fe   :  { %v13846_v57 = vpop.f32.mrb[159].mxu0  ;;  %14052 = vmatmul.mubr.msk.f32.gmra.mrb[168].mxu0 %vm3869_vm1, %v6264_v55  ;;  %v12729_v55 = vunpack.c.l.bf16 %v12774_v53 }
 0x8ff   :  { %14054 = vmatprep.mubr.msk.f32.mxu0 %vm15736_vm4, %v15737_v20  ;;  %v12775_v57 = vld [vmem:[%s20020_s9 + $0x20] sm:$0xff]  }
 0x901   :  { %v6269_v26 = vpop.f32.mrb[160].mxu0 }
 0x902   :  { %14055 = vmatmul.mubr.msk.f32.gmra.mrb[170].mxu0 %vm3869_vm1, %v6269_v26  ;;  %v13849_v58 = vpop.f32.mrb[161].mxu0  ;;  %v12730_v26 = vunpack.c.h.bf16 %v12774_v53  ;;  %v12362_v53 = vld [vmem:[%s20021_s10 + $0x40] sm:$0xff] }
 0x903   :  { %14067 = vmatprep.mubr.msk.f32.mxu0 %vm7380_vm7, %v12717_v32  ;;  %v12733_v58 = vunpack.c.l.bf16 %v12775_v57  ;;  %v12734_v32 = vunpack.c.h.bf16 %v12775_v57 }
 0x9c5   :  { %v7285_v19 = vpop.f32.mrb[162].mxu0 }
 0x9c6   :  { %v15018_v54 = vadd.f32 %v12257_v33, %v7285_v19  ;;  %v14044_v63 = vpop.f32.mrb[163].mxu0  ;;  %v12777_v19 = vld [vmem:[%s20020_s9 + $0x30] sm:$0xff]  }
 0x9c7   :  { %v12741_v63 = vunpack.c.l.bf16 %v12777_v19 }
 0x9c8   :  { %v7319_v4 = vmin.f32 %v15018_v54, 0.0  ;;  %vm7314_vm4 = vcmp.gt.f32.partialorder %v15018_v54, 0.0 }
 0x9c9   :  { %v7290_v5 = vpop.f32.mrb[164].mxu0 }
 0x9ca   :  { %v7324_v61 = vmul.f32 1.442695, %v7319_v4  ;;  %v15019_v52 = vadd.f32 %v12257_v33, %v7290_v5  ;;  %v14047_v2 = vpop.f32.mrb[165].mxu0  ;;  %v12778_v4 = vld [vmem:[%s20020_s9 + $0x38] sm:$0xff]   ;;  %v12742_v5 = vunpack.c.h.bf16 %v12777_v19 }
 0x9cb   :  { %v12746_v2 = vunpack.c.h.bf16 %v12778_v4 }
 0x9cc   :  { %15656 = vpow2.f32 %v7324_v61  ;;  %v7320_v7 = vmin.f32 %v15019_v52, 0.0  ;;  %vm7315_vm3 = vcmp.gt.f32.partialorder %v15019_v52, 0.0  ;;  %v12745_v61 = vunpack.c.l.bf16 %v12778_v4 }
 0x9cd   :  { %v7295_v10 = vpop.f32.mrb[166].mxu0 }
 0x9ce   :  { %v7326_v14 = vmul.f32 1.442695, %v7320_v7  ;;  %v15020_v6 = vadd.f32 %v12257_v33, %v7295_v10  ;;  %v14050_v0 = vpop.f32.mrb[167].mxu0 }
 0x9d0   :  { %15658 = vpow2.f32 %v7326_v14  ;;  %v7321_v12 = vmin.f32 %v15020_v6, 0.0  ;;  %vm7316_vm8 = vcmp.gt.f32.partialorder %v15020_v6, 0.0  ;;  %v12356_v14 = vld [vmem:[%s20021_s10 + $0x20] sm:$0xff] }
 0x9d1   :  { %v7300_v38 = vpop.f32.mrb[168].mxu0 }
 0x9d2   :  { %v7328_v50 = vmul.f32 1.442695, %v7321_v12  ;;  %v15021_v29 = vadd.f32 %v12257_v33, %v7300_v38  ;;  %v14053_v30 = vpop.f32.mrb[169].mxu0  ;;  %v11007_v12 = vld [vmem:[%s20025_s14 + $0x28] sm:$0xff]  ;;  %v11013_v38 = vld [vmem:[%s20025_s14 + $0x58] sm:$0xff] }
 0x9d3   :  { %v11012_v30 = vld [vmem:[%s20025_s14 + $0x50] sm:$0xff] }
 0x9d4   :  { %15660 = vpow2.f32 %v7328_v50  ;;  %v7322_v18 = vmin.f32 %v15021_v29, 0.0  ;;  %vm7317_vm9 = vcmp.gt.f32.partialorder %v15021_v29, 0.0  ;;  %v11006_v50 = vld [vmem:[%s20025_s14 + $0x20] sm:$0xff] }
 0x9d5   :  { %v7305_v8 = vpop.f32.mrb[170].mxu0 }
 0x9d6   :  { %v15657_v23 = vpop.eup %15656  ;;  %v7330_v41 = vmul.f32 1.442695, %v7322_v18  ;;  %v15022_v56 = vadd.f32 %v12257_v33, %v7305_v8  ;;  %v14056_v40 = vpop.f32.mrb[171].mxu0  ;;  %v12737_v33 = vunpack.c.l.bf16 %v12776_v60  ;;  %v11019_v18 = vld [vmem:[%s20025_s14 + $0x88] sm:$0xff]  ;;  %v11025_v8 = vld [vmem:[%s20025_s14 + $0xb8] sm:$0xff] }
 0x9d7   :  { %v12330_v16 = vadd.f32 -1.0, %v15657_v23  ;;  %v14860_v23 = vpack.c.bf16 %v11012_v30, %v11006_v50  ;;  %v11024_v40 = vld [vmem:[%s20025_s14 + $0xb0] sm:$0xff]  ;;  %v12377_v30 = vld [vmem:[%s20021_s10 + $0x98] sm:$0xff] }
 0x9d8   :  { %15662 = vpow2.f32 %v7330_v41  ;;  %v7323_v11 = vmin.f32 %v15022_v56, 0.0  ;;  %vm7318_vm10 = vcmp.gt.f32.partialorder %v15022_v56, 0.0  ;;  %v14862_v41 = vpack.c.bf16 %v11025_v8, %v11019_v18 }
 0x9d9   :  { %v7339_v28 = vsel %vm7314_vm4, %v15018_v54, %v12330_v16  ;;  %v12738_v54 = vunpack.c.h.bf16 %v12776_v60  ;;  %v11037_v16 = vld [vmem:[%s20025_s14 + $0x118] sm:$0xff] }
 0x9da   :  { %v15659_v62 = vpop.eup %15658  ;;  %v7332_v59 = vmul.f32 1.442695, %v7323_v11  ;;  %v11031_v11 = vld [vmem:[%s20025_s14 + $0xe8] sm:$0xff]  ;;  %v12365_v60 = vld [vmem:[%s20021_s10 + $0x58] sm:$0xff] }
 0x9db   :  { %v12331_v49 = vadd.f32 -1.0, %v15659_v62 }
 0x9dc   :  { %15664 = vpow2.f32 %v7332_v59  ;;  %v14866_v59 = vpack.c.bf16 %v11037_v16, %v11031_v11 }
 0x9dd   :  { %v7340_v1 = vsel %vm7315_vm3, %v15019_v52, %v12331_v49  ;;  %v12779_v52 = vld [vmem:[%s20020_s9 + $0x40] sm:$0xff]  }
 0x9de   :  { %v15661_v36 = vpop.eup %15660  ;;  %v14434_v39 = vpack.c.bf16 %v7340_v1, %v7339_v28  ;;  %v12749_v7 = vunpack.c.l.bf16 %v12779_v52  ;;  %v12750_v10 = vunpack.c.h.bf16 %v12779_v52  ;;  %v11030_v49 = vld [vmem:[%s20025_s14 + $0xe0] sm:$0xff]  ;;  %v11036_v28 = vld [vmem:[%s20025_s14 + $0x110] sm:$0xff]  ;;  %v11043_v1 = vld [vmem:[%s20025_s14 + $0x148] sm:$0xff] }
 0x9df   :  { %v12332_v31 = vadd.f32 -1.0, %v15661_v36  ;;  %v11049_v36 = vld [vmem:[%s20025_s14 + $0x178] sm:$0xff]  ;;  %v12370_v52 = vld [vmem:[%s20021_s10 + $0x70] sm:$0xff] }
 0x9e0   :  { %14435 = vmatprep.subr.bf16.mxu0 %v14434_v39 }
 0x9e1   :  { %14437 = vmatpush3.bf16.msra.mxu0 %v14434_v39  ;;  %v7341_v37 = vsel %vm7316_vm8, %v15020_v6, %v12332_v31  ;;  %v12357_v6 = vld [vmem:[%s20021_s10 + $0x28] sm:$0xff]  ;;  %v14868_v39 = vpack.c.bf16 %v11036_v28, %v11030_v49  ;;  %v14870_v31 = vpack.c.bf16 %v11049_v36, %v11043_v1  ;;  %v12386_v36 = vld [vmem:[%s20021_s10 + $0xc0] sm:$0xff] }
 0x9e2   :  { %v15663_v22 = vpop.eup %15662  ;;  %v14450_v0 = vpack.c.bf16 %v12357_v6, %v12356_v14  ;;  %v12374_v6 = vld [vmem:[%s20021_s10 + $0x80] sm:$0xff] }
 0x9e3   :  { %v12333_v34 = vadd.f32 -1.0, %v15663_v22  ;;  %v11042_v22 = vld [vmem:[%s20025_s14 + $0x140] sm:$0xff] }
 0x9e5   :  { %v7342_v43 = vsel %vm7317_vm9, %v15021_v29, %v12333_v34  ;;  %v14858_v29 = vpack.c.bf16 %v11013_v38, %v11007_v12  ;;  %v11048_v34 = vld [vmem:[%s20025_s14 + $0x170] sm:$0xff] }
 0x9e6   :  { %v15665_v27 = vpop.eup %15664  ;;  %v14438_v24 = vpack.c.bf16 %v7342_v43, %v7341_v37  ;;  %v11055_v37 = vld [vmem:[%s20025_s14 + $0x1a8] sm:$0xff]  ;;  %v11061_v43 = vld [vmem:[%s20025_s14 + $0x1d8] sm:$0xff] }
 0x9e7   :  { %v12334_v46 = vadd.f32 -1.0, %v15665_v27  ;;  %14859 = vmatprep.subr.bf16.mxu1 %v14858_v29  ;;  %v14872_v27 = vpack.c.bf16 %v11048_v34, %v11042_v22  ;;  %v12376_v29 = vld [vmem:[%s20021_s10 + $0x90] sm:$0xff]  ;;  %v12389_v34 = vld [vmem:[%s20021_s10 + $0xd8] sm:$0xff] }
 0x9e8   :  { %14439 = vmatprep.subr.bf16.mxu0 %v14438_v24  ;;  %14861 = vmatpush1.bf16.msra.mxu1 %v14860_v23  ;;  %v14478_v8 = vpack.c.bf16 %v12377_v30, %v12376_v29  ;;  %v12388_v22 = vld [vmem:[%s20021_s10 + $0xd0] sm:$0xff] }
 0x9e9   :  { %14441 = vmatpush3.bf16.msra.mxu0 %v14438_v24  ;;  %v7343_v44 = vsel %vm7318_vm10, %v15022_v56, %v12334_v46  ;;  %v11018_v56 = vld [vmem:[%s20025_s14 + $0x80] sm:$0xff]  ;;  %14863 = vmatprep.subr.bf16.mxu1 %v14862_v41  ;;  %v14874_v24 = vpack.c.bf16 %v11061_v43, %v11055_v37  ;;  %v14494_v37 = vpack.c.bf16 %v12389_v34, %v12388_v22  ;;  %v11108_v30 = vld [vmem:[%s20025_s14 + $0x350] sm:$0xff]  ;;  %v8417_v22 = vld [vmem:[%s20024_s13 + $0x78] sm:$0xff] }
 0x9ea   :  { %14065 = vmatprep.subr.mxu0 %v7343_v44  ;;  %v14864_v62 = vpack.c.bf16 %v11024_v40, %v11018_v56  ;;  %v11054_v46 = vld [vmem:[%s20025_s14 + $0x1a0] sm:$0xff]  ;;  %v12381_v56 = vld [vmem:[%s20021_s10 + $0xa8] sm:$0xff] }
 0x9eb   :  { %v12380_v41 = vld [vmem:[%s20021_s10 + $0xa0] sm:$0xff]  ;;  %v8423_v34 = vld [vmem:[%s20024_s13 + $0xa8] sm:$0xff] }
 0x9ec   :  { %14865 = vmatpush1.bf16.msra.mxu1 %v14864_v62  ;;  %v14482_v11 = vpack.c.bf16 %v12381_v56, %v12380_v41  ;;  %v12382_v62 = vld [vmem:[%s20021_s10 + $0xb0] sm:$0xff]  ;;  %v12392_v43 = vld [vmem:[%s20021_s10 + $0xe0] sm:$0xff]  ;;  %v11121_v41 = vld [vmem:[%s20025_s14 + $0x3b8] sm:$0xff] }
 0x9ed   :  { %14066 = vmatpush3.msra.mxu0 %v7343_v44  ;;  %14867 = vmatprep.subr.bf16.mxu1 %v14866_v59  ;;  %v14876_v44 = vpack.c.bf16 %v11060_v42, %v11054_v46  ;;  %v12383_v59 = vld [vmem:[%s20021_s10 + $0xb8] sm:$0xff]  ;;  %v12394_v46 = vld [vmem:[%s20021_s10 + $0xf0] sm:$0xff]  ;;  %v11114_v56 = vld [vmem:[%s20025_s14 + $0x380] sm:$0xff] }
 0x9ee   :  { %14068 = vmatmul.mubr.msk.f32.vlgmr.msra.gmra.mrb[172].mxu0 %vm7380_vm7, %v12718_v47  ;;  %14443 = vmatprep.subr.bf16.mxu0 %v14442_v45  ;;  %v11072_v47 = vld [vmem:[%s20025_s14 + $0x230] sm:$0xff]  ;;  %v14486_v28 = vpack.c.bf16 %v12383_v59, %v12382_v62  ;;  %v12395_v42 = vld [vmem:[%s20021_s10 + $0xf8] sm:$0xff] }
 0x9ef   :  { %14070 = vmatprep.mubr.msk.f32.mxu0 %vm7380_vm7, %v12721_v17  ;;  %14445 = vmatpush3.bf16.msra.mxu0 %v14442_v45  ;;  %v14880_v45 = vpack.c.bf16 %v11072_v47, %v11066_v35  ;;  %v12358_v17 = vld [vmem:[%s20021_s10 + $0x30] sm:$0xff]  ;;  %v14502_v13 = vpack.c.bf16 %v12395_v42, %v12394_v46  ;;  %v12401_v47 = vld [vmem:[%s20021_s10 + $0x118] sm:$0xff]  ;;  %v8422_v42 = vld [vmem:[%s20024_s13 + $0xa0] sm:$0xff] }
 0x9f0   :  { %14447 = vmatprep.subr.bf16.mxu0 %v14446_v51  ;;  %14869 = vmatpush1.bf16.msra.mxu1 %v14868_v39  ;;  %v12387_v39 = vld [vmem:[%s20021_s10 + $0xc8] sm:$0xff]  ;;  %v12400_v35 = vld [vmem:[%s20021_s10 + $0x110] sm:$0xff] }
 0x9f1   :  { %14871 = vmatprep.subr.bf16.mxu1 %v14870_v31  ;;  %v14490_v31 = vpack.c.bf16 %v12387_v39, %v12386_v36  ;;  %v8404_v39 = vld [vmem:[%s20024_s13 + $0x10] sm:$0xff] }
 0x9f2   :  { %14071 = vmatmul.mubr.msk.f32.gmra.mrb[174].mxu0 %vm7380_vm7, %v12722_v15  ;;  %v8416_v46 = vld [vmem:[%s20024_s13 + $0x70] sm:$0xff] }
 0x9f3   :  { %14073 = vmatprep.mubr.msk.f32.mxu0 %vm7380_vm7, %v12725_v25  ;;  %14449 = vmatpush3.bf16.msra.mxu0 %v14446_v51  ;;  %v14454_v25 = vpack.c.bf16 %v12359_v9, %v12358_v17  ;;  %v8403_v17 = vld [vmem:[%s20024_s13 + $0x8] sm:$0xff]  ;;  %v8409_v9 = vld [vmem:[%s20024_s13 + $0x38] sm:$0xff] }
 0x9f4   :  { %14451 = vmatprep.subr.bf16.mxu0 %v14450_v0  ;;  %14873 = vmatpush1.bf16.msra.mxu1 %v14872_v27  ;;  %v12393_v27 = vld [vmem:[%s20021_s10 + $0xe8] sm:$0xff] }
 0x9f5   :  { %14875 = vmatprep.subr.bf16.mxu1 %v14874_v24  ;;  %v14498_v24 = vpack.c.bf16 %v12393_v27, %v12392_v43 }
 0x9f6   :  { %14074 = vmatmul.mubr.msk.f32.gmra.mrb[176].mxu0 %vm7380_vm7, %v12726_v3  ;;  %v12363_v3 = vld [vmem:[%s20021_s10 + $0x48] sm:$0xff] }
 0x9f7   :  { %14076 = vmatprep.mubr.msk.f32.mxu0 %vm7380_vm7, %v12729_v55 }
 0x9f8   :  { %14877 = vmatpush1.bf16.msra.mxu1 %v14876_v44  ;;  %v12399_v44 = vld [vmem:[%s20021_s10 + $0x108] sm:$0xff] }
 0x9f9   :  { %14879 = vmatprep.subr.bf16.mxu1 %v14878_v21  ;;  %v14506_v21 = vpack.c.bf16 %v12399_v44, %v12398_v48  ;;  %v8407_v48 = vld [vmem:[%s20024_s13 + $0x28] sm:$0xff]  ;;  %v8413_v44 = vld [vmem:[%s20024_s13 + $0x58] sm:$0xff] }
 0x9fa   :  { %14077 = vmatmul.mubr.msk.f32.gmra.mrb[178].mxu0 %vm7380_vm7, %v12730_v26  ;;  %v14458_v26 = vpack.c.bf16 %v12363_v3, %v12362_v53  ;;  %v8415_v3 = vld [vmem:[%s20024_s13 + $0x68] sm:$0xff] }
 0x9fb   :  { %14079 = vmatprep.mubr.msk.f32.mxu0 %vm7380_vm7, %v12733_v58  ;;  %v12364_v58 = vld [vmem:[%s20021_s10 + $0x50] sm:$0xff] }
 0x9fc   :  { %14881 = vmatpush1.bf16.msra.mxu1 %v14880_v45  ;;  %v14510_v45 = vpack.c.bf16 %v12401_v47, %v12400_v35  ;;  %v14530_v35 = vpack.c.bf16 %v8413_v44, %v8407_v48  ;;  %v8406_v47 = vld [vmem:[%s20024_s13 + $0x20] sm:$0xff]  ;;  %v12449_v48 = vld [vmem:[%s20024_s13 + $0x1e8] sm:$0xff]  ;;  %v12455_v44 = vld [vmem:[%s20024_s13 + $0x218] sm:$0xff] }
 0x9fe   :  { %14080 = vmatmul.mubr.msk.f32.gmra.mrb[180].mxu0 %vm7380_vm7, %v12734_v32 }
 0x9ff   :  { %14082 = vmatprep.mubr.msk.f32.mxu0 %vm7380_vm7, %v12737_v33  ;;  %v14462_v33 = vpack.c.bf16 %v12365_v60, %v12364_v58  ;;  %v8420_v58 = vld [vmem:[%s20024_s13 + $0x90] sm:$0xff] }
 0xa02   :  { %14083 = vmatmul.mubr.msk.f32.gmra.mrb[182].mxu0 %vm7380_vm7, %v12738_v54  ;;  %v12368_v54 = vld [vmem:[%s20021_s10 + $0x60] sm:$0xff] }
 0xa03   :  { %14085 = vmatprep.mubr.msk.f32.mxu0 %vm7380_vm7, %v12741_v63  ;;  %v12369_v63 = vld [vmem:[%s20021_s10 + $0x68] sm:$0xff] }
 0xa06   :  { %14086 = vmatmul.mubr.msk.f32.gmra.mrb[184].mxu0 %vm7380_vm7, %v12742_v5  ;;  %v14466_v5 = vpack.c.bf16 %v12369_v63, %v12368_v54  ;;  %v11079_v54 = vld [vmem:[%s20025_s14 + $0x268] sm:$0xff]  ;;  %v11085_v63 = vld [vmem:[%s20025_s14 + $0x298] sm:$0xff] }
 0xa07   :  { %14088 = vmatprep.mubr.msk.f32.mxu0 %vm7380_vm7, %v12745_v61 }
 0xa0a   :  { %14089 = vmatmul.mubr.msk.f32.gmra.mrb[186].mxu0 %vm7380_vm7, %v12746_v2  ;;  %v12371_v2 = vld [vmem:[%s20021_s10 + $0x78] sm:$0xff] }
 0xa0b   :  { %14091 = vmatprep.mubr.msk.f32.mxu0 %vm7380_vm7, %v12749_v7 }
 0xa0e   :  { %14092 = vmatmul.mubr.msk.f32.gmra.mrb[188].mxu0 %vm7380_vm7, %v12750_v10  ;;  %v14470_v10 = vpack.c.bf16 %v12371_v2, %v12370_v52  ;;  %v11091_v2 = vld [vmem:[%s20025_s14 + $0x2c8] sm:$0xff] }
 0xac1   :  { %v14069_v51 = vpop.f32.mrb[172].mxu0 }
 0xac2   :  { %v7501_v15 = vpop.f32.mrb[173].mxu0 }
 0xac3   :  { %14102 = vmatprep.mubr.msk.f32.mxu0 %vm3869_vm1, %v7501_v15  ;;  %v8402_v15 = vld [vmem:[%s20024_s13] sm:$0xff] }
 0xac4   :  { %14103 = vmatmul.mubr.msk.f32.vlgmr.msra.gmra.mrb[190].mxu0 %vm3869_vm1, %v14069_v51  ;;  %v14514_v51 = vpack.c.bf16 %v8409_v9, %v8403_v17  ;;  %v8419_v17 = vld [vmem:[%s20024_s13 + $0x88] sm:$0xff]  ;;  %v8425_v9 = vld [vmem:[%s20024_s13 + $0xb8] sm:$0xff] }
 0xac5   :  { %14453 = vmatpush3.bf16.msra.mxu0 %v14450_v0  ;;  %v14072_v55 = vpop.f32.mrb[174].mxu0  ;;  %v12375_v0 = vld [vmem:[%s20021_s10 + $0x88] sm:$0xff] }
 0xac6   :  { %14455 = vmatprep.subr.bf16.mxu0 %v14454_v25  ;;  %v7511_v57 = vpop.f32.mrb[175].mxu0  ;;  %v14474_v38 = vpack.c.bf16 %v12375_v0, %v12374_v6  ;;  %v11096_v6 = vld [vmem:[%s20025_s14 + $0x2f0] sm:$0xff] }
 0xac7   :  { %14113 = vmatprep.mubr.msk.f32.mxu0 %vm3869_vm1, %v7511_v57 }
 0xac9   :  { %14457 = vmatpush3.bf16.msra.mxu0 %v14454_v25  ;;  %v14075_v32 = vpop.f32.mrb[176].mxu0  ;;  %v8408_v25 = vld [vmem:[%s20024_s13 + $0x30] sm:$0xff] }
 0xaca   :  { %14459 = vmatprep.subr.bf16.mxu0 %v14458_v26  ;;  %v7521_v19 = vpop.f32.mrb[177].mxu0  ;;  %v14516_v53 = vpack.c.bf16 %v8408_v25, %v8402_v15  ;;  %v14534_v15 = vpack.c.bf16 %v8425_v9, %v8419_v17  ;;  %v8418_v25 = vld [vmem:[%s20024_s13 + $0x80] sm:$0xff]  ;;  %v12439_v17 = vld [vmem:[%s20024_s13 + $0x198] sm:$0xff]  ;;  %v12445_v9 = vld [vmem:[%s20024_s13 + $0x1c8] sm:$0xff] }
 0xacc   :  { %14114 = vmatmul.mubr.msk.f32.vlgmr.msra.gmra.mrb[190].mxu0 %vm3869_vm1, %v14072_v55  ;;  %v8421_v55 = vld [vmem:[%s20024_s13 + $0x98] sm:$0xff] }
 0xacd   :  { %14461 = vmatpush3.bf16.msra.mxu0 %v14458_v26  ;;  %14124 = vmatprep.mubr.msk.f32.mxu0 %vm3869_vm1, %v7521_v19  ;;  %v14078_v4 = vpop.f32.mrb[178].mxu0  ;;  %v14518_v57 = vpack.c.bf16 %v8421_v55, %v8415_v3  ;;  %v8414_v26 = vld [vmem:[%s20024_s13 + $0x60] sm:$0xff]  ;;  %v12410_v3 = vld [vmem:[%s20024_s13 + $0xc8] sm:$0xff]  ;;  %v12416_v55 = vld [vmem:[%s20024_s13 + $0xf8] sm:$0xff] }
 0xace   :  { %14463 = vmatprep.subr.bf16.mxu0 %v14462_v33  ;;  %v7531_v61 = vpop.f32.mrb[179].mxu0  ;;  %v14520_v60 = vpack.c.bf16 %v8420_v58, %v8414_v26  ;;  %v14538_v26 = vpack.c.bf16 %v12416_v55, %v12410_v3  ;;  %v12409_v58 = vld [vmem:[%s20024_s13 + $0xc0] sm:$0xff]  ;;  %v12451_v3 = vld [vmem:[%s20024_s13 + $0x1f8] sm:$0xff]  ;;  %v12457_v55 = vld [vmem:[%s20024_s13 + $0x228] sm:$0xff] }
 0xad1   :  { %14465 = vmatpush3.bf16.msra.mxu0 %v14462_v33  ;;  %v14081_v7 = vpop.f32.mrb[180].mxu0  ;;  %v8411_v33 = vld [vmem:[%s20024_s13 + $0x48] sm:$0xff] }
 0xad2   :  { %14467 = vmatprep.subr.bf16.mxu0 %v14466_v5  ;;  %v7541_v14 = vpop.f32.mrb[181].mxu0 }
 0xad4   :  { %14125 = vmatmul.mubr.msk.f32.vlgmr.msra.gmra.mrb[190].mxu0 %vm3869_vm1, %v14075_v32  ;;  %v8405_v32 = vld [vmem:[%s20024_s13 + $0x18] sm:$0xff] }
 0xad5   :  { %14469 = vmatpush3.bf16.msra.mxu0 %v14466_v5  ;;  %14135 = vmatprep.mubr.msk.f32.mxu0 %vm3869_vm1, %v7531_v61  ;;  %v14084_v12 = vpop.f32.mrb[182].mxu0  ;;  %v14522_v19 = vpack.c.bf16 %v8411_v33, %v8405_v32  ;;  %v14882_v5 = vpack.c.bf16 %v11085_v63, %v11079_v54  ;;  %v11084_v61 = vld [vmem:[%s20025_s14 + $0x290] sm:$0xff]  ;;  %v12422_v32 = vld [vmem:[%s20024_s13 + $0x128] sm:$0xff]  ;;  %v12428_v33 = vld [vmem:[%s20024_s13 + $0x158] sm:$0xff] }
 0xad6   :  { %14471 = vmatprep.subr.bf16.mxu0 %v14470_v10  ;;  %v7551_v50 = vpop.f32.mrb[183].mxu0  ;;  %v11127_v54 = vld [vmem:[%s20025_s14 + $0x3e8] sm:$0xff]  ;;  %v11133_v63 = vld [vmem:[%s20025_s14 + $0x418] sm:$0xff] }
 0xad7   :  { %14883 = vmatprep.subr.bf16.mxu1 %v14882_v5  ;;  %v14542_v5 = vpack.c.bf16 %v12428_v33, %v12422_v32  ;;  %v12456_v32 = vld [vmem:[%s20024_s13 + $0x220] sm:$0xff]  ;;  %v12441_v33 = vld [vmem:[%s20024_s13 + $0x1a8] sm:$0xff] }
 0xad9   :  { %14473 = vmatpush3.bf16.msra.mxu0 %v14470_v10  ;;  %v14087_v18 = vpop.f32.mrb[184].mxu0  ;;  %v11090_v10 = vld [vmem:[%s20025_s14 + $0x2c0] sm:$0xff] }
 0xada   :  { %14475 = vmatprep.subr.bf16.mxu0 %v14474_v38  ;;  %v7561_v23 = vpop.f32.mrb[185].mxu0  ;;  %v14888_v0 = vpack.c.bf16 %v11096_v6, %v11090_v10  ;;  %v12412_v10 = vld [vmem:[%s20024_s13 + $0xd8] sm:$0xff] }
 0xadc   :  { %14136 = vmatmul.mubr.msk.f32.vlgmr.msra.gmra.mrb[190].mxu0 %vm3869_vm1, %v14078_v4  ;;  %v11078_v4 = vld [vmem:[%s20025_s14 + $0x260] sm:$0xff] }
 0xadd   :  { %14477 = vmatpush3.bf16.msra.mxu0 %v14474_v38  ;;  %14146 = vmatprep.mubr.msk.f32.mxu0 %vm3869_vm1, %v7541_v14  ;;  %v14090_v40 = vpop.f32.mrb[186].mxu0  ;;  %v14884_v52 = vpack.c.bf16 %v11084_v61, %v11078_v4  ;;  %v11109_v38 = vld [vmem:[%s20025_s14 + $0x358] sm:$0xff]  ;;  %v11126_v4 = vld [vmem:[%s20025_s14 + $0x3e0] sm:$0xff] }
 0xade   :  { %14479 = vmatprep.subr.bf16.mxu0 %v14478_v8  ;;  %v7571_v16 = vpop.f32.mrb[187].mxu0  ;;  %v12421_v61 = vld [vmem:[%s20024_s13 + $0x120] sm:$0xff] }
 0xadf   :  { %14885 = vmatpush1.bf16.msra.mxu1 %v14884_v52  ;;  %v12427_v52 = vld [vmem:[%s20024_s13 + $0x150] sm:$0xff] }
 0xae1   :  { %14481 = vmatpush3.bf16.msra.mxu0 %v14478_v8  ;;  %v14093_v49 = vpop.f32.mrb[188].mxu0  ;;  %v12355_v8 = vld [vmem:[%s20022_s11] ss:$0 sm:$0xff] }
 0xae2   :  { %14483 = vmatprep.subr.bf16.mxu0 %v14482_v11  ;;  %v7581_v1 = vpop.f32.mrb[189].mxu0 }
 0xae4   :  { %14147 = vmatmul.mubr.msk.f32.vlgmr.msra.gmra.mrb[190].mxu0 %vm3869_vm1, %v14081_v7  ;;  %v11097_v7 = vld [vmem:[%s20025_s14 + $0x2f8] sm:$0xff] }
 0xae5   :  { %14485 = vmatpush3.bf16.msra.mxu0 %v14482_v11  ;;  %14157 = vmatprep.mubr.msk.f32.mxu0 %vm3869_vm1, %v7551_v50  ;;  %v14886_v14 = vpack.c.bf16 %v11097_v7, %v11091_v2  ;;  %v11102_v50 = vld [vmem:[%s20025_s14 + $0x320] sm:$0xff]  ;;  %v14898_v2 = vpack.c.bf16 %v11133_v63, %v11127_v54  ;;  %v11132_v7 = vld [vmem:[%s20025_s14 + $0x410] sm:$0xff]  ;;  %v11139_v63 = vld [vmem:[%s20025_s14 + $0x448] sm:$0xff] }
 0xae6   :  { %14487 = vmatprep.subr.bf16.mxu0 %v14486_v28  ;;  %v14900_v6 = vpack.c.bf16 %v11132_v7, %v11126_v4  ;;  %v11145_v4 = vld [vmem:[%s20025_s14 + $0x478] sm:$0xff] }
 0xae7   :  { %14887 = vmatprep.subr.bf16.mxu1 %v14886_v14  ;;  %v12418_v14 = vld [vmem:[%s20024_s13 + $0x108] sm:$0xff]  ;;  %v14902_v7 = vpack.c.bf16 %v11145_v4, %v11139_v63  ;;  %v12502_v63 = vld [vmem:[%s20024_s13 + $0x360] sm:$0xff] }
 0xae8   :  { %14889 = vmatpush1.bf16.msra.mxu1 %v14888_v0  ;;  %v14544_v0 = vpack.c.bf16 %v12427_v52, %v12421_v61  ;;  %v12440_v52 = vld [vmem:[%s20024_s13 + $0x1a0] sm:$0xff] }
 0xae9   :  { %14489 = vmatpush3.bf16.msra.mxu0 %v14486_v28 }
 0xaea   :  { %14491 = vmatprep.subr.bf16.mxu0 %v14490_v31 }
 0xaec   :  { %14158 = vmatmul.mubr.msk.f32.vlgmr.msra.gmra.mrb[190].mxu0 %vm3869_vm1, %v14084_v12  ;;  %v11103_v12 = vld [vmem:[%s20025_s14 + $0x328] sm:$0xff] }
 0xaed   :  { %14493 = vmatpush3.bf16.msra.mxu0 %v14490_v31  ;;  %14168 = vmatprep.mubr.msk.f32.mxu0 %vm3869_vm1, %v7561_v23  ;;  %v14890_v29 = vpack.c.bf16 %v11109_v38, %v11103_v12  ;;  %v11115_v23 = vld [vmem:[%s20025_s14 + $0x388] sm:$0xff]  ;;  %v8410_v31 = vld [vmem:[%s20024_s13 + $0x40] sm:$0xff]  ;;  %v14546_v12 = vpack.c.bf16 %v12418_v14, %v12412_v10  ;;  %v12411_v38 = vld [vmem:[%s20024_s13 + $0xd0] sm:$0xff] }
 0xaee   :  { %14495 = vmatprep.subr.bf16.mxu0 %v14494_v37  ;;  %v14894_v11 = vpack.c.bf16 %v11121_v41, %v11115_v23  ;;  %v14524_v27 = vpack.c.bf16 %v8410_v31, %v8404_v39  ;;  %v12423_v41 = vld [vmem:[%s20024_s13 + $0x130] sm:$0xff]  ;;  %v12453_v14 = vld [vmem:[%s20024_s13 + $0x208] sm:$0xff] }
 0xaef   :  { %14891 = vmatprep.subr.bf16.mxu1 %v14890_v29  ;;  %v12424_v29 = vld [vmem:[%s20024_s13 + $0x138] sm:$0xff]  ;;  %v11144_v10 = vld [vmem:[%s20025_s14 + $0x470] sm:$0xff] }
 0xaf1   :  { %14497 = vmatpush3.bf16.msra.mxu0 %v14494_v37 }
 0xaf2   :  { %14499 = vmatprep.subr.bf16.mxu0 %v14498_v24 }
 0xaf4   :  { %14169 = vmatmul.mubr.msk.f32.vlgmr.msra.gmra.mrb[190].mxu0 %vm3869_vm1, %v14087_v18  ;;  %v14892_v18 = vpack.c.bf16 %v11108_v30, %v11102_v50  ;;  %v12417_v50 = vld [vmem:[%s20024_s13 + $0x100] sm:$0xff]  ;;  %v12430_v30 = vld [vmem:[%s20024_s13 + $0x168] sm:$0xff] }
 0xaf5   :  { %14501 = vmatpush3.bf16.msra.mxu0 %v14498_v24  ;;  %14179 = vmatprep.mubr.msk.f32.mxu0 %vm3869_vm1, %v7571_v16  ;;  %v11120_v16 = vld [vmem:[%s20025_s14 + $0x3b0] sm:$0xff]  ;;  %v14526_v24 = vpack.c.bf16 %v8423_v34, %v8417_v22  ;;  %v14550_v23 = vpack.c.bf16 %v12430_v30, %v12424_v29  ;;  %v12425_v22 = vld [vmem:[%s20024_s13 + $0x140] sm:$0xff]  ;;  %v12464_v30 = vld [vmem:[%s20024_s13 + $0x248] sm:$0xff] }
 0xaf6   :  { %14503 = vmatprep.subr.bf16.mxu0 %v14502_v13  ;;  %14893 = vmatpush1.bf16.msra.mxu1 %v14892_v18  ;;  %v14548_v18 = vpack.c.bf16 %v12417_v50, %v12411_v38  ;;  %v12431_v34 = vld [vmem:[%s20024_s13 + $0x170] sm:$0xff]  ;;  %v12452_v50 = vld [vmem:[%s20024_s13 + $0x200] sm:$0xff] }
 0xaf7   :  { %14895 = vmatprep.subr.bf16.mxu1 %v14894_v11  ;;  %v12420_v11 = vld [vmem:[%s20024_s13 + $0x118] sm:$0xff]  ;;  %v12458_v29 = vld [vmem:[%s20024_s13 + $0x230] sm:$0xff] }
 0xaf9   :  { %14505 = vmatpush3.bf16.msra.mxu0 %v14502_v13 }
 0xafa   :  { %14507 = vmatprep.subr.bf16.mxu0 %v14506_v21 }
 0xafc   :  { %14180 = vmatmul.mubr.msk.f32.vlgmr.msra.gmra.mrb[190].mxu0 %vm3869_vm1, %v14090_v40 }
 0xafd   :  { %14509 = vmatpush3.bf16.msra.mxu0 %v14506_v21  ;;  %14190 = vmatprep.mubr.msk.f32.mxu0 %vm3869_vm1, %v7581_v1  ;;  %v14528_v21 = vpack.c.bf16 %v8422_v42, %v8416_v46  ;;  %v12436_v46 = vld [vmem:[%s20024_s13 + $0x180] sm:$0xff]  ;;  %v12442_v42 = vld [vmem:[%s20024_s13 + $0x1b0] sm:$0xff] }
 0xafe   :  { %14511 = vmatprep.subr.bf16.mxu0 %v14510_v45 }
 0xb01   :  { %14513 = vmatpush3.bf16.msra.mxu0 %v14510_v45  ;;  %v8412_v45 = vld [vmem:[%s20024_s13 + $0x50] sm:$0xff] }
 0xb02   :  { %14515 = vmatprep.subr.bf16.mxu0 %v14514_v51  ;;  %v14532_v51 = vpack.c.bf16 %v8412_v45, %v8406_v47  ;;  %v12448_v47 = vld [vmem:[%s20024_s13 + $0x1e0] sm:$0xff]  ;;  %v12454_v45 = vld [vmem:[%s20024_s13 + $0x210] sm:$0xff] }
 0xb04   :  { %14191 = vmatmul.mubr.msk.f32.vlgmr.msra.gmra.mrb[190].mxu0 %vm3869_vm1, %v14093_v49  ;;  %v14896_v49 = vpack.c.bf16 %v11120_v16, %v11114_v56  ;;  %v12429_v56 = vld [vmem:[%s20024_s13 + $0x160] sm:$0xff] }
 0xb05   :  { %8493 = vmatprep.mubr.f32.mxu0 %v15737_v20  ;;  %14517 = vmatpush1.bf16.msra.mxu0 %v14516_v53  ;;  %v8424_v53 = vld [vmem:[%s20024_s13 + $0xb0] sm:$0xff]  ;;  %v14552_v16 = vpack.c.bf16 %v12429_v56, %v12423_v41  ;;  %v12463_v41 = vld [vmem:[%s20024_s13 + $0x240] sm:$0xff] }
 0xb06   :  { %14519 = vmatprep.subr.bf16.mxu0 %v14518_v57  ;;  %14897 = vmatpush1.bf16.msra.mxu1 %v14896_v49  ;;  %v14536_v57 = vpack.c.bf16 %v8424_v53, %v8418_v25  ;;  %v12413_v49 = vld [vmem:[%s20024_s13 + $0xe0] sm:$0xff]  ;;  %v12438_v25 = vld [vmem:[%s20024_s13 + $0x190] sm:$0xff] }
 0xb07   :  { %14899 = vmatprep.subr.bf16.mxu1 %v14898_v2  ;;  %v12444_v53 = vld [vmem:[%s20024_s13 + $0x1c0] sm:$0xff]  ;;  %v12446_v2 = vld [vmem:[%s20024_s13 + $0x1d0] sm:$0xff] }
 0xb08   :  { %v12469_v56 = vld [vmem:[%s20024_s13 + $0x270] sm:$0xff] }
 0xb09   :  { %14521 = vmatpush1.bf16.msra.mxu0 %v14520_v60  ;;  %v12415_v60 = vld [vmem:[%s20024_s13 + $0xf0] sm:$0xff] }
 0xb0a   :  { %14523 = vmatprep.subr.bf16.mxu0 %v14522_v19  ;;  %v14540_v19 = vpack.c.bf16 %v12415_v60, %v12409_v58  ;;  %14901 = vmatpush1.bf16.msra.mxu1 %v14900_v6  ;;  %v14574_v58 = vpack.c.bf16 %v12457_v55, %v12451_v3  ;;  %v12450_v60 = vld [vmem:[%s20024_s13 + $0x1f0] sm:$0xff]  ;;  %v12459_v6 = vld [vmem:[%s20024_s13 + $0x238] sm:$0xff]  ;;  %v12491_v55 = vld [vmem:[%s20024_s13 + $0x308] sm:$0xff] }
 0xb0b   :  { %v14576_v54 = vpack.c.bf16 %v12456_v32, %v12450_v60  ;;  %14903 = vmatprep.subr.bf16.mxu1 %v14902_v7  ;;  %v14582_v38 = vpack.c.bf16 %v12459_v6, %v12453_v14  ;;  %v12485_v3 = vld [vmem:[%s20024_s13 + $0x2f0] sm:$0xff]  ;;  %v12490_v60 = vld [vmem:[%s20024_s13 + $0x300] sm:$0xff]  ;;  %v11157_v7 = vld [vmem:[%s20025_s14 + $0x4d8] sm:$0xff] }
 0xb0c   :  { %v12496_v32 = vld [vmem:[%s20024_s13 + $0x330] sm:$0xff] }
 0xb0d   :  { %v11156_v6 = vld [vmem:[%s20025_s14 + $0x4d0] sm:$0xff] }
 0xbd7   :  { %v14192_v40 = vpop.f32.mrb[190].mxu0 }
 0xbd8   :  { %v18511_v62 = vadd.f32 %v14192_v40, %v12355_v8  ;;  %v8377_v59 = vpop.f32.mrb[191].mxu0  ;;  %v12414_v40 = vld [vmem:[%s20024_s13 + $0xe8] sm:$0xff] }
 0xbd9   :  { %v15024_v28 = vadd.f32 %v12355_v8, %v8377_v59  ;;  %v14554_v59 = vpack.c.bf16 %v12420_v11, %v12414_v40  ;;  %v12476_v40 = vld [vmem:[%s20024_s13 + $0x2a8] sm:$0xff]  ;;  %v12482_v11 = vld [vmem:[%s20024_s13 + $0x2d8] sm:$0xff] }
 0xbda   :  { %vm8389_vm12 = vcmp.gt.f32.partialorder %v18511_v62, 0.0 }
 0xbdb   :  { %v8390_v1 = vmin.f32 %v15024_v28, 0.0  ;;  %vm8388_vm11 = vcmp.gt.f32.partialorder %v15024_v28, 0.0 }
 0xbdd   :  { %v8392_v36 = vmul.f32 1.442695, %v8390_v1  ;;  %v12426_v1 = vld [vmem:[%s20024_s13 + $0x148] sm:$0xff] }
 0xbdf   :  { %15666 = vpow2.f32 %v8392_v36  ;;  %v12432_v36 = vld [vmem:[%s20024_s13 + $0x178] sm:$0xff] }
 0xbe0   :  { %v14558_v31 = vpack.c.bf16 %v12432_v36, %v12426_v1  ;;  %v12466_v1 = vld [vmem:[%s20024_s13 + $0x258] sm:$0xff]  ;;  %v12472_v36 = vld [vmem:[%s20024_s13 + $0x288] sm:$0xff] }
 0xbe9   :  { %v15667_v37 = vpop.eup %15666 }
 0xbea   :  { %v12404_v43 = vadd.f32 -1.0, %v15667_v37  ;;  %v12437_v37 = vld [vmem:[%s20024_s13 + $0x188] sm:$0xff] }
 0xbec   :  { %v18531_v13 = vsel %vm8388_vm11, %v15024_v28, %v12404_v43  ;;  %v12419_v28 = vld [vmem:[%s20024_s13 + $0x110] sm:$0xff]  ;;  %v12443_v43 = vld [vmem:[%s20024_s13 + $0x1b8] sm:$0xff] }
 0xbed   :  { %12406 = vmatmul.mubr.msk.f32.vlgmr.msra.gmra.mrb[192].mxu0 %vm3869_vm1, %v18531_v13  ;;  %v8715_v8 = vrot.slane %v18531_v13, 1  ;;  %v14556_v39 = vpack.c.bf16 %v12419_v28, %v12413_v49  ;;  %v12475_v49 = vld [vmem:[%s20024_s13 + $0x2a0] sm:$0xff]  ;;  %v12481_v28 = vld [vmem:[%s20024_s13 + $0x2d0] sm:$0xff] }
 0xbee   :  { %14525 = vmatpush1.bf16.msra.mxu0 %v14524_v27  ;;  %8564 = vmatprep.mubr.f32.mxu0 %v15737_v20  ;;  %v14560_v27 = vpack.c.bf16 %v12431_v34, %v12425_v22  ;;  %v12465_v22 = vld [vmem:[%s20024_s13 + $0x250] sm:$0xff]  ;;  %v12471_v34 = vld [vmem:[%s20024_s13 + $0x280] sm:$0xff] }
 0xbef   :  { %14527 = vmatprep.subr.bf16.mxu0 %v14526_v24  ;;  %v14562_v24 = vpack.c.bf16 %v12443_v43, %v12437_v37  ;;  %v12478_v37 = vld [vmem:[%s20024_s13 + $0x2b8] sm:$0xff]  ;;  %v12484_v43 = vld [vmem:[%s20024_s13 + $0x2e8] sm:$0xff] }
 0xbf2   :  { %14529 = vmatpush1.bf16.msra.mxu0 %v14528_v21  ;;  %v14564_v21 = vpack.c.bf16 %v12442_v42, %v12436_v46  ;;  %v14598_v46 = vpack.c.bf16 %v12484_v43, %v12478_v37  ;;  %v12477_v42 = vld [vmem:[%s20024_s13 + $0x2b0] sm:$0xff]  ;;  %v12518_v43 = vld [vmem:[%s20024_s13 + $0x3c8] sm:$0xff] }
 0xbf3   :  { %14531 = vmatprep.subr.bf16.mxu0 %v14530_v35  ;;  %v14566_v35 = vpack.c.bf16 %v12455_v44, %v12449_v48  ;;  %v12483_v48 = vld [vmem:[%s20024_s13 + $0x2e0] sm:$0xff]  ;;  %v12468_v44 = vld [vmem:[%s20024_s13 + $0x268] sm:$0xff]  ;;  %v12512_v37 = vld [vmem:[%s20024_s13 + $0x3b0] sm:$0xff] }
 0xbf5   :  { %12407 = vmatmul.mubr.msk.f32.vlgmr.msra.gmra.mrb[194].mxu0 %vm3869_vm1, %v18531_v13 }
 0xbf6   :  { %14533 = vmatpush1.bf16.msra.mxu0 %v14532_v51  ;;  %8635 = vmatprep.mubr.f32.mxu0 %v15737_v20  ;;  %v14568_v51 = vpack.c.bf16 %v12454_v45, %v12448_v47  ;;  %v12467_v45 = vld [vmem:[%s20024_s13 + $0x260] sm:$0xff] }
 0xbf7   :  { %14535 = vmatprep.subr.bf16.mxu0 %v14534_v15  ;;  %v14570_v15 = vpack.c.bf16 %v12445_v9, %v12439_v17  ;;  %v12473_v17 = vld [vmem:[%s20024_s13 + $0x290] sm:$0xff]  ;;  %v12480_v9 = vld [vmem:[%s20024_s13 + $0x2c8] sm:$0xff] }
 0xbfa   :  { %14537 = vmatpush1.bf16.msra.mxu0 %v14536_v57  ;;  %v14572_v57 = vpack.c.bf16 %v12444_v53, %v12438_v25  ;;  %v12479_v53 = vld [vmem:[%s20024_s13 + $0x2c0] sm:$0xff] }
 0xbfb   :  { %14539 = vmatprep.subr.bf16.mxu0 %v14538_v26  ;;  %v9004_v26 = vrot.slane %v18531_v13, 2 }
 0xbfd   :  { %12408 = vmatmul.mubr.msk.f32.vlgmr.msra.gmra.mrb[196].mxu0 %vm3869_vm1, %v18531_v13 }
 0xbfe   :  { %14541 = vmatpush1.bf16.msra.mxu0 %v14540_v19  ;;  %8782 = vmatprep.mubr.f32.mxu0 %v15737_v20  ;;  %v12447_v19 = vld [vmem:[%s20024_s13 + $0x1d8] sm:$0xff] }
 0xbff   :  { %14543 = vmatprep.subr.bf16.mxu0 %v14542_v5  ;;  %v11138_v5 = vld [vmem:[%s20025_s14 + $0x440] sm:$0xff]  ;;  %v14578_v61 = vpack.c.bf16 %v12447_v19, %v12441_v33  ;;  %v12503_v33 = vld [vmem:[%s20024_s13 + $0x368] sm:$0xff]  ;;  %v12509_v19 = vld [vmem:[%s20024_s13 + $0x398] sm:$0xff] }
 0xc00   :  { %v14614_v4 = vpack.c.bf16 %v12509_v19, %v12503_v33  ;;  %v12537_v33 = vld [vmem:[%s20024_s13 + $0x460] sm:$0xff]  ;;  %v12522_v19 = vld [vmem:[%s20024_s13 + $0x3e8] sm:$0xff] }
 0xc02   :  { %14545 = vmatpush1.bf16.msra.mxu0 %v14544_v0  ;;  %v14904_v0 = vpack.c.bf16 %v11144_v10, %v11138_v5  ;;  %v12508_v5 = vld [vmem:[%s20024_s13 + $0x390] sm:$0xff]  ;;  %v11150_v10 = vld [vmem:[%s20025_s14 + $0x4a0] sm:$0xff] }
 0xc03   :  { %14547 = vmatprep.subr.bf16.mxu0 %v14546_v12  ;;  %v14580_v12 = vpack.c.bf16 %v12446_v2, %v12440_v52  ;;  %v12499_v52 = vld [vmem:[%s20024_s13 + $0x348] sm:$0xff] }
 0xc04   :  { %14905 = vmatpush1.bf16.msra.mxu1 %v14904_v0  ;;  %v11151_v2 = vld [vmem:[%s20025_s14 + $0x4a8] sm:$0xff]  ;;  %v14616_v0 = vpack.c.bf16 %v12508_v5, %v12502_v63 }
 0xc05   :  { %12433 = vmatmul.mubr.msk.f32.vlgmr.msra.gmra.mrb[198].mxu0 %vm3869_vm1, %v8715_v8  ;;  %v14906_v14 = vpack.c.bf16 %v11157_v7, %v11151_v2  ;;  %v12540_v2 = vld [vmem:[%s20024_s13 + $0x478] sm:$0xff]  ;;  %v11163_v7 = vld [vmem:[%s20025_s14 + $0x508] sm:$0xff] }
 0xc06   :  { %14549 = vmatpush1.bf16.msra.mxu0 %v14548_v18  ;;  %8853 = vmatprep.mubr.f32.mxu0 %v15737_v20  ;;  %v12470_v18 = vld [vmem:[%s20024_s13 + $0x278] sm:$0xff] }
 0xc07   :  { %14551 = vmatprep.subr.bf16.mxu0 %v14550_v23  ;;  %v14586_v23 = vpack.c.bf16 %v12470_v18, %v12464_v30  ;;  %14907 = vmatprep.subr.bf16.mxu1 %v14906_v14  ;;  %v12505_v30 = vld [vmem:[%s20024_s13 + $0x378] sm:$0xff]  ;;  %v12511_v18 = vld [vmem:[%s20024_s13 + $0x3a8] sm:$0xff]  ;;  %v11162_v14 = vld [vmem:[%s20025_s14 + $0x500] sm:$0xff] }
 0xc0a   :  { %14553 = vmatpush1.bf16.msra.mxu0 %v14552_v16  ;;  %v14588_v16 = vpack.c.bf16 %v12469_v56, %v12463_v41  ;;  %v14622_v41 = vpack.c.bf16 %v12511_v18, %v12505_v30  ;;  %v12504_v56 = vld [vmem:[%s20024_s13 + $0x370] sm:$0xff]  ;;  %v12545_v18 = vld [vmem:[%s20024_s13 + $0x488] sm:$0xff] }
 0xc0b   :  { %14555 = vmatprep.subr.bf16.mxu0 %v14554_v59  ;;  %v14590_v59 = vpack.c.bf16 %v12482_v11, %v12476_v40  ;;  %v12510_v40 = vld [vmem:[%s20024_s13 + $0x3a0] sm:$0xff]  ;;  %v12495_v11 = vld [vmem:[%s20024_s13 + $0x328] sm:$0xff]  ;;  %v12539_v30 = vld [vmem:[%s20024_s13 + $0x470] sm:$0xff] }
 0xc0d   :  { %12434 = vmatmul.mubr.msk.f32.vlgmr.msra.gmra.mrb[200].mxu0 %vm3869_vm1, %v8715_v8 }
 0xc0e   :  { %14557 = vmatpush1.bf16.msra.mxu0 %v14556_v39  ;;  %8924 = vmatprep.mubr.f32.mxu0 %v15737_v20  ;;  %v14592_v39 = vpack.c.bf16 %v12481_v28, %v12475_v49  ;;  %v12494_v28 = vld [vmem:[%s20024_s13 + $0x320] sm:$0xff] }
 0xc0f   :  { %14559 = vmatprep.subr.bf16.mxu0 %v14558_v31  ;;  %v14594_v31 = vpack.c.bf16 %v12472_v36, %v12466_v1  ;;  %v12500_v1 = vld [vmem:[%s20024_s13 + $0x350] sm:$0xff]  ;;  %v12507_v36 = vld [vmem:[%s20024_s13 + $0x388] sm:$0xff] }
 0xc12   :  { %14561 = vmatpush1.bf16.msra.mxu0 %v14560_v27  ;;  %v14596_v27 = vpack.c.bf16 %v12471_v34, %v12465_v22  ;;  %v12506_v34 = vld [vmem:[%s20024_s13 + $0x380] sm:$0xff] }
 0xc13   :  { %14563 = vmatprep.subr.bf16.mxu0 %v14562_v24  ;;  %v9293_v24 = vrot.slane %v18531_v13, 3 }
 0xc15   :  { %12435 = vmatmul.mubr.msk.f32.vlgmr.msra.gmra.mrb[202].mxu0 %vm3869_vm1, %v8715_v8  ;;  %v14584_v8 = vpack.c.bf16 %v12458_v29, %v12452_v50  ;;  %v12492_v50 = vld [vmem:[%s20024_s13 + $0x310] sm:$0xff]  ;;  %v12498_v29 = vld [vmem:[%s20024_s13 + $0x340] sm:$0xff] }
 0xc16   :  { %14565 = vmatpush1.bf16.msra.mxu0 %v14564_v21  ;;  %9071 = vmatprep.mubr.f32.mxu0 %v15737_v20  ;;  %v12474_v21 = vld [vmem:[%s20024_s13 + $0x298] sm:$0xff] }
 0xc17   :  { %14567 = vmatprep.subr.bf16.mxu0 %v14566_v35  ;;  %v14600_v35 = vpack.c.bf16 %v12483_v48, %v12477_v42  ;;  %v14602_v47 = vpack.c.bf16 %v12474_v21, %v12468_v44  ;;  %v12517_v42 = vld [vmem:[%s20024_s13 + $0x3c0] sm:$0xff]  ;;  %v12523_v48 = vld [vmem:[%s20024_s13 + $0x3f0] sm:$0xff]  ;;  %v12530_v44 = vld [vmem:[%s20024_s13 + $0x428] sm:$0xff] }
 0xc18   :  { %v12536_v21 = vld [vmem:[%s20024_s13 + $0x458] sm:$0xff] }
 0xc1a   :  { %14569 = vmatpush1.bf16.msra.mxu0 %v14568_v51  ;;  %v12486_v51 = vld [vmem:[%s20024_s13 + $0x2f8] sm:$0xff] }
 0xc1b   :  { %14571 = vmatprep.subr.bf16.mxu0 %v14570_v15  ;;  %v14604_v15 = vpack.c.bf16 %v12473_v17, %v12467_v45  ;;  %v14606_v25 = vpack.c.bf16 %v12486_v51, %v12480_v9  ;;  %v12529_v45 = vld [vmem:[%s20024_s13 + $0x420] sm:$0xff]  ;;  %v12535_v17 = vld [vmem:[%s20024_s13 + $0x450] sm:$0xff]  ;;  %v12520_v9 = vld [vmem:[%s20024_s13 + $0x3d8] sm:$0xff] }
 0xc1c   :  { %v12526_v51 = vld [vmem:[%s20024_s13 + $0x408] sm:$0xff] }
 0xc1d   :  { %12460 = vmatmul.mubr.msk.f32.vlgmr.msra.gmra.mrb[204].mxu0 %vm3869_vm1, %v9004_v26 }
 0xc1e   :  { %14573 = vmatpush1.bf16.msra.mxu0 %v14572_v57  ;;  %9142 = vmatprep.mubr.f32.mxu0 %v15737_v20  ;;  %v12497_v57 = vld [vmem:[%s20024_s13 + $0x338] sm:$0xff] }
 0xc1f   :  { %14575 = vmatprep.subr.bf16.mxu0 %v14574_v58  ;;  %v14610_v58 = vpack.c.bf16 %v12497_v57, %v12491_v55  ;;  %v12532_v55 = vld [vmem:[%s20024_s13 + $0x438] sm:$0xff]  ;;  %v12538_v57 = vld [vmem:[%s20024_s13 + $0x468] sm:$0xff] }
 0xc22   :  { %14577 = vmatpush1.bf16.msra.mxu0 %v14576_v54  ;;  %v14612_v54 = vpack.c.bf16 %v12496_v32, %v12490_v60  ;;  %v14646_v60 = vpack.c.bf16 %v12538_v57, %v12532_v55  ;;  %v12531_v32 = vld [vmem:[%s20024_s13 + $0x430] sm:$0xff]  ;;  %v12561_v55 = vld [vmem:[%s20024_s13 + $0x508] sm:$0xff]  ;;  %v12567_v57 = vld [vmem:[%s20024_s13 + $0x538] sm:$0xff] }
 0xc23   :  { %14579 = vmatprep.subr.bf16.mxu0 %v14578_v61  ;;  %v12493_v61 = vld [vmem:[%s20024_s13 + $0x318] sm:$0xff]  ;;  %v14648_v63 = vpack.c.bf16 %v12537_v33, %v12531_v32  ;;  %v12566_v32 = vld [vmem:[%s20024_s13 + $0x530] sm:$0xff]  ;;  %v12572_v33 = vld [vmem:[%s20024_s13 + $0x548] sm:$0xff] }
 0xc25   :  { %12461 = vmatmul.mubr.msk.f32.vlgmr.msra.gmra.mrb[206].mxu0 %vm3869_vm1, %v9004_v26 }
 0xc26   :  { %14581 = vmatpush1.bf16.msra.mxu0 %v14580_v12  ;;  %9213 = vmatprep.mubr.f32.mxu0 %v15737_v20  ;;  %v14908_v12 = vpack.c.bf16 %v11156_v6, %v11150_v10  ;;  %v11169_v10 = vld [vmem:[%s20025_s14 + $0x538] sm:$0xff] }
 0xc27   :  { %14583 = vmatprep.subr.bf16.mxu0 %v14582_v38  ;;  %v14618_v38 = vpack.c.bf16 %v12499_v52, %v12493_v61  ;;  %v12527_v61 = vld [vmem:[%s20024_s13 + $0x410] sm:$0xff]  ;;  %v12534_v52 = vld [vmem:[%s20024_s13 + $0x448] sm:$0xff]  ;;  %v14910_v6 = vpack.c.bf16 %v11169_v10, %v11163_v7  ;;  %v12583_v7 = vld [vmem:[%s20024_s13 + $0x5a0] sm:$0xff] }
 0xc28   :  { %14909 = vmatpush1.bf16.msra.mxu1 %v14908_v12 }
 0xc29   :  { %14911 = vmatprep.subr.bf16.mxu1 %v14910_v6  ;;  %v12574_v6 = vld [vmem:[%s20024_s13 + $0x558] sm:$0xff] }
 0xc2a   :  { %14585 = vmatpush1.bf16.msra.mxu0 %v14584_v8  ;;  %v14620_v8 = vpack.c.bf16 %v12498_v29, %v12492_v50  ;;  %v14654_v50 = vpack.c.bf16 %v12540_v2, %v12534_v52  ;;  %v12533_v29 = vld [vmem:[%s20024_s13 + $0x440] sm:$0xff]  ;;  %v12590_v52 = vld [vmem:[%s20024_s13 + $0x5d8] sm:$0xff] }
 0xc2b   :  { %14587 = vmatprep.subr.bf16.mxu0 %v14586_v23  ;;  %v9582_v23 = vrot.slane %v18531_v13, 4 }
 0xc2d   :  { %12462 = vmatmul.mubr.msk.f32.vlgmr.msra.gmra.mrb[208].mxu0 %vm3869_vm1, %v9004_v26  ;;  %v14608_v26 = vpack.c.bf16 %v12485_v3, %v12479_v53  ;;  %v12519_v53 = vld [vmem:[%s20024_s13 + $0x3d0] sm:$0xff]  ;;  %v12525_v3 = vld [vmem:[%s20024_s13 + $0x400] sm:$0xff] }
 0xc2e   :  { %14589 = vmatpush1.bf16.msra.mxu0 %v14588_v16  ;;  %9360 = vmatprep.mubr.f32.mxu0 %v15737_v20  ;;  %v12501_v16 = vld [vmem:[%s20024_s13 + $0x358] sm:$0xff] }
 0xc2f   :  { %14591 = vmatprep.subr.bf16.mxu0 %v14590_v59  ;;  %v14624_v59 = vpack.c.bf16 %v12510_v40, %v12504_v56  ;;  %v14626_v49 = vpack.c.bf16 %v12501_v16, %v12495_v11  ;;  %v12544_v56 = vld [vmem:[%s20024_s13 + $0x480] sm:$0xff]  ;;  %v12550_v40 = vld [vmem:[%s20024_s13 + $0x4b0] sm:$0xff]  ;;  %v12557_v11 = vld [vmem:[%s20024_s13 + $0x4e8] sm:$0xff] }
 0xc30   :  { %v12563_v16 = vld [vmem:[%s20024_s13 + $0x518] sm:$0xff] }
 0xc32   :  { %14593 = vmatpush1.bf16.msra.mxu0 %v14592_v39  ;;  %v12513_v39 = vld [vmem:[%s20024_s13 + $0x3b8] sm:$0xff] }
 0xc33   :  { %14595 = vmatprep.subr.bf16.mxu0 %v14594_v31  ;;  %v14628_v31 = vpack.c.bf16 %v12500_v1, %v12494_v28  ;;  %v14630_v22 = vpack.c.bf16 %v12513_v39, %v12507_v36  ;;  %v14662_v28 = vpack.c.bf16 %v12563_v16, %v12557_v11  ;;  %v12556_v1 = vld [vmem:[%s20024_s13 + $0x4e0] sm:$0xff]  ;;  %v12562_v36 = vld [vmem:[%s20024_s13 + $0x510] sm:$0xff]  ;;  %v12547_v39 = vld [vmem:[%s20024_s13 + $0x498] sm:$0xff] }
 0xc34   :  { %v12592_v11 = vld [vmem:[%s20024_s13 + $0x5e8] sm:$0xff] }
 0xc35   :  { %12487 = vmatmul.mubr.msk.f32.vlgmr.msra.gmra.mrb[210].mxu0 %vm3869_vm1, %v9293_v24 }
 0xc36   :  { %14597 = vmatpush1.bf16.msra.mxu0 %v14596_v27  ;;  %9431 = vmatprep.mubr.f32.mxu0 %v15737_v20  ;;  %v12524_v27 = vld [vmem:[%s20024_s13 + $0x3f8] sm:$0xff] }
 0xc37   :  { %14599 = vmatprep.subr.bf16.mxu0 %v14598_v46  ;;  %v14634_v46 = vpack.c.bf16 %v12524_v27, %v12518_v43  ;;  %v12546_v43 = vld [vmem:[%s20024_s13 + $0x490] sm:$0xff]  ;;  %v12552_v27 = vld [vmem:[%s20024_s13 + $0x4c0] sm:$0xff] }
 0xc3a   :  { %14601 = vmatpush1.bf16.msra.mxu0 %v14600_v35  ;;  %v14636_v35 = vpack.c.bf16 %v12523_v48, %v12517_v42  ;;  %v19060_v48 = vld [vmem:[%s20023_s12] sm:$0x3] }
 0xc3b   :  { %14603 = vmatprep.subr.bf16.mxu0 %v14602_v47  ;;  %v14638_v47 = vpack.c.bf16 %v12536_v21, %v12530_v44  ;;  %v14668_v44 = vpack.c.bf16 %v12552_v27, %v12546_v43  ;;  %v12582_v43 = vld [vmem:[%s20024_s13 + $0x598] sm:$0xff] }
 0xc3d   :  { %12488 = vmatmul.mubr.msk.f32.vlgmr.msra.gmra.mrb[212].mxu0 %vm3869_vm1, %v9293_v24 }
 0xc3e   :  { %14605 = vmatpush1.bf16.msra.mxu0 %v14604_v15  ;;  %9502 = vmatprep.mubr.f32.mxu0 %v15737_v20  ;;  %v14640_v15 = vpack.c.bf16 %v12535_v17, %v12529_v45  ;;  %v12558_v45 = vld [vmem:[%s20024_s13 + $0x4f0] sm:$0xff]  ;;  %v12564_v17 = vld [vmem:[%s20024_s13 + $0x520] sm:$0xff] }
 0xc3f   :  { %14607 = vmatprep.subr.bf16.mxu0 %v14606_v25  ;;  %v14642_v25 = vpack.c.bf16 %v12526_v51, %v12520_v9  ;;  %v12549_v9 = vld [vmem:[%s20024_s13 + $0x4a8] sm:$0xff]  ;;  %v12555_v51 = vld [vmem:[%s20024_s13 + $0x4d8] sm:$0xff] }
 0xc42   :  { %14609 = vmatpush1.bf16.msra.mxu0 %v14608_v26  ;;  %v14644_v26 = vpack.c.bf16 %v12525_v3, %v12519_v53  ;;  %v12548_v53 = vld [vmem:[%s20024_s13 + $0x4a0] sm:$0xff]  ;;  %v12554_v3 = vld [vmem:[%s20024_s13 + $0x4d0] sm:$0xff] }
 0xc43   :  { %14611 = vmatprep.subr.bf16.mxu0 %v14610_v58  ;;  %v9871_v58 = vrot.slane %v18531_v13, 5 }
 0xc45   :  { %12489 = vmatmul.mubr.msk.f32.vlgmr.msra.gmra.mrb[214].mxu0 %vm3869_vm1, %v9293_v24  ;;  %v14632_v24 = vpack.c.bf16 %v12512_v37, %v12506_v34 }
 0xc46   :  { %14613 = vmatpush1.bf16.msra.mxu0 %v14612_v54  ;;  %9649 = vmatprep.mubr.f32.mxu0 %v15737_v20  ;;  %v12528_v54 = vld [vmem:[%s20024_s13 + $0x418] sm:$0xff] }
 0xc47   :  { %14615 = vmatprep.subr.bf16.mxu0 %v14614_v4  ;;  %v12521_v4 = vld [vmem:[%s20024_s13 + $0x3e0] sm:$0xff]  ;;  %v14650_v5 = vpack.c.bf16 %v12528_v54, %v12522_v19  ;;  %v12578_v19 = vld [vmem:[%s20024_s13 + $0x578] sm:$0xff] }
 0xc48   :  { %v14652_v12 = vpack.c.bf16 %v12527_v61, %v12521_v4  ;;  %v12571_v4 = vld [vmem:[%s20024_s13 + $0x540] sm:$0xff]  ;;  %v12584_v61 = vld [vmem:[%s20024_s13 + $0x5a8] sm:$0xff] }
 0xc49   :  { %v14686_v10 = vpack.c.bf16 %v12590_v52, %v12584_v61  ;;  %v12616_v61 = vld [vmem:[%s20024_s13 + $0x690] sm:$0xff]  ;;  %v12601_v52 = vld [vmem:[%s20024_s13 + $0x618] sm:$0xff] }
 0xc4a   :  { %14617 = vmatpush1.bf16.msra.mxu0 %v14616_v0  ;;  %v11168_v0 = vld [vmem:[%s20025_s14 + $0x530] sm:$0xff] }
 0xc4b   :  { %14619 = vmatprep.subr.bf16.mxu0 %v14618_v38  ;;  %v14912_v38 = vpack.c.bf16 %v11168_v0, %v11162_v14  ;;  %v12589_v14 = vld [vmem:[%s20024_s13 + $0x5d0] sm:$0xff]  ;;  %v12580_v0 = vld [vmem:[%s20024_s13 + $0x588] sm:$0xff] }
 0xc4d   :  { %12514 = vmatmul.mubr.msk.f32.vlgmr.msra.gmra.mrb[216].mxu0 %vm3869_vm1, %v9582_v23  ;;  %14913 = vmatpush1.bf16.msra.mxu1 %v14912_v38  ;;  %v11181_v38 = vld [vmem:[%s20025_s14 + $0x598] sm:$0xff] }
 0xc4e   :  { %14621 = vmatpush1.bf16.msra.mxu0 %v14620_v8  ;;  %9720 = vmatprep.mubr.f32.mxu0 %v15737_v20  ;;  %v12551_v8 = vld [vmem:[%s20024_s13 + $0x4b8] sm:$0xff] }
 0xc4f   :  { %14623 = vmatprep.subr.bf16.mxu0 %v14622_v41  ;;  %v14658_v41 = vpack.c.bf16 %v12551_v8, %v12545_v18  ;;  %v14688_v18 = vpack.c.bf16 %v12589_v14, %v12583_v7 }
 0xc52   :  { %14625 = vmatpush1.bf16.msra.mxu0 %v14624_v59  ;;  %v14660_v59 = vpack.c.bf16 %v12550_v40, %v12544_v56  ;;  %v12579_v56 = vld [vmem:[%s20024_s13 + $0x580] sm:$0xff]  ;;  %v12586_v40 = vld [vmem:[%s20024_s13 + $0x5b8] sm:$0xff] }
 0xc53   :  { %14627 = vmatprep.subr.bf16.mxu0 %v14626_v49  ;;  %v8654_v49 = vlaneseq }
 0xc55   :  { %12515 = vmatmul.mubr.msk.f32.vlgmr.msra.gmra.mrb[218].mxu0 %vm3869_vm1, %v9582_v23  ;;  %v19040_v34 = vshrl.u32 %v8654_v49, 7 }
 0xc56   :  { %14629 = vmatpush1.bf16.msra.mxu0 %v14628_v31  ;;  %9791 = vmatprep.mubr.f32.mxu0 %v15737_v20  ;;  %v12553_v31 = vld [vmem:[%s20024_s13 + $0x4c8] sm:$0xff] }
 0xc57   :  { %14631 = vmatprep.subr.bf16.mxu0 %v14630_v22  ;;  %v14664_v22 = vpack.c.bf16 %v12562_v36, %v12556_v1  ;;  %v14666_v37 = vpack.c.bf16 %v12553_v31, %v12547_v39  ;;  %v19055_v42 = vsub.s32 1, %v19040_v34  ;;  %v8391_v1 = vmin.f32 %v18511_v62, 0.0  ;;  %v12591_v31 = vld [vmem:[%s20024_s13 + $0x5e0] sm:$0xff] }
 0xc58   :  { %v10449_v36 = vrot.slane %v18531_v13, 7  ;;  %v14694_v39 = vpack.c.bf16 %v12592_v11, %v12586_v40 }
 0xc59   :  { %v19064_v21 = vrot.slane %v19060_v48, %v19055_v42 }
 0xc5a   :  { %14633 = vmatpush1.bf16.msra.mxu0 %v14632_v24  ;;  %v12559_v24 = vld [vmem:[%s20024_s13 + $0x4f8] sm:$0xff] }
 0xc5b   :  { %14635 = vmatprep.subr.bf16.mxu0 %v14634_v46  ;;  %v12565_v46 = vld [vmem:[%s20024_s13 + $0x528] sm:$0xff]  ;;  %11443 = vmatprep.mubr.f32.mxu1 %v19064_v21 }
 0xc5d   :  { %12516 = vmatmul.mubr.msk.f32.vlgmr.msra.gmra.mrb[220].mxu0 %vm3869_vm1, %v9582_v23  ;;  %v14656_v23 = vpack.c.bf16 %v12539_v30, %v12533_v29  ;;  %v11180_v30 = vld [vmem:[%s20025_s14 + $0x590] sm:$0xff] }
 0xc5e   :  { %14637 = vmatpush1.bf16.msra.mxu0 %v14636_v35  ;;  %9938 = vmatprep.mubr.f32.mxu0 %v15737_v20  ;;  %v10160_v35 = vrot.slane %v18531_v13, 6  ;;  %v11186_v13 = vld [vmem:[%s20025_s14 + $0x5c0] sm:$0xff] }
 0xc5f   :  { %14639 = vmatprep.subr.bf16.mxu0 %v14638_v47  ;;  %v14670_v47 = vpack.c.bf16 %v12565_v46, %v12559_v24  ;;  %v11192_v24 = vld [vmem:[%s20025_s14 + $0x5f0] sm:$0xff]  ;;  %v19186_v46 = vsub.s32 0, %v19040_v34 }
 0xc62   :  { %14641 = vmatpush1.bf16.msra.mxu0 %v14640_v15  ;;  %v14672_v15 = vpack.c.bf16 %v12564_v17, %v12558_v45  ;;  %v12575_v17 = vld [vmem:[%s20024_s13 + $0x560] sm:$0xff] }
 0xc63   :  { %14643 = vmatprep.subr.bf16.mxu0 %v14642_v25  ;;  %v14674_v25 = vpack.c.bf16 %v12555_v51, %v12549_v9  ;;  %v12581_v9 = vld [vmem:[%s20024_s13 + $0x590] sm:$0xff]  ;;  %v12588_v51 = vld [vmem:[%s20024_s13 + $0x5c8] sm:$0xff] }
 0xc65   :  { %12541 = vmatmul.mubr.msk.f32.vlgmr.msra.gmra.mrb[222].mxu0 %vm3869_vm1, %v9871_v58 }
 0xc66   :  { %14645 = vmatpush1.bf16.msra.mxu0 %v14644_v26  ;;  %10009 = vmatprep.mubr.f32.mxu0 %v15737_v20  ;;  %v14676_v26 = vpack.c.bf16 %v12554_v3, %v12548_v53  ;;  %v14700_v53 = vpack.c.bf16 %v12581_v9, %v12575_v17  ;;  %v11020_v17 = vld [vmem:[%s20025_s14 + $0x90] sm:$0xff]  ;;  %v11027_v9 = vld [vmem:[%s20025_s14 + $0xc8] sm:$0xff] }
 0xc67   :  { %14647 = vmatprep.subr.bf16.mxu0 %v14646_v60  ;;  %v12560_v60 = vld [vmem:[%s20024_s13 + $0x500] sm:$0xff] }
 0xc68   :  { %v14680_v54 = vpack.c.bf16 %v12566_v32, %v12560_v60  ;;  %v12598_v32 = vld [vmem:[%s20024_s13 + $0x600] sm:$0xff] }
 0xc6a   :  { %14649 = vmatpush1.bf16.msra.mxu0 %v14648_v63  ;;  %v14682_v63 = vpack.c.bf16 %v12578_v19, %v12572_v33  ;;  %v12604_v33 = vld [vmem:[%s20024_s13 + $0x630] sm:$0xff]  ;;  %v12611_v19 = vld [vmem:[%s20024_s13 + $0x668] sm:$0xff] }
 0xc6b   :  { %14651 = vmatprep.subr.bf16.mxu0 %v14650_v5  ;;  %v12577_v5 = vld [vmem:[%s20024_s13 + $0x570] sm:$0xff] }
 0xc6c   :  { %v14684_v2 = vpack.c.bf16 %v12577_v5, %v12571_v4  ;;  %v12610_v5 = vld [vmem:[%s20024_s13 + $0x660] sm:$0xff] }
 0xc6d   :  { %12542 = vmatmul.mubr.msk.f32.vlgmr.msra.gmra.mrb[224].mxu0 %vm3869_vm1, %v9871_v58 }
 0xc6e   :  { %14653 = vmatpush1.bf16.msra.mxu0 %v14652_v12  ;;  %10080 = vmatprep.mubr.f32.mxu0 %v15737_v20  ;;  %v11175_v12 = vld [vmem:[%s20025_s14 + $0x568] sm:$0xff] }
 0xc6f   :  { %14655 = vmatprep.subr.bf16.mxu0 %v14654_v50  ;;  %v11174_v50 = vld [vmem:[%s20025_s14 + $0x560] sm:$0xff]  ;;  %v14914_v29 = vpack.c.bf16 %v11181_v38, %v11175_v12  ;;  %v12613_v38 = vld [vmem:[%s20024_s13 + $0x678] sm:$0xff] }
 0xc70   :  { %v14916_v8 = vpack.c.bf16 %v11180_v30, %v11174_v50  ;;  %v12619_v50 = vld [vmem:[%s20024_s13 + $0x6a8] sm:$0xff] }
 0xc71   :  { %14915 = vmatprep.subr.bf16.mxu1 %v14914_v29  ;;  %v14718_v30 = vpack.c.bf16 %v12619_v50, %v12613_v38  ;;  %v11069_v38 = vld [vmem:[%s20025_s14 + $0x218] sm:$0xff] }
 0xc72   :  { %14657 = vmatpush1.bf16.msra.mxu0 %v14656_v23  ;;  %v14690_v23 = vpack.c.bf16 %v12580_v0, %v12574_v6  ;;  %14917 = vmatpush1.bf16.msra.mxu1 %v14916_v8  ;;  %v12600_v6 = vld [vmem:[%s20024_s13 + $0x610] sm:$0xff]  ;;  %v12606_v0 = vld [vmem:[%s20024_s13 + $0x640] sm:$0xff] }
 0xc73   :  { %14659 = vmatprep.subr.bf16.mxu0 %v14658_v41  ;;  %v12573_v41 = vld [vmem:[%s20024_s13 + $0x550] sm:$0xff]  ;;  %v14716_v29 = vpack.c.bf16 %v12606_v0, %v12600_v6  ;;  %v12618_v8 = vld [vmem:[%s20024_s13 + $0x6a0] sm:$0xff] }
 0xc74   :  { %v14692_v16 = vpack.c.bf16 %v12579_v56, %v12573_v41  ;;  %v12603_v41 = vld [vmem:[%s20024_s13 + $0x628] sm:$0xff]  ;;  %v12609_v56 = vld [vmem:[%s20024_s13 + $0x658] sm:$0xff] }
 0xc75   :  { %12543 = vmatmul.mubr.msk.f32.vlgmr.msra.gmra.mrb[226].mxu0 %vm3869_vm1, %v9871_v58  ;;  %v14678_v58 = vpack.c.bf16 %v12567_v57, %v12561_v55  ;;  %v12587_v55 = vld [vmem:[%s20024_s13 + $0x5c0] sm:$0xff]  ;;  %v12593_v57 = vld [vmem:[%s20024_s13 + $0x5f0] sm:$0xff]  ;;  %v14722_v11 = vpack.c.bf16 %v12609_v56, %v12603_v41 }
 0xc76   :  { %14661 = vmatpush1.bf16.msra.mxu0 %v14660_v59  ;;  %10227 = vmatprep.mubr.f32.mxu0 %v15737_v20  ;;  %v12585_v59 = vld [vmem:[%s20024_s13 + $0x5b0] sm:$0xff] }
 0xc77   :  { %14663 = vmatprep.subr.bf16.mxu0 %v14662_v28  ;;  %v11187_v28 = vld [vmem:[%s20025_s14 + $0x5c8] sm:$0xff] }
 0xc7a   :  { %14665 = vmatpush1.bf16.msra.mxu0 %v14664_v22  ;;  %v12576_v22 = vld [vmem:[%s20024_s13 + $0x568] sm:$0xff] }
 0xc7b   :  { %14667 = vmatprep.subr.bf16.mxu0 %v14666_v37  ;;  %v11193_v37 = vld [vmem:[%s20025_s14 + $0x5f8] sm:$0xff]  ;;  %v14698_v45 = vpack.c.bf16 %v12582_v43, %v12576_v22  ;;  %v11003_v22 = vld [vmem:[%s20025_s14 + $0x8] sm:$0xff] }
 0xc7c   :  { %v14918_v27 = vpack.c.bf16 %v11193_v37, %v11187_v28  ;;  %v12621_v28 = vld [vmem:[%s20024_s13 + $0x6b8] sm:$0xff] }
 0xc7d   :  { %12568 = vmatmul.mubr.msk.f32.vlgmr.msra.gmra.mrb[228].mxu0 %vm3869_vm1, %v10160_v35  ;;  %v11009_v37 = vld [vmem:[%s20025_s14 + $0x38] sm:$0xff] }
 0xc7e   :  { %14669 = vmatpush1.bf16.msra.mxu0 %v14668_v44  ;;  %10298 = vmatprep.mubr.f32.mxu0 %v15737_v20  ;;  %v14920_v44 = vpack.c.bf16 %v11192_v24, %v11186_v13  ;;  %v11002_v13 = vld [vmem:[%s20025_s14] sm:$0xff]  ;;  %v11008_v24 = vld [vmem:[%s20025_s14 + $0x30] sm:$0xff] }
 0xc7f   :  { %14671 = vmatprep.subr.bf16.mxu0 %v14670_v47  ;;  %v8394_v47 = vmul.f32 1.442695, %v8391_v1  ;;  %14919 = vmatprep.subr.bf16.mxu1 %v14918_v27  ;;  %v14730_v27 = vpack.c.bf16 %v11009_v37, %v11003_v22 }
 0xc80   :  { %14921 = vmatpush1.bf16.msra.mxu1 %v14920_v44  ;;  %v11015_v44 = vld [vmem:[%s20025_s14 + $0x68] sm:$0xff] }
 0xc81   :  { %15668 = vpow2.f32 %v8394_v47 }
 0xc82   :  { %14673 = vmatpush1.bf16.msra.mxu0 %v14672_v15  ;;  %v12594_v15 = vld [vmem:[%s20024_s13 + $0x5f8] sm:$0xff] }
 0xc83   :  { %14675 = vmatprep.subr.bf16.mxu0 %v14674_v25  ;;  %v19203_v25 = vrot.slane %v19060_v48, %v19186_v46  ;;  %v14702_v3 = vpack.c.bf16 %v12594_v15, %v12588_v51  ;;  %v12599_v48 = vld [vmem:[%s20024_s13 + $0x608] sm:$0xff]  ;;  %v11033_v51 = vld [vmem:[%s20025_s14 + $0xf8] sm:$0xff] }
 0xc85   :  { %12569 = vmatmul.mubr.msk.f32.vlgmr.msra.gmra.mrb[230].mxu0 %vm3869_vm1, %v10160_v35  ;;  %11444 = vmatmul.mubr.f32.vlgmr.msra.gmra.mrb[32].mxu1 %v19203_v25 }
 0xc86   :  { %14677 = vmatpush1.bf16.msra.mxu0 %v14676_v26  ;;  %10369 = vmatprep.mubr.f32.mxu0 %v15737_v20  ;;  %v12605_v26 = vld [vmem:[%s20024_s13 + $0x638] sm:$0xff] }
 0xc87   :  { %14679 = vmatprep.subr.bf16.mxu0 %v14678_v58  ;;  %v14704_v58 = vpack.c.bf16 %v12593_v57, %v12587_v55  ;;  %v14706_v60 = vpack.c.bf16 %v12605_v26, %v12599_v48  ;;  %v11032_v55 = vld [vmem:[%s20025_s14 + $0xf0] sm:$0xff]  ;;  %v15738_v48 = vmov 1966171168  }
 0xc88   :  { %v8652_v26 = vunpack.c.l.s4 %v15738_v48 }
 0xc8a   :  { %14681 = vmatpush1.bf16.msra.mxu0 %v14680_v54  ;;  %v12617_v54 = vld [vmem:[%s20024_s13 + $0x698] sm:$0xff] }
 0xc8b   :  { %14683 = vmatprep.subr.bf16.mxu0 %v14682_v63  ;;  %v14708_v63 = vpack.c.bf16 %v12604_v33, %v12598_v32  ;;  %v14710_v4 = vpack.c.bf16 %v12617_v54, %v12611_v19  ;;  %v15669_v7 = vpop.eup %15668 }
 0xc8c   :  { %v12405_v12 = vadd.f32 -1.0, %v15669_v7 }
 0xc8d   :  { %12570 = vmatmul.mubr.msk.f32.vlgmr.msra.gmra.mrb[232].mxu0 %vm3869_vm1, %v10160_v35  ;;  %v14696_v35 = vpack.c.bf16 %v12591_v31, %v12585_v59  ;;  %v12615_v59 = vld [vmem:[%s20024_s13 + $0x688] sm:$0xff]  ;;  %v12620_v31 = vld [vmem:[%s20024_s13 + $0x6b0] sm:$0xff] }
 0xc8e   :  { %14685 = vmatpush1.bf16.msra.mxu0 %v14684_v2  ;;  %10516 = vmatprep.mubr.f32.mxu0 %v15737_v20  ;;  %v12607_v2 = vld [vmem:[%s20024_s13 + $0x648] sm:$0xff] }
 0xc8f   :  { %14687 = vmatprep.subr.bf16.mxu0 %v14686_v10  ;;  %v14712_v10 = vpack.c.bf16 %v12616_v61, %v12610_v5  ;;  %v14714_v14 = vpack.c.bf16 %v12607_v2, %v12601_v52  ;;  %v8653_v5 = vunpack.c.0.s8 %v8652_v26  ;;  %v11051_v61 = vld [vmem:[%s20025_s14 + $0x188] sm:$0xff]  ;;  %v11057_v52 = vld [vmem:[%s20025_s14 + $0x1b8] sm:$0xff] }
 0xc90   :  { %v14746_v7 = vpack.c.bf16 %v11057_v52, %v11051_v61  ;;  %v11128_v61 = vld [vmem:[%s20025_s14 + $0x3f0] sm:$0xff] }
 0xc91   :  { %v19357_v6 = vsub.s32 %v8653_v5, %v19040_v34  ;;  %v11122_v5 = vld [vmem:[%s20025_s14 + $0x3c0] sm:$0xff] }
 0xc92   :  { %14689 = vmatpush1.bf16.msra.mxu0 %v14688_v18  ;;  %v12612_v18 = vld [vmem:[%s20024_s13 + $0x670] sm:$0xff] }
 0xc93   :  { %14691 = vmatprep.subr.bf16.mxu0 %v14690_v23  ;;  %v8399_v23 = vsel %vm8389_vm12, %v18511_v62, %v12405_v12  ;;  %v14720_v40 = vpack.c.bf16 %v12618_v8, %v12612_v18  ;;  %v12602_v62 = vld [vmem:[%s20024_s13 + $0x620] sm:$0xff]  ;;  %v11063_v12 = vld [vmem:[%s20025_s14 + $0x1e8] sm:$0xff] }
 0xc94   :  { %v14750_v18 = vpack.c.bf16 %v11069_v38, %v11063_v12  ;;  %v11062_v8 = vld [vmem:[%s20025_s14 + $0x1e0] sm:$0xff] }
 0xc95   :  { %12595 = vmatmul.mubr.msk.f32.vlgmr.msra.gmra.mrb[234].mxu0 %vm3869_vm1, %v10449_v36  ;;  %v11134_v38 = vld [vmem:[%s20025_s14 + $0x420] sm:$0xff] }
 0xc96   :  { %14693 = vmatpush1.bf16.msra.mxu0 %v14692_v16  ;;  %10587 = vmatprep.mubr.f32.mxu0 %v15737_v20  ;;  %v12608_v16 = vld [vmem:[%s20024_s13 + $0x650] sm:$0xff] }
 0xc97   :  { %14695 = vmatprep.subr.bf16.mxu0 %v14694_v39  ;;  %v14724_v1 = vpack.c.bf16 %v12608_v16, %v12602_v62  ;;  %v12614_v39 = vld [vmem:[%s20024_s13 + $0x680] sm:$0xff] }
 0xc98   :  { %v14728_v43 = vpack.c.bf16 %v12620_v31, %v12614_v39  ;;  %v11087_v39 = vld [vmem:[%s20025_s14 + $0x2a8] sm:$0xff]  ;;  %v11093_v31 = vld [vmem:[%s20025_s14 + $0x2d8] sm:$0xff] }
 0xc9a   :  { %14697 = vmatpush1.bf16.msra.mxu0 %v14696_v35  ;;  %v11021_v35 = vld [vmem:[%s20025_s14 + $0x98] sm:$0xff] }
 0xc9b   :  { %14699 = vmatprep.subr.bf16.mxu0 %v14698_v45  ;;  %v14734_v47 = vpack.c.bf16 %v11021_v35, %v11015_v44  ;;  %v11014_v45 = vld [vmem:[%s20025_s14 + $0x60] sm:$0xff]  ;;  %v11099_v35 = vld [vmem:[%s20025_s14 + $0x308] sm:$0xff] }
 0xc9c   :  { %v14736_v15 = vpack.c.bf16 %v11020_v17, %v11014_v45 }
 0xc9d   :  { %12596 = vmatmul.mubr.msk.f32.vlgmr.msra.gmra.mrb[236].mxu0 %vm3869_vm1, %v10449_v36 }
 0xc9e   :  { %14701 = vmatpush1.bf16.msra.mxu0 %v14700_v53  ;;  %10658 = vmatprep.mubr.f32.mxu0 %v15737_v20  ;;  %v14738_v53 = vpack.c.bf16 %v11033_v51, %v11027_v9  ;;  %v11098_v51 = vld [vmem:[%s20025_s14 + $0x300] sm:$0xff] }
 0xc9f   :  { %14703 = vmatprep.subr.bf16.mxu0 %v14702_v3  ;;  %v11026_v3 = vld [vmem:[%s20025_s14 + $0xc0] sm:$0xff] }
 0xca0   :  { %v14740_v19 = vpack.c.bf16 %v11032_v55, %v11026_v3  ;;  %v11111_v55 = vld [vmem:[%s20025_s14 + $0x368] sm:$0xff] }
 0xca2   :  { %14705 = vmatpush1.bf16.msra.mxu0 %v14704_v58  ;;  %v11039_v58 = vld [vmem:[%s20025_s14 + $0x128] sm:$0xff] }
 0xca3   :  { %14707 = vmatprep.subr.bf16.mxu0 %v14706_v60  ;;  %v11045_v60 = vld [vmem:[%s20025_s14 + $0x158] sm:$0xff] }
 0xca4   :  { %v14742_v54 = vpack.c.bf16 %v11045_v60, %v11039_v58 }
 0xca5   :  { %12597 = vmatmul.mubr.msk.f32.vlgmr.msra.gmra.mrb[238].mxu0 %vm3869_vm1, %v10449_v36  ;;  %v14726_v36 = vpack.c.bf16 %v12621_v28, %v12615_v59  ;;  %v11074_v28 = vld [vmem:[%s20025_s14 + $0x240] sm:$0xff] }
 0xca6   :  { %14709 = vmatpush1.bf16.msra.mxu0 %v14708_v63  ;;  %10805 = vmatprep.mubr.f32.mxu0 %v15737_v20  ;;  %v11038_v63 = vld [vmem:[%s20025_s14 + $0x120] sm:$0xff] }
 0xca7   :  { %14711 = vmatprep.subr.bf16.mxu0 %v14710_v4  ;;  %v11044_v4 = vld [vmem:[%s20025_s14 + $0x150] sm:$0xff] }
 0xca8   :  { %v14744_v2 = vpack.c.bf16 %v11044_v4, %v11038_v63 }
 0xcaa   :  { %14713 = vmatpush1.bf16.msra.mxu0 %v14712_v10  ;;  %v11050_v10 = vld [vmem:[%s20025_s14 + $0x180] sm:$0xff] }
 0xcab   :  { %14715 = vmatprep.subr.bf16.mxu0 %v14714_v14  ;;  %v11056_v14 = vld [vmem:[%s20025_s14 + $0x1b0] sm:$0xff] }
 0xcad   :  { %12622 = vmatmul.mubr.msk.f32.vlgmr.msra.gmra.mrb[240].mxu0 %vm3869_vm1, %v8399_v23 }
 0xcae   :  { %14717 = vmatpush1.bf16.msra.mxu0 %v14716_v29  ;;  %10876 = vmatprep.mubr.f32.mxu0 %v15737_v20 }
 0xcaf   :  { %14719 = vmatprep.subr.bf16.mxu0 %v14718_v30  ;;  %v14748_v30 = vpack.c.bf16 %v11056_v14, %v11050_v10 }
 0xcb2   :  { %14721 = vmatpush1.bf16.msra.mxu0 %v14720_v40  ;;  %v11075_v40 = vld [vmem:[%s20025_s14 + $0x248] sm:$0xff] }
 0xcb3   :  { %14723 = vmatprep.subr.bf16.mxu0 %v14722_v11  ;;  %v11081_v11 = vld [vmem:[%s20025_s14 + $0x278] sm:$0xff] }
 0xcb4   :  { %v14754_v59 = vpack.c.bf16 %v11081_v11, %v11075_v40  ;;  %v11146_v40 = vld [vmem:[%s20025_s14 + $0x480] sm:$0xff]  ;;  %v11152_v11 = vld [vmem:[%s20025_s14 + $0x4b0] sm:$0xff] }
 0xcb5   :  { %12623 = vmatmul.mubr.msk.f32.vlgmr.msra.gmra.mrb[242].mxu0 %vm3869_vm1, %v8399_v23 }
 0xcb6   :  { %14725 = vmatpush1.bf16.msra.mxu0 %v14724_v1  ;;  %10947 = vmatprep.mubr.f32.mxu0 %v15737_v20  ;;  %v14732_v20 = vpack.c.bf16 %v11008_v24, %v11002_v13  ;;  %v11080_v1 = vld [vmem:[%s20025_s14 + $0x270] sm:$0xff]  ;;  %v11086_v13 = vld [vmem:[%s20025_s14 + $0x2a0] sm:$0xff] }
 0xcb7   :  { %14727 = vmatprep.subr.bf16.mxu0 %v14726_v36  ;;  %v11092_v24 = vld [vmem:[%s20025_s14 + $0x2d0] sm:$0xff] }
 0xcb8   :  { %v14760_v17 = vpack.c.bf16 %v11092_v24, %v11086_v13  ;;  %v8401_v13 = vld [vmem:[%s20026_s15] sm:$0x3f] }
 0xcba   :  { %14729 = vmatpush1.bf16.msra.mxu0 %v14728_v43  ;;  %v14756_v43 = vpack.c.bf16 %v11080_v1, %v11074_v28 }
 0xcbb   :  { %14731 = vmatprep.subr.bf16.mxu0 %v14730_v27  ;;  %v14758_v27 = vpack.c.bf16 %v11093_v31, %v11087_v39  ;;  %v11158_v31 = vld [vmem:[%s20025_s14 + $0x4e0] sm:$0xff] }
 0xcbd   :  { %12624 = vmatmul.mubr.msk.f32.vlgmr.msra.gmra.mrb[244].mxu0 %vm3869_vm1, %v8399_v23  ;;  %v11068_v23 = vld [vmem:[%s20025_s14 + $0x210] sm:$0xff]  ;;  %vm11532_vm1 = vcmp.lt.s32.totalorder %v8654_v49, 256 }
 0xcbe   :  { %14733 = vmatpush1.bf16.msra.mxu0 %v14732_v20  ;;  %11301 = vmatprep.mubr.f32.mxu0 %v19064_v21  ;;  %v14752_v16 = vpack.c.bf16 %v11068_v23, %v11062_v8  ;;  %v11105_v20 = vld [vmem:[%s20025_s14 + $0x338] sm:$0xff] }
 0xcbf   :  { %14735 = vmatprep.subr.bf16.mxu0 %v14734_v47  ;;  %v14762_v9 = vpack.c.bf16 %v11105_v20, %v11099_v35  ;;  %v11153_v8 = vld [vmem:[%s20025_s14 + $0x4b8] sm:$0xff] }
 0xcc0   :  { %v8495_v57 = vpop.f32.mrb[192].mxu0 }
 0xcc1   :  { %v8497_v32 = vpop.f32.mrb[193].mxu0 }
 0xcc2   :  { %v8648_v33 = vcombine.low %v8495_v57, %v8497_v32  ;;  %14737 = vmatpush1.bf16.msra.mxu0 %v14736_v15  ;;  %v11104_v15 = vld [vmem:[%s20025_s14 + $0x330] sm:$0xff]  ;;  %v11117_v57 = vld [vmem:[%s20025_s14 + $0x398] sm:$0xff]  ;;  %v11110_v32 = vld [vmem:[%s20025_s14 + $0x360] sm:$0xff] }
 0xcc3   :  { %14739 = vmatprep.subr.bf16.mxu0 %v14738_v53  ;;  %v14764_v58 = vpack.c.bf16 %v11104_v15, %v11098_v51  ;;  %v14766_v60 = vpack.c.bf16 %v11117_v57, %v11111_v55  ;;  %v11183_v15 = vld [vmem:[%s20025_s14 + $0x5a8] sm:$0xff] }
 0xcc4   :  { %v8657_v41 = vrot.slane %v8648_v33, %v19357_v6  ;;  %v11116_v33 = vld [vmem:[%s20025_s14 + $0x390] sm:$0xff] }
 0xcc5   :  { %v14768_v63 = vpack.c.bf16 %v11116_v33, %v11110_v32  ;;  %v11005_v32 = vld [vmem:[%s20025_s14 + $0x18] sm:$0xff]  ;;  %v11011_v33 = vld [vmem:[%s20025_s14 + $0x48] sm:$0xff] }
 0xcc6   :  { %14741 = vmatpush1.bf16.msra.mxu0 %v14740_v19  ;;  %v11123_v19 = vld [vmem:[%s20025_s14 + $0x3c8] sm:$0xff] }
 0xcc7   :  { %14743 = vmatprep.subr.bf16.mxu0 %v14742_v54  ;;  %v11129_v54 = vld [vmem:[%s20025_s14 + $0x3f8] sm:$0xff] }
 0xcc8   :  { %v8566_v0 = vpop.f32.mrb[194].mxu0  ;;  %v14770_v4 = vpack.c.bf16 %v11129_v54, %v11123_v19  ;;  %v14794_v54 = vpack.c.bf16 %v11011_v33, %v11005_v32  ;;  %v11082_v32 = vld [vmem:[%s20025_s14 + $0x280] sm:$0xff] }
 0xcc9   :  { %v8568_v50 = vpop.f32.mrb[195].mxu0 }
 0xcca   :  { %v8649_v29 = vcombine.low %v8566_v0, %v8568_v50  ;;  %14745 = vmatpush1.bf16.msra.mxu0 %v14744_v2  ;;  %v11135_v2 = vld [vmem:[%s20025_s14 + $0x428] sm:$0xff]  ;;  %v14772_v0 = vpack.c.bf16 %v11128_v61, %v11122_v5  ;;  %v11140_v50 = vld [vmem:[%s20025_s14 + $0x450] sm:$0xff]  ;;  %v11017_v61 = vld [vmem:[%s20025_s14 + $0x78] sm:$0xff] }
 0xccb   :  { %14747 = vmatprep.subr.bf16.mxu0 %v14746_v7  ;;  %v11141_v7 = vld [vmem:[%s20025_s14 + $0x458] sm:$0xff] }
 0xccc   :  { %v8664_v56 = vrot.slane %v8649_v29, %v19357_v6  ;;  %v14774_v12 = vpack.c.bf16 %v11141_v7, %v11135_v2 }
 0xcce   :  { %v8672_v62 = vcombine.low %v8657_v41, %v8664_v56  ;;  %14749 = vmatpush1.bf16.msra.mxu0 %v14748_v30  ;;  %v14776_v41 = vpack.c.bf16 %v11140_v50, %v11134_v38 }
 0xccf   :  { %14751 = vmatprep.subr.bf16.mxu0 %v14750_v18  ;;  %v11147_v18 = vld [vmem:[%s20025_s14 + $0x488] sm:$0xff] }
 0xcd0   :  { %v8637_v36 = vpop.f32.mrb[196].mxu0  ;;  %v8679_v47 = vrot.slane %v8672_v62, %v19357_v6  ;;  %v14778_v56 = vpack.c.bf16 %v11153_v8, %v11147_v18 }
 0xcd1   :  { %v8639_v22 = vpop.f32.mrb[197].mxu0 }
 0xcd2   :  { %v8650_v37 = vcombine.low %v8637_v36, %v8639_v22  ;;  %14753 = vmatpush1.bf16.msra.mxu0 %v14752_v16  ;;  %v11159_v16 = vld [vmem:[%s20025_s14 + $0x4e8] sm:$0xff]  ;;  %v14780_v36 = vpack.c.bf16 %v11152_v11, %v11146_v40  ;;  %v11164_v22 = vld [vmem:[%s20025_s14 + $0x510] sm:$0xff]  ;;  %v11041_v11 = vld [vmem:[%s20025_s14 + $0x138] sm:$0xff] }
 0xcd3   :  { %14755 = vmatprep.subr.bf16.mxu0 %v14754_v59  ;;  %v11165_v59 = vld [vmem:[%s20025_s14 + $0x518] sm:$0xff]  ;;  %v14784_v35 = vpack.c.bf16 %v11164_v22, %v11158_v31  ;;  %v11059_v22 = vld [vmem:[%s20025_s14 + $0x1c8] sm:$0xff] }
 0xcd4   :  { %v8671_v44 = vrot.slane %v8650_v37, %v19357_v6  ;;  %v14782_v39 = vpack.c.bf16 %v11165_v59, %v11159_v16  ;;  %v11053_v31 = vld [vmem:[%s20025_s14 + $0x198] sm:$0xff] }
 0xcd6   :  { %v8686_v45 = vrot.slane %v8671_v44, %v19357_v6  ;;  %14757 = vmatpush1.bf16.msra.mxu0 %v14756_v43  ;;  %v11171_v43 = vld [vmem:[%s20025_s14 + $0x548] sm:$0xff] }
 0xcd7   :  { %14759 = vmatprep.subr.bf16.mxu0 %v14758_v27  ;;  %v11177_v27 = vld [vmem:[%s20025_s14 + $0x578] sm:$0xff] }
 0xcd8   :  { %v19412_v53 = vcombine.low %v8679_v47, %v8686_v45  ;;  %v8784_v3 = vpop.f32.mrb[198].mxu0  ;;  %v14786_v20 = vpack.c.bf16 %v11177_v27, %v11171_v43  ;;  %v11170_v47 = vld [vmem:[%s20025_s14 + $0x540] sm:$0xff]  ;;  %v11176_v45 = vld [vmem:[%s20025_s14 + $0x570] sm:$0xff] }
 0xcd9   :  { %v8786_v48 = vpop.f32.mrb[199].mxu0 }
 0xcda   :  { %v8937_v26 = vcombine.low %v8784_v3, %v8786_v48  ;;  %14761 = vmatpush1.bf16.msra.mxu0 %v14760_v17  ;;  %v8689_v17 = vadd.f32 %v19412_v53, %v8401_v13  ;;  %v11189_v3 = vld [vmem:[%s20025_s14 + $0x5d8] sm:$0xff]  ;;  %v11182_v53 = vld [vmem:[%s20025_s14 + $0x5a0] sm:$0xff]  ;;  %v14810_v13 = vpack.c.bf16 %v11059_v22, %v11053_v31  ;;  %v11124_v22 = vld [vmem:[%s20025_s14 + $0x3d0] sm:$0xff] }
 0xcdb   :  { %14763 = vmatprep.subr.bf16.mxu0 %v14762_v9 }
 0xcdc   :  { %v8946_v29 = vrot.slane %v8937_v26, %v19357_v6  ;;  %v14788_v26 = vpack.c.bf16 %v11176_v45, %v11170_v47  ;;  %v11065_v47 = vld [vmem:[%s20025_s14 + $0x1f8] sm:$0xff]  ;;  %v11071_v45 = vld [vmem:[%s20025_s14 + $0x228] sm:$0xff] }
 0xcde   :  { %14765 = vmatpush1.bf16.msra.mxu0 %v14764_v58  ;;  %v14790_v58 = vpack.c.bf16 %v11189_v3, %v11183_v15  ;;  %v14814_v3 = vpack.c.bf16 %v11071_v45, %v11065_v47 }
 0xcdf   :  { %14767 = vmatprep.subr.bf16.mxu0 %v14766_v60  ;;  %v11188_v60 = vld [vmem:[%s20025_s14 + $0x5d0] sm:$0xff] }
 0xce0   :  { %v8855_v52 = vpop.f32.mrb[200].mxu0  ;;  %v14792_v19 = vpack.c.bf16 %v11188_v60, %v11182_v53  ;;  %v11076_v60 = vld [vmem:[%s20025_s14 + $0x250] sm:$0xff] }
 0xce1   :  { %v8857_v10 = vpop.f32.mrb[201].mxu0 }
 0xce2   :  { %v8938_v14 = vcombine.low %v8855_v52, %v8857_v10  ;;  %14769 = vmatpush1.bf16.msra.mxu0 %v14768_v63  ;;  %v11004_v63 = vld [vmem:[%s20025_s14 + $0x10] sm:$0xff]  ;;  %v11023_v52 = vld [vmem:[%s20025_s14 + $0xa8] sm:$0xff] }
 0xce3   :  { %14771 = vmatprep.subr.bf16.mxu0 %v14770_v4  ;;  %v11010_v4 = vld [vmem:[%s20025_s14 + $0x40] sm:$0xff] }
 0xce4   :  { %v8953_v30 = vrot.slane %v8938_v14, %v19357_v6  ;;  %v14796_v10 = vpack.c.bf16 %v11010_v4, %v11004_v63  ;;  %v14798_v14 = vpack.c.bf16 %v11023_v52, %v11017_v61  ;;  %v11088_v52 = vld [vmem:[%s20025_s14 + $0x2b0] sm:$0xff] }
 0xce6   :  { %v8961_v23 = vcombine.low %v8946_v29, %v8953_v30  ;;  %14773 = vmatpush1.bf16.msra.mxu0 %v14772_v0  ;;  %v11016_v0 = vld [vmem:[%s20025_s14 + $0x70] sm:$0xff]  ;;  %v11029_v29 = vld [vmem:[%s20025_s14 + $0xd8] sm:$0xff]  ;;  %v11035_v30 = vld [vmem:[%s20025_s14 + $0x108] sm:$0xff] }
 0xce7   :  { %14775 = vmatprep.subr.bf16.mxu0 %v14774_v12  ;;  %v11022_v12 = vld [vmem:[%s20025_s14 + $0xa0] sm:$0xff] }
 0xce8   :  { %v8926_v62 = vpop.f32.mrb[202].mxu0  ;;  %v8968_v24 = vrot.slane %v8961_v23, %v19357_v6  ;;  %v14800_v8 = vpack.c.bf16 %v11022_v12, %v11016_v0  ;;  %v14802_v23 = vpack.c.bf16 %v11035_v30, %v11029_v29  ;;  %v11107_v0 = vld [vmem:[%s20025_s14 + $0x348] sm:$0xff]  ;;  %v11100_v29 = vld [vmem:[%s20025_s14 + $0x310] sm:$0xff]  ;;  %v11106_v30 = vld [vmem:[%s20025_s14 + $0x340] sm:$0xff] }
 0xce9   :  { %v8928_v28 = vpop.f32.mrb[203].mxu0 }
 0xcea   :  { %v8939_v1 = vcombine.low %v8926_v62, %v8928_v28  ;;  %14777 = vmatpush1.bf16.msra.mxu0 %v14776_v41  ;;  %v11028_v41 = vld [vmem:[%s20025_s14 + $0xd0] sm:$0xff]  ;;  %v11047_v62 = vld [vmem:[%s20025_s14 + $0x168] sm:$0xff] }
 0xceb   :  { %14779 = vmatprep.subr.bf16.mxu0 %v14778_v56  ;;  %v11034_v56 = vld [vmem:[%s20025_s14 + $0x100] sm:$0xff]  ;;  %v14806_v28 = vpack.c.bf16 %v11047_v62, %v11041_v11  ;;  %v11112_v62 = vld [vmem:[%s20025_s14 + $0x370] sm:$0xff] }
 0xcec   :  { %v8960_v37 = vrot.slane %v8939_v1, %v19357_v6  ;;  %v14804_v59 = vpack.c.bf16 %v11034_v56, %v11028_v41  ;;  %v11040_v1 = vld [vmem:[%s20025_s14 + $0x130] sm:$0xff] }
 0xcee   :  { %v8975_v44 = vrot.slane %v8960_v37, %v19357_v6  ;;  %14781 = vmatpush1.bf16.msra.mxu0 %v14780_v36  ;;  %v11046_v36 = vld [vmem:[%s20025_s14 + $0x160] sm:$0xff] }
 0xcef   :  { %14783 = vmatprep.subr.bf16.mxu0 %v14782_v39  ;;  %v14808_v27 = vpack.c.bf16 %v11046_v36, %v11040_v1 }
 0xcf0   :  { %v8976_v9 = vcombine.low %v8968_v24, %v8975_v44  ;;  %v9073_v51 = vpop.f32.mrb[204].mxu0  ;;  %v11052_v24 = vld [vmem:[%s20025_s14 + $0x190] sm:$0xff]  ;;  %v11058_v44 = vld [vmem:[%s20025_s14 + $0x1c0] sm:$0xff] }
 0xcf1   :  { %v9075_v55 = vpop.f32.mrb[205].mxu0  ;;  %v14812_v15 = vpack.c.bf16 %v11058_v44, %v11052_v24  ;;  %v11143_v24 = vld [vmem:[%s20025_s14 + $0x468] sm:$0xff] }
 0xcf2   :  { %v19501_v57 = vadd.f32 %v8976_v9, %v8689_v17  ;;  %v9226_v48 = vcombine.low %v9073_v51, %v9075_v55  ;;  %14785 = vmatpush1.bf16.msra.mxu0 %v14784_v35  ;;  %v11064_v55 = vld [vmem:[%s20025_s14 + $0x1f0] sm:$0xff] }
 0xcf3   :  { %14787 = vmatprep.subr.bf16.mxu0 %v14786_v20 }
 0xcf4   :  { %v9235_v38 = vrot.slane %v9226_v48, %v19357_v6  ;;  %v11070_v48 = vld [vmem:[%s20025_s14 + $0x220] sm:$0xff] }
 0xcf6   :  { %14789 = vmatpush1.bf16.msra.mxu0 %v14788_v26  ;;  %v11077_v26 = vld [vmem:[%s20025_s14 + $0x258] sm:$0xff] }
 0xcf7   :  { %14791 = vmatprep.subr.bf16.mxu0 %v14790_v58  ;;  %v14816_v58 = vpack.c.bf16 %v11070_v48, %v11064_v55  ;;  %v11148_v48 = vld [vmem:[%s20025_s14 + $0x490] sm:$0xff] }
 0xcf8   :  { %v9144_v5 = vpop.f32.mrb[206].mxu0 }
 0xcf9   :  { %v9146_v2 = vpop.f32.mrb[207].mxu0 }
 0xcfa   :  { %v9227_v7 = vcombine.low %v9144_v5, %v9146_v2  ;;  %14793 = vmatpush1.bf16.msra.mxu0 %v14792_v19  ;;  %v11089_v19 = vld [vmem:[%s20025_s14 + $0x2b8] sm:$0xff]  ;;  %v14820_v5 = vpack.c.bf16 %v11082_v32, %v11076_v60  ;;  %v11094_v2 = vld [vmem:[%s20025_s14 + $0x2e0] sm:$0xff] }
 0xcfb   :  { %14795 = vmatprep.subr.bf16.mxu0 %v14794_v54  ;;  %v11095_v54 = vld [vmem:[%s20025_s14 + $0x2e8] sm:$0xff] }
 0xcfc   :  { %v9242_v50 = vrot.slane %v9227_v7, %v19357_v6  ;;  %v14822_v61 = vpack.c.bf16 %v11095_v54, %v11089_v19  ;;  %v11160_v54 = vld [vmem:[%s20025_s14 + $0x4f0] sm:$0xff] }
 0xcfd   :  { %11302 = vmatmul.mubr.f32.vlgmr.msra.gmra.mrb[246].mxu0 %v19203_v25 }
 0xcfe   :  { %v9250_v18 = vcombine.low %v9235_v38, %v9242_v50  ;;  %14797 = vmatpush1.bf16.msra.mxu0 %v14796_v10  ;;  %11372 = vmatprep.mubr.f32.mxu0 %v19064_v21  ;;  %v14824_v38 = vpack.c.bf16 %v11094_v2, %v11088_v52  ;;  %v11179_v52 = vld [vmem:[%s20025_s14 + $0x588] sm:$0xff] }
 0xcff   :  { %14799 = vmatprep.subr.bf16.mxu0 %v14798_v14  ;;  %v11101_v14 = vld [vmem:[%s20025_s14 + $0x318] sm:$0xff] }
 0xd00   :  { %v9215_v40 = vpop.f32.mrb[208].mxu0  ;;  %v9257_v37 = vrot.slane %v9250_v18, %v19357_v6  ;;  %v14826_v50 = vpack.c.bf16 %v11107_v0, %v11101_v14  ;;  %v11172_v14 = vld [vmem:[%s20025_s14 + $0x550] sm:$0xff]  ;;  %v11178_v0 = vld [vmem:[%s20025_s14 + $0x580] sm:$0xff] }
 0xd01   :  { %v9217_v21 = vpop.f32.mrb[209].mxu0 }
 0xd02   :  { %v9228_v16 = vcombine.low %v9215_v40, %v9217_v21  ;;  %14801 = vmatpush1.bf16.msra.mxu0 %v14800_v8  ;;  %v11113_v8 = vld [vmem:[%s20025_s14 + $0x378] sm:$0xff]  ;;  %v14828_v40 = vpack.c.bf16 %v11106_v30, %v11100_v29  ;;  %v11118_v21 = vld [vmem:[%s20025_s14 + $0x3a0] sm:$0xff] }
 0xd03   :  { %14803 = vmatprep.subr.bf16.mxu0 %v14802_v23  ;;  %v11119_v23 = vld [vmem:[%s20025_s14 + $0x3a8] sm:$0xff] }
 0xd04   :  { %v9249_v39 = vrot.slane %v9228_v16, %v19357_v6  ;;  %v14830_v11 = vpack.c.bf16 %v11119_v23, %v11113_v8  ;;  %v11184_v23 = vld [vmem:[%s20025_s14 + $0x5b0] sm:$0xff] }
 0xd06   :  { %v9264_v43 = vrot.slane %v9249_v39, %v19357_v6  ;;  %14805 = vmatpush1.bf16.msra.mxu0 %v14804_v59  ;;  %v11125_v59 = vld [vmem:[%s20025_s14 + $0x3d8] sm:$0xff]  ;;  %v14832_v39 = vpack.c.bf16 %v11118_v21, %v11112_v62 }
 0xd07   :  { %14807 = vmatprep.subr.bf16.mxu0 %v14806_v28  ;;  %v11131_v28 = vld [vmem:[%s20025_s14 + $0x408] sm:$0xff] }
 0xd08   :  { %v9265_v35 = vcombine.low %v9257_v37, %v9264_v43  ;;  %v9362_v20 = vpop.f32.mrb[210].mxu0  ;;  %v14834_v31 = vpack.c.bf16 %v11131_v28, %v11125_v59  ;;  %v11130_v37 = vld [vmem:[%s20025_s14 + $0x400] sm:$0xff] }
 0xd09   :  { %v9364_v17 = vpop.f32.mrb[211].mxu0  ;;  %v14836_v47 = vpack.c.bf16 %v11130_v37, %v11124_v22 }
 0xd0a   :  { %v19583_v9 = vadd.f32 %v9265_v35, %v19501_v57  ;;  %v9515_v51 = vcombine.low %v9362_v20, %v9364_v17  ;;  %14809 = vmatpush1.bf16.msra.mxu0 %v14808_v27  ;;  %v11083_v57 = vld [vmem:[%s20025_s14 + $0x288] sm:$0xff]  ;;  %v11136_v17 = vld [vmem:[%s20025_s14 + $0x430] sm:$0xff] }
 0xd0b   :  { %14811 = vmatprep.subr.bf16.mxu0 %v14810_v13  ;;  %v14818_v53 = vpack.c.bf16 %v11083_v57, %v11077_v26  ;;  %v11137_v13 = vld [vmem:[%s20025_s14 + $0x438] sm:$0xff]  ;;  %v11154_v26 = vld [vmem:[%s20025_s14 + $0x4c0] sm:$0xff] }
 0xd0c   :  { %v9524_v7 = vrot.slane %v9515_v51, %v19357_v6  ;;  %v14838_v45 = vpack.c.bf16 %v11143_v24, %v11137_v13  ;;  %v11142_v51 = vld [vmem:[%s20025_s14 + $0x460] sm:$0xff] }
 0xd0e   :  { %14813 = vmatpush1.bf16.msra.mxu0 %v14812_v15  ;;  %v11149_v15 = vld [vmem:[%s20025_s14 + $0x498] sm:$0xff] }
 0xd0f   :  { %14815 = vmatprep.subr.bf16.mxu0 %v14814_v3  ;;  %v14840_v3 = vpack.c.bf16 %v11142_v51, %v11136_v17 }
 0xd10   :  { %v9433_v33 = vpop.f32.mrb[212].mxu0 }
 0xd11   :  { %v9435_v63 = vpop.f32.mrb[213].mxu0 }
 0xd12   :  { %v9516_v4 = vcombine.low %v9433_v33, %v9435_v63  ;;  %14817 = vmatpush1.bf16.msra.mxu0 %v14816_v58  ;;  %v11161_v58 = vld [vmem:[%s20025_s14 + $0x4f8] sm:$0xff]  ;;  %v14844_v33 = vpack.c.bf16 %v11154_v26, %v11148_v48  ;;  %v11166_v63 = vld [vmem:[%s20025_s14 + $0x520] sm:$0xff] }
 0xd13   :  { %14819 = vmatprep.subr.bf16.mxu0 %v14818_v53  ;;  %v11167_v53 = vld [vmem:[%s20025_s14 + $0x528] sm:$0xff] }
 0xd14   :  { %v9531_v10 = vrot.slane %v9516_v4, %v19357_v6  ;;  %v14846_v19 = vpack.c.bf16 %v11167_v53, %v11161_v58 }
 0xd16   :  { %v9539_v12 = vcombine.low %v9524_v7, %v9531_v10  ;;  %14821 = vmatpush1.bf16.msra.mxu0 %v14820_v5  ;;  %v14848_v7 = vpack.c.bf16 %v11166_v63, %v11160_v54 }
 0xd17   :  { %14823 = vmatprep.subr.bf16.mxu0 %v14822_v61  ;;  %v11173_v61 = vld [vmem:[%s20025_s14 + $0x558] sm:$0xff] }
 0xd18   :  { %v9504_v18 = vpop.f32.mrb[214].mxu0  ;;  %v9546_v1 = vrot.slane %v9539_v12, %v19357_v6  ;;  %v14850_v10 = vpack.c.bf16 %v11179_v52, %v11173_v61  ;;  %v11225_v61 = vsub.s32 4, %v19040_v34  ;;  %v11229_v52 = vsub.s32 5, %v19040_v34 }
 0xd19   :  { %v9506_v41 = vpop.f32.mrb[215].mxu0 }
 0xd1a   :  { %v9517_v56 = vcombine.low %v9504_v18, %v9506_v41  ;;  %14825 = vmatpush1.bf16.msra.mxu0 %v14824_v38  ;;  %v11185_v38 = vld [vmem:[%s20025_s14 + $0x5b8] sm:$0xff]  ;;  %v14852_v18 = vpack.c.bf16 %v11178_v0, %v11172_v14  ;;  %v11190_v41 = vld [vmem:[%s20025_s14 + $0x5e0] sm:$0xff] }
 0xd1b   :  { %14827 = vmatprep.subr.bf16.mxu0 %v14826_v50  ;;  %v11191_v50 = vld [vmem:[%s20025_s14 + $0x5e8] sm:$0xff]  ;;  %v14856_v62 = vpack.c.bf16 %v11190_v41, %v11184_v23 }
 0xd1c   :  { %v9538_v16 = vrot.slane %v9517_v56, %v19357_v6  ;;  %v14854_v8 = vpack.c.bf16 %v11191_v50, %v11185_v38 }
 0xd1e   :  { %v9553_v36 = vrot.slane %v9538_v16, %v19357_v6  ;;  %14829 = vmatpush1.bf16.msra.mxu0 %v14828_v40 }
 0xd1f   :  { %14831 = vmatprep.subr.bf16.mxu0 %v14830_v11 }
 0xd20   :  { %v9554_v43 = vcombine.low %v9546_v1, %v9553_v36  ;;  %v9651_v27 = vpop.f32.mrb[216].mxu0 }
 0xd21   :  { %v9653_v44 = vpop.f32.mrb[217].mxu0 }
 0xd22   :  { %v9556_v35 = vadd.f32 %v9554_v43, %v19583_v9  ;;  %v9804_v20 = vcombine.low %v9651_v27, %v9653_v44  ;;  %14833 = vmatpush1.bf16.msra.mxu0 %v14832_v39  ;;  %v11155_v9 = vld [vmem:[%s20025_s14 + $0x4c8] sm:$0xff] }
 0xd23   :  { %14835 = vmatprep.subr.bf16.mxu0 %v14834_v31  ;;  %v14842_v55 = vpack.c.bf16 %v11155_v9, %v11149_v15 }
 0xd24   :  { %v9813_v4 = vrot.slane %v9804_v20, %v19357_v6 }
 0xd26   :  { %14837 = vmatpush1.bf16.msra.mxu0 %v14836_v47 }
 0xd27   :  { %14839 = vmatprep.subr.bf16.mxu0 %v14838_v45 }
 0xd28   :  { %v9722_v57 = vpop.f32.mrb[218].mxu0 }
 0xd29   :  { %v9724_v60 = vpop.f32.mrb[219].mxu0 }
 0xd2a   :  { %v9805_v32 = vcombine.low %v9722_v57, %v9724_v60  ;;  %14841 = vmatpush1.bf16.msra.mxu0 %v14840_v3 }
 0xd2b   :  { %14843 = vmatprep.subr.bf16.mxu0 %v14842_v55 }
 0xd2c   :  { %v9820_v5 = vrot.slane %v9805_v32, %v19357_v6 }
 0xd2e   :  { %v9828_v2 = vcombine.low %v9813_v4, %v9820_v5  ;;  %14845 = vmatpush1.bf16.msra.mxu0 %v14844_v33 }
 0xd2f   :  { %14847 = vmatprep.subr.bf16.mxu0 %v14846_v19 }
 0xd30   :  { %v9793_v12 = vpop.f32.mrb[220].mxu0  ;;  %v9835_v40 = vrot.slane %v9828_v2, %v19357_v6  ;;  %v19738_v2 = vld [vmem:[%s20027_s16] sm:$0x3f] }
 0xd31   :  { %v9795_v29 = vpop.f32.mrb[221].mxu0 }
 0xd32   :  { %v9806_v30 = vcombine.low %v9793_v12, %v9795_v29  ;;  %14849 = vmatpush1.bf16.msra.mxu0 %v14848_v7  ;;  %v11226_v7 = vrot.slane %v19738_v2, %v11225_v61  ;;  %v11538_v61 = vld [vmem:[%s20028_s17 + $0x18] sm:$0xff] }
 0xd33   :  { %14851 = vmatprep.subr.bf16.mxu0 %v14850_v10  ;;  %v11230_v10 = vrot.slane %v19738_v2, %v11229_v52 }
 0xd34   :  { %v9827_v56 = vrot.slane %v9806_v30, %v19357_v6 }
 0xd36   :  { %v9842_v11 = vrot.slane %v9827_v56, %v19357_v6  ;;  %14853 = vmatpush1.bf16.msra.mxu0 %v14852_v18 }
 0xd37   :  { %14855 = vmatprep.subr.bf16.mxu0 %v14854_v8 }
 0xd38   :  { %v9843_v21 = vcombine.low %v9835_v40, %v9842_v11  ;;  %v9940_v16 = vpop.f32.mrb[222].mxu0 }
 0xd39   :  { %v9942_v59 = vpop.f32.mrb[223].mxu0 }
 0xd3a   :  { %v9845_v28 = vadd.f32 %v9843_v21, %v9556_v35  ;;  %v10093_v1 = vcombine.low %v9940_v16, %v9942_v59  ;;  %14857 = vmatpush1.bf16.msra.mxu0 %v14856_v62 }
 0xd3c   :  { %v10102_v22 = vrot.slane %v10093_v1, %v19357_v6 }
 0xd3d   :  { %11373 = vmatmul.mubr.f32.vlgmr.msra.gmra.mrb[248].mxu0 %v19203_v25 }
 0xd40   :  { %v10011_v36 = vpop.f32.mrb[224].mxu0 }
 0xd41   :  { %v10013_v39 = vpop.f32.mrb[225].mxu0 }
 0xd42   :  { %v10094_v31 = vcombine.low %v10011_v36, %v10013_v39 }
 0xd44   :  { %v10109_v37 = vrot.slane %v10094_v31, %v19357_v6 }
 0xd46   :  { %v10117_v43 = vcombine.low %v10102_v22, %v10109_v37 }
 0xd48   :  { %v10082_v27 = vpop.f32.mrb[226].mxu0  ;;  %v10124_v20 = vrot.slane %v10117_v43, %v19357_v6 }
 0xd49   :  { %v10084_v13 = vpop.f32.mrb[227].mxu0 }
 0xd4a   :  { %v10095_v24 = vcombine.low %v10082_v27, %v10084_v13 }
 0xd4c   :  { %v10116_v44 = vrot.slane %v10095_v24, %v19357_v6 }
 0xd4e   :  { %v10131_v35 = vrot.slane %v10116_v44, %v19357_v6 }
 0xd50   :  { %v10132_v47 = vcombine.low %v10124_v20, %v10131_v35  ;;  %v10229_v45 = vpop.f32.mrb[228].mxu0 }
 0xd51   :  { %v10231_v25 = vpop.f32.mrb[229].mxu0 }
 0xd52   :  { %v10134_v17 = vadd.f32 %v10132_v47, %v9845_v28  ;;  %v10382_v51 = vcombine.low %v10229_v45, %v10231_v25 }
 0xd54   :  { %v10391_v55 = vrot.slane %v10382_v51, %v19357_v6  ;;  %v11551_v51 = vld [vmem:[%s20028_s17 + $0x80] sm:$0xff] }
 0xd58   :  { %v10300_v15 = vpop.f32.mrb[230].mxu0  ;;  %v11445_v14 = vpop.f32.mrb[32].mxu1 }
 0xd59   :  { %v10302_v9 = vpop.f32.mrb[231].mxu0  ;;  %v19742_v0 = vadd.f32 %v11445_v14, %v11226_v7  ;;  %v11447_v12 = vpop.f32.mrb[33].mxu1  ;;  %v11666_v14 = vld [vmem:[%s20030_s19 + $0x18] sm:$0xff] }
 0xd5a   :  { %v10383_v3 = vcombine.low %v10300_v15, %v10302_v9  ;;  %v19744_v50 = vadd.f32 %v11447_v12, %v11230_v10  ;;  %v11552_v15 = vld [vmem:[%s20028_s17 + $0x88] sm:$0xff]  ;;  %v11679_v9 = vld [vmem:[%s20030_s19 + $0x80] sm:$0xff]  ;;  %v11665_v10 = vld [vmem:[%s20030_s19 + $0x10] sm:$0xff] }
 0xd5b   :  { %v14960_v12 = vpack.c.bf16 %v11666_v14, %v11665_v10  ;;  %v11691_v10 = vld [vmem:[%s20030_s19 + $0xe0] sm:$0xff]  ;;  %v11692_v14 = vld [vmem:[%s20030_s19 + $0xe8] sm:$0xff] }
 0xd5c   :  { %v10398_v48 = vrot.slane %v10383_v3, %v19357_v6  ;;  %v11505_v18 = vcombine.low %v19742_v0, %v19744_v50  ;;  %v14922_v3 = vpack.c.bf16 %v11552_v15, %v11551_v51  ;;  %v11544_v51 = vld [vmem:[%s20028_s17 + $0x48] sm:$0xff] }
 0xd5e   :  { %v10406_v26 = vcombine.low %v10391_v55, %v10398_v48  ;;  %v11680_v55 = vld [vmem:[%s20030_s19 + $0x88] sm:$0xff]  ;;  %v11535_v48 = vld [vmem:[%s20028_s17] sm:$0xff]  ;;  %14923 = vmatprep.subr.bf16.mxu0 %v14922_v3 }
 0xd5f   :  { %v11671_v3 = vld [vmem:[%s20030_s19 + $0x40] sm:$0xff] }
 0xd60   :  { %v10371_v57 = vpop.f32.mrb[232].mxu0  ;;  %v10413_v32 = vrot.slane %v10406_v26, %v19357_v6  ;;  %v11536_v26 = vld [vmem:[%s20028_s17 + $0x8] sm:$0xff] }
 0xd61   :  { %v10373_v58 = vpop.f32.mrb[233].mxu0 }
 0xd62   :  { %v10384_v53 = vcombine.low %v10371_v57, %v10373_v58  ;;  %v14954_v57 = vpack.c.bf16 %v11680_v55, %v11679_v9  ;;  %v14924_v58 = vpack.c.bf16 %v11536_v26, %v11535_v48  ;;  %v11672_v55 = vld [vmem:[%s20030_s19 + $0x48] sm:$0xff]  ;;  %v11561_v48 = vld [vmem:[%s20028_s17 + $0xd0] sm:$0xff] }
 0xd63   :  { %v14972_v26 = vpack.c.bf16 %v11672_v55, %v11671_v3 }
 0xd64   :  { %v10405_v60 = vrot.slane %v10384_v53, %v19357_v6  ;;  %v11663_v53 = vld [vmem:[%s20030_s19] sm:$0xff]  ;;  %14955 = vmatprep.subr.bf16.mxu1 %v14954_v57  ;;  %14925 = vmatpush3.bf16.msra.mxu0 %v14924_v58  ;;  %v11562_v57 = vld [vmem:[%s20028_s17 + $0xd8] sm:$0xff]  ;;  %v11689_v58 = vld [vmem:[%s20030_s19 + $0xd0] sm:$0xff] }
 0xd66   :  { %v10420_v33 = vrot.slane %v10405_v60, %v19357_v6  ;;  %v11664_v60 = vld [vmem:[%s20030_s19 + $0x8] sm:$0xff] }
 0xd68   :  { %v10421_v19 = vcombine.low %v10413_v32, %v10420_v33  ;;  %v10518_v54 = vpop.f32.mrb[234].mxu0  ;;  %v14956_v32 = vpack.c.bf16 %v11664_v60, %v11663_v53  ;;  %v11553_v33 = vld [vmem:[%s20028_s17 + $0x90] sm:$0xff]  ;;  %v11690_v53 = vld [vmem:[%s20030_s19 + $0xd8] sm:$0xff]  ;;  %v14942_v60 = vpack.c.bf16 %v11562_v57, %v11561_v48  ;;  %v11217_v57 = vsub.s32 2, %v19040_v34 }
 0xd69   :  { %v10520_v63 = vpop.f32.mrb[235].mxu0 }
 0xd6a   :  { %v10423_v4 = vadd.f32 %v10421_v19, %v10134_v17  ;;  %v10671_v5 = vcombine.low %v10518_v54, %v10520_v63  ;;  %v11554_v19 = vld [vmem:[%s20028_s17 + $0x98] sm:$0xff]  ;;  %v11681_v54 = vld [vmem:[%s20030_s19 + $0x90] sm:$0xff]  ;;  %14957 = vmatpush3.bf16.msra.mxu1 %v14956_v32  ;;  %v14974_v32 = vpack.c.bf16 %v11690_v53, %v11689_v58  ;;  %v11221_v58 = vsub.s32 3, %v19040_v34 }
 0xd6b   :  { %v14926_v63 = vpack.c.bf16 %v11554_v19, %v11553_v33  ;;  %v11545_v33 = vld [vmem:[%s20028_s17 + $0x50] sm:$0xff]  ;;  %v11546_v19 = vld [vmem:[%s20028_s17 + $0x58] sm:$0xff]  ;;  %v11218_v53 = vrot.slane %v19738_v2, %v11217_v57 }
 0xd6c   :  { %v10680_v8 = vrot.slane %v10671_v5, %v19357_v6  ;;  %v11537_v5 = vld [vmem:[%s20028_s17 + $0x10] sm:$0xff] }
 0xd6d   :  { %v14928_v7 = vpack.c.bf16 %v11538_v61, %v11537_v5  ;;  %14927 = vmatprep.subr.bf16.mxu0 %v14926_v63  ;;  %v14944_v63 = vpack.c.bf16 %v11546_v19, %v11545_v33  ;;  %v11563_v5 = vld [vmem:[%s20028_s17 + $0xe0] sm:$0xff]  ;;  %v11564_v61 = vld [vmem:[%s20028_s17 + $0xe8] sm:$0xff] }
 0xd6f   :  { %14929 = vmatpush3.bf16.msra.mxu0 %v14928_v7  ;;  %v14946_v7 = vpack.c.bf16 %v11564_v61, %v11563_v5 }
 0xd70   :  { %v10589_v38 = vpop.f32.mrb[236].mxu0 }
 0xd71   :  { %v10591_v29 = vpop.f32.mrb[237].mxu0 }
 0xd72   :  { %v10672_v30 = vcombine.low %v10589_v38, %v10591_v29  ;;  %v11555_v38 = vld [vmem:[%s20028_s17 + $0xa0] sm:$0xff]  ;;  %v11556_v29 = vld [vmem:[%s20028_s17 + $0xa8] sm:$0xff] }
 0xd74   :  { %v10687_v23 = vrot.slane %v10672_v30, %v19357_v6  ;;  %v11683_v30 = vld [vmem:[%s20030_s19 + $0xa0] sm:$0xff] }
 0xd76   :  { %v10695_v41 = vcombine.low %v10680_v8, %v10687_v23  ;;  %v14930_v8 = vpack.c.bf16 %v11556_v29, %v11555_v38  ;;  %v11684_v23 = vld [vmem:[%s20030_s19 + $0xa8] sm:$0xff]  ;;  %v14978_v38 = vpack.c.bf16 %v11692_v14, %v11691_v10  ;;  %v15685_v14 = vld [vmem:[%s20023_s12] sm:$0x3]  ;;  %s15739_s12 = smov [#allocation3]  }
 0xd77   :  { %v11548_v29 = vld [vmem:[%s20028_s17 + $0x68] sm:$0xff] }
 0xd78   :  { %v10660_v56 = vpop.f32.mrb[238].mxu0  ;;  %v10702_v21 = vrot.slane %v10695_v41, %v19357_v6  ;;  %v11539_v41 = vld [vmem:[%s20028_s17 + $0x20] sm:$0xff]  ;;  %14931 = vmatprep.subr.bf16.mxu0 %v14930_v8  ;;  %v11676_v8 = vld [vmem:[%s20030_s19 + $0x68] sm:$0xff] }
 0xd79   :  { %v10662_v40 = vpop.f32.mrb[239].mxu0 }
 0xd7a   :  { %v10673_v11 = vcombine.low %v10660_v56, %v10662_v40  ;;  %v11540_v56 = vld [vmem:[%s20028_s17 + $0x28] sm:$0xff]  ;;  %v14962_v40 = vpack.c.bf16 %v11684_v23, %v11683_v30  ;;  %v11675_v30 = vld [vmem:[%s20030_s19 + $0x60] sm:$0xff]  ;;  %v11565_v23 = vld [vmem:[%s20028_s17 + $0xf0] sm:$0xff] }
 0xd7c   :  { %v10694_v62 = vrot.slane %v10673_v11, %v19357_v6  ;;  %v14932_v11 = vpack.c.bf16 %v11540_v56, %v11539_v41  ;;  %v11566_v41 = vld [vmem:[%s20028_s17 + $0xf8] sm:$0xff]  ;;  %v11693_v56 = vld [vmem:[%s20030_s19 + $0xf0] sm:$0xff] }
 0xd7e   :  { %v10709_v16 = vrot.slane %v10694_v62, %v19357_v6  ;;  %v11667_v62 = vld [vmem:[%s20030_s19 + $0x20] sm:$0xff]  ;;  %14933 = vmatpush3.bf16.msra.mxu0 %v14932_v11  ;;  %v11694_v11 = vld [vmem:[%s20030_s19 + $0xf8] sm:$0xff] }
 0xd80   :  { %v10710_v59 = vcombine.low %v10702_v21, %v10709_v16  ;;  %v10807_v28 = vpop.f32.mrb[240].mxu0  ;;  %v11668_v21 = vld [vmem:[%s20030_s19 + $0x28] sm:$0xff] }
 0xd81   :  { %v10809_v1 = vpop.f32.mrb[241].mxu0  ;;  %v14964_v16 = vpack.c.bf16 %v11668_v21, %v11667_v62  ;;  %v14980_v62 = vpack.c.bf16 %v11676_v8, %v11675_v30  ;;  %v14950_v21 = vpack.c.bf16 %v11566_v41, %v11565_v23  ;;  %v11567_v41 = vld [vmem:[%s20029_s18] sm:$0x1]  ;;  %s11776_s18 = sshll.u32 %s15739_s12, 4  ;;  %s11777_s18 = int_to_ptr.vmem [resolvable:$true] %s11776_s18 }
 0xd82   :  { %v10712_v36 = vadd.f32 %v10710_v59, %v10423_v4  ;;  %v10960_v39 = vcombine.low %v10807_v28, %v10809_v1  ;;  %v11682_v4 = vld [vmem:[%s20030_s19 + $0x98] sm:$0xff]  ;;  %v11557_v59 = vld [vmem:[%s20028_s17 + $0xb0] sm:$0xff]  ;;  %s15686_s8 = scalar_lea.vmem %s11777_s18, 16  ;;  %s15690_s5 = scalar_lea.vmem %s11777_s18, 32 }
 0xd83   :  { %v14958_v52 = vpack.c.bf16 %v11682_v4, %v11681_v54  ;;  %v11558_v28 = vld [vmem:[%s20028_s17 + $0xb8] sm:$0xff]  ;;  %v11685_v1 = vld [vmem:[%s20030_s19 + $0xb0] sm:$0xff]  ;;  %p15687_p0 = scmp.ne.s32.totalorder %s11777_s18, %s15686_s8  ;;  %p15691_p1 = scmp.lt.s32.totalorder %s11777_s18, %s11777_s18 }
 0xd84   :  { %v10969_v43 = vrot.slane %v10960_v39, %v19357_v6  ;;  %v11686_v39 = vld [vmem:[%s20030_s19 + $0xb8] sm:$0xff]  ;;  %v11673_v54 = vld [vmem:[%s20030_s19 + $0x50] sm:$0xff]  ;;  %p15692_p2 = scmp.lt.s32.totalorder %s15690_s5, %s15686_s8 }
 0xd85   :  { %14959 = vmatprep.subr.bf16.mxu1 %v14958_v52  ;;  %v11674_v4 = vld [vmem:[%s20030_s19 + $0x58] sm:$0xff] }
 0xd86   :  { %14961 = vmatpush3.bf16.msra.mxu1 %v14960_v12  ;;  %v14976_v52 = vpack.c.bf16 %v11674_v4, %v11673_v54  ;;  %v11547_v12 = vld [vmem:[%s20028_s17 + $0x60] sm:$0xff]  ;;  %p15693_p3 = por %p15692_p2, %p15691_p1 }
 0xd87   :  { %14963 = vmatprep.subr.bf16.mxu1 %v14962_v40  ;;  %v14948_v40 = vpack.c.bf16 %v11548_v29, %v11547_v12 }
 0xd88   :  { %v10878_v31 = vpop.f32.mrb[242].mxu0  ;;  %p15694_p4 = pnand %p15693_p3, %p15687_p0 }
 0xd89   :  { %v10880_v22 = vpop.f32.mrb[243].mxu0 }
 0xd8a   :  { %v10961_v37 = vcombine.low %v10878_v31, %v10880_v22  ;;  %14965 = vmatpush3.bf16.msra.mxu1 %v14964_v16  ;;  %v11541_v31 = vld [vmem:[%s20028_s17 + $0x30] sm:$0xff]  ;;  %v11542_v22 = vld [vmem:[%s20028_s17 + $0x38] sm:$0xff] }
 0xd8b   :  { %v11549_v16 = vld [vmem:[%s20028_s17 + $0x70] sm:$0xff] }
 0xd8c   :  { %v10976_v27 = vrot.slane %v10961_v37, %v19357_v6  ;;  %v14966_v37 = vpack.c.bf16 %v11686_v39, %v11685_v1  ;;  %v11677_v1 = vld [vmem:[%s20030_s19 + $0x70] sm:$0xff] }
 0xd8e   :  { %v10984_v13 = vcombine.low %v10969_v43, %v10976_v27  ;;  %v14936_v43 = vpack.c.bf16 %v11542_v22, %v11541_v31  ;;  %v11669_v27 = vld [vmem:[%s20030_s19 + $0x30] sm:$0xff]  ;;  %14967 = vmatprep.subr.bf16.mxu1 %v14966_v37  ;;  %v11210_v22 = vrot.slane %v19738_v2, %v19186_v46  ;;  %v11214_v37 = vrot.slane %v19738_v2, %v19055_v42 }
 0xd90   :  { %v10949_v24 = vpop.f32.mrb[244].mxu0  ;;  %v10991_v47 = vrot.slane %v10984_v13, %v19357_v6  ;;  %v11670_v13 = vld [vmem:[%s20030_s19 + $0x38] sm:$0xff] }
 0xd91   :  { %v10951_v44 = vpop.f32.mrb[245].mxu0 }
 0xd92   :  { %v10962_v20 = vcombine.low %v10949_v24, %v10951_v44  ;;  %v14968_v24 = vpack.c.bf16 %v11670_v13, %v11669_v27  ;;  %v11559_v44 = vld [vmem:[%s20028_s17 + $0xc0] sm:$0xff] }
 0xd94   :  { %v10983_v35 = vrot.slane %v10962_v20, %v19357_v6  ;;  %v11560_v20 = vld [vmem:[%s20028_s17 + $0xc8] sm:$0xff]  ;;  %14969 = vmatpush3.bf16.msra.mxu1 %v14968_v24 }
 0xd96   :  { %v10998_v45 = vrot.slane %v10983_v35, %v19357_v6  ;;  %v11687_v35 = vld [vmem:[%s20030_s19 + $0xc0] sm:$0xff] }
 0xd98   :  { %v10999_v25 = vcombine.low %v10991_v47, %v10998_v45  ;;  %v14938_v47 = vpack.c.bf16 %v11560_v20, %v11559_v44  ;;  %v11688_v45 = vld [vmem:[%s20030_s19 + $0xc8] sm:$0xff] }
 0xd99   :  { %v14970_v15 = vpack.c.bf16 %v11688_v45, %v11687_v35 }
 0xd9a   :  { %v19758_v17 = vadd.f32 %v10999_v25, %v10712_v36  ;;  %v14934_v36 = vpack.c.bf16 %v11558_v28, %v11557_v59  ;;  %v11543_v25 = vld [vmem:[%s20028_s17 + $0x40] sm:$0xff]  ;;  %v11550_v59 = vld [vmem:[%s20028_s17 + $0x78] sm:$0xff]  ;;  %v14982_v28 = vpack.c.bf16 %v11694_v11, %v11693_v56 }
 0xd9b   :  { %v14940_v9 = vpack.c.bf16 %v11544_v51, %v11543_v25  ;;  %14971 = vmatprep.subr.bf16.mxu1 %v14970_v15  ;;  %v14952_v39 = vpack.c.bf16 %v11550_v59, %v11549_v16  ;;  %v11512_v15 = vrot.slane %v11505_v18, %v19357_v6  ;;  %v11695_v56 = vld [vmem:[#allocation2] sm:$0x1] }
 0xd9c   :  { %14935 = vmatprep.subr.bf16.mxu0 %v14934_v36  ;;  %14973 = vmatpush3.bf16.msra.mxu1 %v14972_v26  ;;  %v11678_v36 = vld [vmem:[%s20030_s19 + $0x78] sm:$0xff]  ;;  %v11522_v48 = vrot.slane %v19758_v17, 4  ;;  %v11476_v54 = vrot.slane %v19758_v17, 2 }
 0xd9d   :  { %14937 = vmatpush3.bf16.msra.mxu0 %v14936_v43  ;;  %14975 = vmatprep.subr.bf16.mxu1 %v14974_v32  ;;  %v14984_v31 = vpack.c.bf16 %v11678_v36, %v11677_v1 }
 0xd9e   :  { %14939 = vmatprep.subr.bf16.mxu0 %v14938_v47 }
 0xda0   :  { %14977 = vmatpush3.bf16.msra.mxu1 %v14976_v52 }
 0xda1   :  { %14941 = vmatpush3.bf16.msra.mxu0 %v14940_v9  ;;  %14979 = vmatprep.subr.bf16.mxu1 %v14978_v38  ;;  %v11519_v9 = vrot.slane %v11512_v15, %v19357_v6 }
 0xda2   :  { %14943 = vmatprep.subr.bf16.mxu0 %v14942_v60  ;;  %v11222_v60 = vrot.slane %v19738_v2, %v11221_v58 }
 0xda4   :  { %14981 = vmatpush3.bf16.msra.mxu1 %v14980_v62 }
 0xda5   :  { %14945 = vmatpush3.bf16.msra.mxu0 %v14944_v63  ;;  %14983 = vmatprep.subr.bf16.mxu1 %v14982_v28 }
 0xda6   :  { %14947 = vmatprep.subr.bf16.mxu0 %v14946_v7 }
 0xda8   :  { %14985 = vmatpush3.bf16.msra.mxu1 %v14984_v31 }
 0xda9   :  { %14949 = vmatpush3.bf16.msra.mxu0 %v14948_v40 }
 0xdaa   :  { %14951 = vmatprep.subr.bf16.mxu0 %v14950_v21 }
 0xdad   :  { %14953 = vmatpush3.bf16.msra.mxu0 %v14952_v39 }
 0xdd0   :  { %v11303_v43 = vpop.f32.mrb[246].mxu0 }
 0xdd1   :  { %v11304_v27 = vadd.f32 %v11303_v43, %v11210_v22  ;;  %v11305_v13 = vpop.f32.mrb[247].mxu0 }
 0xdd2   :  { %v11306_v24 = vadd.f32 %v11305_v13, %v11214_v37 }
 0xdd4   :  { %v11452_v44 = vcombine.low %v11304_v27, %v11306_v24 }
 0xdd6   :  { %v11459_v20 = vrot.slane %v11452_v44, %v19357_v6 }
 0xdd8   :  { %v11466_v35 = vrot.slane %v11459_v20, %v19357_v6 }
 0xdda   :  { %v11468_v47 = vadd.f32 %v11466_v35, %v19758_v17 }
 0xddc   :  { %v12625_v45 = vmul.f32 -1.442695, %v11468_v47 }
 0xdde   :  { %15670 = vpow2.f32 %v12625_v45 }
 0xde8   :  { %v15671_v25 = vpop.eup %15670 }
 0xde9   :  { %v11472_v51 = vadd.f32 1.0, %v15671_v25 }
 0xdeb   :  { %15672 = vrcp.f32 %v11472_v51 }
 0xdf5   :  { %v15673_v3 = vpop.eup %15672 }
 0xdf6   :  { %v11521_v55 = vmul.f32 %v15673_v3, %v11519_v9 }
 0xdf8   :  { %v11524_v26 = vadd.f32 %v11522_v48, %v11521_v55 }
 0xe10   :  { %v11374_v32 = vpop.f32.mrb[248].mxu0 }
 0xe11   :  { %v11375_v33 = vadd.f32 %v11374_v32, %v11218_v53  ;;  %v11376_v19 = vpop.f32.mrb[249].mxu0 }
 0xe12   :  { %v11377_v0 = vadd.f32 %v11376_v19, %v11222_v60 }
 0xe14   :  { %v11480_v50 = vcombine.low %v11375_v33, %v11377_v0 }
 0xe16   :  { %v11487_v18 = vrot.slane %v11480_v50, %v19357_v6 }
 0xe18   :  { %v11494_v63 = vrot.slane %v11487_v18, %v19357_v6 }
 0xe1a   :  { %v11496_v4 = vadd.f32 %v11494_v63, %v11476_v54 }
 0xe1c   :  { %v12626_v5 = vmul.f32 -1.442695, %v11496_v4 }
 0xe1e   :  { %15674 = vpow2.f32 %v12626_v5 }
 0xe28   :  { %v15675_v61 = vpop.eup %15674 }
 0xe29   :  { %v11500_v34 = vadd.f32 1.0, %v15675_v61 }
 0xe2b   :  { %15676 = vrcp.f32 %v11500_v34 }
 0xe2c   :  { %15678 = vtanh.f32 %v11524_v26 }
 0xe35   :  { %v15677_v52 = vpop.eup %15676 }
 0xe36   :  { %v11526_v2 = vsub.f32 1.0, %v15677_v52  ;;  %v15679_v7 = vpop.eup %15678  ;;  %v11528_v12 = vmul.f32 %v15685_v14, %v15677_v52 }
 0xe38   :  { %v11527_v10 = vmul.f32 %v15679_v7, %v11526_v2 }
 0xe3a   :  { %v11529_v17 = vadd.f32 %v11528_v12, %v11527_v10 }
 0xe3c   :  { %v11576_v6 = vrot.slane %v11529_v17, %v19055_v42  ;;  %v11572_v38 = vrot.slane %v11529_v17, %v19186_v46  ;;  %11534 = vst.msk [vmem:[#allocation5] sm:$0x3] %vm11532_vm1, %v11529_v17 }
 0xe3e   :  { %11643 = vmatprep.mubr.f32.mxu0 %v11576_v6  ;;  %11760 = vmatprep.mubr.f32.mxu1 %v11576_v6 }
 0xe3f   :  { %11644 = vmatmul.mubr.f32.vlgmr.msra.gmra.mrb[250].mxu0 %v11572_v38  ;;  %11761 = vmatmul.mubr.f32.vlgmr.msra.gmra.mrb[34].mxu1 %v11572_v38 }
 0xf12   :  { %v13269_v29 = vpop.f32.mrb[250].mxu0  ;;  %v13304_v30 = vpop.f32.mrb[34].mxu1 }
 0xf13   :  { %v13270_v8 = vpop.f32.mrb[251].mxu0  ;;  %v13305_v23 = vpop.f32.mrb[35].mxu1 }
 0xf14   :  { %v13271_v49 = vadd.f32 %v13270_v8, %v13269_v29  ;;  %v13306_v40 = vadd.f32 %v13305_v23, %v13304_v30 }
 0xf16   :  { %v11646_v42 = vadd.f32 %v13271_v49, %v11567_v41  ;;  %v11763_v46 = vadd.f32 %v13306_v40, %v11695_v56 }
 0xf18   :  { %v11650_v11 = vsel %vm11649_vm13, %v11646_v42, -inf  ;;  %11767 = vst.msk [vmem:[#allocation3] sm:$0x1] %vm11766_vm14, %v11763_v46 }
 0xf19   :  { %11651 = vmax.xlane.f32.xlu0 %v11650_v11 }
 0xfa6   :  { %v11652_v62 = vpop.xlane.xlu0 %11651 }
 0xfa7   :  { %v11653_v21 = vsub.f32 %v11646_v42, %v11652_v62 }
 0xfa9   :  { %v11654_v16 = vmul.f32 1.442695, %v11653_v21 }
 0xfab   :  { %15680 = vpow2.f32 %v11654_v16 }
 0xfb5   :  { %v15681_v59 = vpop.eup %15680 }
 0xfb6   :  { %v11656_v28 = vsel %vm11649_vm13, %v15681_v59, 0.0 }
 0xfb7   :  { %11657 = vadd.xlane.f32.xlu0 %v11656_v28 }
 0xfb8   :  { %15697 = shalt.err (!%p15694_p4)
}
 0xfb9   :  { %s15698_s6 = scalar_lea.hbm %s20033_s22, 16 }
 0xfba   :  { %p15699_p5 = scmp.ne.s32.totalorder %s20033_s22, %s15698_s6  ;;  %p15702_p6 = scmp.lt.u32.totalorder %s15698_s6, %s20033_s22 }
 0xfbc   :  { %p15704_p7 = pnand %p15702_p6, %p15699_p5 }
 0xfbe   :  { %15707 = shalt.err (!%p15704_p7)
}
 0xfbf   :  { %11779 = dma.vmem_to_hbm [thread:$0]  %s11777_s18, 16, %s20033_s22, [#allocation4]  }
 0xfc0   :  { %s15708_s26 = scalar_lea.vmem %s11787_s30, 32  ;;  %p15713_p9 = scmp.lt.s32.totalorder %s11787_s30, %s11787_s30 }
 0xfc1   :  { %p15709_p8 = scmp.ne.s32.totalorder %s11787_s30, %s15708_s26  ;;  %p15714_p10 = scmp.lt.s32.totalorder %s15708_s26, %s15708_s26 }
 0xfc3   :  { %p15715_p11 = por %p15714_p10, %p15713_p9 }
 0xfc5   :  { %p15716_p12 = pnand %p15715_p11, %p15709_p8 }
 0xfc7   :  { %15719 = shalt.err (!%p15716_p12)
}
 0xfc8   :  { %s15720_s27 = scalar_lea.hbm %s20034_s23, 32 }
 0xfc9   :  { %p15721_p13 = scmp.ne.s32.totalorder %s20034_s23, %s15720_s27  ;;  %p15724_p0 = scmp.lt.u32.totalorder %s15720_s27, %s20034_s23 }
 0xfcb   :  { %p15726_p1 = pnand %p15724_p0, %p15721_p13 }
 0xfcd   :  { %15729 = shalt.err (!%p15726_p1)
}
 0xfce   :  { %11789 = dma.vmem_to_hbm [thread:$0]  %s11787_s30, 32, %s20034_s23, [#allocation6]  }
0x1044   :  { %v11658_v1 = vpop.xlane.xlu0 %11657 }
0x1045   :  { %15682 = vlog2.f32 %v11658_v1 }
0x104f   :  { %v15683_v36 = vpop.eup %15682 }
0x1050   :  { %v11660_v39 = vmul.f32 0.6931472, %v15683_v36 }
0x1052   :  { %v11661_v31 = vsub.f32 %v11653_v21, %v11660_v39 }
0x1054   :  { %11662 = vst.msk [vmem:[%s20032_s21] sm:$0x1] %vm11649_vm13, %v11661_v31 }
0x1055   :  { %15730 = dma.done.wait [#allocation4], 16  }
0x1056   :  { %15731 = vsyncadd [#allocation4], 4294967280 }
0x1057   :  { %15732 = dma.done.wait [#allocation6], 32  }
0x1058   :  { %15733 = vsyncadd [#allocation6], 4294967264 }
0x1059   :  { %11798 = vsyncpa [#allocation4], 1 }
0x105a   :  { %11799 = vsyncpa [#allocation6], 1 }

</bundles_post_ra>
